<compile_context>
chip_gen: v7x
topology: tpu7x:2x2x1
jax: 0.10.0
libtpu: 0.0.40
codegen_flags: <defaults>
</compile_context>

<pallas_src>
import jax
import jax.numpy as jnp
from jax.experimental import pallas as pl
from jax.experimental.pallas import tpu as pltpu

VMEM_LIMIT = 32 * 1024 * 1024


# -----------------------------------------------------------------------------
# Kernel 1: matmul + bias + LeakyReLU  (layer 1, no BN)  -- M-tiled, parallel
# -----------------------------------------------------------------------------
def _conv_leaky_kernel(x_ref, w_ref, b_ref, o_ref):
    z = jnp.dot(x_ref[...], w_ref[...], preferred_element_type=jnp.float32)
    z = z + b_ref[...]
    z = jnp.where(z > 0, z, 0.2 * z)
    o_ref[...] = z.astype(o_ref.dtype)


def conv_leaky(patches, w, b, *, tm=256):
    M, K = patches.shape
    C = w.shape[1]
    if M % tm != 0:
        tm = M
    flops = 2 * M * K * C
    bytes_accessed = (M * K + K * C) * 2 + C * 4 + M * C * 2
    return pl.pallas_call(
        _conv_leaky_kernel,
        out_shape=jax.ShapeDtypeStruct((M, C), jnp.bfloat16),
        grid=(M // tm,),
        in_specs=[
            pl.BlockSpec((tm, K), lambda i: (i, 0)),
            pl.BlockSpec((K, C), lambda i: (0, 0)),
            pl.BlockSpec((1, C), lambda i: (0, 0)),
        ],
        out_specs=pl.BlockSpec((tm, C), lambda i: (i, 0)),
        compiler_params=pltpu.CompilerParams(
            dimension_semantics=("parallel",),
            vmem_limit_bytes=VMEM_LIMIT,
        ),
        cost_estimate=pl.CostEstimate(
            flops=flops, transcendentals=0, bytes_accessed=bytes_accessed
        ),
    )(patches, w, b)


# -----------------------------------------------------------------------------
# Kernel 2: matmul (K-accumulated) + training-mode BatchNorm + LeakyReLU
#           (layers 2-4)  -- grid over K reduction axis
# -----------------------------------------------------------------------------
def _conv_bn_leaky_kernel(x_ref, w_ref, g_ref, be_ref, o_ref, acc_ref):
    @pl.when(pl.program_id(0) == 0)
    def _():
        acc_ref[...] = jnp.zeros_like(acc_ref)

    acc_ref[...] += jnp.dot(
        x_ref[...], w_ref[...], preferred_element_type=jnp.float32
    )

    @pl.when(pl.program_id(0) == pl.num_programs(0) - 1)
    def _():
        z = acc_ref[...]
        # BatchNorm2d, training mode: batch statistics over N*H*W (= M rows),
        # biased variance, eps = 1e-5 (PyTorch default).  Conv bias omitted:
        # it is exactly cancelled by the mean subtraction.
        mean = jnp.mean(z, axis=0, keepdims=True)
        var = jnp.mean((z - mean) ** 2, axis=0, keepdims=True)
        z = (z - mean) * jax.lax.rsqrt(var + 1e-5)
        z = z * g_ref[...] + be_ref[...]
        z = jnp.where(z > 0, z, 0.2 * z)
        o_ref[...] = z.astype(o_ref.dtype)


def conv_bn_leaky(patches, w, gamma, beta, *, tk=512):
    M, K = patches.shape
    C = w.shape[1]
    if K % tk != 0:
        tk = K
    flops = 2 * M * K * C
    bytes_accessed = (M * K + K * C) * 2 + 2 * C * 4 + M * C * 2
    return pl.pallas_call(
        _conv_bn_leaky_kernel,
        out_shape=jax.ShapeDtypeStruct((M, C), jnp.bfloat16),
        grid=(K // tk,),
        in_specs=[
            pl.BlockSpec((M, tk), lambda k: (0, k)),
            pl.BlockSpec((tk, C), lambda k: (k, 0)),
            pl.BlockSpec((1, C), lambda k: (0, 0)),
            pl.BlockSpec((1, C), lambda k: (0, 0)),
        ],
        out_specs=pl.BlockSpec((M, C), lambda k: (0, 0)),
        scratch_shapes=[pltpu.VMEM((M, C), jnp.float32)],
        compiler_params=pltpu.CompilerParams(
            dimension_semantics=("arbitrary",),
            vmem_limit_bytes=VMEM_LIMIT,
        ),
        cost_estimate=pl.CostEstimate(
            flops=flops, transcendentals=0, bytes_accessed=bytes_accessed
        ),
    )(patches, w, gamma, beta)


# -----------------------------------------------------------------------------
# Kernel 3: final 1-channel conv as a VPU dot-reduce + bias + sigmoid (layer 5)
# -----------------------------------------------------------------------------
def _head_sigmoid_kernel(x_ref, w_ref, b_ref, o_ref):
    x = x_ref[...].astype(jnp.float32)
    z = jnp.sum(x * w_ref[...], axis=1, keepdims=True) + b_ref[...]
    o_ref[...] = 1.0 / (1.0 + jnp.exp(-z))


def head_sigmoid(x, w, b):
    N, K = x.shape
    return pl.pallas_call(
        _head_sigmoid_kernel,
        out_shape=jax.ShapeDtypeStruct((N, 1), jnp.float32),
        grid=(1,),
        in_specs=[
            pl.BlockSpec((N, K), lambda i: (0, 0)),
            pl.BlockSpec((1, K), lambda i: (0, 0)),
            pl.BlockSpec((1, 1), lambda i: (0, 0)),
        ],
        out_specs=pl.BlockSpec((N, 1), lambda i: (0, 0)),
        compiler_params=pltpu.CompilerParams(
            dimension_semantics=("arbitrary",),
            vmem_limit_bytes=VMEM_LIMIT,
        ),
        cost_estimate=pl.CostEstimate(
            flops=2 * N * K,
            transcendentals=N,
            bytes_accessed=N * K * 2 + K * 4 + N * 4 + 4,
        ),
    )(x, w, b)


# -----------------------------------------------------------------------------
# Glue: im2col patch extraction (wrapper-side JAX reshape/slice plumbing)
# -----------------------------------------------------------------------------
def im2col(x_nhwc, k, stride, pad):
    N, H, W, C = x_nhwc.shape
    xp = jnp.pad(x_nhwc, ((0, 0), (pad, pad), (pad, pad), (0, 0)))
    OH = (H + 2 * pad - k) // stride + 1
    OW = (W + 2 * pad - k) // stride + 1
    cols = []
    for i in range(k):
        for j in range(k):
            cols.append(
                xp[:, i:i + stride * OH:stride, j:j + stride * OW:stride, :]
            )
    p = jnp.stack(cols, axis=3)  # (N, OH, OW, k*k, C)
    return p.reshape(N * OH * OW, k * k * C), (N, OH, OW)


# -----------------------------------------------------------------------------
# D (DCGAN discriminator) parameters
# -----------------------------------------------------------------------------
LAYERS = [
    dict(cin=3,   cout=64,  k=4, s=2, p=1, bn=False, act="leaky"),
    dict(cin=64,  cout=128, k=4, s=2, p=1, bn=True,  act="leaky"),
    dict(cin=128, cout=256, k=4, s=2, p=1, bn=True,  act="leaky"),
    dict(cin=256, cout=512, k=4, s=2, p=1, bn=True,  act="leaky"),
    dict(cin=512, cout=1,   k=4, s=1, p=0, bn=False, act="sigmoid"),
]


def init_params(key):
    """Deterministic synthetic parameters (DCGAN-style N(0, 0.02) conv init)."""
    params = []
    for cfg in LAYERS:
        key, wk, bk = jax.random.split(key, 3)
        w = 0.02 * jax.random.normal(
            wk, (cfg["cout"], cfg["cin"], cfg["k"], cfg["k"]), jnp.float32
        )  # PyTorch conv layout (Cout, Cin, KH, KW)
        b = 0.01 * jax.random.normal(bk, (cfg["cout"],), jnp.float32)
        gamma = jnp.ones((cfg["cout"],), jnp.float32)
        beta = jnp.zeros((cfg["cout"],), jnp.float32)
        params.append((w, b, gamma, beta))
    return params


def prepare_params(params):
    """One-time conversion of PyTorch-layout params into kernel-ready matrices."""
    (w1, b1, _, _), (w2, _, g2, be2), (w3, _, g3, be3), (w4, _, g4, be4), \
        (w5, b5, _, _) = params

    def to_mat(w):  # (Cout,Cin,KH,KW) -> (KH*KW*Cin, Cout), matches im2col order
        cout, cin, kh, kw = w.shape
        return jnp.transpose(w, (2, 3, 1, 0)).reshape(kh * kw * cin, cout)

    # Layer 1: pad Cout 64 -> 128 (zeros) so the output store is lane-dense.
    w1p = jnp.pad(w1, ((0, 64), (0, 0), (0, 0), (0, 0)))
    b1p = jnp.pad(b1, (0, 64))
    l1 = (to_mat(w1p).astype(jnp.bfloat16),
          b1p.reshape(1, -1).astype(jnp.float32))

    # Layer 2: pad Cin 64 -> 128 with zero rows to match padded layer-1 output.
    w2p = jnp.pad(w2, ((0, 0), (0, 64), (0, 0), (0, 0)))
    l2 = (to_mat(w2p).astype(jnp.bfloat16),
          g2.reshape(1, -1).astype(jnp.float32),
          be2.reshape(1, -1).astype(jnp.float32))
    # Conv biases b2/b3/b4 are dropped: training-mode BN subtracts the batch
    # mean, which cancels any per-channel constant exactly.
    l3 = (to_mat(w3).astype(jnp.bfloat16),
          g3.reshape(1, -1).astype(jnp.float32),
          be3.reshape(1, -1).astype(jnp.float32))
    l4 = (to_mat(w4).astype(jnp.bfloat16),
          g4.reshape(1, -1).astype(jnp.float32),
          be4.reshape(1, -1).astype(jnp.float32))

    # Layer 5: Cout = 1 -> keep weights as a (1, K) row for the VPU dot-reduce.
    l5 = (to_mat(w5).reshape(1, -1).astype(jnp.float32),
          b5.reshape(1, 1).astype(jnp.float32))
    return (l1, l2, l3, l4, l5)


def d_forward(x_nchw, prepared):
    (w1, b1), (w2, g2, be2), (w3, g3, be3), (w4, g4, be4), (w5, b5) = prepared
    N = x_nchw.shape[0]
    x = jnp.transpose(x_nchw, (0, 2, 3, 1))  # NCHW -> NHWC

    # Layer 1: Conv(3 -> 64[padded to 128], 4, s2, p1) + LeakyReLU(0.2)
    p, (n, oh, ow) = im2col(x, 4, 2, 1)
    y = conv_leaky(p.astype(jnp.bfloat16), w1, b1)
    x = y.reshape(n, oh, ow, w1.shape[1])

    # Layers 2-4: Conv(4, s2, p1) + BatchNorm(train) + LeakyReLU(0.2)
    for (w, g, be) in ((w2, g2, be2), (w3, g3, be3), (w4, g4, be4)):
        p, (n, oh, ow) = im2col(x, 4, 2, 1)
        y = conv_bn_leaky(p.astype(jnp.bfloat16), w, g, be)
        x = y.reshape(n, oh, ow, w.shape[1])

    # Layer 5: 4x4 conv (stride 1, no pad) over the 4x4 map == flatten + dot;
    # sigmoid; D.forward returns output.view(-1).
    p = x.reshape(N, -1)
    out = head_sigmoid(p, w5, b5)
    return out.reshape(-1)


if __name__ == "__main__":
    key = jax.random.PRNGKey(0)
    pkey, xkey = jax.random.split(key)
    params = init_params(pkey)
    prepared = prepare_params(params)  # precomputed once, not per-forward

    # DCGAN discriminator requires 64x64 spatial input (arch-implied); batch=2.
    x = jax.random.normal(xkey, (2, 3, 64, 64), jnp.float32)

    fwd = jax.jit(d_forward)
    out = jax.block_until_ready(fwd(x, prepared))

    assert out.shape == (2,), out.shape
    assert bool(jnp.all(jnp.isfinite(out)))
    assert bool(jnp.all((out >= 0.0) & (out <= 1.0)))  # post-sigmoid range
    print("KERNEL_OK")
</pallas_src>

<mosaic_0001>
module attributes {stable_mosaic.version = 11 : i64} {
  func.func @_conv_leaky_kernel(%arg0: i32, %arg1: memref<256x48xbf16, #tpu.memory_space<vmem>>, %arg2: memref<48x128xbf16, #tpu.memory_space<vmem>>, %arg3: memref<1x128xf32, #tpu.memory_space<vmem>>, %arg4: memref<256x128xbf16, #tpu.memory_space<vmem>>) attributes {dimension_semantics = [#tpu.dimension_semantics<parallel>], iteration_bounds = array<i64: 8>, scalar_prefetch = 0 : i64, scratch_operands = 0 : i64, tpu.core_type = #tpu.core_type<tc>, window_params = [{transform_indices = @transform_0, window_bounds = array<i64: 256, 48>}, {pipeline_mode = #tpu.pipeline_mode<synchronous>, transform_indices = @transform_1, window_bounds = array<i64: 48, 128>}, {pipeline_mode = #tpu.pipeline_mode<synchronous>, transform_indices = @transform_2, window_bounds = array<i64: 1, 128>}, {transform_indices = @transform_3, window_bounds = array<i64: 256, 128>}]} {
    %c0 = arith.constant 0 : index
    %c0_0 = arith.constant 0 : index
    %0 = vector.load %arg1[%c0, %c0_0] : memref<256x48xbf16, #tpu.memory_space<vmem>>, vector<256x48xbf16>
    %c0_1 = arith.constant 0 : index
    %c0_2 = arith.constant 0 : index
    %1 = vector.load %arg2[%c0_1, %c0_2] : memref<48x128xbf16, #tpu.memory_space<vmem>>, vector<48x128xbf16>
    %cst = arith.constant dense<0.000000e+00> : vector<256x128xf32>
    %2 = tpu.matmul %0, %1, %cst {dimension_numbers = #tpu.dot_dimension_numbers<[1], [0], [0], [1], [0, 0, 1, 1], [], []>} : vector<256x48xbf16>, vector<48x128xbf16>, vector<256x128xf32> -> vector<256x128xf32>
    %c0_3 = arith.constant 0 : index
    %c0_4 = arith.constant 0 : index
    %3 = vector.load %arg3[%c0_3, %c0_4] : memref<1x128xf32, #tpu.memory_space<vmem>>, vector<1x128xf32>
    %4 = vector.broadcast %3 : vector<1x128xf32> to vector<256x128xf32>
    %5 = arith.addf %2, %4 : vector<256x128xf32>
    %cst_5 = arith.constant 0.000000e+00 : f32
    %6 = vector.broadcast %cst_5 : f32 to vector<256x128xf32>
    %7 = arith.cmpf ogt, %5, %6 : vector<256x128xf32>
    %cst_6 = arith.constant 2.000000e-01 : f32
    %8 = vector.broadcast %cst_6 : f32 to vector<256x128xf32>
    %9 = arith.mulf %8, %5 : vector<256x128xf32>
    %10 = arith.select %7, %5, %9 : vector<256x128xi1>, vector<256x128xf32>
    %11 = arith.truncf %10 : vector<256x128xf32> to vector<256x128xbf16>
    %c0_7 = arith.constant 0 : index
    %c0_8 = arith.constant 0 : index
    %12 = vector.load %arg4[%c0_7, %c0_8] : memref<256x128xbf16, #tpu.memory_space<vmem>>, vector<256x128xbf16>
    tpu.vector_store %arg4[%c0_7, %c0_8], %11 {strides = array<i32>} : memref<256x128xbf16, #tpu.memory_space<vmem>>, vector<256x128xbf16>,
    return
  }
  func.func @transform_0(%arg0: i32) -> (i32, i32) {
    %c0_i32 = arith.constant 0 : i32
    %c0_i32_0 = arith.constant 0 : i32
    return %arg0, %c0_i32 : i32, i32
  }
  func.func @transform_1(%arg0: i32) -> (i32, i32) {
    %c0_i32 = arith.constant 0 : i32
    %c0_i32_0 = arith.constant 0 : i32
    %c0_i32_1 = arith.constant 0 : i32
    return %c0_i32, %c0_i32_0 : i32, i32
  }
  func.func @transform_2(%arg0: i32) -> (i32, i32) {
    %c0_i32 = arith.constant 0 : i32
    %c0_i32_0 = arith.constant 0 : i32
    %c0_i32_1 = arith.constant 0 : i32
    return %c0_i32, %c0_i32_0 : i32, i32
  }
  func.func @transform_3(%arg0: i32) -> (i32, i32) {
    %c0_i32 = arith.constant 0 : i32
    %c0_i32_0 = arith.constant 0 : i32
    return %arg0, %c0_i32 : i32, i32
  }
}

module attributes {stable_mosaic.version = 11 : i64} {
  func.func @_conv_bn_leaky_kernel(%arg0: i32, %arg1: memref<512x512xbf16, #tpu.memory_space<vmem>>, %arg2: memref<512x128xbf16, #tpu.memory_space<vmem>>, %arg3: memref<1x128xf32, #tpu.memory_space<vmem>>, %arg4: memref<1x128xf32, #tpu.memory_space<vmem>>, %arg5: memref<512x128xbf16, #tpu.memory_space<vmem>>, %arg6: memref<512x128xf32, #tpu.memory_space<vmem>>) attributes {dimension_semantics = [#tpu.dimension_semantics<arbitrary>], iteration_bounds = array<i64: 4>, scalar_prefetch = 0 : i64, scratch_operands = 1 : i64, tpu.core_type = #tpu.core_type<tc>, window_params = [{transform_indices = @transform_0, window_bounds = array<i64: 512, 512>}, {transform_indices = @transform_1, window_bounds = array<i64: 512, 128>}, {pipeline_mode = #tpu.pipeline_mode<synchronous>, transform_indices = @transform_2, window_bounds = array<i64: 1, 128>}, {pipeline_mode = #tpu.pipeline_mode<synchronous>, transform_indices = @transform_3, window_bounds = array<i64: 1, 128>}, {pipeline_mode = #tpu.pipeline_mode<synchronous>, transform_indices = @transform_4, window_bounds = array<i64: 512, 128>}]} {
    %c0_i32 = arith.constant 0 : i32
    %0 = arith.cmpi eq, %arg0, %c0_i32 : i32
    %1 = arith.extui %0 : i1 to i32
    %c0_i32_0 = arith.constant 0 : i32
    %2 = arith.cmpi ne, %1, %c0_i32_0 : i32
    scf.if %2 {
      %cst_9 = arith.constant 0.000000e+00 : f32
      %12 = vector.broadcast %cst_9 : f32 to vector<512x128xf32>
      %c0_10 = arith.constant 0 : index
      %c0_11 = arith.constant 0 : index
      %13 = vector.load %arg6[%c0_10, %c0_11] : memref<512x128xf32, #tpu.memory_space<vmem>>, vector<512x128xf32>
      tpu.vector_store %arg6[%c0_10, %c0_11], %12 {strides = array<i32>} : memref<512x128xf32, #tpu.memory_space<vmem>>, vector<512x128xf32>,
    } else {
    }
    %c0 = arith.constant 0 : index
    %c0_1 = arith.constant 0 : index
    %3 = vector.load %arg6[%c0, %c0_1] : memref<512x128xf32, #tpu.memory_space<vmem>>, vector<512x128xf32>
    %c0_2 = arith.constant 0 : index
    %c0_3 = arith.constant 0 : index
    %4 = vector.load %arg1[%c0_2, %c0_3] : memref<512x512xbf16, #tpu.memory_space<vmem>>, vector<512x512xbf16>
    %c0_4 = arith.constant 0 : index
    %c0_5 = arith.constant 0 : index
    %5 = vector.load %arg2[%c0_4, %c0_5] : memref<512x128xbf16, #tpu.memory_space<vmem>>, vector<512x128xbf16>
    %cst = arith.constant dense<0.000000e+00> : vector<512x128xf32>
    %6 = tpu.matmul %4, %5, %cst {dimension_numbers = #tpu.dot_dimension_numbers<[1], [0], [0], [1], [0, 0, 1, 1], [], []>} : vector<512x512xbf16>, vector<512x128xbf16>, vector<512x128xf32> -> vector<512x128xf32>
    %7 = arith.addf %3, %6 : vector<512x128xf32>
    %c0_6 = arith.constant 0 : index
    %c0_7 = arith.constant 0 : index
    %8 = vector.load %arg6[%c0_6, %c0_7] : memref<512x128xf32, #tpu.memory_space<vmem>>, vector<512x128xf32>
    tpu.vector_store %arg6[%c0_6, %c0_7], %7 {strides = array<i32>} : memref<512x128xf32, #tpu.memory_space<vmem>>, vector<512x128xf32>,
    %c3_i32 = arith.constant 3 : i32
    %9 = arith.cmpi eq, %arg0, %c3_i32 : i32
    %10 = arith.extui %9 : i1 to i32
    %c0_i32_8 = arith.constant 0 : i32
    %11 = arith.cmpi ne, %10, %c0_i32_8 : i32
    scf.if %11 {
      %c0_9 = arith.constant 0 : index
      %c0_10 = arith.constant 0 : index
      %12 = vector.load %arg6[%c0_9, %c0_10] : memref<512x128xf32, #tpu.memory_space<vmem>>, vector<512x128xf32>
      %cst_11 = arith.constant dense<0.000000e+00> : vector<128xf32>
      %13 = vector.multi_reduction <add>, %12, %cst_11 [0] : vector<512x128xf32> to vector<128xf32>
      %14 = vector.shape_cast %13 : vector<128xf32> to vector<1x128xf32>
      %cst_12 = arith.constant 5.120000e+02 : f32
      %15 = vector.broadcast %cst_12 : f32 to vector<1x128xf32>
      %16 = arith.divf %14, %15 : vector<1x128xf32>
      %17 = vector.broadcast %16 : vector<1x128xf32> to vector<512x128xf32>
      %18 = arith.subf %12, %17 : vector<512x128xf32>
      %19 = arith.mulf %18, %18 : vector<512x128xf32>
      %cst_13 = arith.constant dense<0.000000e+00> : vector<128xf32>
      %20 = vector.multi_reduction <add>, %19, %cst_13 [0] : vector<512x128xf32> to vector<128xf32>
      %21 = vector.shape_cast %20 : vector<128xf32> to vector<1x128xf32>
      %cst_14 = arith.constant 5.120000e+02 : f32
      %22 = vector.broadcast %cst_14 : f32 to vector<1x128xf32>
      %23 = arith.divf %21, %22 : vector<1x128xf32>
      %24 = vector.broadcast %16 : vector<1x128xf32> to vector<512x128xf32>
      %25 = arith.subf %12, %24 : vector<512x128xf32>
      %cst_15 = arith.constant 9.99999974E-6 : f32
      %26 = vector.broadcast %cst_15 : f32 to vector<1x128xf32>
      %27 = arith.addf %23, %26 : vector<1x128xf32>
      %28 = math.rsqrt %27 : vector<1x128xf32>
      %29 = vector.broadcast %28 : vector<1x128xf32> to vector<512x128xf32>
      %30 = arith.mulf %25, %29 : vector<512x128xf32>
      %c0_16 = arith.constant 0 : index
      %c0_17 = arith.constant 0 : index
      %31 = vector.load %arg3[%c0_16, %c0_17] : memref<1x128xf32, #tpu.memory_space<vmem>>, vector<1x128xf32>
      %32 = vector.broadcast %31 : vector<1x128xf32> to vector<512x128xf32>
      %33 = arith.mulf %30, %32 : vector<512x128xf32>
      %c0_18 = arith.constant 0 : index
      %c0_19 = arith.constant 0 : index
      %34 = vector.load %arg4[%c0_18, %c0_19] : memref<1x128xf32, #tpu.memory_space<vmem>>, vector<1x128xf32>
      %35 = vector.broadcast %34 : vector<1x128xf32> to vector<512x128xf32>
      %36 = arith.addf %33, %35 : vector<512x128xf32>
      %cst_20 = arith.constant 0.000000e+00 : f32
      %37 = vector.broadcast %cst_20 : f32 to vector<512x128xf32>
      %38 = arith.cmpf ogt, %36, %37 : vector<512x128xf32>
      %cst_21 = arith.constant 2.000000e-01 : f32
      %39 = vector.broadcast %cst_21 : f32 to vector<512x128xf32>
      %40 = arith.mulf %39, %36 : vector<512x128xf32>
      %41 = arith.select %38, %36, %40 : vector<512x128xi1>, vector<512x128xf32>
      %42 = arith.truncf %41 : vector<512x128xf32> to vector<512x128xbf16>
      %c0_22 = arith.constant 0 : index
      %c0_23 = arith.constant 0 : index
      %43 = vector.load %arg5[%c0_22, %c0_23] : memref<512x128xbf16, #tpu.memory_space<vmem>>, vector<512x128xbf16>
      tpu.vector_store %arg5[%c0_22, %c0_23], %42 {strides = array<i32>} : memref<512x128xbf16, #tpu.memory_space<vmem>>, vector<512x128xbf16>,
    } else {
    }
    return
  }
  func.func @transform_0(%arg0: i32) -> (i32, i32) {
    %c0_i32 = arith.constant 0 : i32
    %c0_i32_0 = arith.constant 0 : i32
    return %c0_i32, %arg0 : i32, i32
  }
  func.func @transform_1(%arg0: i32) -> (i32, i32) {
    %c0_i32 = arith.constant 0 : i32
    %c0_i32_0 = arith.constant 0 : i32
    return %arg0, %c0_i32 : i32, i32
  }
  func.func @transform_2(%arg0: i32) -> (i32, i32) {
    %c0_i32 = arith.constant 0 : i32
    %c0_i32_0 = arith.constant 0 : i32
    %c0_i32_1 = arith.constant 0 : i32
    return %c0_i32, %c0_i32_0 : i32, i32
  }
  func.func @transform_3(%arg0: i32) -> (i32, i32) {
    %c0_i32 = arith.constant 0 : i32
    %c0_i32_0 = arith.constant 0 : i32
    %c0_i32_1 = arith.constant 0 : i32
    return %c0_i32, %c0_i32_0 : i32, i32
  }
  func.func @transform_4(%arg0: i32) -> (i32, i32) {
    %c0_i32 = arith.constant 0 : i32
    %c0_i32_0 = arith.constant 0 : i32
    %c0_i32_1 = arith.constant 0 : i32
    return %c0_i32, %c0_i32_0 : i32, i32
  }
}

module attributes {stable_mosaic.version = 11 : i64} {
  func.func @_conv_bn_leaky_kernel(%arg0: i32, %arg1: memref<128x512xbf16, #tpu.memory_space<vmem>>, %arg2: memref<512x256xbf16, #tpu.memory_space<vmem>>, %arg3: memref<1x256xf32, #tpu.memory_space<vmem>>, %arg4: memref<1x256xf32, #tpu.memory_space<vmem>>, %arg5: memref<128x256xbf16, #tpu.memory_space<vmem>>, %arg6: memref<128x256xf32, #tpu.memory_space<vmem>>) attributes {dimension_semantics = [#tpu.dimension_semantics<arbitrary>], iteration_bounds = array<i64: 4>, scalar_prefetch = 0 : i64, scratch_operands = 1 : i64, tpu.core_type = #tpu.core_type<tc>, window_params = [{transform_indices = @transform_0, window_bounds = array<i64: 128, 512>}, {transform_indices = @transform_1, window_bounds = array<i64: 512, 256>}, {pipeline_mode = #tpu.pipeline_mode<synchronous>, transform_indices = @transform_2, window_bounds = array<i64: 1, 256>}, {pipeline_mode = #tpu.pipeline_mode<synchronous>, transform_indices = @transform_3, window_bounds = array<i64: 1, 256>}, {pipeline_mode = #tpu.pipeline_mode<synchronous>, transform_indices = @transform_4, window_bounds = array<i64: 128, 256>}]} {
    %c0_i32 = arith.constant 0 : i32
    %0 = arith.cmpi eq, %arg0, %c0_i32 : i32
    %1 = arith.extui %0 : i1 to i32
    %c0_i32_0 = arith.constant 0 : i32
    %2 = arith.cmpi ne, %1, %c0_i32_0 : i32
    scf.if %2 {
      %cst_9 = arith.constant 0.000000e+00 : f32
      %12 = vector.broadcast %cst_9 : f32 to vector<128x256xf32>
      %c0_10 = arith.constant 0 : index
      %c0_11 = arith.constant 0 : index
      %13 = vector.load %arg6[%c0_10, %c0_11] : memref<128x256xf32, #tpu.memory_space<vmem>>, vector<128x256xf32>
      tpu.vector_store %arg6[%c0_10, %c0_11], %12 {strides = array<i32>} : memref<128x256xf32, #tpu.memory_space<vmem>>, vector<128x256xf32>,
    } else {
    }
    %c0 = arith.constant 0 : index
    %c0_1 = arith.constant 0 : index
    %3 = vector.load %arg6[%c0, %c0_1] : memref<128x256xf32, #tpu.memory_space<vmem>>, vector<128x256xf32>
    %c0_2 = arith.constant 0 : index
    %c0_3 = arith.constant 0 : index
    %4 = vector.load %arg1[%c0_2, %c0_3] : memref<128x512xbf16, #tpu.memory_space<vmem>>, vector<128x512xbf16>
    %c0_4 = arith.constant 0 : index
    %c0_5 = arith.constant 0 : index
    %5 = vector.load %arg2[%c0_4, %c0_5] : memref<512x256xbf16, #tpu.memory_space<vmem>>, vector<512x256xbf16>
    %cst = arith.constant dense<0.000000e+00> : vector<128x256xf32>
    %6 = tpu.matmul %4, %5, %cst {dimension_numbers = #tpu.dot_dimension_numbers<[1], [0], [0], [1], [0, 0, 1, 1], [], []>} : vector<128x512xbf16>, vector<512x256xbf16>, vector<128x256xf32> -> vector<128x256xf32>
    %7 = arith.addf %3, %6 : vector<128x256xf32>
    %c0_6 = arith.constant 0 : index
    %c0_7 = arith.constant 0 : index
    %8 = vector.load %arg6[%c0_6, %c0_7] : memref<128x256xf32, #tpu.memory_space<vmem>>, vector<128x256xf32>
    tpu.vector_store %arg6[%c0_6, %c0_7], %7 {strides = array<i32>} : memref<128x256xf32, #tpu.memory_space<vmem>>, vector<128x256xf32>,
    %c3_i32 = arith.constant 3 : i32
    %9 = arith.cmpi eq, %arg0, %c3_i32 : i32
    %10 = arith.extui %9 : i1 to i32
    %c0_i32_8 = arith.constant 0 : i32
    %11 = arith.cmpi ne, %10, %c0_i32_8 : i32
    scf.if %11 {
      %c0_9 = arith.constant 0 : index
      %c0_10 = arith.constant 0 : index
      %12 = vector.load %arg6[%c0_9, %c0_10] : memref<128x256xf32, #tpu.memory_space<vmem>>, vector<128x256xf32>
      %cst_11 = arith.constant dense<0.000000e+00> : vector<256xf32>
      %13 = vector.multi_reduction <add>, %12, %cst_11 [0] : vector<128x256xf32> to vector<256xf32>
      %14 = vector.shape_cast %13 : vector<256xf32> to vector<1x256xf32>
      %cst_12 = arith.constant 1.280000e+02 : f32
      %15 = vector.broadcast %cst_12 : f32 to vector<1x256xf32>
      %16 = arith.divf %14, %15 : vector<1x256xf32>
      %17 = vector.broadcast %16 : vector<1x256xf32> to vector<128x256xf32>
      %18 = arith.subf %12, %17 : vector<128x256xf32>
      %19 = arith.mulf %18, %18 : vector<128x256xf32>
      %cst_13 = arith.constant dense<0.000000e+00> : vector<256xf32>
      %20 = vector.multi_reduction <add>, %19, %cst_13 [0] : vector<128x256xf32> to vector<256xf32>
      %21 = vector.shape_cast %20 : vector<256xf32> to vector<1x256xf32>
      %cst_14 = arith.constant 1.280000e+02 : f32
      %22 = vector.broadcast %cst_14 : f32 to vector<1x256xf32>
      %23 = arith.divf %21, %22 : vector<1x256xf32>
      %24 = vector.broadcast %16 : vector<1x256xf32> to vector<128x256xf32>
      %25 = arith.subf %12, %24 : vector<128x256xf32>
      %cst_15 = arith.constant 9.99999974E-6 : f32
      %26 = vector.broadcast %cst_15 : f32 to vector<1x256xf32>
      %27 = arith.addf %23, %26 : vector<1x256xf32>
      %28 = math.rsqrt %27 : vector<1x256xf32>
      %29 = vector.broadcast %28 : vector<1x256xf32> to vector<128x256xf32>
      %30 = arith.mulf %25, %29 : vector<128x256xf32>
      %c0_16 = arith.constant 0 : index
      %c0_17 = arith.constant 0 : index
      %31 = vector.load %arg3[%c0_16, %c0_17] : memref<1x256xf32, #tpu.memory_space<vmem>>, vector<1x256xf32>
      %32 = vector.broadcast %31 : vector<1x256xf32> to vector<128x256xf32>
      %33 = arith.mulf %30, %32 : vector<128x256xf32>
      %c0_18 = arith.constant 0 : index
      %c0_19 = arith.constant 0 : index
      %34 = vector.load %arg4[%c0_18, %c0_19] : memref<1x256xf32, #tpu.memory_space<vmem>>, vector<1x256xf32>
      %35 = vector.broadcast %34 : vector<1x256xf32> to vector<128x256xf32>
      %36 = arith.addf %33, %35 : vector<128x256xf32>
      %cst_20 = arith.constant 0.000000e+00 : f32
      %37 = vector.broadcast %cst_20 : f32 to vector<128x256xf32>
      %38 = arith.cmpf ogt, %36, %37 : vector<128x256xf32>
      %cst_21 = arith.constant 2.000000e-01 : f32
      %39 = vector.broadcast %cst_21 : f32 to vector<128x256xf32>
      %40 = arith.mulf %39, %36 : vector<128x256xf32>
      %41 = arith.select %38, %36, %40 : vector<128x256xi1>, vector<128x256xf32>
      %42 = arith.truncf %41 : vector<128x256xf32> to vector<128x256xbf16>
      %c0_22 = arith.constant 0 : index
      %c0_23 = arith.constant 0 : index
      %43 = vector.load %arg5[%c0_22, %c0_23] : memref<128x256xbf16, #tpu.memory_space<vmem>>, vector<128x256xbf16>
      tpu.vector_store %arg5[%c0_22, %c0_23], %42 {strides = array<i32>} : memref<128x256xbf16, #tpu.memory_space<vmem>>, vector<128x256xbf16>,
    } else {
    }
    return
  }
  func.func @transform_0(%arg0: i32) -> (i32, i32) {
    %c0_i32 = arith.constant 0 : i32
    %c0_i32_0 = arith.constant 0 : i32
    return %c0_i32, %arg0 : i32, i32
  }
  func.func @transform_1(%arg0: i32) -> (i32, i32) {
    %c0_i32 = arith.constant 0 : i32
    %c0_i32_0 = arith.constant 0 : i32
    return %arg0, %c0_i32 : i32, i32
  }
  func.func @transform_2(%arg0: i32) -> (i32, i32) {
    %c0_i32 = arith.constant 0 : i32
    %c0_i32_0 = arith.constant 0 : i32
    %c0_i32_1 = arith.constant 0 : i32
    return %c0_i32, %c0_i32_0 : i32, i32
  }
  func.func @transform_3(%arg0: i32) -> (i32, i32) {
    %c0_i32 = arith.constant 0 : i32
    %c0_i32_0 = arith.constant 0 : i32
    %c0_i32_1 = arith.constant 0 : i32
    return %c0_i32, %c0_i32_0 : i32, i32
  }
  func.func @transform_4(%arg0: i32) -> (i32, i32) {
    %c0_i32 = arith.constant 0 : i32
    %c0_i32_0 = arith.constant 0 : i32
    %c0_i32_1 = arith.constant 0 : i32
    return %c0_i32, %c0_i32_0 : i32, i32
  }
}

module attributes {stable_mosaic.version = 11 : i64} {
  func.func @_conv_bn_leaky_kernel(%arg0: i32, %arg1: memref<32x512xbf16, #tpu.memory_space<vmem>>, %arg2: memref<512x512xbf16, #tpu.memory_space<vmem>>, %arg3: memref<1x512xf32, #tpu.memory_space<vmem>>, %arg4: memref<1x512xf32, #tpu.memory_space<vmem>>, %arg5: memref<32x512xbf16, #tpu.memory_space<vmem>>, %arg6: memref<32x512xf32, #tpu.memory_space<vmem>>) attributes {dimension_semantics = [#tpu.dimension_semantics<arbitrary>], iteration_bounds = array<i64: 8>, scalar_prefetch = 0 : i64, scratch_operands = 1 : i64, tpu.core_type = #tpu.core_type<tc>, window_params = [{transform_indices = @transform_0, window_bounds = array<i64: 32, 512>}, {transform_indices = @transform_1, window_bounds = array<i64: 512, 512>}, {pipeline_mode = #tpu.pipeline_mode<synchronous>, transform_indices = @transform_2, window_bounds = array<i64: 1, 512>}, {pipeline_mode = #tpu.pipeline_mode<synchronous>, transform_indices = @transform_3, window_bounds = array<i64: 1, 512>}, {pipeline_mode = #tpu.pipeline_mode<synchronous>, transform_indices = @transform_4, window_bounds = array<i64: 32, 512>}]} {
    %c0_i32 = arith.constant 0 : i32
    %0 = arith.cmpi eq, %arg0, %c0_i32 : i32
    %1 = arith.extui %0 : i1 to i32
    %c0_i32_0 = arith.constant 0 : i32
    %2 = arith.cmpi ne, %1, %c0_i32_0 : i32
    scf.if %2 {
      %cst_9 = arith.constant 0.000000e+00 : f32
      %12 = vector.broadcast %cst_9 : f32 to vector<32x512xf32>
      %c0_10 = arith.constant 0 : index
      %c0_11 = arith.constant 0 : index
      %13 = vector.load %arg6[%c0_10, %c0_11] : memref<32x512xf32, #tpu.memory_space<vmem>>, vector<32x512xf32>
      tpu.vector_store %arg6[%c0_10, %c0_11], %12 {strides = array<i32>} : memref<32x512xf32, #tpu.memory_space<vmem>>, vector<32x512xf32>,
    } else {
    }
    %c0 = arith.constant 0 : index
    %c0_1 = arith.constant 0 : index
    %3 = vector.load %arg6[%c0, %c0_1] : memref<32x512xf32, #tpu.memory_space<vmem>>, vector<32x512xf32>
    %c0_2 = arith.constant 0 : index
    %c0_3 = arith.constant 0 : index
    %4 = vector.load %arg1[%c0_2, %c0_3] : memref<32x512xbf16, #tpu.memory_space<vmem>>, vector<32x512xbf16>
    %c0_4 = arith.constant 0 : index
    %c0_5 = arith.constant 0 : index
    %5 = vector.load %arg2[%c0_4, %c0_5] : memref<512x512xbf16, #tpu.memory_space<vmem>>, vector<512x512xbf16>
    %cst = arith.constant dense<0.000000e+00> : vector<32x512xf32>
    %6 = tpu.matmul %4, %5, %cst {dimension_numbers = #tpu.dot_dimension_numbers<[1], [0], [0], [1], [0, 0, 1, 1], [], []>} : vector<32x512xbf16>, vector<512x512xbf16>, vector<32x512xf32> -> vector<32x512xf32>
    %7 = arith.addf %3, %6 : vector<32x512xf32>
    %c0_6 = arith.constant 0 : index
    %c0_7 = arith.constant 0 : index
    %8 = vector.load %arg6[%c0_6, %c0_7] : memref<32x512xf32, #tpu.memory_space<vmem>>, vector<32x512xf32>
    tpu.vector_store %arg6[%c0_6, %c0_7], %7 {strides = array<i32>} : memref<32x512xf32, #tpu.memory_space<vmem>>, vector<32x512xf32>,
    %c7_i32 = arith.constant 7 : i32
    %9 = arith.cmpi eq, %arg0, %c7_i32 : i32
    %10 = arith.extui %9 : i1 to i32
    %c0_i32_8 = arith.constant 0 : i32
    %11 = arith.cmpi ne, %10, %c0_i32_8 : i32
    scf.if %11 {
      %c0_9 = arith.constant 0 : index
      %c0_10 = arith.constant 0 : index
      %12 = vector.load %arg6[%c0_9, %c0_10] : memref<32x512xf32, #tpu.memory_space<vmem>>, vector<32x512xf32>
      %cst_11 = arith.constant dense<0.000000e+00> : vector<512xf32>
      %13 = vector.multi_reduction <add>, %12, %cst_11 [0] : vector<32x512xf32> to vector<512xf32>
      %14 = vector.shape_cast %13 : vector<512xf32> to vector<1x512xf32>
      %cst_12 = arith.constant 3.200000e+01 : f32
      %15 = vector.broadcast %cst_12 : f32 to vector<1x512xf32>
      %16 = arith.divf %14, %15 : vector<1x512xf32>
      %17 = vector.broadcast %16 : vector<1x512xf32> to vector<32x512xf32>
      %18 = arith.subf %12, %17 : vector<32x512xf32>
      %19 = arith.mulf %18, %18 : vector<32x512xf32>
      %cst_13 = arith.constant dense<0.000000e+00> : vector<512xf32>
      %20 = vector.multi_reduction <add>, %19, %cst_13 [0] : vector<32x512xf32> to vector<512xf32>
      %21 = vector.shape_cast %20 : vector<512xf32> to vector<1x512xf32>
      %cst_14 = arith.constant 3.200000e+01 : f32
      %22 = vector.broadcast %cst_14 : f32 to vector<1x512xf32>
      %23 = arith.divf %21, %22 : vector<1x512xf32>
      %24 = vector.broadcast %16 : vector<1x512xf32> to vector<32x512xf32>
      %25 = arith.subf %12, %24 : vector<32x512xf32>
      %cst_15 = arith.constant 9.99999974E-6 : f32
      %26 = vector.broadcast %cst_15 : f32 to vector<1x512xf32>
      %27 = arith.addf %23, %26 : vector<1x512xf32>
      %28 = math.rsqrt %27 : vector<1x512xf32>
      %29 = vector.broadcast %28 : vector<1x512xf32> to vector<32x512xf32>
      %30 = arith.mulf %25, %29 : vector<32x512xf32>
      %c0_16 = arith.constant 0 : index
      %c0_17 = arith.constant 0 : index
      %31 = vector.load %arg3[%c0_16, %c0_17] : memref<1x512xf32, #tpu.memory_space<vmem>>, vector<1x512xf32>
      %32 = vector.broadcast %31 : vector<1x512xf32> to vector<32x512xf32>
      %33 = arith.mulf %30, %32 : vector<32x512xf32>
      %c0_18 = arith.constant 0 : index
      %c0_19 = arith.constant 0 : index
      %34 = vector.load %arg4[%c0_18, %c0_19] : memref<1x512xf32, #tpu.memory_space<vmem>>, vector<1x512xf32>
      %35 = vector.broadcast %34 : vector<1x512xf32> to vector<32x512xf32>
      %36 = arith.addf %33, %35 : vector<32x512xf32>
      %cst_20 = arith.constant 0.000000e+00 : f32
      %37 = vector.broadcast %cst_20 : f32 to vector<32x512xf32>
      %38 = arith.cmpf ogt, %36, %37 : vector<32x512xf32>
      %cst_21 = arith.constant 2.000000e-01 : f32
      %39 = vector.broadcast %cst_21 : f32 to vector<32x512xf32>
      %40 = arith.mulf %39, %36 : vector<32x512xf32>
      %41 = arith.select %38, %36, %40 : vector<32x512xi1>, vector<32x512xf32>
      %42 = arith.truncf %41 : vector<32x512xf32> to vector<32x512xbf16>
      %c0_22 = arith.constant 0 : index
      %c0_23 = arith.constant 0 : index
      %43 = vector.load %arg5[%c0_22, %c0_23] : memref<32x512xbf16, #tpu.memory_space<vmem>>, vector<32x512xbf16>
      tpu.vector_store %arg5[%c0_22, %c0_23], %42 {strides = array<i32>} : memref<32x512xbf16, #tpu.memory_space<vmem>>, vector<32x512xbf16>,
    } else {
    }
    return
  }
  func.func @transform_0(%arg0: i32) -> (i32, i32) {
    %c0_i32 = arith.constant 0 : i32
    %c0_i32_0 = arith.constant 0 : i32
    return %c0_i32, %arg0 : i32, i32
  }
  func.func @transform_1(%arg0: i32) -> (i32, i32) {
    %c0_i32 = arith.constant 0 : i32
    %c0_i32_0 = arith.constant 0 : i32
    return %arg0, %c0_i32 : i32, i32
  }
  func.func @transform_2(%arg0: i32) -> (i32, i32) {
    %c0_i32 = arith.constant 0 : i32
    %c0_i32_0 = arith.constant 0 : i32
    %c0_i32_1 = arith.constant 0 : i32
    return %c0_i32, %c0_i32_0 : i32, i32
  }
  func.func @transform_3(%arg0: i32) -> (i32, i32) {
    %c0_i32 = arith.constant 0 : i32
    %c0_i32_0 = arith.constant 0 : i32
    %c0_i32_1 = arith.constant 0 : i32
    return %c0_i32, %c0_i32_0 : i32, i32
  }
  func.func @transform_4(%arg0: i32) -> (i32, i32) {
    %c0_i32 = arith.constant 0 : i32
    %c0_i32_0 = arith.constant 0 : i32
    %c0_i32_1 = arith.constant 0 : i32
    return %c0_i32, %c0_i32_0 : i32, i32
  }
}

module attributes {stable_mosaic.version = 11 : i64} {
  func.func @_head_sigmoid_kernel(%arg0: i32, %arg1: memref<2x8192xbf16, #tpu.memory_space<vmem>>, %arg2: memref<1x8192xf32, #tpu.memory_space<vmem>>, %arg3: memref<1x1xf32, #tpu.memory_space<vmem>>, %arg4: memref<2x1xf32, #tpu.memory_space<vmem>>) attributes {dimension_semantics = [#tpu.dimension_semantics<arbitrary>], iteration_bounds = array<i64: 1>, scalar_prefetch = 0 : i64, scratch_operands = 0 : i64, tpu.core_type = #tpu.core_type<tc>, window_params = [{pipeline_mode = #tpu.pipeline_mode<synchronous>, transform_indices = @transform_0, window_bounds = array<i64: 2, 8192>}, {pipeline_mode = #tpu.pipeline_mode<synchronous>, transform_indices = @transform_1, window_bounds = array<i64: 1, 8192>}, {pipeline_mode = #tpu.pipeline_mode<synchronous>, transform_indices = @transform_2, window_bounds = array<i64: 1, 1>}, {pipeline_mode = #tpu.pipeline_mode<synchronous>, transform_indices = @transform_3, window_bounds = array<i64: 2, 1>}]} {
    %c0 = arith.constant 0 : index
    %c0_0 = arith.constant 0 : index
    %0 = vector.load %arg1[%c0, %c0_0] : memref<2x8192xbf16, #tpu.memory_space<vmem>>, vector<2x8192xbf16>
    %1 = arith.extf %0 : vector<2x8192xbf16> to vector<2x8192xf32>
    %c0_1 = arith.constant 0 : index
    %c0_2 = arith.constant 0 : index
    %2 = vector.load %arg2[%c0_1, %c0_2] : memref<1x8192xf32, #tpu.memory_space<vmem>>, vector<1x8192xf32>
    %3 = vector.broadcast %2 : vector<1x8192xf32> to vector<2x8192xf32>
    %4 = arith.mulf %1, %3 : vector<2x8192xf32>
    %cst = arith.constant dense<0.000000e+00> : vector<2xf32>
    %5 = vector.multi_reduction <add>, %4, %cst [1] : vector<2x8192xf32> to vector<2xf32>
    %6 = vector.shape_cast %5 : vector<2xf32> to vector<2x1xf32>
    %c0_3 = arith.constant 0 : index
    %c0_4 = arith.constant 0 : index
    %7 = vector.load %arg3[%c0_3, %c0_4] : memref<1x1xf32, #tpu.memory_space<vmem>>, vector<1x1xf32>
    %8 = vector.broadcast %7 : vector<1x1xf32> to vector<2x1xf32>
    %9 = arith.addf %6, %8 : vector<2x1xf32>
    %cst_5 = arith.constant 0.000000e+00 : f32
    %10 = vector.broadcast %cst_5 : f32 to vector<2x1xf32>
    %11 = arith.subf %10, %9 : vector<2x1xf32>
    %12 = math.exp %11 : vector<2x1xf32>
    %cst_6 = arith.constant 1.000000e+00 : f32
    %13 = vector.broadcast %cst_6 : f32 to vector<2x1xf32>
    %14 = arith.addf %13, %12 : vector<2x1xf32>
    %cst_7 = arith.constant 1.000000e+00 : f32
    %15 = vector.broadcast %cst_7 : f32 to vector<2x1xf32>
    %16 = arith.divf %15, %14 : vector<2x1xf32>
    %c0_8 = arith.constant 0 : index
    %c0_9 = arith.constant 0 : index
    %17 = vector.load %arg4[%c0_8, %c0_9] : memref<2x1xf32, #tpu.memory_space<vmem>>, vector<2x1xf32>
    tpu.vector_store %arg4[%c0_8, %c0_9], %16 {strides = array<i32>} : memref<2x1xf32, #tpu.memory_space<vmem>>, vector<2x1xf32>,
    return
  }
  func.func @transform_0(%arg0: i32) -> (i32, i32) {
    %c0_i32 = arith.constant 0 : i32
    %c0_i32_0 = arith.constant 0 : i32
    %c0_i32_1 = arith.constant 0 : i32
    return %c0_i32, %c0_i32_0 : i32, i32
  }
  func.func @transform_1(%arg0: i32) -> (i32, i32) {
    %c0_i32 = arith.constant 0 : i32
    %c0_i32_0 = arith.constant 0 : i32
    %c0_i32_1 = arith.constant 0 : i32
    return %c0_i32, %c0_i32_0 : i32, i32
  }
  func.func @transform_2(%arg0: i32) -> (i32, i32) {
    %c0_i32 = arith.constant 0 : i32
    %c0_i32_0 = arith.constant 0 : i32
    %c0_i32_1 = arith.constant 0 : i32
    return %c0_i32, %c0_i32_0 : i32, i32
  }
  func.func @transform_3(%arg0: i32) -> (i32, i32) {
    %c0_i32 = arith.constant 0 : i32
    %c0_i32_0 = arith.constant 0 : i32
    %c0_i32_1 = arith.constant 0 : i32
    return %c0_i32, %c0_i32_0 : i32, i32
  }
}

</mosaic_0001>

<bundles_post_ra>
// kernel: d_forward.5
= control target key start
LH: loop header
LB: loop body
LE: loop exit
PB: predicated region body
PF: predicated region fallthrough
CT: control target
= control target key end

     0   :  { %s1164_s12 = smov 0   ;;  %s1292_s0 = inlined_call_operand.vmem [shape: bf16[2048,48], index: 0, kind: input, shape index: {}]   ;;  %s1293_s1 = inlined_call_operand.vmem [shape: bf16[48,128], index: 1, kind: input, shape index: {}]   ;;  %s1294_s2 = inlined_call_operand.vmem [shape: f32[1,128], index: 2, kind: input, shape index: {}]   ;;  %s1295_s3 = inlined_call_operand.vmem [shape: bf16[2048,128], index: 3, kind: output, shape index: {}]  }
   0x1 LB: > { %s840_s13 = sadd.s32 4294967295, %s1142_s12   ;;  %p844_p0 = scmp.ge.s32.totalorder %s1142_s12, 1  ;;  %s1142_s12 = sphi %s1164_s12, %s13_s12  }
   0x2   : > { %p138_p1 = scmp.lt.s32.totalorder %s1142_s12, 9 }
   0x4   : > { %p139_p2 = pnand %p844_p0, %p138_p1 }
   0x5   : > { %v1117_v0 = vld [vmem:[%s1293_s1] sm:$0xff] (!%p139_p2)   ;;  %s845_s16 = sshll.u32 (!%p139_p2), %s840_s13, 5  ;;  %v1118_v1 = vld [vmem:[%s1293_s1 + $0x8] sm:$0xff] (!%p139_p2)   ;;  %v1119_v2 = vld [vmem:[%s1293_s1 + $0x10] sm:$0xff] (!%p139_p2)   ;;  %vm318_vm0 = vcmask (!%p139_p2), 392192  }
   0x6   : > { %142 = sbr.rel (%p139_p2) target bundleno = 273 (0x111), region = 32  ;;  %p163_p3 = scmp.lt.s32.totalorder (!%p139_p2), %s845_s16, 255  ;;  %1065 = vmatprep.subr.bf16.mxu0 (!%p139_p2), %v1117_v0  ;;  %1103 = vmatprep.subr.bf16.mxu1 (!%p139_p2), %v1117_v0  ;;  %v1226_v19 = vld [vmem:[%s1294_s2] ss:$0 sm:$0xff] (!%p139_p2) }
   0x7   : > { %1066 = vmatpush3.bf16.msra.mxu0 (!%p139_p2), %v1117_v0  ;;  %1106 = vmatpush3.bf16.msra.mxu1 (!%p139_p2), %v1117_v0 }
   0x8   : > { %1067 = vmatprep.subr.bf16.mxu0 (!%p139_p2), %v1118_v1  ;;  %1104 = vmatprep.subr.bf16.mxu1 (!%p139_p2), %v1118_v1 }
   0xb   : > { %1068 = vmatpush3.bf16.msra.mxu0 (!%p139_p2), %v1118_v1  ;;  %1107 = vmatpush3.bf16.msra.mxu1 (!%p139_p2), %v1118_v1 }
   0xc   : > { %1069 = vmatprep.subr.bf16.mxu0 (!%p139_p2), %v1119_v2  ;;  %1105 = vmatprep.subr.bf16.mxu1 (!%p139_p2), %v1119_v2 }
   0xd   : > { %s1297_s16 = smov (!%p163_p3, %s845_s16), 255 }
   0xe   : > { %s846_s21 = sshll.u32 %s1297_s16, 2 }
   0xf   : > { %s1189_s24 = scalar_lea.vmem %s1292_s0, %s846_s21  ;;  %1070 = vmatpush3.bf16.msra.mxu0 %v1119_v2  ;;  %1108 = vmatpush3.bf16.msra.mxu1 %v1119_v2  ;;  %s1243_s29 = scalar_lea.vmem %s1295_s3, %s846_s21 }
  0x10   : > { %v1120_v3 = vld [vmem:[%s1189_s24] sm:$0xff]   ;;  %v1122_v5 = vld [vmem:[%s1189_s24 + $0x8] sm:$0xff]   ;;  %v1124_v7 = vld [vmem:[%s1189_s24 + $0x10] sm:$0xff]  }
  0x11   : > { %v1121_v4 = vld [vmem:[%s1189_s24 + $0x40] sm:$0xff]   ;;  %1071 = vmatprep.mubr.msk.bf16.mxu0 %vm318_vm0, %v1120_v3  ;;  %v1123_v6 = vld [vmem:[%s1189_s24 + $0x48] sm:$0xff]   ;;  %v1125_v8 = vld [vmem:[%s1189_s24 + $0x50] sm:$0xff]  }
  0x12   : > { %1087 = vmatprep.mubr.msk.bf16.mxu1 %vm318_vm0, %v1121_v4  ;;  %1072 = vmatmul.mubr.msk.bf16.vlgmr.msra.gmra.mrb[0].mxu0 %vm318_vm0, %v1122_v5  ;;  %v1126_v9 = vld [vmem:[%s1189_s24 + $0x18] sm:$0xff]   ;;  %v1128_v11 = vld [vmem:[%s1189_s24 + $0x20] sm:$0xff]   ;;  %v1130_v13 = vld [vmem:[%s1189_s24 + $0x28] sm:$0xff]  }
  0x13   : > { %1088 = vmatmul.mubr.msk.bf16.vlgmr.msra.gmra.mrb[0].mxu1 %vm318_vm0, %v1123_v6  ;;  %1075 = vmatprep.mubr.msk.bf16.mxu0 %vm318_vm0, %v1124_v7  ;;  %v1127_v10 = vld [vmem:[%s1189_s24 + $0x58] sm:$0xff]   ;;  %v1129_v12 = vld [vmem:[%s1189_s24 + $0x60] sm:$0xff]   ;;  %v1131_v14 = vld [vmem:[%s1189_s24 + $0x68] sm:$0xff]  }
  0x14   : > { %1091 = vmatprep.mubr.msk.bf16.mxu1 %vm318_vm0, %v1125_v8  ;;  %v1132_v15 = vld [vmem:[%s1189_s24 + $0x30] sm:$0xff]   ;;  %v1134_v17 = vld [vmem:[%s1189_s24 + $0x38] sm:$0xff]  }
  0x15   : > { %v1133_v16 = vld [vmem:[%s1189_s24 + $0x70] sm:$0xff]   ;;  %v1135_v18 = vld [vmem:[%s1189_s24 + $0x78] sm:$0xff]  }
  0x1a   : > { %1076 = vmatmul.mubr.msk.bf16.gmra.mrb[4].mxu0 %vm318_vm0, %v1126_v9 }
  0x1b   : > { %1092 = vmatmul.mubr.msk.bf16.gmra.mrb[4].mxu1 %vm318_vm0, %v1127_v10  ;;  %1079 = vmatprep.mubr.msk.bf16.mxu0 %vm318_vm0, %v1128_v11 }
  0x1c   : > { %1095 = vmatprep.mubr.msk.bf16.mxu1 %vm318_vm0, %v1129_v12 }
  0x22   : > { %1080 = vmatmul.mubr.msk.bf16.gmra.mrb[8].mxu0 %vm318_vm0, %v1130_v13 }
  0x23   : > { %1096 = vmatmul.mubr.msk.bf16.gmra.mrb[8].mxu1 %vm318_vm0, %v1131_v14  ;;  %1083 = vmatprep.mubr.msk.bf16.mxu0 %vm318_vm0, %v1132_v15 }
  0x24   : > { %1099 = vmatprep.mubr.msk.bf16.mxu1 %vm318_vm0, %v1133_v16 }
  0x2a   : > { %1084 = vmatmul.mubr.msk.bf16.gmra.mrb[12].mxu0 %vm318_vm0, %v1134_v17 }
  0x2b   : > { %1100 = vmatmul.mubr.msk.bf16.gmra.mrb[12].mxu1 %vm318_vm0, %v1135_v18 }
  0xe5   : > { %v1073_v20 = vpop.f32.mrb[0].mxu0 }
  0xe6   : > { %v1089_v21 = vpop.f32.mrb[0].mxu1  ;;  %v410_v22 = vadd.f32 %v1073_v20, %v1226_v19  ;;  %v401_v24 = vpop.f32.mrb[1].mxu0 }
  0xe7   : > { %v474_v23 = vadd.f32 %v1089_v21, %v1226_v19  ;;  %v465_v25 = vpop.f32.mrb[1].mxu1  ;;  %v402_v26 = vadd.f32 %v1226_v19, %v401_v24  ;;  %v1074_v28 = vpop.f32.mrb[2].mxu0 }
  0xe8   : > { %v466_v27 = vadd.f32 %v1226_v19, %v465_v25  ;;  %v1090_v29 = vpop.f32.mrb[2].mxu1  ;;  %vm530_vm1 = vcmp.gt.f32.partialorder %v410_v22, 0.0  ;;  %v562_v30 = vmul.f32 0.2, %v410_v22  ;;  %v413_v34 = vadd.f32 %v1074_v28, %v1226_v19  ;;  %v404_v36 = vpop.f32.mrb[3].mxu0 }
  0xe9   : > { %vm546_vm2 = vcmp.gt.f32.partialorder %v474_v23, 0.0  ;;  %v578_v31 = vmul.f32 0.2, %v474_v23  ;;  %vm528_vm3 = vcmp.gt.f32.partialorder %v402_v26, 0.0  ;;  %v560_v32 = vmul.f32 0.2, %v402_v26 }
  0xea   : > { %vm544_vm4 = vcmp.gt.f32.partialorder %v466_v27, 0.0  ;;  %v576_v33 = vmul.f32 0.2, %v466_v27  ;;  %v477_v35 = vadd.f32 %v1090_v29, %v1226_v19  ;;  %v468_v37 = vpop.f32.mrb[3].mxu1  ;;  %v594_v38 = vsel %vm530_vm1, %v410_v22, %v562_v30 }
  0xeb   : > { %v610_v39 = vsel %vm546_vm2, %v474_v23, %v578_v31  ;;  %v405_v40 = vadd.f32 %v1226_v19, %v404_v36  ;;  %v469_v41 = vadd.f32 %v1226_v19, %v468_v37  ;;  %vm531_vm5 = vcmp.gt.f32.partialorder %v413_v34, 0.0 }
  0xec   : > { %v563_v42 = vmul.f32 0.2, %v413_v34  ;;  %vm547_vm6 = vcmp.gt.f32.partialorder %v477_v35, 0.0  ;;  %v579_v43 = vmul.f32 0.2, %v477_v35  ;;  %v592_v46 = vsel %vm528_vm3, %v402_v26, %v560_v32 }
  0xed   : > { %vm529_vm7 = vcmp.gt.f32.partialorder %v405_v40, 0.0  ;;  %v561_v44 = vmul.f32 0.2, %v405_v40  ;;  %vm545_vm8 = vcmp.gt.f32.partialorder %v469_v41, 0.0  ;;  %v577_v45 = vmul.f32 0.2, %v469_v41 }
  0xee   : > { %v608_v47 = vsel %vm544_vm4, %v466_v27, %v576_v33  ;;  %v595_v48 = vsel %vm531_vm5, %v413_v34, %v563_v42  ;;  %v611_v49 = vsel %vm547_vm6, %v477_v35, %v579_v43  ;;  %v1077_v50 = vpop.f32.mrb[4].mxu0  ;;  %v1093_v51 = vpop.f32.mrb[4].mxu1 }
  0xef   : > { %v959_v52 = vpack.c.bf16 %v595_v48, %v594_v38  ;;  %v999_v53 = vpack.c.bf16 %v611_v49, %v610_v39  ;;  %v593_v54 = vsel %vm529_vm7, %v405_v40, %v561_v44  ;;  %v609_v55 = vsel %vm545_vm8, %v469_v41, %v577_v45  ;;  %v417_v56 = vpop.f32.mrb[5].mxu0  ;;  %v481_v57 = vpop.f32.mrb[5].mxu1 }
  0xf0   : > { %v954_v58 = vpack.c.bf16 %v593_v54, %v592_v46  ;;  %v994_v59 = vpack.c.bf16 %v609_v55, %v608_v47  ;;  %v426_v60 = vadd.f32 %v1077_v50, %v1226_v19  ;;  %v490_v61 = vadd.f32 %v1093_v51, %v1226_v19  ;;  %v1078_v62 = vpop.f32.mrb[6].mxu0  ;;  %v1094_v63 = vpop.f32.mrb[6].mxu1 }
  0xf1   : > { %1031 = vst [vmem:[%s1243_s29 + $0x8] sm:$0xff] %v959_v52   ;;  %1039 = vst [vmem:[%s1243_s29 + $0x48] sm:$0xff] %v999_v53   ;;  %v418_v0 = vadd.f32 %v1226_v19, %v417_v56  ;;  %v482_v1 = vadd.f32 %v1226_v19, %v481_v57  ;;  %v429_v2 = vadd.f32 %v1078_v62, %v1226_v19  ;;  %v420_v4 = vpop.f32.mrb[7].mxu0  ;;  %v484_v5 = vpop.f32.mrb[7].mxu1 }
  0xf2   : > { %v493_v3 = vadd.f32 %v1094_v63, %v1226_v19  ;;  %955 = vst [vmem:[%s1243_s29] sm:$0xff] %v954_v58   ;;  %1038 = vst [vmem:[%s1243_s29 + $0x40] sm:$0xff] %v994_v59   ;;  %vm534_vm9 = vcmp.gt.f32.partialorder %v426_v60, 0.0  ;;  %v566_v6 = vmul.f32 0.2, %v426_v60  ;;  %vm550_vm10 = vcmp.gt.f32.partialorder %v490_v61, 0.0 }
  0xf3   : > { %v582_v7 = vmul.f32 0.2, %v490_v61  ;;  %vm532_vm11 = vcmp.gt.f32.partialorder %v418_v0, 0.0  ;;  %v564_v8 = vmul.f32 0.2, %v418_v0  ;;  %vm548_vm12 = vcmp.gt.f32.partialorder %v482_v1, 0.0 }
  0xf4   : > { %v598_v9 = vsel %vm534_vm9, %v426_v60, %v566_v6  ;;  %v580_v10 = vmul.f32 0.2, %v482_v1  ;;  %vm535_vm13 = vcmp.gt.f32.partialorder %v429_v2, 0.0  ;;  %v567_v11 = vmul.f32 0.2, %v429_v2 }
  0xf5   : > { %v614_v12 = vsel %vm550_vm10, %v490_v61, %v582_v7  ;;  %v596_v13 = vsel %vm532_vm11, %v418_v0, %v564_v8  ;;  %vm551_vm14 = vcmp.gt.f32.partialorder %v493_v3, 0.0  ;;  %v583_v14 = vmul.f32 0.2, %v493_v3  ;;  %v1081_v15 = vpop.f32.mrb[8].mxu0 }
  0xf6   : > { %v1097_v16 = vpop.f32.mrb[8].mxu1  ;;  %v599_v17 = vsel %vm535_vm13, %v429_v2, %v567_v11  ;;  %v421_v18 = vadd.f32 %v1226_v19, %v420_v4  ;;  %v485_v20 = vadd.f32 %v1226_v19, %v484_v5  ;;  %v442_v21 = vadd.f32 %v1081_v15, %v1226_v19  ;;  %v433_v22 = vpop.f32.mrb[9].mxu0 }
  0xf7   : > { %v497_v23 = vpop.f32.mrb[9].mxu1  ;;  %v969_v24 = vpack.c.bf16 %v599_v17, %v598_v9  ;;  %v615_v25 = vsel %vm551_vm14, %v493_v3, %v583_v14  ;;  %v506_v26 = vadd.f32 %v1097_v16, %v1226_v19  ;;  %v434_v27 = vadd.f32 %v1226_v19, %v433_v22  ;;  %v1082_v28 = vpop.f32.mrb[10].mxu0 }
  0xf8   : > { %v1098_v29 = vpop.f32.mrb[10].mxu1  ;;  %v1009_v30 = vpack.c.bf16 %v615_v25, %v614_v12  ;;  %vm533_vm15 = vcmp.gt.f32.partialorder %v421_v18, 0.0  ;;  %v565_v31 = vmul.f32 0.2, %v421_v18  ;;  %vm549_vm0 = vcmp.gt.f32.partialorder %v485_v20, 0.0  ;;  %v436_v32 = vpop.f32.mrb[11].mxu0 }
  0xf9   : > { %v500_v33 = vpop.f32.mrb[11].mxu1  ;;  %1033 = vst [vmem:[%s1243_s29 + $0x18] sm:$0xff] %v969_v24   ;;  %v581_v34 = vmul.f32 0.2, %v485_v20  ;;  %vm538_vm1 = vcmp.gt.f32.partialorder %v442_v21, 0.0  ;;  %vm554_vm2 = vcmp.gt.f32.partialorder %v506_v26, 0.0  ;;  %v612_v36 = vsel %vm548_vm12, %v482_v1, %v580_v10 }
  0xfa   : > { %v570_v35 = vmul.f32 0.2, %v442_v21  ;;  %1041 = vst [vmem:[%s1243_s29 + $0x58] sm:$0xff] %v1009_v30   ;;  %v597_v37 = vsel %vm533_vm15, %v421_v18, %v565_v31  ;;  %v586_v38 = vmul.f32 0.2, %v506_v26  ;;  %vm536_vm3 = vcmp.gt.f32.partialorder %v434_v27, 0.0 }
  0xfb   : > { %v964_v39 = vpack.c.bf16 %v597_v37, %v596_v13  ;;  %v613_v40 = vsel %vm549_vm0, %v485_v20, %v581_v34  ;;  %v568_v41 = vmul.f32 0.2, %v434_v27  ;;  %v498_v42 = vadd.f32 %v1226_v19, %v497_v23 }
  0xfc   : > { %v1004_v43 = vpack.c.bf16 %v613_v40, %v612_v36  ;;  %v602_v44 = vsel %vm538_vm1, %v442_v21, %v570_v35  ;;  %v618_v45 = vsel %vm554_vm2, %v506_v26, %v586_v38  ;;  %v445_v46 = vadd.f32 %v1082_v28, %v1226_v19 }
  0xfd   : > { %1032 = vst [vmem:[%s1243_s29 + $0x10] sm:$0xff] %v964_v39   ;;  %vm552_vm4 = vcmp.gt.f32.partialorder %v498_v42, 0.0  ;;  %v584_v47 = vmul.f32 0.2, %v498_v42  ;;  %v509_v48 = vadd.f32 %v1098_v29, %v1226_v19  ;;  %v437_v49 = vadd.f32 %v1226_v19, %v436_v32  ;;  %v1085_v50 = vpop.f32.mrb[12].mxu0 }
  0xfe   : > { %v1101_v51 = vpop.f32.mrb[12].mxu1  ;;  %1040 = vst [vmem:[%s1243_s29 + $0x50] sm:$0xff] %v1004_v43   ;;  %vm539_vm5 = vcmp.gt.f32.partialorder %v445_v46, 0.0  ;;  %v571_v52 = vmul.f32 0.2, %v445_v46  ;;  %v501_v53 = vadd.f32 %v1226_v19, %v500_v33  ;;  %v458_v54 = vadd.f32 %v1085_v50, %v1226_v19  ;;  %v449_v55 = vpop.f32.mrb[13].mxu0 }
  0xff   : > { %v513_v56 = vpop.f32.mrb[13].mxu1  ;;  %v600_v57 = vsel %vm536_vm3, %v434_v27, %v568_v41  ;;  %vm555_vm6 = vcmp.gt.f32.partialorder %v509_v48, 0.0  ;;  %v587_v58 = vmul.f32 0.2, %v509_v48  ;;  %vm537_vm7 = vcmp.gt.f32.partialorder %v437_v49, 0.0  ;;  %v1086_v59 = vpop.f32.mrb[14].mxu0 }
 0x100   : > { %v1102_v60 = vpop.f32.mrb[14].mxu1  ;;  %v603_v61 = vsel %vm539_vm5, %v445_v46, %v571_v52  ;;  %v569_v62 = vmul.f32 0.2, %v437_v49  ;;  %vm553_vm8 = vcmp.gt.f32.partialorder %v501_v53, 0.0  ;;  %v585_v63 = vmul.f32 0.2, %v501_v53 }
 0x101   : > { %v452_v0 = vpop.f32.mrb[15].mxu0  ;;  %v616_v1 = vsel %vm552_vm4, %v498_v42, %v584_v47  ;;  %v979_v2 = vpack.c.bf16 %v603_v61, %v602_v44  ;;  %v619_v3 = vsel %vm555_vm6, %v509_v48, %v587_v58  ;;  %v574_v4 = vmul.f32 0.2, %v458_v54  ;;  %v516_v5 = vpop.f32.mrb[15].mxu1 }
 0x102   : > { %v1019_v6 = vpack.c.bf16 %v619_v3, %v618_v45  ;;  %v601_v7 = vsel %vm537_vm7, %v437_v49, %v569_v62  ;;  %v617_v8 = vsel %vm553_vm8, %v501_v53, %v585_v63  ;;  %v522_v9 = vadd.f32 %v1101_v51, %v1226_v19 }
 0x103   : > { %1035 = vst [vmem:[%s1243_s29 + $0x28] sm:$0xff] %v979_v2   ;;  %v974_v10 = vpack.c.bf16 %v601_v7, %v600_v57  ;;  %v1014_v11 = vpack.c.bf16 %v617_v8, %v616_v1  ;;  %vm542_vm9 = vcmp.gt.f32.partialorder %v458_v54, 0.0  ;;  %v450_v12 = vadd.f32 %v1226_v19, %v449_v55 }
 0x104   : > { %1043 = vst [vmem:[%s1243_s29 + $0x68] sm:$0xff] %v1019_v6   ;;  %vm558_vm10 = vcmp.gt.f32.partialorder %v522_v9, 0.0  ;;  %v590_v13 = vmul.f32 0.2, %v522_v9  ;;  %v514_v14 = vadd.f32 %v1226_v19, %v513_v56  ;;  %v461_v15 = vadd.f32 %v1086_v59, %v1226_v19 }
 0x105   : > { %1034 = vst [vmem:[%s1243_s29 + $0x20] sm:$0xff] %v974_v10   ;;  %1042 = vst [vmem:[%s1243_s29 + $0x60] sm:$0xff] %v1014_v11   ;;  %v572_v16 = vmul.f32 0.2, %v450_v12  ;;  %v525_v17 = vadd.f32 %v1102_v60, %v1226_v19  ;;  %v453_v18 = vadd.f32 %v1226_v19, %v452_v0  ;;  %v606_v20 = vsel %vm542_vm9, %v458_v54, %v574_v4 }
 0x106   : > { %vm540_vm11 = vcmp.gt.f32.partialorder %v450_v12, 0.0  ;;  %vm543_vm12 = vcmp.gt.f32.partialorder %v461_v15, 0.0  ;;  %v622_v21 = vsel %vm558_vm10, %v522_v9, %v590_v13  ;;  %v575_v22 = vmul.f32 0.2, %v461_v15 }
 0x107   : > { %vm559_vm13 = vcmp.gt.f32.partialorder %v525_v17, 0.0  ;;  %v591_v23 = vmul.f32 0.2, %v525_v17  ;;  %vm556_vm14 = vcmp.gt.f32.partialorder %v514_v14, 0.0  ;;  %vm541_vm15 = vcmp.gt.f32.partialorder %v453_v18, 0.0 }
 0x108   : > { %v573_v24 = vmul.f32 0.2, %v453_v18  ;;  %v517_v25 = vadd.f32 %v1226_v19, %v516_v5  ;;  %v604_v26 = vsel %vm540_vm11, %v450_v12, %v572_v16  ;;  %v588_v27 = vmul.f32 0.2, %v514_v14 }
 0x109   : > { %v607_v28 = vsel %vm543_vm12, %v461_v15, %v575_v22  ;;  %v623_v29 = vsel %vm559_vm13, %v525_v17, %v591_v23 }
 0x10a   : > { %v989_v30 = vpack.c.bf16 %v607_v28, %v606_v20  ;;  %v1029_v31 = vpack.c.bf16 %v623_v29, %v622_v21  ;;  %v605_v32 = vsel %vm541_vm15, %v453_v18, %v573_v24  ;;  %vm557_vm0 = vcmp.gt.f32.partialorder %v517_v25, 0.0 }
 0x10b   : > { %v984_v33 = vpack.c.bf16 %v605_v32, %v604_v26  ;;  %v589_v34 = vmul.f32 0.2, %v517_v25  ;;  %v620_v35 = vsel %vm556_vm14, %v514_v14, %v588_v27 }
 0x10c   : > { %1037 = vst [vmem:[%s1243_s29 + $0x38] sm:$0xff] %v989_v30   ;;  %1045 = vst [vmem:[%s1243_s29 + $0x78] sm:$0xff] %v1029_v31  }
 0x10d   : > { %1036 = vst [vmem:[%s1243_s29 + $0x30] sm:$0xff] %v984_v33   ;;  %v621_v36 = vsel %vm557_vm0, %v517_v25, %v589_v34 }
 0x10e   : > { %v1024_v37 = vpack.c.bf16 %v621_v36, %v620_v35 }
 0x110   : > { %1044 = vst [vmem:[%s1243_s29 + $0x70] sm:$0xff] %v1024_v37  }
 0x111 PF: > { %s13_s12 = sadd.s32 1, %s1142_s12  }
 0x112   : > { %p10_p4 = scmp.ge.s32.totalorder %s13_s12, 10  }
 0x114   :  { %12 = sbr.rel (!%p10_p4) target bundleno = 1 (0x1), region = 62 }

// kernel: d_forward.6
= control target key start
LH: loop header
LB: loop body
LE: loop exit
PB: predicated region body
PF: predicated region fallthrough
CT: control target
= control target key end

     0   :  { %s4245_s15 = smov 0   ;;  %s4247_s16 = smov 0   ;;  %s5686_s0 = inlined_call_operand.vmem [shape: bf16[512,2048], index: 0, kind: input, shape index: {}]   ;;  %s5687_s1 = inlined_call_operand.vmem [shape: bf16[2048,128], index: 1, kind: input, shape index: {}]   ;;  %s5688_s2 = inlined_call_operand.vmem [shape: f32[1,128], index: 2, kind: input, shape index: {}]   ;;  %s5689_s3 = inlined_call_operand.vmem [shape: f32[1,128], index: 3, kind: input, shape index: {}]   ;;  %s5690_s4 = inlined_call_operand.vmem [shape: bf16[512,128], index: 4, kind: output, shape index: {}]  }
   0x1   :  { %s4249_s17 = smov 0  }
   0x2 LB: > { %s4261_s18 = sadd.s32 4294967295, %s4216_s17   ;;  %s4264_s19 = sadd.s32 1, %s4216_s17   ;;  %s4216_s17 = sphi %s4249_s17, %s5795_s17   ;;  %s4212_s16 = sphi %s4247_s16, %s5794_s16   ;;  %s4208_s15 = sphi %s4245_s15, %s5793_s15  }
   0x3   : > { %s18_s20 = ssub.s32 %s4216_s17, %s4264_s19  ;;  %s21_s21 = sadd.s32 1, %s4212_s16 }
   0x4   : > { %p19_p0 = scmp.eq.s32.totalorder %s18_s20, 0  ;;  %p28_p1 = scmp.ne.s32.totalorder %s4212_s16, %s4208_s15 }
   0x5   : > { %p29_p2 = scmp.eq.s32.totalorder %s4216_s17, 0  ;;  %p3448_p4 = scmp.ge.s32.totalorder %s4216_s17, 4 }
   0x6   : > { %s4273_s22 = scalar_select %p19_p0, %s4212_s16, %s21_s21  }
   0x7   : > { %p30_p3 = por %p29_p2, %p28_p1  ;;  %149 = sbr.rel (%p3448_p4) target bundleno = 82 (0x52), region = 24 }
   0xe   : > { %152 = sbr.rel (!%p30_p3) target bundleno = 82 (0x52), region = 28  ;;  %s154_s23 = sand.u32 (%p30_p3), 1, %s4212_s16  }
   0xf   : > { %s3686_s24 = sshll.u32 (%p30_p3), %s4216_s17, 4  ;;  %s3449_s25 = sshll.u32 (%p30_p3), %s154_s23, 10 }
  0x10   : > { %s4281_s28 = scalar_lea.vmem (%p30_p3), %s5686_s0, %s3686_s24  ;;  %s4286_s29 = scalar_lea.vmem (%p30_p3), [#allocation3], %s3449_s25 }
  0x11   : > { %v172_v0 = vld [vmem:[%s4281_s28] sm:$0xff] (%p30_p3)  ;;  %v174_v1 = vld [vmem:[%s4281_s28 + $0x8] sm:$0xff] (%p30_p3) }
  0x12   : > { %v176_v2 = vld [vmem:[%s4281_s28 + $0x40] sm:$0xff] (%p30_p3)  ;;  %173 = vst [vmem:[%s4286_s29] sm:$0xff] (%p30_p3), %v172_v0  ;;  %175 = vst [vmem:[%s4286_s29 + $0x8] sm:$0xff] (%p30_p3), %v174_v1  ;;  %v178_v3 = vld [vmem:[%s4281_s28 + $0x48] sm:$0xff] (%p30_p3) }
  0x13   : > { %177 = vst [vmem:[%s4286_s29 + $0x10] sm:$0xff] (%p30_p3), %v176_v2  ;;  %v180_v4 = vld [vmem:[%s4281_s28 + $0x80] sm:$0xff] (%p30_p3)  ;;  %v182_v5 = vld [vmem:[%s4281_s28 + $0x88] sm:$0xff] (%p30_p3)  ;;  %179 = vst [vmem:[%s4286_s29 + $0x18] sm:$0xff] (%p30_p3), %v178_v3 }
  0x14   : > { %181 = vst [vmem:[%s4286_s29 + $0x20] sm:$0xff] (%p30_p3), %v180_v4  ;;  %183 = vst [vmem:[%s4286_s29 + $0x28] sm:$0xff] (%p30_p3), %v182_v5  ;;  %v184_v6 = vld [vmem:[%s4281_s28 + $0xc0] sm:$0xff] (%p30_p3)  ;;  %v186_v7 = vld [vmem:[%s4281_s28 + $0xc8] sm:$0xff] (%p30_p3) }
  0x15   : > { %v188_v8 = vld [vmem:[%s4281_s28 + $0x100] sm:$0xff]  ;;  %185 = vst [vmem:[%s4286_s29 + $0x30] sm:$0xff] %v184_v6  ;;  %187 = vst [vmem:[%s4286_s29 + $0x38] sm:$0xff] %v186_v7  ;;  %v190_v9 = vld [vmem:[%s4281_s28 + $0x108] sm:$0xff] }
  0x16   : > { %189 = vst [vmem:[%s4286_s29 + $0x40] sm:$0xff] %v188_v8  ;;  %v192_v10 = vld [vmem:[%s4281_s28 + $0x140] sm:$0xff]  ;;  %v194_v11 = vld [vmem:[%s4281_s28 + $0x148] sm:$0xff]  ;;  %191 = vst [vmem:[%s4286_s29 + $0x48] sm:$0xff] %v190_v9 }
  0x17   : > { %193 = vst [vmem:[%s4286_s29 + $0x50] sm:$0xff] %v192_v10  ;;  %195 = vst [vmem:[%s4286_s29 + $0x58] sm:$0xff] %v194_v11  ;;  %v196_v12 = vld [vmem:[%s4281_s28 + $0x180] sm:$0xff]  ;;  %v198_v13 = vld [vmem:[%s4281_s28 + $0x188] sm:$0xff] }
  0x18   : > { %v200_v14 = vld [vmem:[%s4281_s28 + $0x1c0] sm:$0xff]  ;;  %197 = vst [vmem:[%s4286_s29 + $0x60] sm:$0xff] %v196_v12  ;;  %199 = vst [vmem:[%s4286_s29 + $0x68] sm:$0xff] %v198_v13  ;;  %v202_v15 = vld [vmem:[%s4281_s28 + $0x1c8] sm:$0xff] }
  0x19   : > { %201 = vst [vmem:[%s4286_s29 + $0x70] sm:$0xff] %v200_v14  ;;  %v204_v16 = vld [vmem:[%s4281_s28 + $0x200] sm:$0xff]  ;;  %v206_v17 = vld [vmem:[%s4281_s28 + $0x208] sm:$0xff]  ;;  %203 = vst [vmem:[%s4286_s29 + $0x78] sm:$0xff] %v202_v15 }
  0x1a   : > { %205 = vst [vmem:[%s4286_s29 + $0x80] sm:$0xff] %v204_v16  ;;  %207 = vst [vmem:[%s4286_s29 + $0x88] sm:$0xff] %v206_v17  ;;  %v208_v18 = vld [vmem:[%s4281_s28 + $0x240] sm:$0xff]  ;;  %v210_v19 = vld [vmem:[%s4281_s28 + $0x248] sm:$0xff] }
  0x1b   : > { %v212_v20 = vld [vmem:[%s4281_s28 + $0x280] sm:$0xff]  ;;  %209 = vst [vmem:[%s4286_s29 + $0x90] sm:$0xff] %v208_v18  ;;  %211 = vst [vmem:[%s4286_s29 + $0x98] sm:$0xff] %v210_v19  ;;  %v214_v21 = vld [vmem:[%s4281_s28 + $0x288] sm:$0xff] }
  0x1c   : > { %213 = vst [vmem:[%s4286_s29 + $0xa0] sm:$0xff] %v212_v20  ;;  %v216_v22 = vld [vmem:[%s4281_s28 + $0x2c0] sm:$0xff]  ;;  %v218_v23 = vld [vmem:[%s4281_s28 + $0x2c8] sm:$0xff]  ;;  %215 = vst [vmem:[%s4286_s29 + $0xa8] sm:$0xff] %v214_v21 }
  0x1d   : > { %217 = vst [vmem:[%s4286_s29 + $0xb0] sm:$0xff] %v216_v22  ;;  %219 = vst [vmem:[%s4286_s29 + $0xb8] sm:$0xff] %v218_v23  ;;  %v220_v24 = vld [vmem:[%s4281_s28 + $0x300] sm:$0xff]  ;;  %v222_v25 = vld [vmem:[%s4281_s28 + $0x308] sm:$0xff] }
  0x1e   : > { %v224_v26 = vld [vmem:[%s4281_s28 + $0x340] sm:$0xff]  ;;  %221 = vst [vmem:[%s4286_s29 + $0xc0] sm:$0xff] %v220_v24  ;;  %223 = vst [vmem:[%s4286_s29 + $0xc8] sm:$0xff] %v222_v25  ;;  %v226_v27 = vld [vmem:[%s4281_s28 + $0x348] sm:$0xff] }
  0x1f   : > { %225 = vst [vmem:[%s4286_s29 + $0xd0] sm:$0xff] %v224_v26  ;;  %v228_v28 = vld [vmem:[%s4281_s28 + $0x380] sm:$0xff]  ;;  %v230_v29 = vld [vmem:[%s4281_s28 + $0x388] sm:$0xff]  ;;  %227 = vst [vmem:[%s4286_s29 + $0xd8] sm:$0xff] %v226_v27 }
  0x20   : > { %229 = vst [vmem:[%s4286_s29 + $0xe0] sm:$0xff] %v228_v28  ;;  %231 = vst [vmem:[%s4286_s29 + $0xe8] sm:$0xff] %v230_v29  ;;  %v232_v30 = vld [vmem:[%s4281_s28 + $0x3c0] sm:$0xff]  ;;  %v234_v31 = vld [vmem:[%s4281_s28 + $0x3c8] sm:$0xff] }
  0x21   : > { %v236_v32 = vld [vmem:[%s4281_s28 + $0x400] sm:$0xff]  ;;  %233 = vst [vmem:[%s4286_s29 + $0xf0] sm:$0xff] %v232_v30  ;;  %235 = vst [vmem:[%s4286_s29 + $0xf8] sm:$0xff] %v234_v31  ;;  %v238_v33 = vld [vmem:[%s4281_s28 + $0x408] sm:$0xff] }
  0x22   : > { %237 = vst [vmem:[%s4286_s29 + $0x100] sm:$0xff] %v236_v32  ;;  %v240_v34 = vld [vmem:[%s4281_s28 + $0x440] sm:$0xff]  ;;  %v242_v35 = vld [vmem:[%s4281_s28 + $0x448] sm:$0xff]  ;;  %239 = vst [vmem:[%s4286_s29 + $0x108] sm:$0xff] %v238_v33 }
  0x23   : > { %241 = vst [vmem:[%s4286_s29 + $0x110] sm:$0xff] %v240_v34  ;;  %243 = vst [vmem:[%s4286_s29 + $0x118] sm:$0xff] %v242_v35  ;;  %v244_v36 = vld [vmem:[%s4281_s28 + $0x480] sm:$0xff]  ;;  %v246_v37 = vld [vmem:[%s4281_s28 + $0x488] sm:$0xff] }
  0x24   : > { %v248_v38 = vld [vmem:[%s4281_s28 + $0x4c0] sm:$0xff]  ;;  %245 = vst [vmem:[%s4286_s29 + $0x120] sm:$0xff] %v244_v36  ;;  %247 = vst [vmem:[%s4286_s29 + $0x128] sm:$0xff] %v246_v37  ;;  %v250_v39 = vld [vmem:[%s4281_s28 + $0x4c8] sm:$0xff] }
  0x25   : > { %249 = vst [vmem:[%s4286_s29 + $0x130] sm:$0xff] %v248_v38  ;;  %v252_v40 = vld [vmem:[%s4281_s28 + $0x500] sm:$0xff]  ;;  %v254_v41 = vld [vmem:[%s4281_s28 + $0x508] sm:$0xff]  ;;  %251 = vst [vmem:[%s4286_s29 + $0x138] sm:$0xff] %v250_v39 }
  0x26   : > { %253 = vst [vmem:[%s4286_s29 + $0x140] sm:$0xff] %v252_v40  ;;  %255 = vst [vmem:[%s4286_s29 + $0x148] sm:$0xff] %v254_v41  ;;  %v256_v42 = vld [vmem:[%s4281_s28 + $0x540] sm:$0xff]  ;;  %v258_v43 = vld [vmem:[%s4281_s28 + $0x548] sm:$0xff] }
  0x27   : > { %v260_v44 = vld [vmem:[%s4281_s28 + $0x580] sm:$0xff]  ;;  %257 = vst [vmem:[%s4286_s29 + $0x150] sm:$0xff] %v256_v42  ;;  %259 = vst [vmem:[%s4286_s29 + $0x158] sm:$0xff] %v258_v43  ;;  %v262_v45 = vld [vmem:[%s4281_s28 + $0x588] sm:$0xff] }
  0x28   : > { %261 = vst [vmem:[%s4286_s29 + $0x160] sm:$0xff] %v260_v44  ;;  %v264_v46 = vld [vmem:[%s4281_s28 + $0x5c0] sm:$0xff]  ;;  %v266_v47 = vld [vmem:[%s4281_s28 + $0x5c8] sm:$0xff]  ;;  %263 = vst [vmem:[%s4286_s29 + $0x168] sm:$0xff] %v262_v45 }
  0x29   : > { %265 = vst [vmem:[%s4286_s29 + $0x170] sm:$0xff] %v264_v46  ;;  %267 = vst [vmem:[%s4286_s29 + $0x178] sm:$0xff] %v266_v47  ;;  %v268_v48 = vld [vmem:[%s4281_s28 + $0x600] sm:$0xff]  ;;  %v270_v49 = vld [vmem:[%s4281_s28 + $0x608] sm:$0xff] }
  0x2a   : > { %v272_v50 = vld [vmem:[%s4281_s28 + $0x640] sm:$0xff]  ;;  %269 = vst [vmem:[%s4286_s29 + $0x180] sm:$0xff] %v268_v48  ;;  %271 = vst [vmem:[%s4286_s29 + $0x188] sm:$0xff] %v270_v49  ;;  %v274_v51 = vld [vmem:[%s4281_s28 + $0x648] sm:$0xff] }
  0x2b   : > { %273 = vst [vmem:[%s4286_s29 + $0x190] sm:$0xff] %v272_v50  ;;  %v276_v52 = vld [vmem:[%s4281_s28 + $0x680] sm:$0xff]  ;;  %v278_v53 = vld [vmem:[%s4281_s28 + $0x688] sm:$0xff]  ;;  %275 = vst [vmem:[%s4286_s29 + $0x198] sm:$0xff] %v274_v51 }
  0x2c   : > { %277 = vst [vmem:[%s4286_s29 + $0x1a0] sm:$0xff] %v276_v52  ;;  %279 = vst [vmem:[%s4286_s29 + $0x1a8] sm:$0xff] %v278_v53  ;;  %v280_v54 = vld [vmem:[%s4281_s28 + $0x6c0] sm:$0xff]  ;;  %v282_v55 = vld [vmem:[%s4281_s28 + $0x6c8] sm:$0xff] }
  0x2d   : > { %v284_v56 = vld [vmem:[%s4281_s28 + $0x700] sm:$0xff]  ;;  %281 = vst [vmem:[%s4286_s29 + $0x1b0] sm:$0xff] %v280_v54  ;;  %283 = vst [vmem:[%s4286_s29 + $0x1b8] sm:$0xff] %v282_v55  ;;  %v286_v57 = vld [vmem:[%s4281_s28 + $0x708] sm:$0xff] }
  0x2e   : > { %285 = vst [vmem:[%s4286_s29 + $0x1c0] sm:$0xff] %v284_v56  ;;  %v288_v58 = vld [vmem:[%s4281_s28 + $0x740] sm:$0xff]  ;;  %v290_v59 = vld [vmem:[%s4281_s28 + $0x748] sm:$0xff]  ;;  %287 = vst [vmem:[%s4286_s29 + $0x1c8] sm:$0xff] %v286_v57 }
  0x2f   : > { %289 = vst [vmem:[%s4286_s29 + $0x1d0] sm:$0xff] %v288_v58  ;;  %291 = vst [vmem:[%s4286_s29 + $0x1d8] sm:$0xff] %v290_v59  ;;  %v292_v60 = vld [vmem:[%s4281_s28 + $0x780] sm:$0xff]  ;;  %v294_v61 = vld [vmem:[%s4281_s28 + $0x788] sm:$0xff] }
  0x30   : > { %v296_v62 = vld [vmem:[%s4281_s28 + $0x7c0] sm:$0xff]  ;;  %293 = vst [vmem:[%s4286_s29 + $0x1e0] sm:$0xff] %v292_v60  ;;  %295 = vst [vmem:[%s4286_s29 + $0x1e8] sm:$0xff] %v294_v61  ;;  %v298_v63 = vld [vmem:[%s4281_s28 + $0x7c8] sm:$0xff] }
  0x31   : > { %297 = vst [vmem:[%s4286_s29 + $0x1f0] sm:$0xff] %v296_v62  ;;  %v300_v0 = vld [vmem:[%s4281_s28 + $0x800] sm:$0xff]  ;;  %v302_v1 = vld [vmem:[%s4281_s28 + $0x808] sm:$0xff]  ;;  %299 = vst [vmem:[%s4286_s29 + $0x1f8] sm:$0xff] %v298_v63 }
  0x32   : > { %301 = vst [vmem:[%s4286_s29 + $0x200] sm:$0xff] %v300_v0  ;;  %303 = vst [vmem:[%s4286_s29 + $0x208] sm:$0xff] %v302_v1  ;;  %v304_v2 = vld [vmem:[%s4281_s28 + $0x840] sm:$0xff]  ;;  %v306_v3 = vld [vmem:[%s4281_s28 + $0x848] sm:$0xff] }
  0x33   : > { %v308_v4 = vld [vmem:[%s4281_s28 + $0x880] sm:$0xff]  ;;  %305 = vst [vmem:[%s4286_s29 + $0x210] sm:$0xff] %v304_v2  ;;  %307 = vst [vmem:[%s4286_s29 + $0x218] sm:$0xff] %v306_v3  ;;  %v310_v5 = vld [vmem:[%s4281_s28 + $0x888] sm:$0xff] }
  0x34   : > { %309 = vst [vmem:[%s4286_s29 + $0x220] sm:$0xff] %v308_v4  ;;  %v312_v6 = vld [vmem:[%s4281_s28 + $0x8c0] sm:$0xff]  ;;  %v314_v7 = vld [vmem:[%s4281_s28 + $0x8c8] sm:$0xff]  ;;  %311 = vst [vmem:[%s4286_s29 + $0x228] sm:$0xff] %v310_v5 }
  0x35   : > { %313 = vst [vmem:[%s4286_s29 + $0x230] sm:$0xff] %v312_v6  ;;  %315 = vst [vmem:[%s4286_s29 + $0x238] sm:$0xff] %v314_v7  ;;  %v316_v8 = vld [vmem:[%s4281_s28 + $0x900] sm:$0xff]  ;;  %v318_v9 = vld [vmem:[%s4281_s28 + $0x908] sm:$0xff] }
  0x36   : > { %v320_v10 = vld [vmem:[%s4281_s28 + $0x940] sm:$0xff]  ;;  %317 = vst [vmem:[%s4286_s29 + $0x240] sm:$0xff] %v316_v8  ;;  %319 = vst [vmem:[%s4286_s29 + $0x248] sm:$0xff] %v318_v9  ;;  %v322_v11 = vld [vmem:[%s4281_s28 + $0x948] sm:$0xff] }
  0x37   : > { %321 = vst [vmem:[%s4286_s29 + $0x250] sm:$0xff] %v320_v10  ;;  %v324_v12 = vld [vmem:[%s4281_s28 + $0x980] sm:$0xff]  ;;  %v326_v13 = vld [vmem:[%s4281_s28 + $0x988] sm:$0xff]  ;;  %323 = vst [vmem:[%s4286_s29 + $0x258] sm:$0xff] %v322_v11 }
  0x38   : > { %325 = vst [vmem:[%s4286_s29 + $0x260] sm:$0xff] %v324_v12  ;;  %327 = vst [vmem:[%s4286_s29 + $0x268] sm:$0xff] %v326_v13  ;;  %v328_v14 = vld [vmem:[%s4281_s28 + $0x9c0] sm:$0xff]  ;;  %v330_v15 = vld [vmem:[%s4281_s28 + $0x9c8] sm:$0xff] }
  0x39   : > { %v332_v16 = vld [vmem:[%s4281_s28 + $0xa00] sm:$0xff]  ;;  %329 = vst [vmem:[%s4286_s29 + $0x270] sm:$0xff] %v328_v14  ;;  %331 = vst [vmem:[%s4286_s29 + $0x278] sm:$0xff] %v330_v15  ;;  %v334_v17 = vld [vmem:[%s4281_s28 + $0xa08] sm:$0xff] }
  0x3a   : > { %333 = vst [vmem:[%s4286_s29 + $0x280] sm:$0xff] %v332_v16  ;;  %v336_v18 = vld [vmem:[%s4281_s28 + $0xa40] sm:$0xff]  ;;  %v338_v19 = vld [vmem:[%s4281_s28 + $0xa48] sm:$0xff]  ;;  %335 = vst [vmem:[%s4286_s29 + $0x288] sm:$0xff] %v334_v17 }
  0x3b   : > { %337 = vst [vmem:[%s4286_s29 + $0x290] sm:$0xff] %v336_v18  ;;  %339 = vst [vmem:[%s4286_s29 + $0x298] sm:$0xff] %v338_v19  ;;  %v340_v20 = vld [vmem:[%s4281_s28 + $0xa80] sm:$0xff]  ;;  %v342_v21 = vld [vmem:[%s4281_s28 + $0xa88] sm:$0xff] }
  0x3c   : > { %v344_v22 = vld [vmem:[%s4281_s28 + $0xac0] sm:$0xff]  ;;  %341 = vst [vmem:[%s4286_s29 + $0x2a0] sm:$0xff] %v340_v20  ;;  %343 = vst [vmem:[%s4286_s29 + $0x2a8] sm:$0xff] %v342_v21  ;;  %v346_v23 = vld [vmem:[%s4281_s28 + $0xac8] sm:$0xff] }
  0x3d   : > { %345 = vst [vmem:[%s4286_s29 + $0x2b0] sm:$0xff] %v344_v22  ;;  %v348_v24 = vld [vmem:[%s4281_s28 + $0xb00] sm:$0xff]  ;;  %v350_v25 = vld [vmem:[%s4281_s28 + $0xb08] sm:$0xff]  ;;  %347 = vst [vmem:[%s4286_s29 + $0x2b8] sm:$0xff] %v346_v23 }
  0x3e   : > { %349 = vst [vmem:[%s4286_s29 + $0x2c0] sm:$0xff] %v348_v24  ;;  %351 = vst [vmem:[%s4286_s29 + $0x2c8] sm:$0xff] %v350_v25  ;;  %v352_v26 = vld [vmem:[%s4281_s28 + $0xb40] sm:$0xff]  ;;  %v354_v27 = vld [vmem:[%s4281_s28 + $0xb48] sm:$0xff] }
  0x3f   : > { %v356_v28 = vld [vmem:[%s4281_s28 + $0xb80] sm:$0xff]  ;;  %353 = vst [vmem:[%s4286_s29 + $0x2d0] sm:$0xff] %v352_v26  ;;  %355 = vst [vmem:[%s4286_s29 + $0x2d8] sm:$0xff] %v354_v27  ;;  %v358_v29 = vld [vmem:[%s4281_s28 + $0xb88] sm:$0xff] }
  0x40   : > { %357 = vst [vmem:[%s4286_s29 + $0x2e0] sm:$0xff] %v356_v28  ;;  %v360_v30 = vld [vmem:[%s4281_s28 + $0xbc0] sm:$0xff]  ;;  %v362_v31 = vld [vmem:[%s4281_s28 + $0xbc8] sm:$0xff]  ;;  %359 = vst [vmem:[%s4286_s29 + $0x2e8] sm:$0xff] %v358_v29 }
  0x41   : > { %361 = vst [vmem:[%s4286_s29 + $0x2f0] sm:$0xff] %v360_v30  ;;  %363 = vst [vmem:[%s4286_s29 + $0x2f8] sm:$0xff] %v362_v31  ;;  %v364_v32 = vld [vmem:[%s4281_s28 + $0xc00] sm:$0xff]  ;;  %v366_v33 = vld [vmem:[%s4281_s28 + $0xc08] sm:$0xff] }
  0x42   : > { %v368_v34 = vld [vmem:[%s4281_s28 + $0xc40] sm:$0xff]  ;;  %365 = vst [vmem:[%s4286_s29 + $0x300] sm:$0xff] %v364_v32  ;;  %367 = vst [vmem:[%s4286_s29 + $0x308] sm:$0xff] %v366_v33  ;;  %v370_v35 = vld [vmem:[%s4281_s28 + $0xc48] sm:$0xff] }
  0x43   : > { %369 = vst [vmem:[%s4286_s29 + $0x310] sm:$0xff] %v368_v34  ;;  %v372_v36 = vld [vmem:[%s4281_s28 + $0xc80] sm:$0xff]  ;;  %v374_v37 = vld [vmem:[%s4281_s28 + $0xc88] sm:$0xff]  ;;  %371 = vst [vmem:[%s4286_s29 + $0x318] sm:$0xff] %v370_v35 }
  0x44   : > { %373 = vst [vmem:[%s4286_s29 + $0x320] sm:$0xff] %v372_v36  ;;  %375 = vst [vmem:[%s4286_s29 + $0x328] sm:$0xff] %v374_v37  ;;  %v376_v38 = vld [vmem:[%s4281_s28 + $0xcc0] sm:$0xff]  ;;  %v378_v39 = vld [vmem:[%s4281_s28 + $0xcc8] sm:$0xff] }
  0x45   : > { %v380_v40 = vld [vmem:[%s4281_s28 + $0xd00] sm:$0xff]  ;;  %377 = vst [vmem:[%s4286_s29 + $0x330] sm:$0xff] %v376_v38  ;;  %379 = vst [vmem:[%s4286_s29 + $0x338] sm:$0xff] %v378_v39  ;;  %v382_v41 = vld [vmem:[%s4281_s28 + $0xd08] sm:$0xff] }
  0x46   : > { %381 = vst [vmem:[%s4286_s29 + $0x340] sm:$0xff] %v380_v40  ;;  %v384_v42 = vld [vmem:[%s4281_s28 + $0xd40] sm:$0xff]  ;;  %v386_v43 = vld [vmem:[%s4281_s28 + $0xd48] sm:$0xff]  ;;  %383 = vst [vmem:[%s4286_s29 + $0x348] sm:$0xff] %v382_v41 }
  0x47   : > { %385 = vst [vmem:[%s4286_s29 + $0x350] sm:$0xff] %v384_v42  ;;  %387 = vst [vmem:[%s4286_s29 + $0x358] sm:$0xff] %v386_v43  ;;  %v388_v44 = vld [vmem:[%s4281_s28 + $0xd80] sm:$0xff]  ;;  %v390_v45 = vld [vmem:[%s4281_s28 + $0xd88] sm:$0xff] }
  0x48   : > { %v392_v46 = vld [vmem:[%s4281_s28 + $0xdc0] sm:$0xff]  ;;  %389 = vst [vmem:[%s4286_s29 + $0x360] sm:$0xff] %v388_v44  ;;  %391 = vst [vmem:[%s4286_s29 + $0x368] sm:$0xff] %v390_v45  ;;  %v394_v47 = vld [vmem:[%s4281_s28 + $0xdc8] sm:$0xff] }
  0x49   : > { %393 = vst [vmem:[%s4286_s29 + $0x370] sm:$0xff] %v392_v46  ;;  %v396_v48 = vld [vmem:[%s4281_s28 + $0xe00] sm:$0xff]  ;;  %v398_v49 = vld [vmem:[%s4281_s28 + $0xe08] sm:$0xff]  ;;  %395 = vst [vmem:[%s4286_s29 + $0x378] sm:$0xff] %v394_v47 }
  0x4a   : > { %397 = vst [vmem:[%s4286_s29 + $0x380] sm:$0xff] %v396_v48  ;;  %399 = vst [vmem:[%s4286_s29 + $0x388] sm:$0xff] %v398_v49  ;;  %v400_v50 = vld [vmem:[%s4281_s28 + $0xe40] sm:$0xff]  ;;  %v402_v51 = vld [vmem:[%s4281_s28 + $0xe48] sm:$0xff] }
  0x4b   : > { %v404_v52 = vld [vmem:[%s4281_s28 + $0xe80] sm:$0xff]  ;;  %401 = vst [vmem:[%s4286_s29 + $0x390] sm:$0xff] %v400_v50  ;;  %403 = vst [vmem:[%s4286_s29 + $0x398] sm:$0xff] %v402_v51  ;;  %v406_v53 = vld [vmem:[%s4281_s28 + $0xe88] sm:$0xff] }
  0x4c   : > { %405 = vst [vmem:[%s4286_s29 + $0x3a0] sm:$0xff] %v404_v52  ;;  %v408_v54 = vld [vmem:[%s4281_s28 + $0xec0] sm:$0xff]  ;;  %v410_v55 = vld [vmem:[%s4281_s28 + $0xec8] sm:$0xff]  ;;  %407 = vst [vmem:[%s4286_s29 + $0x3a8] sm:$0xff] %v406_v53 }
  0x4d   : > { %409 = vst [vmem:[%s4286_s29 + $0x3b0] sm:$0xff] %v408_v54  ;;  %411 = vst [vmem:[%s4286_s29 + $0x3b8] sm:$0xff] %v410_v55  ;;  %v412_v56 = vld [vmem:[%s4281_s28 + $0xf00] sm:$0xff]  ;;  %v414_v57 = vld [vmem:[%s4281_s28 + $0xf08] sm:$0xff] }
  0x4e   : > { %v416_v58 = vld [vmem:[%s4281_s28 + $0xf40] sm:$0xff]  ;;  %413 = vst [vmem:[%s4286_s29 + $0x3c0] sm:$0xff] %v412_v56  ;;  %415 = vst [vmem:[%s4286_s29 + $0x3c8] sm:$0xff] %v414_v57  ;;  %v418_v59 = vld [vmem:[%s4281_s28 + $0xf48] sm:$0xff] }
  0x4f   : > { %417 = vst [vmem:[%s4286_s29 + $0x3d0] sm:$0xff] %v416_v58  ;;  %v420_v60 = vld [vmem:[%s4281_s28 + $0xf80] sm:$0xff]  ;;  %v422_v61 = vld [vmem:[%s4281_s28 + $0xf88] sm:$0xff]  ;;  %419 = vst [vmem:[%s4286_s29 + $0x3d8] sm:$0xff] %v418_v59 }
  0x50   : > { %421 = vst [vmem:[%s4286_s29 + $0x3e0] sm:$0xff] %v420_v60  ;;  %423 = vst [vmem:[%s4286_s29 + $0x3e8] sm:$0xff] %v422_v61  ;;  %v424_v62 = vld [vmem:[%s4281_s28 + $0xfc0] sm:$0xff]  ;;  %v426_v63 = vld [vmem:[%s4281_s28 + $0xfc8] sm:$0xff] }
  0x51   : > { %425 = vst [vmem:[%s4286_s29 + $0x3f0] sm:$0xff] %v424_v62  ;;  %427 = vst [vmem:[%s4286_s29 + $0x3f8] sm:$0xff] %v426_v63 }
  0x52 PF: > { %p3452_p5 = scmp.ge.s32.totalorder %s4216_s17, 1  ;;  %p441_p6 = scmp.lt.s32.totalorder %s4216_s17, 5 }
  0x54   : > { %p442_p7 = pnand %p3452_p5, %p441_p6 }
  0x55   : > { %s448_s30 = sand.u32 (!%p442_p7), 1, %s4208_s15   ;;  %s3454_s5 = sshll.u32 (!%p442_p7), %s4261_s18, 6 }
  0x56   : > { %445 = sbr.rel (%p442_p7) target bundleno = 1074 (0x432), region = 55  ;;  %s3453_s6 = sshll.u32 (!%p442_p7), %s448_s30, 10 }
  0x57   : > { %p475_p8 = scmp.lt.s32.totalorder (!%p442_p7), %s3454_s5, 255  ;;  %s4550_s11 = scalar_lea.vmem (!%p442_p7), [#allocation3], %s3453_s6 }
  0x58   : > { %p3456_p9 = scmp.ne.s32.totalorder (!%p442_p7), %s4261_s18, 0 }
  0x5d   : > { %s5797_s5 = smov (!%p475_p8, %s3454_s5), 255  ;;  %484 = sbr.rel (%p3456_p9) target bundleno = 127 (0x7f), region = 63 }
  0x5e   : > { %s3455_s7 = sshll.u32 %s5797_s5, 2  ;;  %v4218_v0 = vmov (!%p3456_p9), 0.0  }
  0x5f   : > { %s4548_s10 = scalar_lea.vmem %s5687_s1, %s3455_s7  ;;  %485 = vst [vmem:[#allocation2] sm:$0xff] (!%p3456_p9), %v4218_v0  ;;  %486 = vst [vmem:[#allocation2 + $0x8] sm:$0xff] (!%p3456_p9), %v4218_v0 }
  0x60   : > { %487 = vst [vmem:[#allocation2 + $0x10] sm:$0xff] (!%p3456_p9), %v4218_v0  ;;  %488 = vst [vmem:[#allocation2 + $0x18] sm:$0xff] (!%p3456_p9), %v4218_v0 }
  0x61   : > { %489 = vst [vmem:[#allocation2 + $0x20] sm:$0xff] (!%p3456_p9), %v4218_v0  ;;  %490 = vst [vmem:[#allocation2 + $0x28] sm:$0xff] (!%p3456_p9), %v4218_v0 }
  0x62   : > { %491 = vst [vmem:[#allocation2 + $0x30] sm:$0xff] (!%p3456_p9), %v4218_v0  ;;  %492 = vst [vmem:[#allocation2 + $0x38] sm:$0xff] (!%p3456_p9), %v4218_v0 }
  0x63   : > { %493 = vst [vmem:[#allocation2 + $0x40] sm:$0xff] (!%p3456_p9), %v4218_v0  ;;  %494 = vst [vmem:[#allocation2 + $0x48] sm:$0xff] (!%p3456_p9), %v4218_v0 }
  0x64   : > { %495 = vst [vmem:[#allocation2 + $0x50] sm:$0xff] %v4218_v0  ;;  %496 = vst [vmem:[#allocation2 + $0x58] sm:$0xff] %v4218_v0 }
  0x65   : > { %497 = vst [vmem:[#allocation2 + $0x60] sm:$0xff] %v4218_v0  ;;  %498 = vst [vmem:[#allocation2 + $0x68] sm:$0xff] %v4218_v0 }
  0x66   : > { %499 = vst [vmem:[#allocation2 + $0x70] sm:$0xff] %v4218_v0  ;;  %500 = vst [vmem:[#allocation2 + $0x78] sm:$0xff] %v4218_v0 }
  0x67   : > { %501 = vst [vmem:[#allocation2 + $0x80] sm:$0xff] %v4218_v0  ;;  %502 = vst [vmem:[#allocation2 + $0x88] sm:$0xff] %v4218_v0 }
  0x68   : > { %503 = vst [vmem:[#allocation2 + $0x90] sm:$0xff] %v4218_v0  ;;  %504 = vst [vmem:[#allocation2 + $0x98] sm:$0xff] %v4218_v0 }
  0x69   : > { %505 = vst [vmem:[#allocation2 + $0xa0] sm:$0xff] %v4218_v0  ;;  %506 = vst [vmem:[#allocation2 + $0xa8] sm:$0xff] %v4218_v0 }
  0x6a   : > { %507 = vst [vmem:[#allocation2 + $0xb0] sm:$0xff] %v4218_v0  ;;  %508 = vst [vmem:[#allocation2 + $0xb8] sm:$0xff] %v4218_v0 }
  0x6b   : > { %509 = vst [vmem:[#allocation2 + $0xc0] sm:$0xff] %v4218_v0  ;;  %510 = vst [vmem:[#allocation2 + $0xc8] sm:$0xff] %v4218_v0 }
  0x6c   : > { %511 = vst [vmem:[#allocation2 + $0xd0] sm:$0xff] %v4218_v0  ;;  %512 = vst [vmem:[#allocation2 + $0xd8] sm:$0xff] %v4218_v0 }
  0x6d   : > { %513 = vst [vmem:[#allocation2 + $0xe0] sm:$0xff] %v4218_v0  ;;  %514 = vst [vmem:[#allocation2 + $0xe8] sm:$0xff] %v4218_v0 }
  0x6e   : > { %515 = vst [vmem:[#allocation2 + $0xf0] sm:$0xff] %v4218_v0  ;;  %516 = vst [vmem:[#allocation2 + $0xf8] sm:$0xff] %v4218_v0 }
  0x6f   : > { %517 = vst [vmem:[#allocation2 + $0x100] sm:$0xff] %v4218_v0  ;;  %518 = vst [vmem:[#allocation2 + $0x108] sm:$0xff] %v4218_v0 }
  0x70   : > { %519 = vst [vmem:[#allocation2 + $0x110] sm:$0xff] %v4218_v0  ;;  %520 = vst [vmem:[#allocation2 + $0x118] sm:$0xff] %v4218_v0 }
  0x71   : > { %521 = vst [vmem:[#allocation2 + $0x120] sm:$0xff] %v4218_v0  ;;  %522 = vst [vmem:[#allocation2 + $0x128] sm:$0xff] %v4218_v0 }
  0x72   : > { %523 = vst [vmem:[#allocation2 + $0x130] sm:$0xff] %v4218_v0  ;;  %524 = vst [vmem:[#allocation2 + $0x138] sm:$0xff] %v4218_v0 }
  0x73   : > { %525 = vst [vmem:[#allocation2 + $0x140] sm:$0xff] %v4218_v0  ;;  %526 = vst [vmem:[#allocation2 + $0x148] sm:$0xff] %v4218_v0 }
  0x74   : > { %527 = vst [vmem:[#allocation2 + $0x150] sm:$0xff] %v4218_v0  ;;  %528 = vst [vmem:[#allocation2 + $0x158] sm:$0xff] %v4218_v0 }
  0x75   : > { %529 = vst [vmem:[#allocation2 + $0x160] sm:$0xff] %v4218_v0  ;;  %530 = vst [vmem:[#allocation2 + $0x168] sm:$0xff] %v4218_v0 }
  0x76   : > { %531 = vst [vmem:[#allocation2 + $0x170] sm:$0xff] %v4218_v0  ;;  %532 = vst [vmem:[#allocation2 + $0x178] sm:$0xff] %v4218_v0 }
  0x77   : > { %533 = vst [vmem:[#allocation2 + $0x180] sm:$0xff] %v4218_v0  ;;  %534 = vst [vmem:[#allocation2 + $0x188] sm:$0xff] %v4218_v0 }
  0x78   : > { %535 = vst [vmem:[#allocation2 + $0x190] sm:$0xff] %v4218_v0  ;;  %536 = vst [vmem:[#allocation2 + $0x198] sm:$0xff] %v4218_v0 }
  0x79   : > { %537 = vst [vmem:[#allocation2 + $0x1a0] sm:$0xff] %v4218_v0  ;;  %538 = vst [vmem:[#allocation2 + $0x1a8] sm:$0xff] %v4218_v0 }
  0x7a   : > { %539 = vst [vmem:[#allocation2 + $0x1b0] sm:$0xff] %v4218_v0  ;;  %540 = vst [vmem:[#allocation2 + $0x1b8] sm:$0xff] %v4218_v0 }
  0x7b   : > { %541 = vst [vmem:[#allocation2 + $0x1c0] sm:$0xff] %v4218_v0  ;;  %542 = vst [vmem:[#allocation2 + $0x1c8] sm:$0xff] %v4218_v0 }
  0x7c   : > { %543 = vst [vmem:[#allocation2 + $0x1d0] sm:$0xff] %v4218_v0  ;;  %544 = vst [vmem:[#allocation2 + $0x1d8] sm:$0xff] %v4218_v0 }
  0x7d   : > { %545 = vst [vmem:[#allocation2 + $0x1e0] sm:$0xff] %v4218_v0  ;;  %546 = vst [vmem:[#allocation2 + $0x1e8] sm:$0xff] %v4218_v0 }
  0x7e   : > { %547 = vst [vmem:[#allocation2 + $0x1f0] sm:$0xff] %v4218_v0  ;;  %548 = vst [vmem:[#allocation2 + $0x1f8] sm:$0xff] %v4218_v0 }
  0x7f PF: > { %v3968_v1 = vld [vmem:[%s4548_s10] sm:$0xff]   ;;  %v4219_v2 = vmov 0   ;;  %v3970_v4 = vld [vmem:[%s4548_s10 + $0x8] sm:$0xff]   ;;  %v3972_v6 = vld [vmem:[%s4548_s10 + $0x10] sm:$0xff]   ;;  %p3617_p10 = scmp.ne.s32.totalorder %s4261_s18, 3 }
  0x80   : > { %1637 = vmatprep.subr.bf16.mxu0 %v4219_v2  ;;  %1926 = vmatprep.subr.bf16.mxu1 %v4219_v2  ;;  %v3969_v3 = vld [vmem:[%s4548_s10 + $0x80] sm:$0xff]   ;;  %v3971_v5 = vld [vmem:[%s4548_s10 + $0x88] sm:$0xff]   ;;  %v3973_v7 = vld [vmem:[%s4548_s10 + $0x90] sm:$0xff]  }
  0x81   : > { %1638 = vmatpush1.bf16.msra.mxu0 %v3968_v1  ;;  %1927 = vmatpush1.bf16.msra.mxu1 %v3969_v3  ;;  %v3974_v8 = vld [vmem:[%s4548_s10 + $0x18] sm:$0xff]   ;;  %v3976_v10 = vld [vmem:[%s4548_s10 + $0x20] sm:$0xff]   ;;  %v3978_v12 = vld [vmem:[%s4548_s10 + $0x28] sm:$0xff]  }
  0x82   : > { %1639 = vmatprep.subr.bf16.mxu0 %v4219_v2  ;;  %1928 = vmatprep.subr.bf16.mxu1 %v4219_v2  ;;  %v3975_v9 = vld [vmem:[%s4548_s10 + $0x98] sm:$0xff]   ;;  %v3977_v11 = vld [vmem:[%s4548_s10 + $0xa0] sm:$0xff]   ;;  %v3979_v13 = vld [vmem:[%s4548_s10 + $0xa8] sm:$0xff]  }
  0x83   : > { %v3980_v14 = vld [vmem:[%s4548_s10 + $0x30] sm:$0xff]   ;;  %v3982_v16 = vld [vmem:[%s4548_s10 + $0x38] sm:$0xff]   ;;  %v3984_v18 = vld [vmem:[%s4548_s10 + $0x40] sm:$0xff]  }
  0x84   : > { %v3981_v15 = vld [vmem:[%s4548_s10 + $0xb0] sm:$0xff]   ;;  %v3983_v17 = vld [vmem:[%s4548_s10 + $0xb8] sm:$0xff]   ;;  %v3985_v19 = vld [vmem:[%s4548_s10 + $0xc0] sm:$0xff]  }
  0x85   : > { %1640 = vmatpush1.bf16.msra.mxu0 %v3970_v4  ;;  %1929 = vmatpush1.bf16.msra.mxu1 %v3971_v5  ;;  %v4002_v20 = vld [vmem:[%s4550_s11 + $0x4] ss:$16 sps:$4 sm:$0xff]   ;;  %v3986_v21 = vld [vmem:[%s4548_s10 + $0x48] sm:$0xff]   ;;  %v3990_v26 = vld [vmem:[%s4548_s10 + $0x58] sm:$0xff]  }
  0x86   : > { %1641 = vmatprep.subr.bf16.mxu0 %v4219_v2  ;;  %1930 = vmatprep.subr.bf16.mxu1 %v4219_v2  ;;  %v4005_v22 = vld [vmem:[%s4550_s11 + $0xc] ss:$16 sps:$4 sm:$0xff]   ;;  %v3988_v24 = vld [vmem:[%s4548_s10 + $0x50] sm:$0xff]   ;;  %v3992_v28 = vld [vmem:[%s4548_s10 + $0x60] sm:$0xff]  }
  0x87   : > { %v3987_v23 = vld [vmem:[%s4548_s10 + $0xc8] sm:$0xff]   ;;  %1669 = vmatprep.mubr.bf16.mxu0 %v4002_v20  ;;  %1958 = vmatprep.mubr.bf16.mxu1 %v4005_v22  ;;  %v3989_v25 = vld [vmem:[%s4548_s10 + $0xd0] sm:$0xff]   ;;  %v3991_v27 = vld [vmem:[%s4548_s10 + $0xd8] sm:$0xff]  }
  0x88   : > { %v3993_v29 = vld [vmem:[%s4548_s10 + $0xe0] sm:$0xff]   ;;  %v3994_v30 = vld [vmem:[%s4548_s10 + $0x68] sm:$0xff]   ;;  %v3996_v32 = vld [vmem:[%s4548_s10 + $0x70] sm:$0xff]  }
  0x89   : > { %1642 = vmatpush1.bf16.msra.mxu0 %v3972_v6  ;;  %1931 = vmatpush1.bf16.msra.mxu1 %v3973_v7  ;;  %v3995_v31 = vld [vmem:[%s4548_s10 + $0xe8] sm:$0xff]   ;;  %v3997_v33 = vld [vmem:[%s4548_s10 + $0xf0] sm:$0xff]   ;;  %v3998_v34 = vld [vmem:[%s4548_s10 + $0x78] sm:$0xff]  }
  0x8a   : > { %1643 = vmatprep.subr.bf16.mxu0 %v4219_v2  ;;  %1932 = vmatprep.subr.bf16.mxu1 %v4219_v2  ;;  %v3999_v35 = vld [vmem:[%s4548_s10 + $0xf8] sm:$0xff]   ;;  %v4000_v36 = vld [vmem:[%s4550_s11] ss:$16 sps:$4 sm:$0xff]   ;;  %v4006_v38 = vld [vmem:[%s4550_s11 + $0x24] ss:$16 sps:$4 sm:$0xff]  }
  0x8b   : > { %v4003_v37 = vld [vmem:[%s4550_s11 + $0x8] ss:$16 sps:$4 sm:$0xff]   ;;  %v4008_v39 = vld [vmem:[%s4550_s11 + $0x2c] ss:$16 sps:$4 sm:$0xff]   ;;  %v4010_v40 = vld [vmem:[%s4550_s11 + $0x20] ss:$16 sps:$4 sm:$0xff]  }
  0x8c   : > { %v4011_v41 = vld [vmem:[%s4550_s11 + $0x28] ss:$16 sps:$4 sm:$0xff]   ;;  %v4012_v42 = vld [vmem:[%s4550_s11 + $0x44] ss:$16 sps:$4 sm:$0xff]   ;;  %v4014_v43 = vld [vmem:[%s4550_s11 + $0x4c] ss:$16 sps:$4 sm:$0xff]  }
  0x8d   : > { %1644 = vmatpush1.bf16.msra.mxu0 %v3974_v8  ;;  %1933 = vmatpush1.bf16.msra.mxu1 %v3975_v9  ;;  %v4016_v44 = vld [vmem:[%s4550_s11 + $0x40] ss:$16 sps:$4 sm:$0xff]   ;;  %v4017_v45 = vld [vmem:[%s4550_s11 + $0x48] ss:$16 sps:$4 sm:$0xff]   ;;  %v4018_v46 = vld [vmem:[%s4550_s11 + $0x64] ss:$16 sps:$4 sm:$0xff]  }
  0x8e   : > { %1645 = vmatprep.subr.bf16.mxu0 %v4219_v2  ;;  %1934 = vmatprep.subr.bf16.mxu1 %v4219_v2  ;;  %v4020_v47 = vld [vmem:[%s4550_s11 + $0x6c] ss:$16 sps:$4 sm:$0xff]   ;;  %v4022_v48 = vld [vmem:[%s4550_s11 + $0x60] ss:$16 sps:$4 sm:$0xff]   ;;  %v4023_v49 = vld [vmem:[%s4550_s11 + $0x68] ss:$16 sps:$4 sm:$0xff]  }
  0x8f   : > { %v4024_v50 = vld [vmem:[%s4550_s11 + $0x84] ss:$16 sps:$4 sm:$0xff]   ;;  %v4026_v51 = vld [vmem:[%s4550_s11 + $0x8c] ss:$16 sps:$4 sm:$0xff]   ;;  %v4028_v52 = vld [vmem:[%s4550_s11 + $0x80] ss:$16 sps:$4 sm:$0xff]  }
  0x90   : > { %v4029_v53 = vld [vmem:[%s4550_s11 + $0x88] ss:$16 sps:$4 sm:$0xff]   ;;  %v4030_v54 = vld [vmem:[%s4550_s11 + $0xa4] ss:$16 sps:$4 sm:$0xff]   ;;  %v4032_v55 = vld [vmem:[%s4550_s11 + $0xac] ss:$16 sps:$4 sm:$0xff]  }
  0x91   : > { %1646 = vmatpush1.bf16.msra.mxu0 %v3976_v10  ;;  %1935 = vmatpush1.bf16.msra.mxu1 %v3977_v11  ;;  %v4034_v56 = vld [vmem:[%s4550_s11 + $0xa0] ss:$16 sps:$4 sm:$0xff]   ;;  %v4035_v57 = vld [vmem:[%s4550_s11 + $0xa8] ss:$16 sps:$4 sm:$0xff]   ;;  %v4036_v58 = vld [vmem:[%s4550_s11 + $0xc4] ss:$16 sps:$4 sm:$0xff]  }
  0x92   : > { %1647 = vmatprep.subr.bf16.mxu0 %v4219_v2  ;;  %1936 = vmatprep.subr.bf16.mxu1 %v4219_v2  ;;  %v4038_v59 = vld [vmem:[%s4550_s11 + $0xcc] ss:$16 sps:$4 sm:$0xff]   ;;  %v4040_v60 = vld [vmem:[%s4550_s11 + $0xc0] ss:$16 sps:$4 sm:$0xff]   ;;  %v4041_v61 = vld [vmem:[%s4550_s11 + $0xc8] ss:$16 sps:$4 sm:$0xff]  }
  0x93   : > { %v4042_v62 = vld [vmem:[%s4550_s11 + $0xe4] ss:$16 sps:$4 sm:$0xff]   ;;  %v4044_v63 = vld [vmem:[%s4550_s11 + $0xec] ss:$16 sps:$4 sm:$0xff]   ;;  %v4046_v0 = vld [vmem:[%s4550_s11 + $0xe0] ss:$16 sps:$4 sm:$0xff]  }
  0x94   : > { %v4047_v1 = vld [vmem:[%s4550_s11 + $0xe8] ss:$16 sps:$4 sm:$0xff]   ;;  %v4050_v3 = vld [vmem:[%s4550_s11 + $0x10c] ss:$16 sps:$4 sm:$0xff]   ;;  %v4052_v4 = vld [vmem:[%s4550_s11 + $0x100] ss:$16 sps:$4 sm:$0xff]  }
  0x95   : > { %1648 = vmatpush1.bf16.msra.mxu0 %v3978_v12  ;;  %1937 = vmatpush1.bf16.msra.mxu1 %v3979_v13  ;;  %v4053_v5 = vld [vmem:[%s4550_s11 + $0x108] ss:$16 sps:$4 sm:$0xff]   ;;  %v4054_v6 = vld [vmem:[%s4550_s11 + $0x124] ss:$16 sps:$4 sm:$0xff]   ;;  %v4056_v7 = vld [vmem:[%s4550_s11 + $0x12c] ss:$16 sps:$4 sm:$0xff]  }
  0x96   : > { %1649 = vmatprep.subr.bf16.mxu0 %v4219_v2  ;;  %1938 = vmatprep.subr.bf16.mxu1 %v4219_v2  ;;  %v4058_v8 = vld [vmem:[%s4550_s11 + $0x120] ss:$16 sps:$4 sm:$0xff]   ;;  %v4059_v9 = vld [vmem:[%s4550_s11 + $0x128] ss:$16 sps:$4 sm:$0xff]   ;;  %v4060_v10 = vld [vmem:[%s4550_s11 + $0x144] ss:$16 sps:$4 sm:$0xff]  }
  0x97   : > { %v4062_v11 = vld [vmem:[%s4550_s11 + $0x14c] ss:$16 sps:$4 sm:$0xff]   ;;  %v4064_v12 = vld [vmem:[%s4550_s11 + $0x140] ss:$16 sps:$4 sm:$0xff]   ;;  %v4065_v13 = vld [vmem:[%s4550_s11 + $0x148] ss:$16 sps:$4 sm:$0xff]  }
  0x98   : > { %v4076_v20 = vld [vmem:[%s4550_s11 + $0x180] ss:$16 sps:$4 sm:$0xff]   ;;  %v4078_v22 = vld [vmem:[%s4550_s11 + $0x1a4] ss:$16 sps:$4 sm:$0xff]  }
  0x99   : > { %1650 = vmatpush1.bf16.msra.mxu0 %v3980_v14  ;;  %1939 = vmatpush1.bf16.msra.mxu1 %v3981_v15  ;;  %v4066_v14 = vld [vmem:[%s4550_s11 + $0x164] ss:$16 sps:$4 sm:$0xff]   ;;  %v4068_v15 = vld [vmem:[%s4550_s11 + $0x16c] ss:$16 sps:$4 sm:$0xff]  }
  0x9a   : > { %1651 = vmatprep.subr.bf16.mxu0 %v4219_v2  ;;  %1940 = vmatprep.subr.bf16.mxu1 %v4219_v2 }
  0x9d   : > { %1652 = vmatpush1.bf16.msra.mxu0 %v3982_v16  ;;  %1941 = vmatpush1.bf16.msra.mxu1 %v3983_v17  ;;  %v4070_v16 = vld [vmem:[%s4550_s11 + $0x160] ss:$16 sps:$4 sm:$0xff]   ;;  %v4071_v17 = vld [vmem:[%s4550_s11 + $0x168] ss:$16 sps:$4 sm:$0xff]  }
  0x9e   : > { %1653 = vmatprep.subr.bf16.mxu0 %v4219_v2  ;;  %1942 = vmatprep.subr.bf16.mxu1 %v4219_v2 }
  0xa1   : > { %1654 = vmatpush1.bf16.msra.mxu0 %v3984_v18  ;;  %1943 = vmatpush1.bf16.msra.mxu1 %v3985_v19  ;;  %v4072_v18 = vld [vmem:[%s4550_s11 + $0x184] ss:$16 sps:$4 sm:$0xff]   ;;  %v4074_v19 = vld [vmem:[%s4550_s11 + $0x18c] ss:$16 sps:$4 sm:$0xff]  }
  0xa2   : > { %1655 = vmatprep.subr.bf16.mxu0 %v4219_v2  ;;  %1944 = vmatprep.subr.bf16.mxu1 %v4219_v2 }
  0xa5   : > { %1656 = vmatpush1.bf16.msra.mxu0 %v3986_v21  ;;  %1945 = vmatpush1.bf16.msra.mxu1 %v3987_v23  ;;  %v4077_v21 = vld [vmem:[%s4550_s11 + $0x188] ss:$16 sps:$4 sm:$0xff]   ;;  %v4080_v23 = vld [vmem:[%s4550_s11 + $0x1ac] ss:$16 sps:$4 sm:$0xff]  }
  0xa6   : > { %1657 = vmatprep.subr.bf16.mxu0 %v4219_v2  ;;  %1946 = vmatprep.subr.bf16.mxu1 %v4219_v2 }
  0xa9   : > { %1658 = vmatpush1.bf16.msra.mxu0 %v3988_v24  ;;  %1947 = vmatpush1.bf16.msra.mxu1 %v3989_v25  ;;  %v4082_v24 = vld [vmem:[%s4550_s11 + $0x1a0] ss:$16 sps:$4 sm:$0xff]   ;;  %v4083_v25 = vld [vmem:[%s4550_s11 + $0x1a8] ss:$16 sps:$4 sm:$0xff]  }
  0xaa   : > { %1659 = vmatprep.subr.bf16.mxu0 %v4219_v2  ;;  %1948 = vmatprep.subr.bf16.mxu1 %v4219_v2 }
  0xad   : > { %1660 = vmatpush1.bf16.msra.mxu0 %v3990_v26  ;;  %1949 = vmatpush1.bf16.msra.mxu1 %v3991_v27  ;;  %v4084_v26 = vld [vmem:[%s4550_s11 + $0x1c4] ss:$16 sps:$4 sm:$0xff]   ;;  %v4086_v27 = vld [vmem:[%s4550_s11 + $0x1cc] ss:$16 sps:$4 sm:$0xff]  }
  0xae   : > { %1661 = vmatprep.subr.bf16.mxu0 %v4219_v2  ;;  %1950 = vmatprep.subr.bf16.mxu1 %v4219_v2 }
  0xb1   : > { %1662 = vmatpush1.bf16.msra.mxu0 %v3992_v28  ;;  %1951 = vmatpush1.bf16.msra.mxu1 %v3993_v29  ;;  %v4088_v28 = vld [vmem:[%s4550_s11 + $0x1c0] ss:$16 sps:$4 sm:$0xff]   ;;  %v4089_v29 = vld [vmem:[%s4550_s11 + $0x1c8] ss:$16 sps:$4 sm:$0xff]  }
  0xb2   : > { %1663 = vmatprep.subr.bf16.mxu0 %v4219_v2  ;;  %1952 = vmatprep.subr.bf16.mxu1 %v4219_v2 }
  0xb5   : > { %1664 = vmatpush1.bf16.msra.mxu0 %v3994_v30  ;;  %1953 = vmatpush1.bf16.msra.mxu1 %v3995_v31  ;;  %v4090_v30 = vld [vmem:[%s4550_s11 + $0x1e4] ss:$16 sps:$4 sm:$0xff]   ;;  %v4092_v31 = vld [vmem:[%s4550_s11 + $0x1ec] ss:$16 sps:$4 sm:$0xff]  }
  0xb6   : > { %1665 = vmatprep.subr.bf16.mxu0 %v4219_v2  ;;  %1954 = vmatprep.subr.bf16.mxu1 %v4219_v2 }
  0xb9   : > { %1666 = vmatpush1.bf16.msra.mxu0 %v3996_v32  ;;  %1955 = vmatpush1.bf16.msra.mxu1 %v3997_v33  ;;  %v4094_v32 = vld [vmem:[%s4550_s11 + $0x1e0] ss:$16 sps:$4 sm:$0xff]   ;;  %v4095_v33 = vld [vmem:[%s4550_s11 + $0x1e8] ss:$16 sps:$4 sm:$0xff]  }
  0xba   : > { %1667 = vmatprep.subr.bf16.mxu0 %v4219_v2  ;;  %1956 = vmatprep.subr.bf16.mxu1 %v4219_v2  ;;  %v4048_v2 = vld [vmem:[%s4550_s11 + $0x104] ss:$16 sps:$4 sm:$0xff]  }
  0xbd   : > { %1668 = vmatpush1.bf16.msra.mxu0 %v3998_v34  ;;  %1957 = vmatpush1.bf16.msra.mxu1 %v3999_v35  ;;  %v4096_v34 = vld [vmem:[%s4550_s11 + $0x204] ss:$16 sps:$4 sm:$0xff]   ;;  %v4098_v35 = vld [vmem:[%s4550_s11 + $0x20c] ss:$16 sps:$4 sm:$0xff]  }
  0xc0   : > { %1670 = vmatmul.mubr.bf16.vlgmr.msra.gmra.mrb[0].mxu0 %v4000_v36  ;;  %1959 = vmatmul.mubr.bf16.vlgmr.msra.gmra.mrb[0].mxu1 %v4003_v37  ;;  %v4100_v36 = vld [vmem:[%s4550_s11 + $0x200] ss:$16 sps:$4 sm:$0xff]   ;;  %v4101_v37 = vld [vmem:[%s4550_s11 + $0x208] ss:$16 sps:$4 sm:$0xff]  }
  0xc1   : > { %1677 = vmatprep.mubr.bf16.mxu0 %v4006_v38  ;;  %1966 = vmatprep.mubr.bf16.mxu1 %v4008_v39  ;;  %v4102_v38 = vld [vmem:[%s4550_s11 + $0x224] ss:$16 sps:$4 sm:$0xff]   ;;  %v4104_v39 = vld [vmem:[%s4550_s11 + $0x22c] ss:$16 sps:$4 sm:$0xff]  }
  0xc8   : > { %1678 = vmatmul.mubr.bf16.gmra.mrb[4].mxu0 %v4010_v40  ;;  %1967 = vmatmul.mubr.bf16.gmra.mrb[4].mxu1 %v4011_v41  ;;  %v4106_v40 = vld [vmem:[%s4550_s11 + $0x220] ss:$16 sps:$4 sm:$0xff]   ;;  %v4107_v41 = vld [vmem:[%s4550_s11 + $0x228] ss:$16 sps:$4 sm:$0xff]  }
  0xc9   : > { %1685 = vmatprep.mubr.bf16.mxu0 %v4012_v42  ;;  %1974 = vmatprep.mubr.bf16.mxu1 %v4014_v43  ;;  %v4108_v42 = vld [vmem:[%s4550_s11 + $0x244] ss:$16 sps:$4 sm:$0xff]   ;;  %v4110_v43 = vld [vmem:[%s4550_s11 + $0x24c] ss:$16 sps:$4 sm:$0xff]  }
  0xd0   : > { %1686 = vmatmul.mubr.bf16.gmra.mrb[8].mxu0 %v4016_v44  ;;  %1975 = vmatmul.mubr.bf16.gmra.mrb[8].mxu1 %v4017_v45  ;;  %v4112_v44 = vld [vmem:[%s4550_s11 + $0x240] ss:$16 sps:$4 sm:$0xff]   ;;  %v4113_v45 = vld [vmem:[%s4550_s11 + $0x248] ss:$16 sps:$4 sm:$0xff]  }
  0xd1   : > { %1693 = vmatprep.mubr.bf16.mxu0 %v4018_v46  ;;  %1982 = vmatprep.mubr.bf16.mxu1 %v4020_v47  ;;  %v4114_v46 = vld [vmem:[%s4550_s11 + $0x264] ss:$16 sps:$4 sm:$0xff]   ;;  %v4116_v47 = vld [vmem:[%s4550_s11 + $0x26c] ss:$16 sps:$4 sm:$0xff]  }
  0xd8   : > { %1694 = vmatmul.mubr.bf16.gmra.mrb[12].mxu0 %v4022_v48  ;;  %1983 = vmatmul.mubr.bf16.gmra.mrb[12].mxu1 %v4023_v49  ;;  %v4118_v48 = vld [vmem:[%s4550_s11 + $0x260] ss:$16 sps:$4 sm:$0xff]   ;;  %v4119_v49 = vld [vmem:[%s4550_s11 + $0x268] ss:$16 sps:$4 sm:$0xff]  }
  0xd9   : > { %1701 = vmatprep.mubr.bf16.mxu0 %v4024_v50  ;;  %1990 = vmatprep.mubr.bf16.mxu1 %v4026_v51  ;;  %v4120_v50 = vld [vmem:[%s4550_s11 + $0x284] ss:$16 sps:$4 sm:$0xff]   ;;  %v4122_v51 = vld [vmem:[%s4550_s11 + $0x28c] ss:$16 sps:$4 sm:$0xff]  }
  0xe0   : > { %1702 = vmatmul.mubr.bf16.gmra.mrb[16].mxu0 %v4028_v52  ;;  %1991 = vmatmul.mubr.bf16.gmra.mrb[16].mxu1 %v4029_v53  ;;  %v4124_v52 = vld [vmem:[%s4550_s11 + $0x280] ss:$16 sps:$4 sm:$0xff]   ;;  %v4125_v53 = vld [vmem:[%s4550_s11 + $0x288] ss:$16 sps:$4 sm:$0xff]  }
  0xe1   : > { %1709 = vmatprep.mubr.bf16.mxu0 %v4030_v54  ;;  %1998 = vmatprep.mubr.bf16.mxu1 %v4032_v55  ;;  %v4126_v54 = vld [vmem:[%s4550_s11 + $0x2a4] ss:$16 sps:$4 sm:$0xff]   ;;  %v4128_v55 = vld [vmem:[%s4550_s11 + $0x2ac] ss:$16 sps:$4 sm:$0xff]  }
  0xe8   : > { %1710 = vmatmul.mubr.bf16.gmra.mrb[20].mxu0 %v4034_v56  ;;  %1999 = vmatmul.mubr.bf16.gmra.mrb[20].mxu1 %v4035_v57  ;;  %v4130_v56 = vld [vmem:[%s4550_s11 + $0x2a0] ss:$16 sps:$4 sm:$0xff]   ;;  %v4131_v57 = vld [vmem:[%s4550_s11 + $0x2a8] ss:$16 sps:$4 sm:$0xff]  }
  0xe9   : > { %1717 = vmatprep.mubr.bf16.mxu0 %v4036_v58  ;;  %2006 = vmatprep.mubr.bf16.mxu1 %v4038_v59  ;;  %v4132_v58 = vld [vmem:[%s4550_s11 + $0x2c4] ss:$16 sps:$4 sm:$0xff]   ;;  %v4134_v59 = vld [vmem:[%s4550_s11 + $0x2cc] ss:$16 sps:$4 sm:$0xff]  }
  0xf0   : > { %1718 = vmatmul.mubr.bf16.gmra.mrb[24].mxu0 %v4040_v60  ;;  %2007 = vmatmul.mubr.bf16.gmra.mrb[24].mxu1 %v4041_v61  ;;  %v4136_v60 = vld [vmem:[%s4550_s11 + $0x2c0] ss:$16 sps:$4 sm:$0xff]   ;;  %v4137_v61 = vld [vmem:[%s4550_s11 + $0x2c8] ss:$16 sps:$4 sm:$0xff]  }
  0xf1   : > { %1725 = vmatprep.mubr.bf16.mxu0 %v4042_v62  ;;  %2014 = vmatprep.mubr.bf16.mxu1 %v4044_v63  ;;  %v4138_v62 = vld [vmem:[%s4550_s11 + $0x2e4] ss:$16 sps:$4 sm:$0xff]   ;;  %v4140_v63 = vld [vmem:[%s4550_s11 + $0x2ec] ss:$16 sps:$4 sm:$0xff]  }
  0xf8   : > { %1726 = vmatmul.mubr.bf16.gmra.mrb[28].mxu0 %v4046_v0  ;;  %2015 = vmatmul.mubr.bf16.gmra.mrb[28].mxu1 %v4047_v1  ;;  %v4142_v0 = vld [vmem:[%s4550_s11 + $0x2e0] ss:$16 sps:$4 sm:$0xff]   ;;  %v4143_v1 = vld [vmem:[%s4550_s11 + $0x2e8] ss:$16 sps:$4 sm:$0xff]  }
  0xf9   : > { %1733 = vmatprep.mubr.bf16.mxu0 %v4048_v2  ;;  %2022 = vmatprep.mubr.bf16.mxu1 %v4050_v3  ;;  %v4144_v2 = vld [vmem:[%s4550_s11 + $0x304] ss:$16 sps:$4 sm:$0xff]   ;;  %v4146_v3 = vld [vmem:[%s4550_s11 + $0x30c] ss:$16 sps:$4 sm:$0xff]  }
 0x100   : > { %1734 = vmatmul.mubr.bf16.gmra.mrb[32].mxu0 %v4052_v4  ;;  %2023 = vmatmul.mubr.bf16.gmra.mrb[32].mxu1 %v4053_v5  ;;  %v4148_v4 = vld [vmem:[%s4550_s11 + $0x300] ss:$16 sps:$4 sm:$0xff]   ;;  %v4149_v5 = vld [vmem:[%s4550_s11 + $0x308] ss:$16 sps:$4 sm:$0xff]  }
 0x101   : > { %1741 = vmatprep.mubr.bf16.mxu0 %v4054_v6  ;;  %2030 = vmatprep.mubr.bf16.mxu1 %v4056_v7  ;;  %v4150_v6 = vld [vmem:[%s4550_s11 + $0x324] ss:$16 sps:$4 sm:$0xff]   ;;  %v4152_v7 = vld [vmem:[%s4550_s11 + $0x32c] ss:$16 sps:$4 sm:$0xff]  }
 0x108   : > { %1742 = vmatmul.mubr.bf16.gmra.mrb[36].mxu0 %v4058_v8  ;;  %2031 = vmatmul.mubr.bf16.gmra.mrb[36].mxu1 %v4059_v9  ;;  %v4154_v8 = vld [vmem:[%s4550_s11 + $0x320] ss:$16 sps:$4 sm:$0xff]   ;;  %v4155_v9 = vld [vmem:[%s4550_s11 + $0x328] ss:$16 sps:$4 sm:$0xff]  }
 0x109   : > { %1749 = vmatprep.mubr.bf16.mxu0 %v4060_v10  ;;  %2038 = vmatprep.mubr.bf16.mxu1 %v4062_v11  ;;  %v4156_v10 = vld [vmem:[%s4550_s11 + $0x344] ss:$16 sps:$4 sm:$0xff]   ;;  %v4158_v11 = vld [vmem:[%s4550_s11 + $0x34c] ss:$16 sps:$4 sm:$0xff]  }
 0x110   : > { %1750 = vmatmul.mubr.bf16.gmra.mrb[40].mxu0 %v4064_v12  ;;  %2039 = vmatmul.mubr.bf16.gmra.mrb[40].mxu1 %v4065_v13  ;;  %v4160_v12 = vld [vmem:[%s4550_s11 + $0x340] ss:$16 sps:$4 sm:$0xff]   ;;  %v4161_v13 = vld [vmem:[%s4550_s11 + $0x348] ss:$16 sps:$4 sm:$0xff]  }
 0x111   : > { %1757 = vmatprep.mubr.bf16.mxu0 %v4066_v14  ;;  %2046 = vmatprep.mubr.bf16.mxu1 %v4068_v15  ;;  %v4162_v14 = vld [vmem:[%s4550_s11 + $0x364] ss:$16 sps:$4 sm:$0xff]   ;;  %v4164_v15 = vld [vmem:[%s4550_s11 + $0x36c] ss:$16 sps:$4 sm:$0xff]  }
 0x118   : > { %1758 = vmatmul.mubr.bf16.gmra.mrb[44].mxu0 %v4070_v16  ;;  %2047 = vmatmul.mubr.bf16.gmra.mrb[44].mxu1 %v4071_v17  ;;  %v549_v17 = vld [vmem:[#allocation2] sm:$0xff] }
 0x119   : > { %1765 = vmatprep.mubr.bf16.mxu0 %v4072_v18  ;;  %2054 = vmatprep.mubr.bf16.mxu1 %v4074_v19 }
 0x120   : > { %1766 = vmatmul.mubr.bf16.gmra.mrb[48].mxu0 %v4076_v20  ;;  %2055 = vmatmul.mubr.bf16.gmra.mrb[48].mxu1 %v4077_v21  ;;  %v4166_v20 = vld [vmem:[%s4550_s11 + $0x360] ss:$16 sps:$4 sm:$0xff]  }
 0x121   : > { %1773 = vmatprep.mubr.bf16.mxu0 %v4078_v22  ;;  %2062 = vmatprep.mubr.bf16.mxu1 %v4080_v23 }
 0x128   : > { %1774 = vmatmul.mubr.bf16.gmra.mrb[52].mxu0 %v4082_v24  ;;  %2063 = vmatmul.mubr.bf16.gmra.mrb[52].mxu1 %v4083_v25  ;;  %v4167_v24 = vld [vmem:[%s4550_s11 + $0x368] ss:$16 sps:$4 sm:$0xff]   ;;  %v4168_v25 = vld [vmem:[%s4550_s11 + $0x384] ss:$16 sps:$4 sm:$0xff]  }
 0x129   : > { %1781 = vmatprep.mubr.bf16.mxu0 %v4084_v26  ;;  %2070 = vmatprep.mubr.bf16.mxu1 %v4086_v27  ;;  %v550_v26 = vld [vmem:[#allocation2 + $0x8] sm:$0xff] }
 0x130   : > { %1782 = vmatmul.mubr.bf16.gmra.mrb[56].mxu0 %v4088_v28  ;;  %2071 = vmatmul.mubr.bf16.gmra.mrb[56].mxu1 %v4089_v29  ;;  %v4170_v29 = vld [vmem:[%s4550_s11 + $0x38c] ss:$16 sps:$4 sm:$0xff]  }
 0x131   : > { %1789 = vmatprep.mubr.bf16.mxu0 %v4090_v30  ;;  %2078 = vmatprep.mubr.bf16.mxu1 %v4092_v31 }
 0x138   : > { %1790 = vmatmul.mubr.bf16.gmra.mrb[60].mxu0 %v4094_v32  ;;  %2079 = vmatmul.mubr.bf16.gmra.mrb[60].mxu1 %v4095_v33 }
 0x139   : > { %1797 = vmatprep.mubr.bf16.mxu0 %v4096_v34  ;;  %2086 = vmatprep.mubr.bf16.mxu1 %v4098_v35  ;;  %v551_v35 = vld [vmem:[#allocation2 + $0x10] sm:$0xff] }
 0x140   : > { %1798 = vmatmul.mubr.bf16.gmra.mrb[64].mxu0 %v4100_v36  ;;  %2087 = vmatmul.mubr.bf16.gmra.mrb[64].mxu1 %v4101_v37 }
 0x141   : > { %1805 = vmatprep.mubr.bf16.mxu0 %v4102_v38  ;;  %2094 = vmatprep.mubr.bf16.mxu1 %v4104_v39  ;;  %v4172_v38 = vld [vmem:[%s4550_s11 + $0x380] ss:$16 sps:$4 sm:$0xff]  }
 0x148   : > { %1806 = vmatmul.mubr.bf16.gmra.mrb[68].mxu0 %v4106_v40  ;;  %2095 = vmatmul.mubr.bf16.gmra.mrb[68].mxu1 %v4107_v41 }
 0x149   : > { %1813 = vmatprep.mubr.bf16.mxu0 %v4108_v42  ;;  %2102 = vmatprep.mubr.bf16.mxu1 %v4110_v43  ;;  %v4173_v42 = vld [vmem:[%s4550_s11 + $0x388] ss:$16 sps:$4 sm:$0xff]   ;;  %v4174_v43 = vld [vmem:[%s4550_s11 + $0x3a4] ss:$16 sps:$4 sm:$0xff]  }
 0x150   : > { %1814 = vmatmul.mubr.bf16.gmra.mrb[72].mxu0 %v4112_v44  ;;  %2103 = vmatmul.mubr.bf16.gmra.mrb[72].mxu1 %v4113_v45  ;;  %v552_v44 = vld [vmem:[#allocation2 + $0x18] sm:$0xff] }
 0x151   : > { %1821 = vmatprep.mubr.bf16.mxu0 %v4114_v46  ;;  %2110 = vmatprep.mubr.bf16.mxu1 %v4116_v47  ;;  %v4176_v47 = vld [vmem:[%s4550_s11 + $0x3ac] ss:$16 sps:$4 sm:$0xff]  }
 0x158   : > { %1822 = vmatmul.mubr.bf16.gmra.mrb[76].mxu0 %v4118_v48  ;;  %2111 = vmatmul.mubr.bf16.gmra.mrb[76].mxu1 %v4119_v49 }
 0x159   : > { %1829 = vmatprep.mubr.bf16.mxu0 %v4120_v50  ;;  %2118 = vmatprep.mubr.bf16.mxu1 %v4122_v51 }
 0x160   : > { %1830 = vmatmul.mubr.bf16.gmra.mrb[80].mxu0 %v4124_v52  ;;  %2119 = vmatmul.mubr.bf16.gmra.mrb[80].mxu1 %v4125_v53  ;;  %v553_v53 = vld [vmem:[#allocation2 + $0x20] sm:$0xff] }
 0x161   : > { %1837 = vmatprep.mubr.bf16.mxu0 %v4126_v54  ;;  %2126 = vmatprep.mubr.bf16.mxu1 %v4128_v55 }
 0x168   : > { %1838 = vmatmul.mubr.bf16.gmra.mrb[84].mxu0 %v4130_v56  ;;  %2127 = vmatmul.mubr.bf16.gmra.mrb[84].mxu1 %v4131_v57  ;;  %v4178_v56 = vld [vmem:[%s4550_s11 + $0x3a0] ss:$16 sps:$4 sm:$0xff]  }
 0x169   : > { %1845 = vmatprep.mubr.bf16.mxu0 %v4132_v58  ;;  %2134 = vmatprep.mubr.bf16.mxu1 %v4134_v59 }
 0x170   : > { %1846 = vmatmul.mubr.bf16.gmra.mrb[88].mxu0 %v4136_v60  ;;  %2135 = vmatmul.mubr.bf16.gmra.mrb[88].mxu1 %v4137_v61  ;;  %v4179_v60 = vld [vmem:[%s4550_s11 + $0x3a8] ss:$16 sps:$4 sm:$0xff]   ;;  %v4180_v61 = vld [vmem:[%s4550_s11 + $0x3c4] ss:$16 sps:$4 sm:$0xff]  }
 0x171   : > { %1853 = vmatprep.mubr.bf16.mxu0 %v4138_v62  ;;  %2142 = vmatprep.mubr.bf16.mxu1 %v4140_v63  ;;  %v554_v62 = vld [vmem:[#allocation2 + $0x28] sm:$0xff] }
 0x178   : > { %1854 = vmatmul.mubr.bf16.gmra.mrb[92].mxu0 %v4142_v0  ;;  %2143 = vmatmul.mubr.bf16.gmra.mrb[92].mxu1 %v4143_v1  ;;  %v4182_v1 = vld [vmem:[%s4550_s11 + $0x3cc] ss:$16 sps:$4 sm:$0xff]  }
 0x179   : > { %1861 = vmatprep.mubr.bf16.mxu0 %v4144_v2  ;;  %2150 = vmatprep.mubr.bf16.mxu1 %v4146_v3 }
 0x180   : > { %1862 = vmatmul.mubr.bf16.gmra.mrb[96].mxu0 %v4148_v4  ;;  %2151 = vmatmul.mubr.bf16.gmra.mrb[96].mxu1 %v4149_v5 }
 0x181   : > { %1869 = vmatprep.mubr.bf16.mxu0 %v4150_v6  ;;  %2158 = vmatprep.mubr.bf16.mxu1 %v4152_v7  ;;  %v555_v7 = vld [vmem:[#allocation2 + $0x30] sm:$0xff] }
 0x188   : > { %1870 = vmatmul.mubr.bf16.gmra.mrb[100].mxu0 %v4154_v8  ;;  %2159 = vmatmul.mubr.bf16.gmra.mrb[100].mxu1 %v4155_v9 }
 0x189   : > { %1877 = vmatprep.mubr.bf16.mxu0 %v4156_v10  ;;  %2166 = vmatprep.mubr.bf16.mxu1 %v4158_v11  ;;  %v4184_v10 = vld [vmem:[%s4550_s11 + $0x3c0] ss:$16 sps:$4 sm:$0xff]  }
 0x190   : > { %1878 = vmatmul.mubr.bf16.gmra.mrb[104].mxu0 %v4160_v12  ;;  %2167 = vmatmul.mubr.bf16.gmra.mrb[104].mxu1 %v4161_v13 }
 0x191   : > { %1885 = vmatprep.mubr.bf16.mxu0 %v4162_v14  ;;  %2174 = vmatprep.mubr.bf16.mxu1 %v4164_v15  ;;  %v4185_v14 = vld [vmem:[%s4550_s11 + $0x3c8] ss:$16 sps:$4 sm:$0xff]   ;;  %v4186_v15 = vld [vmem:[%s4550_s11 + $0x3e4] ss:$16 sps:$4 sm:$0xff]  }
 0x193   : > { %v1671_v16 = vpop.f32.mrb[0].mxu0  ;;  %v1960_v18 = vpop.f32.mrb[0].mxu1 }
 0x194   : > { %v1673_v19 = vpop.f32.mrb[1].mxu0  ;;  %v1961_v21 = vadd.f32 %v1960_v18, %v1671_v16  ;;  %v1962_v22 = vpop.f32.mrb[1].mxu1  ;;  %v556_v16 = vld [vmem:[#allocation2 + $0x38] sm:$0xff] }
 0x195   : > { %v1674_v23 = vpop.f32.mrb[2].mxu0  ;;  %v1963_v27 = vpop.f32.mrb[2].mxu1  ;;  %v4188_v19 = vld [vmem:[%s4550_s11 + $0x3ec] ss:$16 sps:$4 sm:$0xff]  }
 0x196   : > { %v1676_v28 = vpop.f32.mrb[3].mxu0  ;;  %v2215_v30 = vadd.f32 %v1961_v21, %v549_v17  ;;  %v1964_v31 = vadd.f32 %v1963_v27, %v1674_v23  ;;  %v1965_v32 = vpop.f32.mrb[3].mxu1 }
 0x197   : > { %v4190_v28 = vld [vmem:[%s4550_s11 + $0x3e0] ss:$16 sps:$4 sm:$0xff]   ;;  %v4191_v32 = vld [vmem:[%s4550_s11 + $0x3e8] ss:$16 sps:$4 sm:$0xff]  }
 0x198   : > { %1886 = vmatmul.mubr.bf16.gmra.mrb[108].mxu0 %v4166_v20  ;;  %2279 = vst [vmem:[#allocation2] sm:$0xff] %v2215_v30  ;;  %v2216_v33 = vadd.f32 %v1964_v31, %v550_v26  ;;  %2175 = vmatmul.mubr.bf16.gmra.mrb[108].mxu1 %v4167_v24 }
 0x199   : > { %1893 = vmatprep.mubr.bf16.mxu0 %v4168_v25  ;;  %2182 = vmatprep.mubr.bf16.mxu1 %v4170_v29  ;;  %v557_v25 = vld [vmem:[#allocation2 + $0x40] sm:$0xff] }
 0x19a   : > { %2280 = vst [vmem:[#allocation2 + $0x8] sm:$0xff] %v2216_v33  ;;  %v558_v33 = vld [vmem:[#allocation2 + $0x48] sm:$0xff] }
 0x19b   : > { %v1679_v34 = vpop.f32.mrb[4].mxu0  ;;  %v1968_v36 = vpop.f32.mrb[4].mxu1 }
 0x19c   : > { %v1681_v37 = vpop.f32.mrb[5].mxu0  ;;  %v1969_v39 = vadd.f32 %v1968_v36, %v1679_v34  ;;  %v1970_v40 = vpop.f32.mrb[5].mxu1 }
 0x19d   : > { %v1682_v41 = vpop.f32.mrb[6].mxu0  ;;  %v1971_v45 = vpop.f32.mrb[6].mxu1 }
 0x19e   : > { %v1684_v46 = vpop.f32.mrb[7].mxu0  ;;  %v2217_v48 = vadd.f32 %v1969_v39, %v551_v35  ;;  %v1972_v49 = vadd.f32 %v1971_v45, %v1682_v41  ;;  %v1973_v50 = vpop.f32.mrb[7].mxu1  ;;  %v559_v41 = vld [vmem:[#allocation2 + $0x50] sm:$0xff] }
 0x1a0   : > { %1894 = vmatmul.mubr.bf16.gmra.mrb[112].mxu0 %v4172_v38  ;;  %2281 = vst [vmem:[#allocation2 + $0x10] sm:$0xff] %v2217_v48  ;;  %v2218_v51 = vadd.f32 %v1972_v49, %v552_v44  ;;  %2183 = vmatmul.mubr.bf16.gmra.mrb[112].mxu1 %v4173_v42 }
 0x1a1   : > { %1901 = vmatprep.mubr.bf16.mxu0 %v4174_v43  ;;  %2190 = vmatprep.mubr.bf16.mxu1 %v4176_v47  ;;  %v560_v47 = vld [vmem:[#allocation2 + $0x58] sm:$0xff] }
 0x1a2   : > { %2282 = vst [vmem:[#allocation2 + $0x18] sm:$0xff] %v2218_v51 }
 0x1a3   : > { %v1687_v52 = vpop.f32.mrb[8].mxu0  ;;  %v1976_v54 = vpop.f32.mrb[8].mxu1 }
 0x1a4   : > { %v1689_v55 = vpop.f32.mrb[9].mxu0  ;;  %v1977_v57 = vadd.f32 %v1976_v54, %v1687_v52  ;;  %v1978_v58 = vpop.f32.mrb[9].mxu1 }
 0x1a5   : > { %v1690_v59 = vpop.f32.mrb[10].mxu0  ;;  %v1979_v63 = vpop.f32.mrb[10].mxu1  ;;  %v561_v55 = vld [vmem:[#allocation2 + $0x60] sm:$0xff] }
 0x1a6   : > { %v1692_v0 = vpop.f32.mrb[11].mxu0  ;;  %v2219_v2 = vadd.f32 %v1977_v57, %v553_v53  ;;  %v1980_v3 = vadd.f32 %v1979_v63, %v1690_v59  ;;  %v1981_v4 = vpop.f32.mrb[11].mxu1 }
 0x1a8   : > { %1902 = vmatmul.mubr.bf16.gmra.mrb[116].mxu0 %v4178_v56  ;;  %2283 = vst [vmem:[#allocation2 + $0x20] sm:$0xff] %v2219_v2  ;;  %v2220_v5 = vadd.f32 %v1980_v3, %v554_v62  ;;  %2191 = vmatmul.mubr.bf16.gmra.mrb[116].mxu1 %v4179_v60 }
 0x1a9   : > { %1909 = vmatprep.mubr.bf16.mxu0 %v4180_v61  ;;  %2198 = vmatprep.mubr.bf16.mxu1 %v4182_v1  ;;  %v562_v61 = vld [vmem:[#allocation2 + $0x68] sm:$0xff] }
 0x1aa   : > { %2284 = vst [vmem:[#allocation2 + $0x28] sm:$0xff] %v2220_v5  ;;  %v563_v5 = vld [vmem:[#allocation2 + $0x70] sm:$0xff] }
 0x1ab   : > { %v1695_v6 = vpop.f32.mrb[12].mxu0  ;;  %v1984_v8 = vpop.f32.mrb[12].mxu1 }
 0x1ac   : > { %v1697_v9 = vpop.f32.mrb[13].mxu0  ;;  %v1985_v11 = vadd.f32 %v1984_v8, %v1695_v6  ;;  %v1986_v12 = vpop.f32.mrb[13].mxu1 }
 0x1ad   : > { %v1698_v13 = vpop.f32.mrb[14].mxu0  ;;  %v1987_v17 = vpop.f32.mrb[14].mxu1 }
 0x1ae   : > { %v1700_v18 = vpop.f32.mrb[15].mxu0  ;;  %v2221_v20 = vadd.f32 %v1985_v11, %v555_v7  ;;  %v1988_v21 = vadd.f32 %v1987_v17, %v1698_v13  ;;  %v1989_v22 = vpop.f32.mrb[15].mxu1  ;;  %v564_v11 = vld [vmem:[#allocation2 + $0x78] sm:$0xff] }
 0x1b0   : > { %1910 = vmatmul.mubr.bf16.gmra.mrb[120].mxu0 %v4184_v10  ;;  %2285 = vst [vmem:[#allocation2 + $0x30] sm:$0xff] %v2221_v20  ;;  %v2222_v23 = vadd.f32 %v1988_v21, %v556_v16  ;;  %2199 = vmatmul.mubr.bf16.gmra.mrb[120].mxu1 %v4185_v14 }
 0x1b1   : > { %1917 = vmatprep.mubr.bf16.mxu0 %v4186_v15  ;;  %2206 = vmatprep.mubr.bf16.mxu1 %v4188_v19  ;;  %v565_v19 = vld [vmem:[#allocation2 + $0x80] sm:$0xff] }
 0x1b2   : > { %2286 = vst [vmem:[#allocation2 + $0x38] sm:$0xff] %v2222_v23 }
 0x1b3   : > { %v1703_v24 = vpop.f32.mrb[16].mxu0  ;;  %v1992_v26 = vpop.f32.mrb[16].mxu1 }
 0x1b4   : > { %v1705_v27 = vpop.f32.mrb[17].mxu0  ;;  %v1993_v29 = vadd.f32 %v1992_v26, %v1703_v24  ;;  %v1994_v30 = vpop.f32.mrb[17].mxu1 }
 0x1b5   : > { %v1706_v31 = vpop.f32.mrb[18].mxu0  ;;  %v1995_v34 = vpop.f32.mrb[18].mxu1 }
 0x1b6   : > { %v1708_v35 = vpop.f32.mrb[19].mxu0  ;;  %v2223_v36 = vadd.f32 %v1993_v29, %v557_v25  ;;  %v1996_v37 = vadd.f32 %v1995_v34, %v1706_v31  ;;  %v1997_v38 = vpop.f32.mrb[19].mxu1  ;;  %v566_v25 = vld [vmem:[#allocation2 + $0x88] sm:$0xff] }
 0x1b8   : > { %1918 = vmatmul.mubr.bf16.gmra.mrb[124].mxu0 %v4190_v28  ;;  %2287 = vst [vmem:[#allocation2 + $0x40] sm:$0xff] %v2223_v36  ;;  %v2224_v39 = vadd.f32 %v1996_v37, %v558_v33  ;;  %2207 = vmatmul.mubr.bf16.gmra.mrb[124].mxu1 %v4191_v32  ;;  %v567_v33 = vld [vmem:[#allocation2 + $0x90] sm:$0xff] }
 0x1ba   : > { %2288 = vst [vmem:[#allocation2 + $0x48] sm:$0xff] %v2224_v39  ;;  %v568_v39 = vld [vmem:[#allocation2 + $0x98] sm:$0xff] }
 0x1bb   : > { %v1711_v40 = vpop.f32.mrb[20].mxu0  ;;  %v2000_v42 = vpop.f32.mrb[20].mxu1 }
 0x1bc   : > { %v1713_v43 = vpop.f32.mrb[21].mxu0  ;;  %v2001_v44 = vadd.f32 %v2000_v42, %v1711_v40  ;;  %v2002_v45 = vpop.f32.mrb[21].mxu1 }
 0x1bd   : > { %v1714_v46 = vpop.f32.mrb[22].mxu0  ;;  %v2003_v48 = vpop.f32.mrb[22].mxu1 }
 0x1be   : > { %v1716_v49 = vpop.f32.mrb[23].mxu0  ;;  %v2225_v50 = vadd.f32 %v2001_v44, %v559_v41  ;;  %v2004_v51 = vadd.f32 %v2003_v48, %v1714_v46  ;;  %v2005_v52 = vpop.f32.mrb[23].mxu1 }
 0x1c0   : > { %2289 = vst [vmem:[#allocation2 + $0x50] sm:$0xff] %v2225_v50  ;;  %v2226_v53 = vadd.f32 %v2004_v51, %v560_v47  ;;  %v569_v47 = vld [vmem:[#allocation2 + $0xa0] sm:$0xff] }
 0x1c2   : > { %2290 = vst [vmem:[#allocation2 + $0x58] sm:$0xff] %v2226_v53  ;;  %v570_v53 = vld [vmem:[#allocation2 + $0xa8] sm:$0xff] }
 0x1c3   : > { %v1719_v54 = vpop.f32.mrb[24].mxu0  ;;  %v2008_v56 = vpop.f32.mrb[24].mxu1 }
 0x1c4   : > { %v1721_v57 = vpop.f32.mrb[25].mxu0  ;;  %v2009_v58 = vadd.f32 %v2008_v56, %v1719_v54  ;;  %v2010_v59 = vpop.f32.mrb[25].mxu1 }
 0x1c5   : > { %v1722_v60 = vpop.f32.mrb[26].mxu0  ;;  %v2011_v62 = vpop.f32.mrb[26].mxu1 }
 0x1c6   : > { %v1724_v63 = vpop.f32.mrb[27].mxu0  ;;  %v2227_v0 = vadd.f32 %v2009_v58, %v561_v55  ;;  %v2012_v1 = vadd.f32 %v2011_v62, %v1722_v60  ;;  %v2013_v2 = vpop.f32.mrb[27].mxu1 }
 0x1c8   : > { %2291 = vst [vmem:[#allocation2 + $0x60] sm:$0xff] %v2227_v0  ;;  %v2228_v3 = vadd.f32 %v2012_v1, %v562_v61  ;;  %v571_v61 = vld [vmem:[#allocation2 + $0xb0] sm:$0xff] }
 0x1ca   : > { %2292 = vst [vmem:[#allocation2 + $0x68] sm:$0xff] %v2228_v3  ;;  %v572_v3 = vld [vmem:[#allocation2 + $0xb8] sm:$0xff] }
 0x1cb   : > { %v1727_v4 = vpop.f32.mrb[28].mxu0  ;;  %v2016_v6 = vpop.f32.mrb[28].mxu1 }
 0x1cc   : > { %v1729_v7 = vpop.f32.mrb[29].mxu0  ;;  %v2017_v8 = vadd.f32 %v2016_v6, %v1727_v4  ;;  %v2018_v9 = vpop.f32.mrb[29].mxu1 }
 0x1cd   : > { %v1730_v10 = vpop.f32.mrb[30].mxu0  ;;  %v2019_v12 = vpop.f32.mrb[30].mxu1 }
 0x1ce   : > { %v1732_v13 = vpop.f32.mrb[31].mxu0  ;;  %v2229_v14 = vadd.f32 %v2017_v8, %v563_v5  ;;  %v2020_v15 = vadd.f32 %v2019_v12, %v1730_v10  ;;  %v2021_v16 = vpop.f32.mrb[31].mxu1 }
 0x1d0   : > { %2293 = vst [vmem:[#allocation2 + $0x70] sm:$0xff] %v2229_v14  ;;  %v2230_v17 = vadd.f32 %v2020_v15, %v564_v11  ;;  %v573_v11 = vld [vmem:[#allocation2 + $0xc0] sm:$0xff] }
 0x1d2   : > { %2294 = vst [vmem:[#allocation2 + $0x78] sm:$0xff] %v2230_v17  ;;  %v574_v17 = vld [vmem:[#allocation2 + $0xc8] sm:$0xff] }
 0x1d3   : > { %v1735_v18 = vpop.f32.mrb[32].mxu0  ;;  %v2024_v20 = vpop.f32.mrb[32].mxu1 }
 0x1d4   : > { %v1737_v21 = vpop.f32.mrb[33].mxu0  ;;  %v2025_v22 = vadd.f32 %v2024_v20, %v1735_v18  ;;  %v2026_v23 = vpop.f32.mrb[33].mxu1 }
 0x1d5   : > { %v1738_v24 = vpop.f32.mrb[34].mxu0  ;;  %v2027_v26 = vpop.f32.mrb[34].mxu1 }
 0x1d6   : > { %v1740_v27 = vpop.f32.mrb[35].mxu0  ;;  %v2231_v28 = vadd.f32 %v2025_v22, %v565_v19  ;;  %v2028_v29 = vadd.f32 %v2027_v26, %v1738_v24  ;;  %v2029_v30 = vpop.f32.mrb[35].mxu1 }
 0x1d8   : > { %2295 = vst [vmem:[#allocation2 + $0x80] sm:$0xff] %v2231_v28  ;;  %v2232_v31 = vadd.f32 %v2028_v29, %v566_v25  ;;  %v575_v25 = vld [vmem:[#allocation2 + $0xd0] sm:$0xff] }
 0x1da   : > { %2296 = vst [vmem:[#allocation2 + $0x88] sm:$0xff] %v2232_v31  ;;  %v576_v31 = vld [vmem:[#allocation2 + $0xd8] sm:$0xff] }
 0x1db   : > { %v1743_v32 = vpop.f32.mrb[36].mxu0  ;;  %v2032_v34 = vpop.f32.mrb[36].mxu1 }
 0x1dc   : > { %v1745_v35 = vpop.f32.mrb[37].mxu0  ;;  %v2033_v36 = vadd.f32 %v2032_v34, %v1743_v32  ;;  %v2034_v37 = vpop.f32.mrb[37].mxu1 }
 0x1dd   : > { %v1746_v38 = vpop.f32.mrb[38].mxu0  ;;  %v2035_v40 = vpop.f32.mrb[38].mxu1 }
 0x1de   : > { %v1748_v41 = vpop.f32.mrb[39].mxu0  ;;  %v2233_v42 = vadd.f32 %v2033_v36, %v567_v33  ;;  %v2036_v43 = vadd.f32 %v2035_v40, %v1746_v38  ;;  %v2037_v44 = vpop.f32.mrb[39].mxu1 }
 0x1e0   : > { %2297 = vst [vmem:[#allocation2 + $0x90] sm:$0xff] %v2233_v42  ;;  %v2234_v45 = vadd.f32 %v2036_v43, %v568_v39  ;;  %v577_v39 = vld [vmem:[#allocation2 + $0xe0] sm:$0xff] }
 0x1e2   : > { %2298 = vst [vmem:[#allocation2 + $0x98] sm:$0xff] %v2234_v45  ;;  %v578_v45 = vld [vmem:[#allocation2 + $0xe8] sm:$0xff] }
 0x1e3   : > { %v1751_v46 = vpop.f32.mrb[40].mxu0  ;;  %v2040_v48 = vpop.f32.mrb[40].mxu1 }
 0x1e4   : > { %v1753_v49 = vpop.f32.mrb[41].mxu0  ;;  %v2041_v50 = vadd.f32 %v2040_v48, %v1751_v46  ;;  %v2042_v51 = vpop.f32.mrb[41].mxu1 }
 0x1e5   : > { %v1754_v52 = vpop.f32.mrb[42].mxu0  ;;  %v2043_v54 = vpop.f32.mrb[42].mxu1 }
 0x1e6   : > { %v1756_v55 = vpop.f32.mrb[43].mxu0  ;;  %v2235_v56 = vadd.f32 %v2041_v50, %v569_v47  ;;  %v2044_v57 = vadd.f32 %v2043_v54, %v1754_v52  ;;  %v2045_v58 = vpop.f32.mrb[43].mxu1 }
 0x1e8   : > { %2299 = vst [vmem:[#allocation2 + $0xa0] sm:$0xff] %v2235_v56  ;;  %v2236_v59 = vadd.f32 %v2044_v57, %v570_v53  ;;  %v579_v53 = vld [vmem:[#allocation2 + $0xf0] sm:$0xff] }
 0x1ea   : > { %2300 = vst [vmem:[#allocation2 + $0xa8] sm:$0xff] %v2236_v59  ;;  %v580_v59 = vld [vmem:[#allocation2 + $0xf8] sm:$0xff] }
 0x1eb   : > { %v1759_v60 = vpop.f32.mrb[44].mxu0  ;;  %v2048_v62 = vpop.f32.mrb[44].mxu1 }
 0x1ec   : > { %v1761_v63 = vpop.f32.mrb[45].mxu0  ;;  %v2049_v0 = vadd.f32 %v2048_v62, %v1759_v60  ;;  %v2050_v1 = vpop.f32.mrb[45].mxu1 }
 0x1ed   : > { %v1762_v2 = vpop.f32.mrb[46].mxu0  ;;  %v2051_v4 = vpop.f32.mrb[46].mxu1 }
 0x1ee   : > { %v1764_v5 = vpop.f32.mrb[47].mxu0  ;;  %v2237_v6 = vadd.f32 %v2049_v0, %v571_v61  ;;  %v2052_v7 = vadd.f32 %v2051_v4, %v1762_v2  ;;  %v2053_v8 = vpop.f32.mrb[47].mxu1 }
 0x1f0   : > { %2301 = vst [vmem:[#allocation2 + $0xb0] sm:$0xff] %v2237_v6  ;;  %v2238_v9 = vadd.f32 %v2052_v7, %v572_v3  ;;  %v581_v3 = vld [vmem:[#allocation2 + $0x100] sm:$0xff] }
 0x1f2   : > { %2302 = vst [vmem:[#allocation2 + $0xb8] sm:$0xff] %v2238_v9  ;;  %v582_v9 = vld [vmem:[#allocation2 + $0x108] sm:$0xff] }
 0x1f3   : > { %v1767_v10 = vpop.f32.mrb[48].mxu0  ;;  %v2056_v12 = vpop.f32.mrb[48].mxu1 }
 0x1f4   : > { %v1769_v13 = vpop.f32.mrb[49].mxu0  ;;  %v2057_v14 = vadd.f32 %v2056_v12, %v1767_v10  ;;  %v2058_v15 = vpop.f32.mrb[49].mxu1 }
 0x1f5   : > { %v1770_v16 = vpop.f32.mrb[50].mxu0  ;;  %v2059_v18 = vpop.f32.mrb[50].mxu1 }
 0x1f6   : > { %v1772_v19 = vpop.f32.mrb[51].mxu0  ;;  %v2239_v20 = vadd.f32 %v2057_v14, %v573_v11  ;;  %v2060_v21 = vadd.f32 %v2059_v18, %v1770_v16  ;;  %v2061_v22 = vpop.f32.mrb[51].mxu1 }
 0x1f8   : > { %2303 = vst [vmem:[#allocation2 + $0xc0] sm:$0xff] %v2239_v20  ;;  %v2240_v23 = vadd.f32 %v2060_v21, %v574_v17  ;;  %v583_v17 = vld [vmem:[#allocation2 + $0x110] sm:$0xff] }
 0x1fa   : > { %2304 = vst [vmem:[#allocation2 + $0xc8] sm:$0xff] %v2240_v23  ;;  %v584_v23 = vld [vmem:[#allocation2 + $0x118] sm:$0xff] }
 0x1fb   : > { %v1775_v24 = vpop.f32.mrb[52].mxu0  ;;  %v2064_v26 = vpop.f32.mrb[52].mxu1 }
 0x1fc   : > { %v1777_v27 = vpop.f32.mrb[53].mxu0  ;;  %v2065_v28 = vadd.f32 %v2064_v26, %v1775_v24  ;;  %v2066_v29 = vpop.f32.mrb[53].mxu1 }
 0x1fd   : > { %v1778_v30 = vpop.f32.mrb[54].mxu0  ;;  %v2067_v32 = vpop.f32.mrb[54].mxu1 }
 0x1fe   : > { %v1780_v33 = vpop.f32.mrb[55].mxu0  ;;  %v2241_v34 = vadd.f32 %v2065_v28, %v575_v25  ;;  %v2068_v35 = vadd.f32 %v2067_v32, %v1778_v30  ;;  %v2069_v36 = vpop.f32.mrb[55].mxu1 }
 0x200   : > { %2305 = vst [vmem:[#allocation2 + $0xd0] sm:$0xff] %v2241_v34  ;;  %v2242_v37 = vadd.f32 %v2068_v35, %v576_v31  ;;  %v585_v31 = vld [vmem:[#allocation2 + $0x120] sm:$0xff] }
 0x202   : > { %2306 = vst [vmem:[#allocation2 + $0xd8] sm:$0xff] %v2242_v37  ;;  %v586_v37 = vld [vmem:[#allocation2 + $0x128] sm:$0xff] }
 0x203   : > { %v1783_v38 = vpop.f32.mrb[56].mxu0  ;;  %v2072_v40 = vpop.f32.mrb[56].mxu1 }
 0x204   : > { %v1785_v41 = vpop.f32.mrb[57].mxu0  ;;  %v2073_v42 = vadd.f32 %v2072_v40, %v1783_v38  ;;  %v2074_v43 = vpop.f32.mrb[57].mxu1 }
 0x205   : > { %v1786_v44 = vpop.f32.mrb[58].mxu0  ;;  %v2075_v46 = vpop.f32.mrb[58].mxu1 }
 0x206   : > { %v1788_v47 = vpop.f32.mrb[59].mxu0  ;;  %v2243_v48 = vadd.f32 %v2073_v42, %v577_v39  ;;  %v2076_v49 = vadd.f32 %v2075_v46, %v1786_v44  ;;  %v2077_v50 = vpop.f32.mrb[59].mxu1 }
 0x208   : > { %2307 = vst [vmem:[#allocation2 + $0xe0] sm:$0xff] %v2243_v48  ;;  %v2244_v51 = vadd.f32 %v2076_v49, %v578_v45  ;;  %v587_v45 = vld [vmem:[#allocation2 + $0x130] sm:$0xff] }
 0x20a   : > { %2308 = vst [vmem:[#allocation2 + $0xe8] sm:$0xff] %v2244_v51  ;;  %v588_v51 = vld [vmem:[#allocation2 + $0x138] sm:$0xff] }
 0x20b   : > { %v1791_v52 = vpop.f32.mrb[60].mxu0  ;;  %v2080_v54 = vpop.f32.mrb[60].mxu1 }
 0x20c   : > { %v1793_v55 = vpop.f32.mrb[61].mxu0  ;;  %v2081_v56 = vadd.f32 %v2080_v54, %v1791_v52  ;;  %v2082_v57 = vpop.f32.mrb[61].mxu1 }
 0x20d   : > { %v1794_v58 = vpop.f32.mrb[62].mxu0  ;;  %v2083_v60 = vpop.f32.mrb[62].mxu1 }
 0x20e   : > { %v1796_v61 = vpop.f32.mrb[63].mxu0  ;;  %v2245_v62 = vadd.f32 %v2081_v56, %v579_v53  ;;  %v2084_v63 = vadd.f32 %v2083_v60, %v1794_v58  ;;  %v2085_v0 = vpop.f32.mrb[63].mxu1 }
 0x210   : > { %2309 = vst [vmem:[#allocation2 + $0xf0] sm:$0xff] %v2245_v62  ;;  %v2246_v1 = vadd.f32 %v2084_v63, %v580_v59  ;;  %v589_v59 = vld [vmem:[#allocation2 + $0x140] sm:$0xff] }
 0x212   : > { %2310 = vst [vmem:[#allocation2 + $0xf8] sm:$0xff] %v2246_v1  ;;  %v590_v1 = vld [vmem:[#allocation2 + $0x148] sm:$0xff] }
 0x213   : > { %v1799_v2 = vpop.f32.mrb[64].mxu0  ;;  %v2088_v4 = vpop.f32.mrb[64].mxu1 }
 0x214   : > { %v1801_v5 = vpop.f32.mrb[65].mxu0  ;;  %v2089_v6 = vadd.f32 %v2088_v4, %v1799_v2  ;;  %v2090_v7 = vpop.f32.mrb[65].mxu1 }
 0x215   : > { %v1802_v8 = vpop.f32.mrb[66].mxu0  ;;  %v2091_v10 = vpop.f32.mrb[66].mxu1 }
 0x216   : > { %v1804_v11 = vpop.f32.mrb[67].mxu0  ;;  %v2247_v12 = vadd.f32 %v2089_v6, %v581_v3  ;;  %v2092_v13 = vadd.f32 %v2091_v10, %v1802_v8  ;;  %v2093_v14 = vpop.f32.mrb[67].mxu1 }
 0x218   : > { %2311 = vst [vmem:[#allocation2 + $0x100] sm:$0xff] %v2247_v12  ;;  %v2248_v15 = vadd.f32 %v2092_v13, %v582_v9  ;;  %v591_v9 = vld [vmem:[#allocation2 + $0x150] sm:$0xff] }
 0x21a   : > { %2312 = vst [vmem:[#allocation2 + $0x108] sm:$0xff] %v2248_v15  ;;  %v592_v15 = vld [vmem:[#allocation2 + $0x158] sm:$0xff] }
 0x21b   : > { %v1807_v16 = vpop.f32.mrb[68].mxu0  ;;  %v2096_v18 = vpop.f32.mrb[68].mxu1 }
 0x21c   : > { %v1809_v19 = vpop.f32.mrb[69].mxu0  ;;  %v2097_v20 = vadd.f32 %v2096_v18, %v1807_v16  ;;  %v2098_v21 = vpop.f32.mrb[69].mxu1 }
 0x21d   : > { %v1810_v22 = vpop.f32.mrb[70].mxu0  ;;  %v2099_v24 = vpop.f32.mrb[70].mxu1 }
 0x21e   : > { %v1812_v25 = vpop.f32.mrb[71].mxu0  ;;  %v2249_v26 = vadd.f32 %v2097_v20, %v583_v17  ;;  %v2100_v27 = vadd.f32 %v2099_v24, %v1810_v22  ;;  %v2101_v28 = vpop.f32.mrb[71].mxu1 }
 0x220   : > { %2313 = vst [vmem:[#allocation2 + $0x110] sm:$0xff] %v2249_v26  ;;  %v2250_v29 = vadd.f32 %v2100_v27, %v584_v23  ;;  %v593_v23 = vld [vmem:[#allocation2 + $0x160] sm:$0xff] }
 0x222   : > { %2314 = vst [vmem:[#allocation2 + $0x118] sm:$0xff] %v2250_v29  ;;  %v594_v29 = vld [vmem:[#allocation2 + $0x168] sm:$0xff] }
 0x223   : > { %v1815_v30 = vpop.f32.mrb[72].mxu0  ;;  %v2104_v32 = vpop.f32.mrb[72].mxu1 }
 0x224   : > { %v1817_v33 = vpop.f32.mrb[73].mxu0  ;;  %v2105_v34 = vadd.f32 %v2104_v32, %v1815_v30  ;;  %v2106_v35 = vpop.f32.mrb[73].mxu1 }
 0x225   : > { %v1818_v36 = vpop.f32.mrb[74].mxu0  ;;  %v2107_v38 = vpop.f32.mrb[74].mxu1 }
 0x226   : > { %v1820_v39 = vpop.f32.mrb[75].mxu0  ;;  %v2251_v40 = vadd.f32 %v2105_v34, %v585_v31  ;;  %v2108_v41 = vadd.f32 %v2107_v38, %v1818_v36  ;;  %v2109_v42 = vpop.f32.mrb[75].mxu1 }
 0x228   : > { %2315 = vst [vmem:[#allocation2 + $0x120] sm:$0xff] %v2251_v40  ;;  %v2252_v43 = vadd.f32 %v2108_v41, %v586_v37  ;;  %v595_v37 = vld [vmem:[#allocation2 + $0x170] sm:$0xff] }
 0x22a   : > { %2316 = vst [vmem:[#allocation2 + $0x128] sm:$0xff] %v2252_v43  ;;  %v596_v43 = vld [vmem:[#allocation2 + $0x178] sm:$0xff] }
 0x22b   : > { %v1823_v44 = vpop.f32.mrb[76].mxu0  ;;  %v2112_v46 = vpop.f32.mrb[76].mxu1 }
 0x22c   : > { %v1825_v47 = vpop.f32.mrb[77].mxu0  ;;  %v2113_v48 = vadd.f32 %v2112_v46, %v1823_v44  ;;  %v2114_v49 = vpop.f32.mrb[77].mxu1 }
 0x22d   : > { %v1826_v50 = vpop.f32.mrb[78].mxu0  ;;  %v2115_v52 = vpop.f32.mrb[78].mxu1 }
 0x22e   : > { %v1828_v53 = vpop.f32.mrb[79].mxu0  ;;  %v2253_v54 = vadd.f32 %v2113_v48, %v587_v45  ;;  %v2116_v55 = vadd.f32 %v2115_v52, %v1826_v50  ;;  %v2117_v56 = vpop.f32.mrb[79].mxu1 }
 0x230   : > { %2317 = vst [vmem:[#allocation2 + $0x130] sm:$0xff] %v2253_v54  ;;  %v2254_v57 = vadd.f32 %v2116_v55, %v588_v51  ;;  %v597_v51 = vld [vmem:[#allocation2 + $0x180] sm:$0xff] }
 0x232   : > { %2318 = vst [vmem:[#allocation2 + $0x138] sm:$0xff] %v2254_v57  ;;  %v598_v57 = vld [vmem:[#allocation2 + $0x188] sm:$0xff] }
 0x233   : > { %v1831_v58 = vpop.f32.mrb[80].mxu0  ;;  %v2120_v60 = vpop.f32.mrb[80].mxu1 }
 0x234   : > { %v1833_v61 = vpop.f32.mrb[81].mxu0  ;;  %v2121_v62 = vadd.f32 %v2120_v60, %v1831_v58  ;;  %v2122_v63 = vpop.f32.mrb[81].mxu1 }
 0x235   : > { %v1834_v0 = vpop.f32.mrb[82].mxu0  ;;  %v2123_v2 = vpop.f32.mrb[82].mxu1 }
 0x236   : > { %v1836_v3 = vpop.f32.mrb[83].mxu0  ;;  %v2255_v4 = vadd.f32 %v2121_v62, %v589_v59  ;;  %v2124_v5 = vadd.f32 %v2123_v2, %v1834_v0  ;;  %v2125_v6 = vpop.f32.mrb[83].mxu1 }
 0x238   : > { %2319 = vst [vmem:[#allocation2 + $0x140] sm:$0xff] %v2255_v4  ;;  %v2256_v7 = vadd.f32 %v2124_v5, %v590_v1  ;;  %v599_v1 = vld [vmem:[#allocation2 + $0x190] sm:$0xff] }
 0x23a   : > { %2320 = vst [vmem:[#allocation2 + $0x148] sm:$0xff] %v2256_v7  ;;  %v600_v7 = vld [vmem:[#allocation2 + $0x198] sm:$0xff] }
 0x23b   : > { %v1839_v8 = vpop.f32.mrb[84].mxu0  ;;  %v2128_v10 = vpop.f32.mrb[84].mxu1 }
 0x23c   : > { %v1841_v11 = vpop.f32.mrb[85].mxu0  ;;  %v2129_v12 = vadd.f32 %v2128_v10, %v1839_v8  ;;  %v2130_v13 = vpop.f32.mrb[85].mxu1 }
 0x23d   : > { %v1842_v14 = vpop.f32.mrb[86].mxu0  ;;  %v2131_v16 = vpop.f32.mrb[86].mxu1 }
 0x23e   : > { %v1844_v17 = vpop.f32.mrb[87].mxu0  ;;  %v2257_v18 = vadd.f32 %v2129_v12, %v591_v9  ;;  %v2132_v19 = vadd.f32 %v2131_v16, %v1842_v14  ;;  %v2133_v20 = vpop.f32.mrb[87].mxu1 }
 0x240   : > { %2321 = vst [vmem:[#allocation2 + $0x150] sm:$0xff] %v2257_v18  ;;  %v2258_v21 = vadd.f32 %v2132_v19, %v592_v15  ;;  %v601_v15 = vld [vmem:[#allocation2 + $0x1a0] sm:$0xff] }
 0x242   : > { %2322 = vst [vmem:[#allocation2 + $0x158] sm:$0xff] %v2258_v21  ;;  %v602_v21 = vld [vmem:[#allocation2 + $0x1a8] sm:$0xff] }
 0x243   : > { %v1847_v22 = vpop.f32.mrb[88].mxu0  ;;  %v2136_v24 = vpop.f32.mrb[88].mxu1 }
 0x244   : > { %v1849_v25 = vpop.f32.mrb[89].mxu0  ;;  %v2137_v26 = vadd.f32 %v2136_v24, %v1847_v22  ;;  %v2138_v27 = vpop.f32.mrb[89].mxu1 }
 0x245   : > { %v1850_v28 = vpop.f32.mrb[90].mxu0  ;;  %v2139_v30 = vpop.f32.mrb[90].mxu1 }
 0x246   : > { %v1852_v31 = vpop.f32.mrb[91].mxu0  ;;  %v2259_v32 = vadd.f32 %v2137_v26, %v593_v23  ;;  %v2140_v33 = vadd.f32 %v2139_v30, %v1850_v28  ;;  %v2141_v34 = vpop.f32.mrb[91].mxu1 }
 0x248   : > { %2323 = vst [vmem:[#allocation2 + $0x160] sm:$0xff] %v2259_v32  ;;  %v2260_v35 = vadd.f32 %v2140_v33, %v594_v29  ;;  %v603_v29 = vld [vmem:[#allocation2 + $0x1b0] sm:$0xff] }
 0x24a   : > { %2324 = vst [vmem:[#allocation2 + $0x168] sm:$0xff] %v2260_v35  ;;  %v604_v35 = vld [vmem:[#allocation2 + $0x1b8] sm:$0xff] }
 0x24b   : > { %v1855_v36 = vpop.f32.mrb[92].mxu0  ;;  %v2144_v38 = vpop.f32.mrb[92].mxu1 }
 0x24c   : > { %v1857_v39 = vpop.f32.mrb[93].mxu0  ;;  %v2145_v40 = vadd.f32 %v2144_v38, %v1855_v36  ;;  %v2146_v41 = vpop.f32.mrb[93].mxu1 }
 0x24d   : > { %v1858_v42 = vpop.f32.mrb[94].mxu0  ;;  %v2147_v44 = vpop.f32.mrb[94].mxu1 }
 0x24e   : > { %v1860_v45 = vpop.f32.mrb[95].mxu0  ;;  %v2261_v46 = vadd.f32 %v2145_v40, %v595_v37  ;;  %v2148_v47 = vadd.f32 %v2147_v44, %v1858_v42  ;;  %v2149_v48 = vpop.f32.mrb[95].mxu1 }
 0x250   : > { %2325 = vst [vmem:[#allocation2 + $0x170] sm:$0xff] %v2261_v46  ;;  %v2262_v49 = vadd.f32 %v2148_v47, %v596_v43  ;;  %v605_v43 = vld [vmem:[#allocation2 + $0x1c0] sm:$0xff] }
 0x252   : > { %2326 = vst [vmem:[#allocation2 + $0x178] sm:$0xff] %v2262_v49  ;;  %v606_v49 = vld [vmem:[#allocation2 + $0x1c8] sm:$0xff] }
 0x253   : > { %v1863_v50 = vpop.f32.mrb[96].mxu0  ;;  %v2152_v52 = vpop.f32.mrb[96].mxu1 }
 0x254   : > { %v1865_v53 = vpop.f32.mrb[97].mxu0  ;;  %v2153_v54 = vadd.f32 %v2152_v52, %v1863_v50  ;;  %v2154_v55 = vpop.f32.mrb[97].mxu1 }
 0x255   : > { %v1866_v56 = vpop.f32.mrb[98].mxu0  ;;  %v2155_v58 = vpop.f32.mrb[98].mxu1 }
 0x256   : > { %v1868_v59 = vpop.f32.mrb[99].mxu0  ;;  %v2263_v60 = vadd.f32 %v2153_v54, %v597_v51  ;;  %v2156_v61 = vadd.f32 %v2155_v58, %v1866_v56  ;;  %v2157_v62 = vpop.f32.mrb[99].mxu1 }
 0x258   : > { %2327 = vst [vmem:[#allocation2 + $0x180] sm:$0xff] %v2263_v60  ;;  %v2264_v63 = vadd.f32 %v2156_v61, %v598_v57  ;;  %v607_v57 = vld [vmem:[#allocation2 + $0x1d0] sm:$0xff] }
 0x25a   : > { %2328 = vst [vmem:[#allocation2 + $0x188] sm:$0xff] %v2264_v63  ;;  %v608_v63 = vld [vmem:[#allocation2 + $0x1d8] sm:$0xff] }
 0x25b   : > { %v1871_v0 = vpop.f32.mrb[100].mxu0  ;;  %v2160_v2 = vpop.f32.mrb[100].mxu1 }
 0x25c   : > { %v1873_v3 = vpop.f32.mrb[101].mxu0  ;;  %v2161_v4 = vadd.f32 %v2160_v2, %v1871_v0  ;;  %v2162_v5 = vpop.f32.mrb[101].mxu1 }
 0x25d   : > { %v1874_v6 = vpop.f32.mrb[102].mxu0  ;;  %v2163_v8 = vpop.f32.mrb[102].mxu1 }
 0x25e   : > { %v1876_v9 = vpop.f32.mrb[103].mxu0  ;;  %v2265_v10 = vadd.f32 %v2161_v4, %v599_v1  ;;  %v2164_v11 = vadd.f32 %v2163_v8, %v1874_v6  ;;  %v2165_v12 = vpop.f32.mrb[103].mxu1 }
 0x260   : > { %2329 = vst [vmem:[#allocation2 + $0x190] sm:$0xff] %v2265_v10  ;;  %v2266_v13 = vadd.f32 %v2164_v11, %v600_v7  ;;  %v609_v7 = vld [vmem:[#allocation2 + $0x1e0] sm:$0xff] }
 0x262   : > { %2330 = vst [vmem:[#allocation2 + $0x198] sm:$0xff] %v2266_v13  ;;  %v610_v13 = vld [vmem:[#allocation2 + $0x1e8] sm:$0xff] }
 0x263   : > { %v1879_v14 = vpop.f32.mrb[104].mxu0  ;;  %v2168_v16 = vpop.f32.mrb[104].mxu1 }
 0x264   : > { %v1881_v17 = vpop.f32.mrb[105].mxu0  ;;  %v2169_v18 = vadd.f32 %v2168_v16, %v1879_v14  ;;  %v2170_v19 = vpop.f32.mrb[105].mxu1 }
 0x265   : > { %v1882_v20 = vpop.f32.mrb[106].mxu0  ;;  %v2171_v22 = vpop.f32.mrb[106].mxu1 }
 0x266   : > { %v1884_v23 = vpop.f32.mrb[107].mxu0  ;;  %v2267_v24 = vadd.f32 %v2169_v18, %v601_v15  ;;  %v2172_v25 = vadd.f32 %v2171_v22, %v1882_v20  ;;  %v2173_v26 = vpop.f32.mrb[107].mxu1 }
 0x268   : > { %2331 = vst [vmem:[#allocation2 + $0x1a0] sm:$0xff] %v2267_v24  ;;  %v2268_v27 = vadd.f32 %v2172_v25, %v602_v21  ;;  %v611_v21 = vld [vmem:[#allocation2 + $0x1f0] sm:$0xff] }
 0x26a   : > { %2332 = vst [vmem:[#allocation2 + $0x1a8] sm:$0xff] %v2268_v27  ;;  %v612_v27 = vld [vmem:[#allocation2 + $0x1f8] sm:$0xff] }
 0x26b   : > { %v1887_v28 = vpop.f32.mrb[108].mxu0  ;;  %v2176_v30 = vpop.f32.mrb[108].mxu1 }
 0x26c   : > { %v1889_v31 = vpop.f32.mrb[109].mxu0  ;;  %v2177_v32 = vadd.f32 %v2176_v30, %v1887_v28  ;;  %v2178_v33 = vpop.f32.mrb[109].mxu1 }
 0x26d   : > { %v1890_v34 = vpop.f32.mrb[110].mxu0  ;;  %v2179_v36 = vpop.f32.mrb[110].mxu1 }
 0x26e   : > { %v1892_v37 = vpop.f32.mrb[111].mxu0  ;;  %v2269_v38 = vadd.f32 %v2177_v32, %v603_v29  ;;  %v2180_v39 = vadd.f32 %v2179_v36, %v1890_v34  ;;  %v2181_v40 = vpop.f32.mrb[111].mxu1 }
 0x270   : > { %2333 = vst [vmem:[#allocation2 + $0x1b0] sm:$0xff] %v2269_v38  ;;  %v2270_v41 = vadd.f32 %v2180_v39, %v604_v35 }
 0x272   : > { %2334 = vst [vmem:[#allocation2 + $0x1b8] sm:$0xff] %v2270_v41 }
 0x273   : > { %v1895_v42 = vpop.f32.mrb[112].mxu0  ;;  %v2184_v44 = vpop.f32.mrb[112].mxu1 }
 0x274   : > { %v1897_v45 = vpop.f32.mrb[113].mxu0  ;;  %v2185_v46 = vadd.f32 %v2184_v44, %v1895_v42  ;;  %v2186_v47 = vpop.f32.mrb[113].mxu1 }
 0x275   : > { %v1898_v48 = vpop.f32.mrb[114].mxu0  ;;  %v2187_v50 = vpop.f32.mrb[114].mxu1 }
 0x276   : > { %v1900_v51 = vpop.f32.mrb[115].mxu0  ;;  %v2271_v52 = vadd.f32 %v2185_v46, %v605_v43  ;;  %v2188_v53 = vadd.f32 %v2187_v50, %v1898_v48  ;;  %v2189_v54 = vpop.f32.mrb[115].mxu1 }
 0x278   : > { %2335 = vst [vmem:[#allocation2 + $0x1c0] sm:$0xff] %v2271_v52  ;;  %v2272_v55 = vadd.f32 %v2188_v53, %v606_v49 }
 0x27a   : > { %2336 = vst [vmem:[#allocation2 + $0x1c8] sm:$0xff] %v2272_v55 }
 0x27b   : > { %v1903_v56 = vpop.f32.mrb[116].mxu0  ;;  %v2192_v58 = vpop.f32.mrb[116].mxu1 }
 0x27c   : > { %v1905_v59 = vpop.f32.mrb[117].mxu0  ;;  %v2193_v60 = vadd.f32 %v2192_v58, %v1903_v56  ;;  %v2194_v61 = vpop.f32.mrb[117].mxu1 }
 0x27d   : > { %v1906_v62 = vpop.f32.mrb[118].mxu0  ;;  %v2195_v0 = vpop.f32.mrb[118].mxu1 }
 0x27e   : > { %v1908_v1 = vpop.f32.mrb[119].mxu0  ;;  %v2273_v2 = vadd.f32 %v2193_v60, %v607_v57  ;;  %v2196_v3 = vadd.f32 %v2195_v0, %v1906_v62  ;;  %v2197_v4 = vpop.f32.mrb[119].mxu1 }
 0x280   : > { %2337 = vst [vmem:[#allocation2 + $0x1d0] sm:$0xff] %v2273_v2  ;;  %v2274_v5 = vadd.f32 %v2196_v3, %v608_v63 }
 0x282   : > { %2338 = vst [vmem:[#allocation2 + $0x1d8] sm:$0xff] %v2274_v5 }
 0x283   : > { %v1911_v6 = vpop.f32.mrb[120].mxu0  ;;  %v2200_v8 = vpop.f32.mrb[120].mxu1 }
 0x284   : > { %v1913_v9 = vpop.f32.mrb[121].mxu0  ;;  %v2201_v10 = vadd.f32 %v2200_v8, %v1911_v6  ;;  %v2202_v11 = vpop.f32.mrb[121].mxu1 }
 0x285   : > { %v1914_v12 = vpop.f32.mrb[122].mxu0  ;;  %v2203_v14 = vpop.f32.mrb[122].mxu1 }
 0x286   : > { %v1916_v15 = vpop.f32.mrb[123].mxu0  ;;  %v2275_v16 = vadd.f32 %v2201_v10, %v609_v7  ;;  %v2204_v17 = vadd.f32 %v2203_v14, %v1914_v12  ;;  %v2205_v18 = vpop.f32.mrb[123].mxu1 }
 0x288   : > { %2339 = vst [vmem:[#allocation2 + $0x1e0] sm:$0xff] %v2275_v16  ;;  %v2276_v19 = vadd.f32 %v2204_v17, %v610_v13 }
 0x28a   : > { %2340 = vst [vmem:[#allocation2 + $0x1e8] sm:$0xff] %v2276_v19 }
 0x28b   : > { %v1919_v20 = vpop.f32.mrb[124].mxu0  ;;  %v2208_v22 = vpop.f32.mrb[124].mxu1 }
 0x28c   : > { %v1921_v23 = vpop.f32.mrb[125].mxu0  ;;  %v2209_v24 = vadd.f32 %v2208_v22, %v1919_v20  ;;  %v2210_v25 = vpop.f32.mrb[125].mxu1  ;;  %2346 = sbr.rel (%p3617_p10) target bundleno = 1074 (0x432), region = 67 }
 0x28d   : > { %v1922_v26 = vpop.f32.mrb[126].mxu0  ;;  %v2211_v28 = vpop.f32.mrb[126].mxu1 }
 0x28e   : > { %v1924_v29 = vpop.f32.mrb[127].mxu0  ;;  %v2277_v30 = vadd.f32 %v2209_v24, %v611_v21  ;;  %v2212_v31 = vadd.f32 %v2211_v28, %v1922_v26  ;;  %v2213_v32 = vpop.f32.mrb[127].mxu1 }
 0x290   : > { %2341 = vst [vmem:[#allocation2 + $0x1f0] sm:$0xff] %v2277_v30  ;;  %v2278_v33 = vadd.f32 %v2212_v31, %v612_v27 }
 0x292   : > { %2342 = vst [vmem:[#allocation2 + $0x1f8] sm:$0xff] %v2278_v33 }
 0x293   : > { %v4810_v34 = vld [vmem:[#allocation2] sm:$0xff]  ;;  %v4812_v35 = vld [vmem:[#allocation2 + $0x8] sm:$0xff]  ;;  %v4814_v36 = vld [vmem:[#allocation2 + $0x10] sm:$0xff] }
 0x294   : > { %v2411_v37 = vadd.f32 %v4812_v35, %v4810_v34  ;;  %v4818_v38 = vld [vmem:[#allocation2 + $0x18] sm:$0xff]  ;;  %v4821_v40 = vld [vmem:[#allocation2 + $0x20] sm:$0xff]  ;;  %v4824_v42 = vld [vmem:[#allocation2 + $0x28] sm:$0xff] }
 0x295   : > { %v4827_v44 = vld [vmem:[#allocation2 + $0x30] sm:$0xff]  ;;  %v4830_v46 = vld [vmem:[#allocation2 + $0x38] sm:$0xff]  ;;  %v4833_v48 = vld [vmem:[#allocation2 + $0x40] sm:$0xff] }
 0x296   : > { %v2412_v39 = vadd.f32 %v2411_v37, %v4814_v36  ;;  %v4836_v50 = vld [vmem:[#allocation2 + $0x48] sm:$0xff]  ;;  %v4839_v52 = vld [vmem:[#allocation2 + $0x50] sm:$0xff]  ;;  %v4842_v54 = vld [vmem:[#allocation2 + $0x58] sm:$0xff] }
 0x297   : > { %v4845_v56 = vld [vmem:[#allocation2 + $0x60] sm:$0xff]  ;;  %v4848_v58 = vld [vmem:[#allocation2 + $0x68] sm:$0xff]  ;;  %v4851_v60 = vld [vmem:[#allocation2 + $0x70] sm:$0xff] }
 0x298   : > { %v2413_v41 = vadd.f32 %v2412_v39, %v4818_v38  ;;  %v4854_v62 = vld [vmem:[#allocation2 + $0x78] sm:$0xff]  ;;  %v4857_v0 = vld [vmem:[#allocation2 + $0x80] sm:$0xff]  ;;  %v4860_v2 = vld [vmem:[#allocation2 + $0x88] sm:$0xff] }
 0x299   : > { %v4863_v4 = vld [vmem:[#allocation2 + $0x90] sm:$0xff]  ;;  %v4866_v6 = vld [vmem:[#allocation2 + $0x98] sm:$0xff]  ;;  %v4869_v8 = vld [vmem:[#allocation2 + $0xa0] sm:$0xff] }
 0x29a   : > { %v2414_v43 = vadd.f32 %v2413_v41, %v4821_v40  ;;  %v4872_v10 = vld [vmem:[#allocation2 + $0xa8] sm:$0xff]  ;;  %v4875_v12 = vld [vmem:[#allocation2 + $0xb0] sm:$0xff]  ;;  %v4878_v14 = vld [vmem:[#allocation2 + $0xb8] sm:$0xff] }
 0x29b   : > { %v4881_v16 = vld [vmem:[#allocation2 + $0xc0] sm:$0xff]  ;;  %v4884_v18 = vld [vmem:[#allocation2 + $0xc8] sm:$0xff]  ;;  %v4887_v20 = vld [vmem:[#allocation2 + $0xd0] sm:$0xff] }
 0x29c   : > { %v2415_v45 = vadd.f32 %v2414_v43, %v4824_v42  ;;  %v4890_v22 = vld [vmem:[#allocation2 + $0xd8] sm:$0xff]  ;;  %v4893_v24 = vld [vmem:[#allocation2 + $0xe0] sm:$0xff]  ;;  %v4896_v26 = vld [vmem:[#allocation2 + $0xe8] sm:$0xff] }
 0x29d   : > { %v4899_v28 = vld [vmem:[#allocation2 + $0xf0] sm:$0xff]  ;;  %v4902_v30 = vld [vmem:[#allocation2 + $0xf8] sm:$0xff]  ;;  %v4905_v32 = vld [vmem:[#allocation2 + $0x100] sm:$0xff] }
 0x29e   : > { %v2416_v47 = vadd.f32 %v2415_v45, %v4827_v44  ;;  %5725 = vst [vmem:[#allocation4_spill] sm:$0xff] %v4899_v28  ;;  %5726 = vst [vmem:[#allocation5_spill] sm:$0xff] %v4902_v30  ;;  %v4908_v37 = vld [vmem:[#allocation2 + $0x108] sm:$0xff]  ;;  %v4911_v41 = vld [vmem:[#allocation2 + $0x110] sm:$0xff] }
 0x29f   : > { %5727 = vst [vmem:[#allocation6_spill] sm:$0xff] %v4905_v32  ;;  %5728 = vst [vmem:[#allocation7_spill] sm:$0xff] %v4908_v37  ;;  %v4914_v45 = vld [vmem:[#allocation2 + $0x118] sm:$0xff] }
 0x2a0   : > { %v2417_v49 = vadd.f32 %v2416_v47, %v4830_v46  ;;  %5729 = vst [vmem:[#allocation8_spill] sm:$0xff] %v4911_v41  ;;  %5730 = vst [vmem:[#allocation9_spill] sm:$0xff] %v4914_v45 }
 0x2a2   : > { %v2418_v51 = vadd.f32 %v2417_v49, %v4833_v48  ;;  %v4917_v49 = vld [vmem:[#allocation2 + $0x120] sm:$0xff] }
 0x2a3   : > { %5731 = vst [vmem:[#allocation10_spill] sm:$0xff] %v4917_v49 }
 0x2a4   : > { %v2419_v53 = vadd.f32 %v2418_v51, %v4836_v50 }
 0x2a6   : > { %v2420_v55 = vadd.f32 %v2419_v53, %v4839_v52  ;;  %v4920_v53 = vld [vmem:[#allocation2 + $0x128] sm:$0xff] }
 0x2a7   : > { %5732 = vst [vmem:[#allocation11_spill] sm:$0xff] %v4920_v53 }
 0x2a8   : > { %v2421_v57 = vadd.f32 %v2420_v55, %v4842_v54 }
 0x2aa   : > { %v2422_v59 = vadd.f32 %v2421_v57, %v4845_v56  ;;  %v4923_v57 = vld [vmem:[#allocation2 + $0x130] sm:$0xff] }
 0x2ab   : > { %5733 = vst [vmem:[#allocation12_spill] sm:$0xff] %v4923_v57 }
 0x2ac   : > { %v2423_v61 = vadd.f32 %v2422_v59, %v4848_v58 }
 0x2ae   : > { %v2424_v63 = vadd.f32 %v2423_v61, %v4851_v60  ;;  %v4926_v61 = vld [vmem:[#allocation2 + $0x138] sm:$0xff] }
 0x2af   : > { %5734 = vst [vmem:[#allocation13_spill] sm:$0xff] %v4926_v61 }
 0x2b0   : > { %v2425_v1 = vadd.f32 %v2424_v63, %v4854_v62 }
 0x2b2   : > { %v2426_v3 = vadd.f32 %v2425_v1, %v4857_v0  ;;  %v4929_v1 = vld [vmem:[#allocation2 + $0x140] sm:$0xff] }
 0x2b3   : > { %5735 = vst [vmem:[#allocation14_spill] sm:$0xff] %v4929_v1 }
 0x2b4   : > { %v2427_v5 = vadd.f32 %v2426_v3, %v4860_v2 }
 0x2b6   : > { %v2428_v7 = vadd.f32 %v2427_v5, %v4863_v4  ;;  %v4932_v5 = vld [vmem:[#allocation2 + $0x148] sm:$0xff] }
 0x2b7   : > { %5736 = vst [vmem:[#allocation15_spill] sm:$0xff] %v4932_v5 }
 0x2b8   : > { %v2429_v9 = vadd.f32 %v2428_v7, %v4866_v6 }
 0x2ba   : > { %v2430_v11 = vadd.f32 %v2429_v9, %v4869_v8  ;;  %v4935_v9 = vld [vmem:[#allocation2 + $0x150] sm:$0xff] }
 0x2bb   : > { %5737 = vst [vmem:[#allocation16_spill] sm:$0xff] %v4935_v9 }
 0x2bc   : > { %v2431_v13 = vadd.f32 %v2430_v11, %v4872_v10 }
 0x2be   : > { %v2432_v15 = vadd.f32 %v2431_v13, %v4875_v12  ;;  %v4938_v13 = vld [vmem:[#allocation2 + $0x158] sm:$0xff] }
 0x2bf   : > { %5738 = vst [vmem:[#allocation17_spill] sm:$0xff] %v4938_v13 }
 0x2c0   : > { %v2433_v17 = vadd.f32 %v2432_v15, %v4878_v14 }
 0x2c2   : > { %v2434_v19 = vadd.f32 %v2433_v17, %v4881_v16  ;;  %v4941_v17 = vld [vmem:[#allocation2 + $0x160] sm:$0xff] }
 0x2c3   : > { %5739 = vst [vmem:[#allocation18_spill] sm:$0xff] %v4941_v17 }
 0x2c4   : > { %v2435_v21 = vadd.f32 %v2434_v19, %v4884_v18 }
 0x2c6   : > { %v2436_v23 = vadd.f32 %v2435_v21, %v4887_v20  ;;  %v2392_v21 = vld [vmem:[#allocation2 + $0x168] sm:$0xff] }
 0x2c8   : > { %v2437_v25 = vadd.f32 %v2436_v23, %v4890_v22 }
 0x2ca   : > { %v2438_v27 = vadd.f32 %v2437_v25, %v4893_v24  ;;  %v2393_v25 = vld [vmem:[#allocation2 + $0x170] sm:$0xff] }
 0x2cc   : > { %v2439_v29 = vadd.f32 %v2438_v27, %v4896_v26 }
 0x2ce   : > { %v2440_v31 = vadd.f32 %v2439_v29, %v4899_v28  ;;  %v2394_v29 = vld [vmem:[#allocation2 + $0x178] sm:$0xff] }
 0x2d0   : > { %v2441_v33 = vadd.f32 %v2440_v31, %v4902_v30 }
 0x2d2   : > { %v2442_v39 = vadd.f32 %v2441_v33, %v4905_v32  ;;  %v2395_v33 = vld [vmem:[#allocation2 + $0x180] sm:$0xff] }
 0x2d4   : > { %v2443_v43 = vadd.f32 %v2442_v39, %v4908_v37 }
 0x2d6   : > { %v2444_v47 = vadd.f32 %v2443_v43, %v4911_v41  ;;  %v2396_v43 = vld [vmem:[#allocation2 + $0x188] sm:$0xff]  ;;  %v2410_v41 = vld [vmem:[#allocation2 + $0x1f8] sm:$0xff] }
 0x2d8   : > { %v2445_v51 = vadd.f32 %v2444_v47, %v4914_v45  ;;  %v2409_v45 = vld [vmem:[#allocation2 + $0x1f0] sm:$0xff] }
 0x2da   : > { %v2446_v55 = vadd.f32 %v2445_v51, %v4917_v49  ;;  %v2397_v51 = vld [vmem:[#allocation2 + $0x190] sm:$0xff]  ;;  %v2408_v49 = vld [vmem:[#allocation2 + $0x1e8] sm:$0xff] }
 0x2dc   : > { %v2447_v59 = vadd.f32 %v2446_v55, %v4920_v53  ;;  %v2407_v53 = vld [vmem:[#allocation2 + $0x1e0] sm:$0xff] }
 0x2de   : > { %v2448_v63 = vadd.f32 %v2447_v59, %v4923_v57  ;;  %v2398_v59 = vld [vmem:[#allocation2 + $0x198] sm:$0xff] }
 0x2df   : > { %v2406_v57 = vld [vmem:[#allocation2 + $0x1d8] sm:$0xff] }
 0x2e0   : > { %v2449_v3 = vadd.f32 %v2448_v63, %v4926_v61  ;;  %v2405_v61 = vld [vmem:[#allocation2 + $0x1d0] sm:$0xff] }
 0x2e2   : > { %v2450_v7 = vadd.f32 %v2449_v3, %v4929_v1  ;;  %v2399_v3 = vld [vmem:[#allocation2 + $0x1a0] sm:$0xff]  ;;  %v2404_v1 = vld [vmem:[#allocation2 + $0x1c8] sm:$0xff] }
 0x2e4   : > { %v2451_v11 = vadd.f32 %v2450_v7, %v4932_v5  ;;  %v2402_v5 = vld [vmem:[#allocation2 + $0x1b8] sm:$0xff] }
 0x2e6   : > { %v2452_v15 = vadd.f32 %v2451_v11, %v4935_v9  ;;  %v2400_v11 = vld [vmem:[#allocation2 + $0x1a8] sm:$0xff] }
 0x2e8   : > { %v2453_v19 = vadd.f32 %v2452_v15, %v4938_v13  ;;  %v2401_v15 = vld [vmem:[#allocation2 + $0x1b0] sm:$0xff] }
 0x2ea   : > { %v2454_v23 = vadd.f32 %v2453_v19, %v4941_v17  ;;  %v2403_v17 = vld [vmem:[#allocation2 + $0x1c0] sm:$0xff] }
 0x2ec   : > { %v2455_v27 = vadd.f32 %v2454_v23, %v2392_v21 }
 0x2ee   : > { %v2456_v31 = vadd.f32 %v2455_v27, %v2393_v25 }
 0x2f0   : > { %v2457_v39 = vadd.f32 %v2456_v31, %v2394_v29 }
 0x2f2   : > { %v2458_v47 = vadd.f32 %v2457_v39, %v2395_v33 }
 0x2f4   : > { %v2459_v55 = vadd.f32 %v2458_v47, %v2396_v43 }
 0x2f6   : > { %v2460_v63 = vadd.f32 %v2459_v55, %v2397_v51 }
 0x2f8   : > { %v2461_v7 = vadd.f32 %v2460_v63, %v2398_v59 }
 0x2fa   : > { %v2462_v9 = vadd.f32 %v2461_v7, %v2399_v3 }
 0x2fc   : > { %v2463_v13 = vadd.f32 %v2462_v9, %v2400_v11 }
 0x2fe   : > { %v2464_v19 = vadd.f32 %v2463_v13, %v2401_v15 }
 0x300   : > { %v2465_v23 = vadd.f32 %v2464_v19, %v2402_v5 }
 0x302   : > { %v2466_v27 = vadd.f32 %v2465_v23, %v2403_v17 }
 0x304   : > { %v2467_v31 = vadd.f32 %v2466_v27, %v2404_v1 }
 0x306   : > { %v2468_v39 = vadd.f32 %v2467_v31, %v2405_v61 }
 0x308   : > { %v2469_v47 = vadd.f32 %v2468_v39, %v2406_v57 }
 0x30a   : > { %v2470_v55 = vadd.f32 %v2469_v47, %v2407_v53 }
 0x30c   : > { %v2471_v63 = vadd.f32 %v2470_v55, %v2408_v49 }
 0x30e   : > { %v2472_v7 = vadd.f32 %v2471_v63, %v2409_v45 }
 0x310   : > { %v2473_v37 = vadd.f32 %v2472_v7, %v2410_v41 }
 0x312   : > { %v2474_v9 = vrot.slane %v2473_v37, 4 }
 0x314   : > { %v2475_v32 = vadd.f32 %v2474_v9, %v2473_v37 }
 0x316   : > { %v2476_v13 = vrot.slane %v2475_v32, 2 }
 0x318   : > { %v2477_v30 = vadd.f32 %v2476_v13, %v2475_v32 }
 0x31a   : > { %v2478_v19 = vrot.slane %v2477_v30, 1 }
 0x31c   : > { %v2479_v28 = vadd.f32 %v2478_v19, %v2477_v30 }
 0x31e   : > { %v4945_v23 = vmul.f32 0.001953125, %v2479_v28 }
 0x320   : > { %v4948_v27 = vsub.f32 %v2392_v21, %v4945_v23  ;;  %v4951_v31 = vsub.f32 %v2393_v25, %v4945_v23  ;;  %v4954_v39 = vsub.f32 %v2394_v29, %v4945_v23  ;;  %v4957_v47 = vsub.f32 %v2395_v33, %v4945_v23 }
 0x321   : > { %v4960_v37 = vsub.f32 %v2396_v43, %v4945_v23  ;;  %v4963_v32 = vsub.f32 %v2397_v51, %v4945_v23  ;;  %v4966_v28 = vsub.f32 %v2398_v59, %v4945_v23  ;;  %v4969_v30 = vsub.f32 %v2399_v3, %v4945_v23 }
 0x322   : > { %v4972_v21 = vsub.f32 %v2400_v11, %v4945_v23  ;;  %v4975_v25 = vsub.f32 %v2401_v15, %v4945_v23  ;;  %v4978_v29 = vsub.f32 %v2402_v5, %v4945_v23  ;;  %v4981_v33 = vsub.f32 %v2403_v17, %v4945_v23 }
 0x323   : > { %v4984_v43 = vsub.f32 %v2404_v1, %v4945_v23  ;;  %v4987_v51 = vsub.f32 %v2405_v61, %v4945_v23  ;;  %v4990_v59 = vsub.f32 %v2406_v57, %v4945_v23  ;;  %v4993_v3 = vsub.f32 %v2407_v53, %v4945_v23 }
 0x324   : > { %5740 = vst [vmem:[#allocation19_spill] sm:$0xff] %v4981_v33  ;;  %v4996_v11 = vsub.f32 %v2408_v49, %v4945_v23  ;;  %v4999_v5 = vsub.f32 %v2409_v45, %v4945_v23  ;;  %v5002_v17 = vsub.f32 %v2410_v41, %v4945_v23  ;;  %v5006_v1 = vsub.f32 %v4810_v34, %v4945_v23 }
 0x325   : > { %5741 = vst [vmem:[#allocation20_spill] sm:$0xff] %v4984_v43  ;;  %5742 = vst [vmem:[#allocation21_spill] sm:$0xff] %v4987_v51  ;;  %v5010_v57 = vsub.f32 %v4812_v35, %v4945_v23  ;;  %v5014_v53 = vsub.f32 %v4814_v36, %v4945_v23  ;;  %v5018_v49 = vsub.f32 %v4818_v38, %v4945_v23 }
 0x326   : > { %5743 = vst [vmem:[#allocation22_spill] sm:$0xff] %v4990_v59  ;;  %5744 = vst [vmem:[#allocation23_spill] sm:$0xff] %v4993_v3  ;;  %v2546_v41 = vmul.f32 %v5006_v1, %v5006_v1  ;;  %v5026_v34 = vsub.f32 %v4821_v40, %v4945_v23  ;;  %v5032_v36 = vsub.f32 %v4824_v42, %v4945_v23 }
 0x327   : > { %v2547_v45 = vmul.f32 %v5010_v57, %v5010_v57  ;;  %v2548_v35 = vmul.f32 %v5014_v53, %v5014_v53  ;;  %v2549_v38 = vmul.f32 %v5018_v49, %v5018_v49  ;;  %v5038_v15 = vsub.f32 %v4827_v44, %v4945_v23 }
 0x328   : > { %v2550_v55 = vmul.f32 %v5026_v34, %v5026_v34  ;;  %v5044_v63 = vsub.f32 %v4830_v46, %v4945_v23  ;;  %v2551_v42 = vmul.f32 %v5032_v36, %v5032_v36  ;;  %v5050_v9 = vsub.f32 %v4833_v48, %v4945_v23 }
 0x329   : > { %v2610_v61 = vadd.f32 %v2547_v45, %v2546_v41  ;;  %v2552_v44 = vmul.f32 %v5038_v15, %v5038_v15  ;;  %v5056_v19 = vsub.f32 %v4836_v50, %v4945_v23  ;;  %v5062_v45 = vsub.f32 %v4839_v52, %v4945_v23 }
 0x32a   : > { %v2553_v46 = vmul.f32 %v5044_v63, %v5044_v63  ;;  %v2554_v48 = vmul.f32 %v5050_v9, %v5050_v9 }
 0x32b   : > { %v2611_v40 = vadd.f32 %v2610_v61, %v2548_v35  ;;  %v2555_v50 = vmul.f32 %v5056_v19, %v5056_v19  ;;  %v2556_v52 = vmul.f32 %v5062_v45, %v5062_v45 }
 0x32d   : > { %v2612_v7 = vadd.f32 %v2611_v40, %v2549_v38  ;;  %v5068_v38 = vsub.f32 %v4842_v54, %v4945_v23 }
 0x32f   : > { %v2613_v13 = vadd.f32 %v2612_v7, %v2550_v55  ;;  %v5074_v55 = vsub.f32 %v4845_v56, %v4945_v23  ;;  %v2557_v54 = vmul.f32 %v5068_v38, %v5068_v38 }
 0x331   : > { %v2614_v41 = vadd.f32 %v2613_v13, %v2551_v42  ;;  %v5080_v42 = vsub.f32 %v4848_v58, %v4945_v23  ;;  %v2558_v56 = vmul.f32 %v5074_v55, %v5074_v55 }
 0x333   : > { %v2615_v35 = vadd.f32 %v2614_v41, %v2552_v44  ;;  %v5086_v44 = vsub.f32 %v4851_v60, %v4945_v23  ;;  %v2559_v58 = vmul.f32 %v5080_v42, %v5080_v42 }
 0x335   : > { %v2616_v61 = vadd.f32 %v2615_v35, %v2553_v46  ;;  %v5092_v46 = vsub.f32 %v4854_v62, %v4945_v23  ;;  %v2560_v60 = vmul.f32 %v5086_v44, %v5086_v44 }
 0x337   : > { %v2617_v40 = vadd.f32 %v2616_v61, %v2554_v48  ;;  %v5098_v48 = vsub.f32 %v4857_v0, %v4945_v23  ;;  %v2561_v62 = vmul.f32 %v5092_v46, %v5092_v46 }
 0x339   : > { %v2618_v7 = vadd.f32 %v2617_v40, %v2555_v50  ;;  %v5104_v50 = vsub.f32 %v4860_v2, %v4945_v23  ;;  %v2562_v0 = vmul.f32 %v5098_v48, %v5098_v48 }
 0x33b   : > { %v2619_v13 = vadd.f32 %v2618_v7, %v2556_v52  ;;  %v5110_v52 = vsub.f32 %v4863_v4, %v4945_v23  ;;  %v2563_v2 = vmul.f32 %v5104_v50, %v5104_v50 }
 0x33d   : > { %v2620_v41 = vadd.f32 %v2619_v13, %v2557_v54  ;;  %v5116_v54 = vsub.f32 %v4866_v6, %v4945_v23  ;;  %v2564_v4 = vmul.f32 %v5110_v52, %v5110_v52 }
 0x33f   : > { %v2621_v35 = vadd.f32 %v2620_v41, %v2558_v56  ;;  %v5122_v56 = vsub.f32 %v4869_v8, %v4945_v23  ;;  %v2565_v6 = vmul.f32 %v5116_v54, %v5116_v54 }
 0x341   : > { %v2622_v61 = vadd.f32 %v2621_v35, %v2559_v58  ;;  %v5128_v58 = vsub.f32 %v4872_v10, %v4945_v23  ;;  %v2566_v8 = vmul.f32 %v5122_v56, %v5122_v56 }
 0x343   : > { %v2623_v40 = vadd.f32 %v2622_v61, %v2560_v60  ;;  %v5134_v60 = vsub.f32 %v4875_v12, %v4945_v23  ;;  %v2567_v10 = vmul.f32 %v5128_v58, %v5128_v58 }
 0x345   : > { %v2624_v7 = vadd.f32 %v2623_v40, %v2561_v62  ;;  %v5140_v62 = vsub.f32 %v4878_v14, %v4945_v23  ;;  %v2568_v12 = vmul.f32 %v5134_v60, %v5134_v60 }
 0x347   : > { %v2625_v13 = vadd.f32 %v2624_v7, %v2562_v0  ;;  %v5146_v0 = vsub.f32 %v4881_v16, %v4945_v23  ;;  %v2569_v14 = vmul.f32 %v5140_v62, %v5140_v62 }
 0x349   : > { %v2626_v41 = vadd.f32 %v2625_v13, %v2563_v2  ;;  %v5152_v2 = vsub.f32 %v4884_v18, %v4945_v23  ;;  %v2570_v16 = vmul.f32 %v5146_v0, %v5146_v0 }
 0x34b   : > { %v2627_v35 = vadd.f32 %v2626_v41, %v2564_v4  ;;  %v5158_v4 = vsub.f32 %v4887_v20, %v4945_v23  ;;  %v2571_v18 = vmul.f32 %v5152_v2, %v5152_v2 }
 0x34d   : > { %v2628_v61 = vadd.f32 %v2627_v35, %v2565_v6  ;;  %v5164_v6 = vsub.f32 %v4890_v22, %v4945_v23  ;;  %v2572_v20 = vmul.f32 %v5158_v4, %v5158_v4 }
 0x34f   : > { %v2629_v40 = vadd.f32 %v2628_v61, %v2566_v8  ;;  %5745 = vst [vmem:[#allocation24_spill] sm:$0xff] %v5164_v6  ;;  %v5170_v8 = vsub.f32 %v4893_v24, %v4945_v23  ;;  %v2573_v22 = vmul.f32 %v5164_v6, %v5164_v6 }
 0x351   : > { %v2630_v7 = vadd.f32 %v2629_v40, %v2567_v10  ;;  %5746 = vst [vmem:[#allocation25_spill] sm:$0xff] %v5170_v8  ;;  %v5176_v10 = vsub.f32 %v4896_v26, %v4945_v23  ;;  %v2574_v24 = vmul.f32 %v5170_v8, %v5170_v8 }
 0x353   : > { %v2631_v13 = vadd.f32 %v2630_v7, %v2568_v12  ;;  %5747 = vst [vmem:[#allocation26_spill] sm:$0xff] %v5176_v10  ;;  %v5748_v12 = vld [vmem:[#allocation4_spill] sm:$0xff]  ;;  %v5750_v7 = vld [vmem:[#allocation5_spill] sm:$0xff]  ;;  %v2575_v26 = vmul.f32 %v5176_v10, %v5176_v10 }
 0x354   : > { %v5182_v40 = vsub.f32 %v5748_v12, %v4945_v23  ;;  %v5754_v12 = vld [vmem:[#allocation7_spill] sm:$0xff] }
 0x355   : > { %v2632_v41 = vadd.f32 %v2631_v13, %v2569_v14  ;;  %v5188_v13 = vsub.f32 %v5750_v7, %v4945_v23  ;;  %v5200_v8 = vsub.f32 %v5754_v12, %v4945_v23  ;;  %v5756_v7 = vld [vmem:[#allocation8_spill] sm:$0xff]  ;;  %v5760_v12 = vld [vmem:[#allocation10_spill] sm:$0xff] }
 0x356   : > { %5749 = vst [vmem:[#allocation4_spill] sm:$0xff] %v5182_v40  ;;  %v5206_v10 = vsub.f32 %v5756_v7, %v4945_v23  ;;  %v5762_v7 = vld [vmem:[#allocation11_spill] sm:$0xff] }
 0x357   : > { %v2633_v35 = vadd.f32 %v2632_v41, %v2570_v16  ;;  %5751 = vst [vmem:[#allocation5_spill] sm:$0xff] %v5188_v13  ;;  %v5752_v41 = vld [vmem:[#allocation6_spill] sm:$0xff]  ;;  %5755 = vst [vmem:[#allocation7_spill] sm:$0xff] %v5200_v8 }
 0x358   : > { %v5194_v6 = vsub.f32 %v5752_v41, %v4945_v23  ;;  %5757 = vst [vmem:[#allocation8_spill] sm:$0xff] %v5206_v10  ;;  %v5758_v41 = vld [vmem:[#allocation9_spill] sm:$0xff] }
 0x359   : > { %v2634_v61 = vadd.f32 %v2633_v35, %v2571_v18  ;;  %v2576_v18 = vmul.f32 %v5182_v40, %v5182_v40  ;;  %v5212_v40 = vsub.f32 %v5758_v41, %v4945_v23  ;;  %v5764_v41 = vld [vmem:[#allocation12_spill] sm:$0xff] }
 0x35a   : > { %5753 = vst [vmem:[#allocation6_spill] sm:$0xff] %v5194_v6 }
 0x35b   : > { %v2635_v14 = vadd.f32 %v2634_v61, %v2572_v20  ;;  %v2577_v20 = vmul.f32 %v5188_v13, %v5188_v13  ;;  %5759 = vst [vmem:[#allocation9_spill] sm:$0xff] %v5212_v40  ;;  %v5218_v13 = vsub.f32 %v5760_v12, %v4945_v23  ;;  %v5766_v12 = vld [vmem:[#allocation13_spill] sm:$0xff] }
 0x35d   : > { %v2636_v16 = vadd.f32 %v2635_v14, %v2573_v22  ;;  %v2578_v22 = vmul.f32 %v5194_v6, %v5194_v6  ;;  %5761 = vst [vmem:[#allocation10_spill] sm:$0xff] %v5218_v13  ;;  %v5224_v6 = vsub.f32 %v5762_v7, %v4945_v23  ;;  %v5768_v7 = vld [vmem:[#allocation14_spill] sm:$0xff] }
 0x35f   : > { %v2637_v35 = vadd.f32 %v2636_v16, %v2574_v24  ;;  %v2579_v24 = vmul.f32 %v5200_v8, %v5200_v8  ;;  %5763 = vst [vmem:[#allocation11_spill] sm:$0xff] %v5224_v6  ;;  %v5230_v8 = vsub.f32 %v5764_v41, %v4945_v23  ;;  %v5769_v41 = vld [vmem:[#allocation15_spill] sm:$0xff] }
 0x361   : > { %v2638_v61 = vadd.f32 %v2637_v35, %v2575_v26  ;;  %v2580_v26 = vmul.f32 %v5206_v10, %v5206_v10  ;;  %5765 = vst [vmem:[#allocation12_spill] sm:$0xff] %v5230_v8  ;;  %v5236_v10 = vsub.f32 %v5766_v12, %v4945_v23  ;;  %v5771_v12 = vld [vmem:[#allocation16_spill] sm:$0xff] }
 0x363   : > { %v2639_v14 = vadd.f32 %v2638_v61, %v2576_v18  ;;  %v2581_v18 = vmul.f32 %v5212_v40, %v5212_v40  ;;  %5767 = vst [vmem:[#allocation13_spill] sm:$0xff] %v5236_v10  ;;  %v5242_v40 = vsub.f32 %v5768_v7, %v4945_v23  ;;  %v5772_v7 = vld [vmem:[#allocation17_spill] sm:$0xff] }
 0x365   : > { %v2640_v16 = vadd.f32 %v2639_v14, %v2577_v20  ;;  %v2582_v20 = vmul.f32 %v5218_v13, %v5218_v13  ;;  %v5248_v13 = vsub.f32 %v5769_v41, %v4945_v23  ;;  %v5773_v41 = vld [vmem:[#allocation18_spill] sm:$0xff] }
 0x367   : > { %v2641_v35 = vadd.f32 %v2640_v16, %v2578_v22  ;;  %v2583_v22 = vmul.f32 %v5224_v6, %v5224_v6  ;;  %5770 = vst [vmem:[#allocation14_spill] sm:$0xff] %v5248_v13  ;;  %v5254_v6 = vsub.f32 %v5771_v12, %v4945_v23 }
 0x369   : > { %v2642_v61 = vadd.f32 %v2641_v35, %v2579_v24  ;;  %v2584_v24 = vmul.f32 %v5230_v8, %v5230_v8  ;;  %v5260_v8 = vsub.f32 %v5772_v7, %v4945_v23 }
 0x36b   : > { %v2643_v14 = vadd.f32 %v2642_v61, %v2580_v26  ;;  %v2585_v26 = vmul.f32 %v5236_v10, %v5236_v10  ;;  %v5266_v10 = vsub.f32 %v5773_v41, %v4945_v23  ;;  %v2589_v12 = vmul.f32 %v5260_v8, %v5260_v8 }
 0x36c   : > { %v2592_v23 = vmul.f32 %v4951_v31, %v4951_v31  ;;  %v2593_v41 = vmul.f32 %v4954_v39, %v4954_v39 }
 0x36d   : > { %v2644_v16 = vadd.f32 %v2643_v14, %v2581_v18  ;;  %v2586_v18 = vmul.f32 %v5242_v40, %v5242_v40 }
 0x36f   : > { %v2645_v35 = vadd.f32 %v2644_v16, %v2582_v20  ;;  %v2587_v20 = vmul.f32 %v5248_v13, %v5248_v13  ;;  %v2591_v13 = vmul.f32 %v4948_v27, %v4948_v27 }
 0x371   : > { %v2646_v61 = vadd.f32 %v2645_v35, %v2583_v22  ;;  %v2588_v22 = vmul.f32 %v5254_v6, %v5254_v6 }
 0x373   : > { %v2647_v14 = vadd.f32 %v2646_v61, %v2584_v24  ;;  %v2590_v61 = vmul.f32 %v5266_v10, %v5266_v10 }
 0x375   : > { %v2648_v16 = vadd.f32 %v2647_v14, %v2585_v26 }
 0x377   : > { %v2649_v35 = vadd.f32 %v2648_v16, %v2586_v18  ;;  %v2594_v16 = vmul.f32 %v4957_v47, %v4957_v47 }
 0x379   : > { %v2650_v24 = vadd.f32 %v2649_v35, %v2587_v20  ;;  %v2595_v35 = vmul.f32 %v4960_v37, %v4960_v37 }
 0x37b   : > { %v2651_v7 = vadd.f32 %v2650_v24, %v2588_v22  ;;  %v2596_v24 = vmul.f32 %v4963_v32, %v4963_v32 }
 0x37d   : > { %v2652_v26 = vadd.f32 %v2651_v7, %v2589_v12  ;;  %v2597_v7 = vmul.f32 %v4966_v28, %v4966_v28 }
 0x37f   : > { %v2653_v14 = vadd.f32 %v2652_v26, %v2590_v61  ;;  %v2598_v26 = vmul.f32 %v4969_v30, %v4969_v30 }
 0x381   : > { %v2654_v18 = vadd.f32 %v2653_v14, %v2591_v13  ;;  %v2599_v14 = vmul.f32 %v4972_v21, %v4972_v21 }
 0x383   : > { %v2655_v20 = vadd.f32 %v2654_v18, %v2592_v23  ;;  %v2600_v18 = vmul.f32 %v4975_v25, %v4975_v25 }
 0x385   : > { %v2656_v22 = vadd.f32 %v2655_v20, %v2593_v41  ;;  %v2601_v20 = vmul.f32 %v4978_v29, %v4978_v29 }
 0x387   : > { %v2657_v12 = vadd.f32 %v2656_v22, %v2594_v16  ;;  %v2602_v22 = vmul.f32 %v4981_v33, %v4981_v33 }
 0x389   : > { %v2658_v61 = vadd.f32 %v2657_v12, %v2595_v35  ;;  %v2603_v12 = vmul.f32 %v4984_v43, %v4984_v43 }
 0x38b   : > { %v2659_v13 = vadd.f32 %v2658_v61, %v2596_v24  ;;  %v2604_v61 = vmul.f32 %v4987_v51, %v4987_v51 }
 0x38d   : > { %v2660_v23 = vadd.f32 %v2659_v13, %v2597_v7  ;;  %v2605_v13 = vmul.f32 %v4990_v59, %v4990_v59 }
 0x38f   : > { %v2661_v41 = vadd.f32 %v2660_v23, %v2598_v26  ;;  %v2606_v23 = vmul.f32 %v4993_v3, %v4993_v3 }
 0x391   : > { %v2662_v16 = vadd.f32 %v2661_v41, %v2599_v14  ;;  %v2607_v41 = vmul.f32 %v4996_v11, %v4996_v11 }
 0x393   : > { %v2663_v35 = vadd.f32 %v2662_v16, %v2600_v18  ;;  %v2608_v16 = vmul.f32 %v4999_v5, %v4999_v5 }
 0x395   : > { %v2664_v24 = vadd.f32 %v2663_v35, %v2601_v20  ;;  %v2609_v35 = vmul.f32 %v5002_v17, %v5002_v17 }
 0x397   : > { %v2665_v7 = vadd.f32 %v2664_v24, %v2602_v22 }
 0x399   : > { %v2666_v26 = vadd.f32 %v2665_v7, %v2603_v12 }
 0x39b   : > { %v2667_v14 = vadd.f32 %v2666_v26, %v2604_v61 }
 0x39d   : > { %v2668_v18 = vadd.f32 %v2667_v14, %v2605_v13 }
 0x39f   : > { %v2669_v20 = vadd.f32 %v2668_v18, %v2606_v23  ;;  %v5317_v23 = vld [vmem:[%s5688_s2] ss:$0 sm:$0xff] }
 0x3a1   : > { %v2670_v22 = vadd.f32 %v2669_v20, %v2607_v41 }
 0x3a3   : > { %v2671_v24 = vadd.f32 %v2670_v22, %v2608_v16 }
 0x3a5   : > { %v2672_v51 = vadd.f32 %v2671_v24, %v2609_v35 }
 0x3a7   : > { %v2673_v59 = vrot.slane %v2672_v51, 4 }
 0x3a9   : > { %v2674_v12 = vadd.f32 %v2673_v59, %v2672_v51 }
 0x3ab   : > { %v2675_v7 = vrot.slane %v2674_v12, 2 }
 0x3ad   : > { %v2676_v43 = vadd.f32 %v2675_v7, %v2674_v12 }
 0x3af   : > { %v2677_v3 = vrot.slane %v2676_v43, 1 }
 0x3b1   : > { %v2678_v61 = vadd.f32 %v2677_v3, %v2676_v43 }
 0x3b3   : > { %v2679_v26 = vmul.f32 0.001953125, %v2678_v61 }
 0x3b5   : > { %v2680_v33 = vadd.f32 1e-05, %v2679_v26 }
 0x3b7   : > { %4192 = vrsqrt.f32 %v2680_v33  ;;  %v5330_v33 = vld [vmem:[%s5689_s3] ss:$0 sm:$0xff] }
 0x3c1   : > { %v5312_v13 = vpop.eup %4192 }
 0x3c2   : > { %v2682_v14 = vmul.f32 %v5312_v13, %v5006_v1  ;;  %v2683_v51 = vmul.f32 %v5312_v13, %v5010_v57  ;;  %v2684_v59 = vmul.f32 %v5312_v13, %v5014_v53  ;;  %v2685_v43 = vmul.f32 %v5312_v13, %v5018_v49 }
 0x3c3   : > { %v2686_v3 = vmul.f32 %v5312_v13, %v5026_v34  ;;  %v2687_v1 = vmul.f32 %v5312_v13, %v5032_v36  ;;  %v2688_v57 = vmul.f32 %v5312_v13, %v5038_v15  ;;  %v2689_v53 = vmul.f32 %v5312_v13, %v5044_v63 }
 0x3c4   : > { %v2753_v41 = vmul.f32 %v5317_v23, %v2682_v14  ;;  %v2754_v49 = vmul.f32 %v5317_v23, %v2683_v51  ;;  %v2755_v18 = vmul.f32 %v5317_v23, %v2684_v59  ;;  %v2756_v16 = vmul.f32 %v5317_v23, %v2685_v43 }
 0x3c5   : > { %v2757_v20 = vmul.f32 %v5317_v23, %v2686_v3  ;;  %v2758_v34 = vmul.f32 %v5317_v23, %v2687_v1  ;;  %v2759_v36 = vmul.f32 %v5317_v23, %v2688_v57  ;;  %v2760_v35 = vmul.f32 %v5317_v23, %v2689_v53 }
 0x3c6   : > { %v2824_v15 = vadd.f32 %v5330_v33, %v2753_v41  ;;  %v2825_v63 = vadd.f32 %v5330_v33, %v2754_v49  ;;  %v2826_v22 = vadd.f32 %v5330_v33, %v2755_v18  ;;  %v2827_v24 = vadd.f32 %v5330_v33, %v2756_v16 }
 0x3c7   : > { %v2828_v12 = vadd.f32 %v5330_v33, %v2757_v20  ;;  %v2829_v7 = vadd.f32 %v5330_v33, %v2758_v34  ;;  %v2830_v61 = vadd.f32 %v5330_v33, %v2759_v36  ;;  %v2831_v26 = vadd.f32 %v5330_v33, %v2760_v35 }
 0x3c8   : > { %vm2888_vm0 = vcmp.gt.f32.partialorder %v2824_v15, 0.0  ;;  %vm2889_vm1 = vcmp.gt.f32.partialorder %v2825_v63, 0.0  ;;  %v2952_v14 = vmul.f32 0.2, %v2824_v15  ;;  %v2953_v51 = vmul.f32 0.2, %v2825_v63 }
 0x3c9   : > { %vm2890_vm2 = vcmp.gt.f32.partialorder %v2826_v22, 0.0  ;;  %vm2891_vm3 = vcmp.gt.f32.partialorder %v2827_v24, 0.0  ;;  %v2954_v59 = vmul.f32 0.2, %v2826_v22  ;;  %v2955_v43 = vmul.f32 0.2, %v2827_v24 }
 0x3ca   : > { %v3016_v3 = vsel %vm2888_vm0, %v2824_v15, %v2952_v14  ;;  %v3017_v1 = vsel %vm2889_vm1, %v2825_v63, %v2953_v51  ;;  %vm2892_vm4 = vcmp.gt.f32.partialorder %v2828_v12, 0.0  ;;  %vm2893_vm5 = vcmp.gt.f32.partialorder %v2829_v7, 0.0 }
 0x3cb   : > { %v3754_v57 = vpack.c.bf16 %v3017_v1, %v3016_v3  ;;  %v3018_v53 = vsel %vm2890_vm2, %v2826_v22, %v2954_v59  ;;  %v3019_v41 = vsel %vm2891_vm3, %v2827_v24, %v2955_v43  ;;  %v2956_v49 = vmul.f32 0.2, %v2828_v12 }
 0x3cc   : > { %v3759_v18 = vpack.c.bf16 %v3019_v41, %v3018_v53  ;;  %v2957_v16 = vmul.f32 0.2, %v2829_v7  ;;  %vm2894_vm6 = vcmp.gt.f32.partialorder %v2830_v61, 0.0  ;;  %vm2895_vm7 = vcmp.gt.f32.partialorder %v2831_v26, 0.0 }
 0x3cd   : > { %3755 = vst [vmem:[%s5690_s4] sm:$0xff] %v3754_v57   ;;  %v3020_v20 = vsel %vm2892_vm4, %v2828_v12, %v2956_v49  ;;  %v2958_v34 = vmul.f32 0.2, %v2830_v61  ;;  %v2959_v36 = vmul.f32 0.2, %v2831_v26  ;;  %v2690_v35 = vmul.f32 %v5312_v13, %v5050_v9 }
 0x3ce   : > { %3911 = vst [vmem:[%s5690_s4 + $0x8] sm:$0xff] %v3759_v18   ;;  %v3021_v15 = vsel %vm2893_vm5, %v2829_v7, %v2957_v16  ;;  %v2691_v63 = vmul.f32 %v5312_v13, %v5056_v19  ;;  %v2692_v22 = vmul.f32 %v5312_v13, %v5062_v45  ;;  %v2693_v24 = vmul.f32 %v5312_v13, %v5068_v38 }
 0x3cf   : > { %v3764_v12 = vpack.c.bf16 %v3021_v15, %v3020_v20  ;;  %v3022_v14 = vsel %vm2894_vm6, %v2830_v61, %v2958_v34  ;;  %v3023_v51 = vsel %vm2895_vm7, %v2831_v26, %v2959_v36  ;;  %v2761_v59 = vmul.f32 %v5317_v23, %v2690_v35 }
 0x3d0   : > { %v3769_v9 = vpack.c.bf16 %v3023_v51, %v3022_v14  ;;  %v2762_v43 = vmul.f32 %v5317_v23, %v2691_v63  ;;  %v2763_v3 = vmul.f32 %v5317_v23, %v2692_v22  ;;  %v2764_v7 = vmul.f32 %v5317_v23, %v2693_v24 }
 0x3d1   : > { %3912 = vst [vmem:[%s5690_s4 + $0x10] sm:$0xff] %v3764_v12   ;;  %v2832_v19 = vadd.f32 %v5330_v33, %v2761_v59  ;;  %v2694_v45 = vmul.f32 %v5312_v13, %v5074_v55  ;;  %v2695_v38 = vmul.f32 %v5312_v13, %v5080_v42  ;;  %v2696_v61 = vmul.f32 %v5312_v13, %v5086_v44 }
 0x3d2   : > { %3913 = vst [vmem:[%s5690_s4 + $0x18] sm:$0xff] %v3769_v9   ;;  %v2833_v26 = vadd.f32 %v5330_v33, %v2762_v43  ;;  %v2834_v1 = vadd.f32 %v5330_v33, %v2763_v3  ;;  %v2835_v57 = vadd.f32 %v5330_v33, %v2764_v7  ;;  %v2697_v53 = vmul.f32 %v5312_v13, %v5092_v46 }
 0x3d3   : > { %vm2896_vm8 = vcmp.gt.f32.partialorder %v2832_v19, 0.0  ;;  %v2960_v55 = vmul.f32 0.2, %v2832_v19  ;;  %v2765_v42 = vmul.f32 %v5317_v23, %v2694_v45  ;;  %v2766_v41 = vmul.f32 %v5317_v23, %v2695_v38 }
 0x3d4   : > { %vm2897_vm9 = vcmp.gt.f32.partialorder %v2833_v26, 0.0  ;;  %v2961_v44 = vmul.f32 0.2, %v2833_v26  ;;  %vm2898_vm10 = vcmp.gt.f32.partialorder %v2834_v1, 0.0  ;;  %vm2899_vm11 = vcmp.gt.f32.partialorder %v2835_v57, 0.0 }
 0x3d5   : > { %v3024_v49 = vsel %vm2896_vm8, %v2832_v19, %v2960_v55  ;;  %v2962_v18 = vmul.f32 0.2, %v2834_v1  ;;  %v2963_v16 = vmul.f32 0.2, %v2835_v57  ;;  %v2836_v20 = vadd.f32 %v5330_v33, %v2765_v42 }
 0x3d6   : > { %v3025_v34 = vsel %vm2897_vm9, %v2833_v26, %v2961_v44  ;;  %v2837_v36 = vadd.f32 %v5330_v33, %v2766_v41  ;;  %v2767_v46 = vmul.f32 %v5317_v23, %v2696_v61  ;;  %v2768_v35 = vmul.f32 %v5317_v23, %v2697_v53 }
 0x3d7   : > { %v3774_v15 = vpack.c.bf16 %v3025_v34, %v3024_v49  ;;  %v3026_v63 = vsel %vm2898_vm10, %v2834_v1, %v2962_v18  ;;  %v3027_v22 = vsel %vm2899_vm11, %v2835_v57, %v2963_v16  ;;  %vm2900_vm12 = vcmp.gt.f32.partialorder %v2836_v20, 0.0 }
 0x3d8   : > { %v3779_v24 = vpack.c.bf16 %v3027_v22, %v3026_v63  ;;  %vm2901_vm13 = vcmp.gt.f32.partialorder %v2837_v36, 0.0  ;;  %v2964_v12 = vmul.f32 0.2, %v2836_v20  ;;  %v2965_v14 = vmul.f32 0.2, %v2837_v36 }
 0x3d9   : > { %3914 = vst [vmem:[%s5690_s4 + $0x20] sm:$0xff] %v3774_v15   ;;  %v2838_v51 = vadd.f32 %v5330_v33, %v2767_v46  ;;  %v2839_v59 = vadd.f32 %v5330_v33, %v2768_v35  ;;  %v2698_v9 = vmul.f32 %v5312_v13, %v5098_v48  ;;  %v2699_v43 = vmul.f32 %v5312_v13, %v5104_v50 }
 0x3da   : > { %3915 = vst [vmem:[%s5690_s4 + $0x28] sm:$0xff] %v3779_v24   ;;  %v3028_v3 = vsel %vm2900_vm12, %v2836_v20, %v2964_v12  ;;  %v3029_v7 = vsel %vm2901_vm13, %v2837_v36, %v2965_v14  ;;  %v2700_v19 = vmul.f32 %v5312_v13, %v5110_v52  ;;  %v2701_v45 = vmul.f32 %v5312_v13, %v5116_v54 }
 0x3db   : > { %v3784_v38 = vpack.c.bf16 %v3029_v7, %v3028_v3  ;;  %vm2902_vm14 = vcmp.gt.f32.partialorder %v2838_v51, 0.0  ;;  %vm2903_vm15 = vcmp.gt.f32.partialorder %v2839_v59, 0.0  ;;  %v2966_v61 = vmul.f32 0.2, %v2838_v51 }
 0x3dc   : > { %v2967_v48 = vmul.f32 0.2, %v2839_v59  ;;  %v2769_v26 = vmul.f32 %v5317_v23, %v2698_v9  ;;  %v2770_v50 = vmul.f32 %v5317_v23, %v2699_v43  ;;  %v2771_v1 = vmul.f32 %v5317_v23, %v2700_v19 }
 0x3dd   : > { %3916 = vst [vmem:[%s5690_s4 + $0x30] sm:$0xff] %v3784_v38   ;;  %v3030_v57 = vsel %vm2902_vm14, %v2838_v51, %v2966_v61  ;;  %v2772_v52 = vmul.f32 %v5317_v23, %v2701_v45  ;;  %v2702_v54 = vmul.f32 %v5312_v13, %v5122_v56  ;;  %v2703_v53 = vmul.f32 %v5312_v13, %v5128_v58  ;;  %v5774_v38 = vld [vmem:[#allocation24_spill] sm:$0xff] }
 0x3de   : > { %v3031_v55 = vsel %vm2903_vm15, %v2839_v59, %v2967_v48  ;;  %v2840_v42 = vadd.f32 %v5330_v33, %v2769_v26  ;;  %v2841_v41 = vadd.f32 %v5330_v33, %v2770_v50  ;;  %v2842_v44 = vadd.f32 %v5330_v33, %v2771_v1 }
 0x3df   : > { %v3789_v49 = vpack.c.bf16 %v3031_v55, %v3030_v57  ;;  %v2843_v18 = vadd.f32 %v5330_v33, %v2772_v52  ;;  %v2773_v16 = vmul.f32 %v5317_v23, %v2702_v54  ;;  %v2774_v20 = vmul.f32 %v5317_v23, %v2703_v53 }
 0x3e0   : > { %vm2904_vm0 = vcmp.gt.f32.partialorder %v2840_v42, 0.0  ;;  %vm2905_vm1 = vcmp.gt.f32.partialorder %v2841_v41, 0.0  ;;  %v2968_v56 = vmul.f32 0.2, %v2840_v42  ;;  %v2969_v34 = vmul.f32 0.2, %v2841_v41 }
 0x3e1   : > { %3917 = vst [vmem:[%s5690_s4 + $0x38] sm:$0xff] %v3789_v49   ;;  %vm2906_vm2 = vcmp.gt.f32.partialorder %v2842_v44, 0.0  ;;  %vm2907_vm3 = vcmp.gt.f32.partialorder %v2843_v18, 0.0  ;;  %v2970_v58 = vmul.f32 0.2, %v2842_v44  ;;  %v2844_v15 = vadd.f32 %v5330_v33, %v2773_v16 }
 0x3e2   : > { %v2971_v36 = vmul.f32 0.2, %v2843_v18  ;;  %v3032_v46 = vsel %vm2904_vm0, %v2840_v42, %v2968_v56  ;;  %v3033_v35 = vsel %vm2905_vm1, %v2841_v41, %v2969_v34  ;;  %v2845_v63 = vadd.f32 %v5330_v33, %v2774_v20  ;;  %v5775_v41 = vld [vmem:[#allocation25_spill] sm:$0xff] }
 0x3e3   : > { %v3794_v22 = vpack.c.bf16 %v3033_v35, %v3032_v46  ;;  %v3034_v24 = vsel %vm2906_vm2, %v2842_v44, %v2970_v58  ;;  %v2704_v14 = vmul.f32 %v5312_v13, %v5134_v60  ;;  %vm2908_vm4 = vcmp.gt.f32.partialorder %v2844_v15, 0.0 }
 0x3e4   : > { %v3035_v12 = vsel %vm2907_vm3, %v2843_v18, %v2971_v36  ;;  %vm2909_vm5 = vcmp.gt.f32.partialorder %v2845_v63, 0.0  ;;  %v2972_v59 = vmul.f32 0.2, %v2844_v15  ;;  %v2973_v9 = vmul.f32 0.2, %v2845_v63 }
 0x3e5   : > { %v3799_v51 = vpack.c.bf16 %v3035_v12, %v3034_v24  ;;  %3918 = vst [vmem:[%s5690_s4 + $0x40] sm:$0xff] %v3794_v22   ;;  %v2705_v43 = vmul.f32 %v5312_v13, %v5140_v62  ;;  %v2775_v3 = vmul.f32 %v5317_v23, %v2704_v14  ;;  %v2706_v7 = vmul.f32 %v5312_v13, %v5146_v0 }
 0x3e6   : > { %v3036_v60 = vsel %vm2908_vm4, %v2844_v15, %v2972_v59  ;;  %v2707_v19 = vmul.f32 %v5312_v13, %v5152_v2  ;;  %v2708_v45 = vmul.f32 %v5312_v13, %v5158_v4  ;;  %v2709_v61 = vmul.f32 %v5312_v13, %v5774_v38  ;;  %v5776_v15 = vld [vmem:[#allocation26_spill] sm:$0xff]  ;;  %v5780_v38 = vld [vmem:[#allocation7_spill] sm:$0xff] }
 0x3e7   : > { %3919 = vst [vmem:[%s5690_s4 + $0x48] sm:$0xff] %v3799_v51   ;;  %v3037_v62 = vsel %vm2909_vm5, %v2845_v63, %v2973_v9  ;;  %v2776_v48 = vmul.f32 %v5317_v23, %v2705_v43  ;;  %v2846_v26 = vadd.f32 %v5330_v33, %v2775_v3  ;;  %v2777_v0 = vmul.f32 %v5317_v23, %v2706_v7  ;;  %v5777_v9 = vld [vmem:[#allocation4_spill] sm:$0xff]  ;;  %v5778_v3 = vld [vmem:[#allocation5_spill] sm:$0xff] }
 0x3e8   : > { %v3804_v50 = vpack.c.bf16 %v3037_v62, %v3036_v60  ;;  %v2778_v1 = vmul.f32 %v5317_v23, %v2707_v19  ;;  %v2779_v57 = vmul.f32 %v5317_v23, %v2708_v45  ;;  %v2780_v2 = vmul.f32 %v5317_v23, %v2709_v61  ;;  %v5779_v19 = vld [vmem:[#allocation6_spill] sm:$0xff]  ;;  %v5781_v62 = vld [vmem:[#allocation8_spill] sm:$0xff] }
 0x3e9   : > { %v2847_v52 = vadd.f32 %v5330_v33, %v2776_v48  ;;  %vm2910_vm6 = vcmp.gt.f32.partialorder %v2846_v26, 0.0  ;;  %v2974_v4 = vmul.f32 0.2, %v2846_v26  ;;  %v2848_v54 = vadd.f32 %v5330_v33, %v2777_v0 }
 0x3ea   : > { %3920 = vst [vmem:[%s5690_s4 + $0x50] sm:$0xff] %v3804_v50   ;;  %v2849_v53 = vadd.f32 %v5330_v33, %v2778_v1  ;;  %v2850_v55 = vadd.f32 %v5330_v33, %v2779_v57  ;;  %v2851_v42 = vadd.f32 %v5330_v33, %v2780_v2  ;;  %v2710_v44 = vmul.f32 %v5312_v13, %v5775_v41  ;;  %v5782_v1 = vld [vmem:[#allocation9_spill] sm:$0xff] }
 0x3eb   : > { %vm2911_vm7 = vcmp.gt.f32.partialorder %v2847_v52, 0.0  ;;  %v2975_v49 = vmul.f32 0.2, %v2847_v52  ;;  %v3038_v18 = vsel %vm2910_vm6, %v2846_v26, %v2974_v4  ;;  %vm2912_vm8 = vcmp.gt.f32.partialorder %v2848_v54, 0.0 }
 0x3ec   : > { %vm2913_vm9 = vcmp.gt.f32.partialorder %v2849_v53, 0.0  ;;  %v2976_v16 = vmul.f32 0.2, %v2848_v54  ;;  %v2977_v20 = vmul.f32 0.2, %v2849_v53  ;;  %vm2914_vm10 = vcmp.gt.f32.partialorder %v2850_v55, 0.0 }
 0x3ed   : > { %v3039_v56 = vsel %vm2911_vm7, %v2847_v52, %v2975_v49  ;;  %vm2915_vm11 = vcmp.gt.f32.partialorder %v2851_v42, 0.0  ;;  %v2978_v34 = vmul.f32 0.2, %v2850_v55  ;;  %v2979_v58 = vmul.f32 0.2, %v2851_v42 }
 0x3ee   : > { %v3809_v36 = vpack.c.bf16 %v3039_v56, %v3038_v18  ;;  %v3040_v46 = vsel %vm2912_vm8, %v2848_v54, %v2976_v16  ;;  %v3041_v35 = vsel %vm2913_vm9, %v2849_v53, %v2977_v20  ;;  %v2711_v63 = vmul.f32 %v5312_v13, %v5776_v15 }
 0x3ef   : > { %v3814_v22 = vpack.c.bf16 %v3041_v35, %v3040_v46  ;;  %v3042_v24 = vsel %vm2914_vm10, %v2850_v55, %v2978_v34  ;;  %v3043_v12 = vsel %vm2915_vm11, %v2851_v42, %v2979_v58  ;;  %v2781_v14 = vmul.f32 %v5317_v23, %v2710_v44 }
 0x3f0   : > { %3921 = vst [vmem:[%s5690_s4 + $0x58] sm:$0xff] %v3809_v36   ;;  %v3819_v51 = vpack.c.bf16 %v3043_v12, %v3042_v24  ;;  %v2782_v59 = vmul.f32 %v5317_v23, %v2711_v63  ;;  %v2712_v43 = vmul.f32 %v5312_v13, %v5777_v9  ;;  %v2713_v7 = vmul.f32 %v5312_v13, %v5778_v3  ;;  %v5783_v63 = vld [vmem:[#allocation10_spill] sm:$0xff]  ;;  %v5784_v24 = vld [vmem:[#allocation11_spill] sm:$0xff] }
 0x3f1   : > { %3922 = vst [vmem:[%s5690_s4 + $0x60] sm:$0xff] %v3814_v22   ;;  %v2852_v60 = vadd.f32 %v5330_v33, %v2781_v14  ;;  %v2714_v45 = vmul.f32 %v5312_v13, %v5779_v19  ;;  %v2715_v61 = vmul.f32 %v5312_v13, %v5780_v38  ;;  %v2716_v48 = vmul.f32 %v5312_v13, %v5781_v62 }
 0x3f2   : > { %3923 = vst [vmem:[%s5690_s4 + $0x68] sm:$0xff] %v3819_v51   ;;  %v2853_v26 = vadd.f32 %v5330_v33, %v2782_v59  ;;  %v2783_v0 = vmul.f32 %v5317_v23, %v2712_v43  ;;  %v2784_v50 = vmul.f32 %v5317_v23, %v2713_v7  ;;  %v2717_v57 = vmul.f32 %v5312_v13, %v5782_v1 }
 0x3f3   : > { %vm2916_vm12 = vcmp.gt.f32.partialorder %v2852_v60, 0.0  ;;  %v2980_v2 = vmul.f32 0.2, %v2852_v60  ;;  %v2785_v52 = vmul.f32 %v5317_v23, %v2714_v45  ;;  %v2786_v4 = vmul.f32 %v5317_v23, %v2715_v61  ;;  %v5785_v45 = vld [vmem:[#allocation12_spill] sm:$0xff] }
 0x3f4   : > { %vm2917_vm13 = vcmp.gt.f32.partialorder %v2853_v26, 0.0  ;;  %v2981_v54 = vmul.f32 0.2, %v2853_v26  ;;  %v2854_v53 = vadd.f32 %v5330_v33, %v2783_v0  ;;  %v2855_v55 = vadd.f32 %v5330_v33, %v2784_v50 }
 0x3f5   : > { %v3044_v42 = vsel %vm2916_vm12, %v2852_v60, %v2980_v2  ;;  %v2856_v41 = vadd.f32 %v5330_v33, %v2785_v52  ;;  %v2857_v44 = vadd.f32 %v5330_v33, %v2786_v4  ;;  %v2787_v49 = vmul.f32 %v5317_v23, %v2716_v48  ;;  %v5786_v48 = vld [vmem:[#allocation13_spill] sm:$0xff]  ;;  %v5787_v2 = vld [vmem:[#allocation14_spill] sm:$0xff] }
 0x3f6   : > { %v3045_v18 = vsel %vm2917_vm13, %v2853_v26, %v2981_v54  ;;  %vm2918_vm14 = vcmp.gt.f32.partialorder %v2854_v53, 0.0  ;;  %vm2919_vm15 = vcmp.gt.f32.partialorder %v2855_v55, 0.0  ;;  %v2982_v16 = vmul.f32 0.2, %v2854_v53 }
 0x3f7   : > { %v3824_v20 = vpack.c.bf16 %v3045_v18, %v3044_v42  ;;  %v2983_v56 = vmul.f32 0.2, %v2855_v55  ;;  %vm2920_vm0 = vcmp.gt.f32.partialorder %v2856_v41, 0.0  ;;  %vm2921_vm1 = vcmp.gt.f32.partialorder %v2857_v44, 0.0 }
 0x3f8   : > { %v3046_v34 = vsel %vm2918_vm14, %v2854_v53, %v2982_v16  ;;  %v2984_v58 = vmul.f32 0.2, %v2856_v41  ;;  %v2985_v36 = vmul.f32 0.2, %v2857_v44  ;;  %v2788_v46 = vmul.f32 %v5317_v23, %v2717_v57 }
 0x3f9   : > { %3924 = vst [vmem:[%s5690_s4 + $0x70] sm:$0xff] %v3824_v20   ;;  %v3047_v35 = vsel %vm2919_vm15, %v2855_v55, %v2983_v56  ;;  %v2858_v15 = vadd.f32 %v5330_v33, %v2787_v49  ;;  %v2718_v22 = vmul.f32 %v5312_v13, %v5783_v63  ;;  %v2719_v12 = vmul.f32 %v5312_v13, %v5784_v24 }
 0x3fa   : > { %v3829_v14 = vpack.c.bf16 %v3047_v35, %v3046_v34  ;;  %v3048_v51 = vsel %vm2920_vm0, %v2856_v41, %v2984_v58  ;;  %v3049_v59 = vsel %vm2921_vm1, %v2857_v44, %v2985_v36  ;;  %v2859_v9 = vadd.f32 %v5330_v33, %v2788_v46 }
 0x3fb   : > { %v3834_v43 = vpack.c.bf16 %v3049_v59, %v3048_v51  ;;  %vm2922_vm2 = vcmp.gt.f32.partialorder %v2858_v15, 0.0  ;;  %v2986_v3 = vmul.f32 0.2, %v2858_v15  ;;  %v2789_v7 = vmul.f32 %v5317_v23, %v2718_v22 }
 0x3fc   : > { %3925 = vst [vmem:[%s5690_s4 + $0x78] sm:$0xff] %v3829_v14   ;;  %vm2923_vm3 = vcmp.gt.f32.partialorder %v2859_v9, 0.0  ;;  %v2987_v60 = vmul.f32 0.2, %v2859_v9  ;;  %v2790_v19 = vmul.f32 %v5317_v23, %v2719_v12  ;;  %v2720_v38 = vmul.f32 %v5312_v13, %v5785_v45 }
 0x3fd   : > { %3926 = vst [vmem:[%s5690_s4 + $0x80] sm:$0xff] %v3834_v43   ;;  %v3050_v61 = vsel %vm2922_vm2, %v2858_v15, %v2986_v3  ;;  %v2860_v62 = vadd.f32 %v5330_v33, %v2789_v7  ;;  %v2721_v26 = vmul.f32 %v5312_v13, %v5786_v48  ;;  %v2722_v0 = vmul.f32 %v5312_v13, %v5242_v40 }
 0x3fe   : > { %v3051_v50 = vsel %vm2923_vm3, %v2859_v9, %v2987_v60  ;;  %v2861_v1 = vadd.f32 %v5330_v33, %v2790_v19  ;;  %v2791_v57 = vmul.f32 %v5317_v23, %v2720_v38  ;;  %v2723_v52 = vmul.f32 %v5312_v13, %v5787_v2 }
 0x3ff   : > { %v3839_v4 = vpack.c.bf16 %v3051_v50, %v3050_v61  ;;  %vm2924_vm4 = vcmp.gt.f32.partialorder %v2860_v62, 0.0  ;;  %v2988_v54 = vmul.f32 0.2, %v2860_v62  ;;  %v2792_v53 = vmul.f32 %v5317_v23, %v2721_v26 }
 0x400   : > { %vm2925_vm5 = vcmp.gt.f32.partialorder %v2861_v1, 0.0  ;;  %v2989_v55 = vmul.f32 0.2, %v2861_v1  ;;  %v2862_v42 = vadd.f32 %v5330_v33, %v2791_v57  ;;  %v2793_v41 = vmul.f32 %v5317_v23, %v2722_v0 }
 0x401   : > { %3927 = vst [vmem:[%s5690_s4 + $0x88] sm:$0xff] %v3839_v4   ;;  %v3052_v40 = vsel %vm2924_vm4, %v2860_v62, %v2988_v54  ;;  %v2863_v44 = vadd.f32 %v5330_v33, %v2792_v53  ;;  %v2794_v49 = vmul.f32 %v5317_v23, %v2723_v52  ;;  %v2724_v18 = vmul.f32 %v5312_v13, %v5254_v6 }
 0x402   : > { %v3053_v16 = vsel %vm2925_vm5, %v2861_v1, %v2989_v55  ;;  %vm2926_vm6 = vcmp.gt.f32.partialorder %v2862_v42, 0.0  ;;  %v2990_v20 = vmul.f32 0.2, %v2862_v42  ;;  %v2864_v56 = vadd.f32 %v5330_v33, %v2793_v41 }
 0x403   : > { %v3844_v34 = vpack.c.bf16 %v3053_v16, %v3052_v40  ;;  %vm2927_vm7 = vcmp.gt.f32.partialorder %v2863_v44, 0.0  ;;  %v2991_v58 = vmul.f32 0.2, %v2863_v44  ;;  %v2865_v36 = vadd.f32 %v5330_v33, %v2794_v49 }
 0x404   : > { %v3054_v46 = vsel %vm2926_vm6, %v2862_v42, %v2990_v20  ;;  %vm2928_vm8 = vcmp.gt.f32.partialorder %v2864_v56, 0.0  ;;  %v2992_v35 = vmul.f32 0.2, %v2864_v56  ;;  %v2725_v15 = vmul.f32 %v5312_v13, %v5260_v8 }
 0x405   : > { %3928 = vst [vmem:[%s5690_s4 + $0x90] sm:$0xff] %v3844_v34   ;;  %v3055_v6 = vsel %vm2927_vm7, %v2863_v44, %v2991_v58  ;;  %vm2929_vm9 = vcmp.gt.f32.partialorder %v2865_v36, 0.0  ;;  %v2993_v63 = vmul.f32 0.2, %v2865_v36  ;;  %v2795_v22 = vmul.f32 %v5317_v23, %v2724_v18 }
 0x406   : > { %v3849_v24 = vpack.c.bf16 %v3055_v6, %v3054_v46  ;;  %v3056_v12 = vsel %vm2928_vm8, %v2864_v56, %v2992_v35  ;;  %v2796_v14 = vmul.f32 %v5317_v23, %v2725_v15  ;;  %v2726_v51 = vmul.f32 %v5312_v13, %v5266_v10 }
 0x407   : > { %v3057_v59 = vsel %vm2929_vm9, %v2865_v36, %v2993_v63  ;;  %v2866_v9 = vadd.f32 %v5330_v33, %v2795_v22  ;;  %v2727_v8 = vmul.f32 %v5312_v13, %v4948_v27  ;;  %v2728_v43 = vmul.f32 %v5312_v13, %v4951_v31 }
 0x408   : > { %3929 = vst [vmem:[%s5690_s4 + $0x98] sm:$0xff] %v3849_v24   ;;  %v3854_v3 = vpack.c.bf16 %v3057_v59, %v3056_v12  ;;  %v2867_v7 = vadd.f32 %v5330_v33, %v2796_v14  ;;  %v2797_v60 = vmul.f32 %v5317_v23, %v2726_v51  ;;  %v2729_v10 = vmul.f32 %v5312_v13, %v4954_v39 }
 0x409   : > { %vm2930_vm10 = vcmp.gt.f32.partialorder %v2866_v9, 0.0  ;;  %v2994_v19 = vmul.f32 0.2, %v2866_v9  ;;  %v2798_v45 = vmul.f32 %v5317_v23, %v2727_v8  ;;  %v2799_v27 = vmul.f32 %v5317_v23, %v2728_v43 }
 0x40a   : > { %3930 = vst [vmem:[%s5690_s4 + $0xa0] sm:$0xff] %v3854_v3   ;;  %vm2931_vm11 = vcmp.gt.f32.partialorder %v2867_v7, 0.0  ;;  %v2995_v31 = vmul.f32 0.2, %v2867_v7  ;;  %v2868_v38 = vadd.f32 %v5330_v33, %v2797_v60  ;;  %v2800_v61 = vmul.f32 %v5317_v23, %v2729_v10 }
 0x40b   : > { %v3058_v62 = vsel %vm2930_vm10, %v2866_v9, %v2994_v19  ;;  %v2869_v48 = vadd.f32 %v5330_v33, %v2798_v45  ;;  %v2870_v39 = vadd.f32 %v5330_v33, %v2799_v27  ;;  %v2730_v26 = vmul.f32 %v5312_v13, %v4957_v47  ;;  %v5788_v19 = vld [vmem:[#allocation19_spill] sm:$0xff]  ;;  %v5789_v27 = vld [vmem:[#allocation20_spill] sm:$0xff] }
 0x40c   : > { %v3059_v0 = vsel %vm2931_vm11, %v2867_v7, %v2995_v31  ;;  %vm2932_vm12 = vcmp.gt.f32.partialorder %v2868_v38, 0.0  ;;  %v2996_v50 = vmul.f32 0.2, %v2868_v38  ;;  %v2871_v1 = vadd.f32 %v5330_v33, %v2800_v61 }
 0x40d   : > { %v3859_v57 = vpack.c.bf16 %v3059_v0, %v3058_v62  ;;  %vm2933_vm13 = vcmp.gt.f32.partialorder %v2869_v48, 0.0  ;;  %v2997_v2 = vmul.f32 0.2, %v2869_v48  ;;  %vm2934_vm14 = vcmp.gt.f32.partialorder %v2870_v39, 0.0  ;;  %v5790_v62 = vld [vmem:[#allocation21_spill] sm:$0xff] }
 0x40e   : > { %v3060_v52 = vsel %vm2932_vm12, %v2868_v38, %v2996_v50  ;;  %vm2935_vm15 = vcmp.gt.f32.partialorder %v2871_v1, 0.0  ;;  %v2998_v4 = vmul.f32 0.2, %v2870_v39  ;;  %v2999_v54 = vmul.f32 0.2, %v2871_v1 }
 0x40f   : > { %3931 = vst [vmem:[%s5690_s4 + $0xa8] sm:$0xff] %v3859_v57   ;;  %v3061_v53 = vsel %vm2933_vm13, %v2869_v48, %v2997_v2  ;;  %v2731_v47 = vmul.f32 %v5312_v13, %v4960_v37  ;;  %v2801_v55 = vmul.f32 %v5317_v23, %v2730_v26  ;;  %v2732_v42 = vmul.f32 %v5312_v13, %v4963_v32 }
 0x410   : > { %v3864_v41 = vpack.c.bf16 %v3061_v53, %v3060_v52  ;;  %v3062_v40 = vsel %vm2934_vm14, %v2870_v39, %v2998_v4  ;;  %v3063_v44 = vsel %vm2935_vm15, %v2871_v1, %v2999_v54  ;;  %v2733_v49 = vmul.f32 %v5312_v13, %v4966_v28  ;;  %v5791_v39 = vld [vmem:[#allocation22_spill] sm:$0xff]  ;;  %v5792_v53 = vld [vmem:[#allocation23_spill] sm:$0xff] }
 0x411   : > { %v3869_v18 = vpack.c.bf16 %v3063_v44, %v3062_v40  ;;  %v2802_v16 = vmul.f32 %v5317_v23, %v2731_v47  ;;  %v2872_v20 = vadd.f32 %v5330_v33, %v2801_v55  ;;  %v2803_v56 = vmul.f32 %v5317_v23, %v2732_v42 }
 0x412   : > { %3932 = vst [vmem:[%s5690_s4 + $0xb0] sm:$0xff] %v3864_v41   ;;  %v2804_v37 = vmul.f32 %v5317_v23, %v2733_v49  ;;  %v2734_v32 = vmul.f32 %v5312_v13, %v4969_v30  ;;  %v2735_v34 = vmul.f32 %v5312_v13, %v4972_v21  ;;  %v2736_v28 = vmul.f32 %v5312_v13, %v4975_v25 }
 0x413   : > { %3933 = vst [vmem:[%s5690_s4 + $0xb8] sm:$0xff] %v3869_v18   ;;  %v2873_v58 = vadd.f32 %v5330_v33, %v2802_v16  ;;  %vm2936_vm0 = vcmp.gt.f32.partialorder %v2872_v20, 0.0  ;;  %v3000_v36 = vmul.f32 0.2, %v2872_v20  ;;  %v2874_v46 = vadd.f32 %v5330_v33, %v2803_v56 }
 0x414   : > { %v2875_v35 = vadd.f32 %v5330_v33, %v2804_v37  ;;  %v2805_v30 = vmul.f32 %v5317_v23, %v2734_v32  ;;  %v2806_v15 = vmul.f32 %v5317_v23, %v2735_v34  ;;  %v2737_v21 = vmul.f32 %v5312_v13, %v4978_v29 }
 0x415   : > { %vm2937_vm1 = vcmp.gt.f32.partialorder %v2873_v58, 0.0  ;;  %v3001_v25 = vmul.f32 0.2, %v2873_v58  ;;  %v3064_v6 = vsel %vm2936_vm0, %v2872_v20, %v3000_v36  ;;  %vm2938_vm2 = vcmp.gt.f32.partialorder %v2874_v46, 0.0 }
 0x416   : > { %vm2939_vm3 = vcmp.gt.f32.partialorder %v2875_v35, 0.0  ;;  %v3002_v63 = vmul.f32 0.2, %v2874_v46  ;;  %v3003_v22 = vmul.f32 0.2, %v2875_v35  ;;  %v2876_v24 = vadd.f32 %v5330_v33, %v2805_v30 }
 0x417   : > { %v3065_v12 = vsel %vm2937_vm1, %v2873_v58, %v3001_v25  ;;  %v2877_v14 = vadd.f32 %v5330_v33, %v2806_v15  ;;  %v2807_v51 = vmul.f32 %v5317_v23, %v2736_v28  ;;  %v2808_v59 = vmul.f32 %v5317_v23, %v2737_v21 }
 0x418   : > { %v3874_v9 = vpack.c.bf16 %v3065_v12, %v3064_v6  ;;  %v3066_v8 = vsel %vm2938_vm2, %v2874_v46, %v3002_v63  ;;  %v3067_v43 = vsel %vm2939_vm3, %v2875_v35, %v3003_v22  ;;  %vm2940_vm4 = vcmp.gt.f32.partialorder %v2876_v24, 0.0 }
 0x419   : > { %v3879_v29 = vpack.c.bf16 %v3067_v43, %v3066_v8  ;;  %vm2941_vm5 = vcmp.gt.f32.partialorder %v2877_v14, 0.0  ;;  %v3004_v3 = vmul.f32 0.2, %v2876_v24  ;;  %v3005_v7 = vmul.f32 0.2, %v2877_v14 }
 0x41a   : > { %3934 = vst [vmem:[%s5690_s4 + $0xc0] sm:$0xff] %v3874_v9   ;;  %v2878_v60 = vadd.f32 %v5330_v33, %v2807_v51  ;;  %v2879_v10 = vadd.f32 %v5330_v33, %v2808_v59  ;;  %v2738_v45 = vmul.f32 %v5312_v13, %v5788_v19  ;;  %v2739_v31 = vmul.f32 %v5312_v13, %v5789_v27 }
 0x41b   : > { %3935 = vst [vmem:[%s5690_s4 + $0xc8] sm:$0xff] %v3879_v29   ;;  %v3068_v38 = vsel %vm2940_vm4, %v2876_v24, %v3004_v3  ;;  %v3069_v61 = vsel %vm2941_vm5, %v2877_v14, %v3005_v7  ;;  %v2740_v48 = vmul.f32 %v5312_v13, %v5790_v62  ;;  %v2741_v26 = vmul.f32 %v5312_v13, %v5791_v39 }
 0x41c   : > { %v3884_v0 = vpack.c.bf16 %v3069_v61, %v3068_v38  ;;  %vm2942_vm6 = vcmp.gt.f32.partialorder %v2878_v60, 0.0  ;;  %vm2943_vm7 = vcmp.gt.f32.partialorder %v2879_v10, 0.0  ;;  %v3006_v50 = vmul.f32 0.2, %v2878_v60 }
 0x41d   : > { %v3007_v1 = vmul.f32 0.2, %v2879_v10  ;;  %v2809_v57 = vmul.f32 %v5317_v23, %v2738_v45  ;;  %v2810_v2 = vmul.f32 %v5317_v23, %v2739_v31  ;;  %v2811_v52 = vmul.f32 %v5317_v23, %v2740_v48 }
 0x41e   : > { %3936 = vst [vmem:[%s5690_s4 + $0xd0] sm:$0xff] %v3884_v0   ;;  %v3070_v4 = vsel %vm2942_vm6, %v2878_v60, %v3006_v50  ;;  %v2812_v54 = vmul.f32 %v5317_v23, %v2741_v26  ;;  %v2742_v47 = vmul.f32 %v5312_v13, %v5792_v53  ;;  %v2743_v55 = vmul.f32 %v5312_v13, %v4996_v11 }
 0x41f   : > { %v3071_v42 = vsel %vm2943_vm7, %v2879_v10, %v3007_v1  ;;  %v2880_v41 = vadd.f32 %v5330_v33, %v2809_v57  ;;  %v2881_v40 = vadd.f32 %v5330_v33, %v2810_v2  ;;  %v2882_v44 = vadd.f32 %v5330_v33, %v2811_v52 }
 0x420   : > { %v3889_v49 = vpack.c.bf16 %v3071_v42, %v3070_v4  ;;  %v2883_v18 = vadd.f32 %v5330_v33, %v2812_v54  ;;  %v2813_v16 = vmul.f32 %v5317_v23, %v2742_v47  ;;  %v2814_v20 = vmul.f32 %v5317_v23, %v2743_v55 }
 0x421   : > { %vm2944_vm8 = vcmp.gt.f32.partialorder %v2880_v41, 0.0  ;;  %vm2945_vm9 = vcmp.gt.f32.partialorder %v2881_v40, 0.0  ;;  %v3008_v56 = vmul.f32 0.2, %v2880_v41  ;;  %v3009_v37 = vmul.f32 0.2, %v2881_v40 }
 0x422   : > { %3937 = vst [vmem:[%s5690_s4 + $0xd8] sm:$0xff] %v3889_v49   ;;  %vm2946_vm10 = vcmp.gt.f32.partialorder %v2882_v44, 0.0  ;;  %vm2947_vm11 = vcmp.gt.f32.partialorder %v2883_v18, 0.0  ;;  %v3010_v11 = vmul.f32 0.2, %v2882_v44  ;;  %v2884_v58 = vadd.f32 %v5330_v33, %v2813_v16 }
 0x423   : > { %v3011_v32 = vmul.f32 0.2, %v2883_v18  ;;  %v3072_v34 = vsel %vm2944_vm8, %v2880_v41, %v3008_v56  ;;  %v3073_v28 = vsel %vm2945_vm9, %v2881_v40, %v3009_v37  ;;  %v2885_v36 = vadd.f32 %v5330_v33, %v2814_v20 }
 0x424   : > { %v3894_v46 = vpack.c.bf16 %v3073_v28, %v3072_v34  ;;  %v3074_v35 = vsel %vm2946_vm10, %v2882_v44, %v3010_v11  ;;  %v2744_v15 = vmul.f32 %v5312_v13, %v4999_v5  ;;  %vm2948_vm12 = vcmp.gt.f32.partialorder %v2884_v58, 0.0 }
 0x425   : > { %v3075_v30 = vsel %vm2947_vm11, %v2883_v18, %v3011_v32  ;;  %vm2949_vm13 = vcmp.gt.f32.partialorder %v2885_v36, 0.0  ;;  %v3012_v25 = vmul.f32 0.2, %v2884_v58  ;;  %v3013_v6 = vmul.f32 0.2, %v2885_v36 }
 0x426   : > { %v3899_v21 = vpack.c.bf16 %v3075_v30, %v3074_v35  ;;  %3938 = vst [vmem:[%s5690_s4 + $0xe0] sm:$0xff] %v3894_v46   ;;  %v2745_v63 = vmul.f32 %v5312_v13, %v5002_v17  ;;  %v2815_v22 = vmul.f32 %v5317_v23, %v2744_v15 }
 0x427   : > { %v3076_v24 = vsel %vm2948_vm12, %v2884_v58, %v3012_v25  ;;  %v3077_v5 = vsel %vm2949_vm13, %v2885_v36, %v3013_v6 }
 0x428   : > { %3939 = vst [vmem:[%s5690_s4 + $0xe8] sm:$0xff] %v3899_v21   ;;  %v2816_v12 = vmul.f32 %v5317_v23, %v2745_v63  ;;  %v2886_v14 = vadd.f32 %v5330_v33, %v2815_v22  ;;  %v3904_v51 = vpack.c.bf16 %v3077_v5, %v3076_v24 }
 0x42a   : > { %v2887_v59 = vadd.f32 %v5330_v33, %v2816_v12  ;;  %vm2950_vm14 = vcmp.gt.f32.partialorder %v2886_v14, 0.0  ;;  %v3014_v9 = vmul.f32 0.2, %v2886_v14  ;;  %3940 = vst [vmem:[%s5690_s4 + $0xf0] sm:$0xff] %v3904_v51  }
 0x42c   : > { %vm2951_vm15 = vcmp.gt.f32.partialorder %v2887_v59, 0.0  ;;  %v3015_v17 = vmul.f32 0.2, %v2887_v59  ;;  %v3078_v13 = vsel %vm2950_vm14, %v2886_v14, %v3014_v9 }
 0x42e   : > { %v3079_v8 = vsel %vm2951_vm15, %v2887_v59, %v3015_v17 }
 0x42f   : > { %v3909_v43 = vpack.c.bf16 %v3079_v8, %v3078_v13 }
 0x431   : > { %3941 = vst [vmem:[%s5690_s4 + $0xf8] sm:$0xff] %v3909_v43  }
 0x432 PF: > { %p11_p11 = scmp.ge.s32.totalorder %s4264_s19, 6   ;;  %s5793_s15 = smov %s4212_s16 }
 0x433   : > { %s5794_s16 = smov %s4273_s22  ;;  %s5795_s17 = smov %s4264_s19 }
 0x434   :  { %13 = sbr.rel (!%p11_p11) target bundleno = 2 (0x2), region = 101 }

// kernel: d_forward.7
= control target key start
LH: loop header
LB: loop body
LE: loop exit
PB: predicated region body
PF: predicated region fallthrough
CT: control target
= control target key end

     0   :  { %s2192_s15 = smov 0   ;;  %s2194_s16 = smov 0   ;;  %s2901_s0 = inlined_call_operand.vmem [shape: bf16[128,2048], index: 0, kind: input, shape index: {}]   ;;  %s2902_s1 = inlined_call_operand.vmem [shape: bf16[2048,256], index: 1, kind: input, shape index: {}]   ;;  %s2903_s2 = inlined_call_operand.vmem [shape: f32[1,256], index: 2, kind: input, shape index: {}]   ;;  %s2904_s3 = inlined_call_operand.vmem [shape: f32[1,256], index: 3, kind: input, shape index: {}]   ;;  %s2905_s4 = inlined_call_operand.vmem [shape: bf16[128,256], index: 4, kind: output, shape index: {}]  }
   0x1   :  { %s2196_s17 = smov 0  }
   0x2 LB: > { %s2208_s18 = sadd.s32 4294967295, %s2164_s17   ;;  %s2211_s19 = sadd.s32 1, %s2164_s17   ;;  %s2164_s17 = sphi %s2196_s17, %s2908_s17   ;;  %s2160_s16 = sphi %s2194_s16, %s2907_s16   ;;  %s2156_s15 = sphi %s2192_s15, %s2906_s15  }
   0x3   : > { %s18_s20 = ssub.s32 %s2164_s17, %s2211_s19  ;;  %s21_s21 = sadd.s32 1, %s2160_s16 }
   0x4   : > { %p19_p0 = scmp.eq.s32.totalorder %s18_s20, 0  ;;  %p28_p1 = scmp.ne.s32.totalorder %s2160_s16, %s2156_s15 }
   0x5   : > { %p29_p2 = scmp.eq.s32.totalorder %s2164_s17, 0  ;;  %p1794_p4 = scmp.ge.s32.totalorder %s2164_s17, 4 }
   0x6   : > { %s2220_s22 = scalar_select %p19_p0, %s2160_s16, %s21_s21  }
   0x7   : > { %p30_p3 = por %p29_p2, %p28_p1  ;;  %149 = sbr.rel (%p1794_p4) target bundleno = 34 (0x22), region = 24 }
   0xe   : > { %152 = sbr.rel (!%p30_p3) target bundleno = 34 (0x22), region = 28  ;;  %s154_s23 = sand.u32 (%p30_p3), 1, %s2160_s16  }
   0xf   : > { %s1919_s24 = sshll.u32 (%p30_p3), %s2164_s17, 4  ;;  %s1795_s25 = sshll.u32 (%p30_p3), %s154_s23, 8 }
  0x10   : > { %s2228_s28 = scalar_lea.vmem (%p30_p3), %s2901_s0, %s1919_s24  ;;  %s2233_s29 = scalar_lea.vmem (%p30_p3), [#allocation3], %s1795_s25 }
  0x11   : > { %v172_v0 = vld [vmem:[%s2228_s28] sm:$0xff] (%p30_p3)  ;;  %v174_v1 = vld [vmem:[%s2228_s28 + $0x8] sm:$0xff] (%p30_p3) }
  0x12   : > { %v176_v2 = vld [vmem:[%s2228_s28 + $0x40] sm:$0xff] (%p30_p3)  ;;  %173 = vst [vmem:[%s2233_s29] sm:$0xff] (%p30_p3), %v172_v0  ;;  %175 = vst [vmem:[%s2233_s29 + $0x8] sm:$0xff] (%p30_p3), %v174_v1  ;;  %v178_v3 = vld [vmem:[%s2228_s28 + $0x48] sm:$0xff] (%p30_p3) }
  0x13   : > { %177 = vst [vmem:[%s2233_s29 + $0x10] sm:$0xff] (%p30_p3), %v176_v2  ;;  %v180_v4 = vld [vmem:[%s2228_s28 + $0x80] sm:$0xff] (%p30_p3)  ;;  %v182_v5 = vld [vmem:[%s2228_s28 + $0x88] sm:$0xff] (%p30_p3)  ;;  %179 = vst [vmem:[%s2233_s29 + $0x18] sm:$0xff] (%p30_p3), %v178_v3 }
  0x14   : > { %181 = vst [vmem:[%s2233_s29 + $0x20] sm:$0xff] (%p30_p3), %v180_v4  ;;  %183 = vst [vmem:[%s2233_s29 + $0x28] sm:$0xff] (%p30_p3), %v182_v5  ;;  %v184_v6 = vld [vmem:[%s2228_s28 + $0xc0] sm:$0xff] (%p30_p3)  ;;  %v186_v7 = vld [vmem:[%s2228_s28 + $0xc8] sm:$0xff] (%p30_p3) }
  0x15   : > { %v188_v8 = vld [vmem:[%s2228_s28 + $0x100] sm:$0xff]  ;;  %185 = vst [vmem:[%s2233_s29 + $0x30] sm:$0xff] %v184_v6  ;;  %187 = vst [vmem:[%s2233_s29 + $0x38] sm:$0xff] %v186_v7  ;;  %v190_v9 = vld [vmem:[%s2228_s28 + $0x108] sm:$0xff] }
  0x16   : > { %189 = vst [vmem:[%s2233_s29 + $0x40] sm:$0xff] %v188_v8  ;;  %v192_v10 = vld [vmem:[%s2228_s28 + $0x140] sm:$0xff]  ;;  %v194_v11 = vld [vmem:[%s2228_s28 + $0x148] sm:$0xff]  ;;  %191 = vst [vmem:[%s2233_s29 + $0x48] sm:$0xff] %v190_v9 }
  0x17   : > { %193 = vst [vmem:[%s2233_s29 + $0x50] sm:$0xff] %v192_v10  ;;  %195 = vst [vmem:[%s2233_s29 + $0x58] sm:$0xff] %v194_v11  ;;  %v196_v12 = vld [vmem:[%s2228_s28 + $0x180] sm:$0xff]  ;;  %v198_v13 = vld [vmem:[%s2228_s28 + $0x188] sm:$0xff] }
  0x18   : > { %v200_v14 = vld [vmem:[%s2228_s28 + $0x1c0] sm:$0xff]  ;;  %197 = vst [vmem:[%s2233_s29 + $0x60] sm:$0xff] %v196_v12  ;;  %199 = vst [vmem:[%s2233_s29 + $0x68] sm:$0xff] %v198_v13  ;;  %v202_v15 = vld [vmem:[%s2228_s28 + $0x1c8] sm:$0xff] }
  0x19   : > { %201 = vst [vmem:[%s2233_s29 + $0x70] sm:$0xff] %v200_v14  ;;  %v204_v16 = vld [vmem:[%s2228_s28 + $0x200] sm:$0xff]  ;;  %v206_v17 = vld [vmem:[%s2228_s28 + $0x208] sm:$0xff]  ;;  %203 = vst [vmem:[%s2233_s29 + $0x78] sm:$0xff] %v202_v15 }
  0x1a   : > { %205 = vst [vmem:[%s2233_s29 + $0x80] sm:$0xff] %v204_v16  ;;  %207 = vst [vmem:[%s2233_s29 + $0x88] sm:$0xff] %v206_v17  ;;  %v208_v18 = vld [vmem:[%s2228_s28 + $0x240] sm:$0xff]  ;;  %v210_v19 = vld [vmem:[%s2228_s28 + $0x248] sm:$0xff] }
  0x1b   : > { %v212_v20 = vld [vmem:[%s2228_s28 + $0x280] sm:$0xff]  ;;  %209 = vst [vmem:[%s2233_s29 + $0x90] sm:$0xff] %v208_v18  ;;  %211 = vst [vmem:[%s2233_s29 + $0x98] sm:$0xff] %v210_v19  ;;  %v214_v21 = vld [vmem:[%s2228_s28 + $0x288] sm:$0xff] }
  0x1c   : > { %213 = vst [vmem:[%s2233_s29 + $0xa0] sm:$0xff] %v212_v20  ;;  %v216_v22 = vld [vmem:[%s2228_s28 + $0x2c0] sm:$0xff]  ;;  %v218_v23 = vld [vmem:[%s2228_s28 + $0x2c8] sm:$0xff]  ;;  %215 = vst [vmem:[%s2233_s29 + $0xa8] sm:$0xff] %v214_v21 }
  0x1d   : > { %217 = vst [vmem:[%s2233_s29 + $0xb0] sm:$0xff] %v216_v22  ;;  %219 = vst [vmem:[%s2233_s29 + $0xb8] sm:$0xff] %v218_v23  ;;  %v220_v24 = vld [vmem:[%s2228_s28 + $0x300] sm:$0xff]  ;;  %v222_v25 = vld [vmem:[%s2228_s28 + $0x308] sm:$0xff] }
  0x1e   : > { %v224_v26 = vld [vmem:[%s2228_s28 + $0x340] sm:$0xff]  ;;  %221 = vst [vmem:[%s2233_s29 + $0xc0] sm:$0xff] %v220_v24  ;;  %223 = vst [vmem:[%s2233_s29 + $0xc8] sm:$0xff] %v222_v25  ;;  %v226_v27 = vld [vmem:[%s2228_s28 + $0x348] sm:$0xff] }
  0x1f   : > { %225 = vst [vmem:[%s2233_s29 + $0xd0] sm:$0xff] %v224_v26  ;;  %v228_v28 = vld [vmem:[%s2228_s28 + $0x380] sm:$0xff]  ;;  %v230_v29 = vld [vmem:[%s2228_s28 + $0x388] sm:$0xff]  ;;  %227 = vst [vmem:[%s2233_s29 + $0xd8] sm:$0xff] %v226_v27 }
  0x20   : > { %229 = vst [vmem:[%s2233_s29 + $0xe0] sm:$0xff] %v228_v28  ;;  %231 = vst [vmem:[%s2233_s29 + $0xe8] sm:$0xff] %v230_v29  ;;  %v232_v30 = vld [vmem:[%s2228_s28 + $0x3c0] sm:$0xff]  ;;  %v234_v31 = vld [vmem:[%s2228_s28 + $0x3c8] sm:$0xff] }
  0x21   : > { %233 = vst [vmem:[%s2233_s29 + $0xf0] sm:$0xff] %v232_v30  ;;  %235 = vst [vmem:[%s2233_s29 + $0xf8] sm:$0xff] %v234_v31 }
  0x22 PF: > { %p1798_p5 = scmp.ge.s32.totalorder %s2164_s17, 1  ;;  %p250_p6 = scmp.lt.s32.totalorder %s2164_s17, 5 }
  0x24   : > { %p251_p7 = pnand %p1798_p5, %p250_p6 }
  0x25   : > { %s257_s30 = sand.u32 (!%p251_p7), 1, %s2156_s15   ;;  %s1800_s5 = sshll.u32 (!%p251_p7), %s2208_s18, 6 }
  0x26   : > { %254 = sbr.rel (%p251_p7) target bundleno = 546 (0x222), region = 55  ;;  %s1799_s6 = sshll.u32 (!%p251_p7), %s257_s30, 8 }
  0x27   : > { %p285_p8 = scmp.lt.s32.totalorder (!%p251_p7), %s1800_s5, 255  ;;  %s2305_s11 = scalar_lea.vmem (!%p251_p7), [#allocation3], %s1799_s6 }
  0x28   : > { %p1803_p9 = scmp.ne.s32.totalorder (!%p251_p7), %s2208_s18, 0 }
  0x2d   : > { %s2910_s5 = smov (!%p285_p8, %s1800_s5), 255  ;;  %294 = sbr.rel (%p1803_p9) target bundleno = 63 (0x3f), region = 63 }
  0x2e   : > { %s1920_s7 = sshll.u32 %s2910_s5, 3  ;;  %v2166_v32 = vmov (!%p1803_p9), 0.0  }
  0x2f   : > { %s2303_s10 = scalar_lea.vmem %s2902_s1, %s1920_s7  ;;  %295 = vst [vmem:[#allocation2] sm:$0xff] (!%p1803_p9), %v2166_v32  ;;  %296 = vst [vmem:[#allocation2 + $0x8] sm:$0xff] (!%p1803_p9), %v2166_v32 }
  0x30   : > { %297 = vst [vmem:[#allocation2 + $0x10] sm:$0xff] (!%p1803_p9), %v2166_v32  ;;  %298 = vst [vmem:[#allocation2 + $0x18] sm:$0xff] (!%p1803_p9), %v2166_v32 }
  0x31   : > { %299 = vst [vmem:[#allocation2 + $0x20] sm:$0xff] (!%p1803_p9), %v2166_v32  ;;  %300 = vst [vmem:[#allocation2 + $0x28] sm:$0xff] (!%p1803_p9), %v2166_v32 }
  0x32   : > { %301 = vst [vmem:[#allocation2 + $0x30] sm:$0xff] (!%p1803_p9), %v2166_v32  ;;  %302 = vst [vmem:[#allocation2 + $0x38] sm:$0xff] (!%p1803_p9), %v2166_v32 }
  0x33   : > { %303 = vst [vmem:[#allocation2 + $0x40] sm:$0xff] (!%p1803_p9), %v2166_v32  ;;  %304 = vst [vmem:[#allocation2 + $0x48] sm:$0xff] (!%p1803_p9), %v2166_v32 }
  0x34   : > { %305 = vst [vmem:[#allocation2 + $0x50] sm:$0xff] %v2166_v32  ;;  %306 = vst [vmem:[#allocation2 + $0x58] sm:$0xff] %v2166_v32 }
  0x35   : > { %307 = vst [vmem:[#allocation2 + $0x60] sm:$0xff] %v2166_v32  ;;  %308 = vst [vmem:[#allocation2 + $0x68] sm:$0xff] %v2166_v32 }
  0x36   : > { %309 = vst [vmem:[#allocation2 + $0x70] sm:$0xff] %v2166_v32  ;;  %310 = vst [vmem:[#allocation2 + $0x78] sm:$0xff] %v2166_v32 }
  0x37   : > { %311 = vst [vmem:[#allocation2 + $0x80] sm:$0xff] %v2166_v32  ;;  %312 = vst [vmem:[#allocation2 + $0x88] sm:$0xff] %v2166_v32 }
  0x38   : > { %313 = vst [vmem:[#allocation2 + $0x90] sm:$0xff] %v2166_v32  ;;  %314 = vst [vmem:[#allocation2 + $0x98] sm:$0xff] %v2166_v32 }
  0x39   : > { %315 = vst [vmem:[#allocation2 + $0xa0] sm:$0xff] %v2166_v32  ;;  %316 = vst [vmem:[#allocation2 + $0xa8] sm:$0xff] %v2166_v32 }
  0x3a   : > { %317 = vst [vmem:[#allocation2 + $0xb0] sm:$0xff] %v2166_v32  ;;  %318 = vst [vmem:[#allocation2 + $0xb8] sm:$0xff] %v2166_v32 }
  0x3b   : > { %319 = vst [vmem:[#allocation2 + $0xc0] sm:$0xff] %v2166_v32  ;;  %320 = vst [vmem:[#allocation2 + $0xc8] sm:$0xff] %v2166_v32 }
  0x3c   : > { %321 = vst [vmem:[#allocation2 + $0xd0] sm:$0xff] %v2166_v32  ;;  %322 = vst [vmem:[#allocation2 + $0xd8] sm:$0xff] %v2166_v32 }
  0x3d   : > { %323 = vst [vmem:[#allocation2 + $0xe0] sm:$0xff] %v2166_v32  ;;  %324 = vst [vmem:[#allocation2 + $0xe8] sm:$0xff] %v2166_v32 }
  0x3e   : > { %325 = vst [vmem:[#allocation2 + $0xf0] sm:$0xff] %v2166_v32  ;;  %326 = vst [vmem:[#allocation2 + $0xf8] sm:$0xff] %v2166_v32 }
  0x3f PF: > { %v1994_v33 = vld [vmem:[%s2303_s10 + $0x4] ss:$8 sps:$4 sm:$0xff]   ;;  %v1998_v35 = vld [vmem:[%s2303_s10] ss:$8 sps:$4 sm:$0xff]   ;;  %v2000_v37 = vld [vmem:[%s2303_s10 + $0x14] ss:$8 sps:$4 sm:$0xff]  }
  0x40   : > { %v1996_v34 = vld [vmem:[%s2303_s10 + $0x104] ss:$8 sps:$4 sm:$0xff]   ;;  %935 = vmatprep.subr.bf16.mxu1 %v1994_v33  ;;  %v1999_v36 = vld [vmem:[%s2303_s10 + $0x100] ss:$8 sps:$4 sm:$0xff]   ;;  %v2002_v38 = vld [vmem:[%s2303_s10 + $0x114] ss:$8 sps:$4 sm:$0xff]  }
  0x41   : > { %1048 = vmatprep.subr.bf16.mxu0 %v1996_v34  ;;  %936 = vmatpush1.bf16.msra.mxu1 %v1998_v35  ;;  %v2004_v39 = vld [vmem:[%s2303_s10 + $0x10] ss:$8 sps:$4 sm:$0xff]   ;;  %v2006_v41 = vld [vmem:[%s2303_s10 + $0x24] ss:$8 sps:$4 sm:$0xff]   ;;  %v2010_v43 = vld [vmem:[%s2303_s10 + $0x20] ss:$8 sps:$4 sm:$0xff]  }
  0x42   : > { %1049 = vmatpush1.bf16.msra.mxu0 %v1999_v36  ;;  %937 = vmatprep.subr.bf16.mxu1 %v2000_v37  ;;  %v2005_v40 = vld [vmem:[%s2303_s10 + $0x110] ss:$8 sps:$4 sm:$0xff]   ;;  %v2008_v42 = vld [vmem:[%s2303_s10 + $0x124] ss:$8 sps:$4 sm:$0xff]   ;;  %v2011_v44 = vld [vmem:[%s2303_s10 + $0x120] ss:$8 sps:$4 sm:$0xff]  }
  0x43   : > { %1050 = vmatprep.subr.bf16.mxu0 %v2002_v38  ;;  %v2012_v45 = vld [vmem:[%s2303_s10 + $0x34] ss:$8 sps:$4 sm:$0xff]   ;;  %v2016_v47 = vld [vmem:[%s2303_s10 + $0x30] ss:$8 sps:$4 sm:$0xff]   ;;  %v2018_v49 = vld [vmem:[%s2303_s10 + $0x44] ss:$8 sps:$4 sm:$0xff]  }
  0x44   : > { %v2014_v46 = vld [vmem:[%s2303_s10 + $0x134] ss:$8 sps:$4 sm:$0xff]   ;;  %v2017_v48 = vld [vmem:[%s2303_s10 + $0x130] ss:$8 sps:$4 sm:$0xff]   ;;  %v2020_v50 = vld [vmem:[%s2303_s10 + $0x144] ss:$8 sps:$4 sm:$0xff]  }
  0x45   : > { %938 = vmatpush1.bf16.msra.mxu1 %v2004_v39  ;;  %v2022_v51 = vld [vmem:[%s2303_s10 + $0x40] ss:$8 sps:$4 sm:$0xff]   ;;  %v2024_v53 = vld [vmem:[%s2303_s10 + $0x54] ss:$8 sps:$4 sm:$0xff]   ;;  %v2028_v55 = vld [vmem:[%s2303_s10 + $0x50] ss:$8 sps:$4 sm:$0xff]  }
  0x46   : > { %1051 = vmatpush1.bf16.msra.mxu0 %v2005_v40  ;;  %939 = vmatprep.subr.bf16.mxu1 %v2006_v41  ;;  %v2023_v52 = vld [vmem:[%s2303_s10 + $0x140] ss:$8 sps:$4 sm:$0xff]   ;;  %v2026_v54 = vld [vmem:[%s2303_s10 + $0x154] ss:$8 sps:$4 sm:$0xff]   ;;  %v2029_v56 = vld [vmem:[%s2303_s10 + $0x150] ss:$8 sps:$4 sm:$0xff]  }
  0x47   : > { %1052 = vmatprep.subr.bf16.mxu0 %v2008_v42  ;;  %v2030_v57 = vld [vmem:[%s2303_s10 + $0x64] ss:$8 sps:$4 sm:$0xff]   ;;  %v2034_v59 = vld [vmem:[%s2303_s10 + $0x60] ss:$8 sps:$4 sm:$0xff]   ;;  %v2036_v61 = vld [vmem:[%s2303_s10 + $0x74] ss:$8 sps:$4 sm:$0xff]  }
  0x48   : > { %v2032_v58 = vld [vmem:[%s2303_s10 + $0x164] ss:$8 sps:$4 sm:$0xff]   ;;  %v2035_v60 = vld [vmem:[%s2303_s10 + $0x160] ss:$8 sps:$4 sm:$0xff]   ;;  %v2038_v62 = vld [vmem:[%s2303_s10 + $0x174] ss:$8 sps:$4 sm:$0xff]  }
  0x49   : > { %940 = vmatpush1.bf16.msra.mxu1 %v2010_v43  ;;  %v2040_v63 = vld [vmem:[%s2303_s10 + $0x70] ss:$8 sps:$4 sm:$0xff]   ;;  %v2042_v1 = vld [vmem:[%s2303_s10 + $0x84] ss:$8 sps:$4 sm:$0xff]   ;;  %v2046_v3 = vld [vmem:[%s2303_s10 + $0x80] ss:$8 sps:$4 sm:$0xff]  }
  0x4a   : > { %1053 = vmatpush1.bf16.msra.mxu0 %v2011_v44  ;;  %941 = vmatprep.subr.bf16.mxu1 %v2012_v45  ;;  %v2041_v0 = vld [vmem:[%s2303_s10 + $0x170] ss:$8 sps:$4 sm:$0xff]   ;;  %v2044_v2 = vld [vmem:[%s2303_s10 + $0x184] ss:$8 sps:$4 sm:$0xff]   ;;  %v2047_v4 = vld [vmem:[%s2303_s10 + $0x180] ss:$8 sps:$4 sm:$0xff]  }
  0x4b   : > { %1054 = vmatprep.subr.bf16.mxu0 %v2014_v46  ;;  %v2048_v5 = vld [vmem:[%s2303_s10 + $0x94] ss:$8 sps:$4 sm:$0xff]   ;;  %v2052_v7 = vld [vmem:[%s2303_s10 + $0x90] ss:$8 sps:$4 sm:$0xff]   ;;  %v2054_v9 = vld [vmem:[%s2303_s10 + $0xa4] ss:$8 sps:$4 sm:$0xff]  }
  0x4c   : > { %v2050_v6 = vld [vmem:[%s2303_s10 + $0x194] ss:$8 sps:$4 sm:$0xff]   ;;  %v2053_v8 = vld [vmem:[%s2303_s10 + $0x190] ss:$8 sps:$4 sm:$0xff]   ;;  %v2056_v10 = vld [vmem:[%s2303_s10 + $0x1a4] ss:$8 sps:$4 sm:$0xff]  }
  0x4d   : > { %942 = vmatpush1.bf16.msra.mxu1 %v2016_v47  ;;  %v2058_v11 = vld [vmem:[%s2303_s10 + $0xa0] ss:$8 sps:$4 sm:$0xff]   ;;  %v2060_v13 = vld [vmem:[%s2303_s10 + $0xb4] ss:$8 sps:$4 sm:$0xff]   ;;  %v2064_v15 = vld [vmem:[%s2303_s10 + $0xb0] ss:$8 sps:$4 sm:$0xff]  }
  0x4e   : > { %1055 = vmatpush1.bf16.msra.mxu0 %v2017_v48  ;;  %943 = vmatprep.subr.bf16.mxu1 %v2018_v49  ;;  %v2059_v12 = vld [vmem:[%s2303_s10 + $0x1a0] ss:$8 sps:$4 sm:$0xff]   ;;  %v2062_v14 = vld [vmem:[%s2303_s10 + $0x1b4] ss:$8 sps:$4 sm:$0xff]   ;;  %v2065_v16 = vld [vmem:[%s2303_s10 + $0x1b0] ss:$8 sps:$4 sm:$0xff]  }
  0x4f   : > { %1056 = vmatprep.subr.bf16.mxu0 %v2020_v50  ;;  %v2066_v17 = vld [vmem:[%s2303_s10 + $0xc4] ss:$8 sps:$4 sm:$0xff]   ;;  %v2070_v21 = vld [vmem:[%s2303_s10 + $0xc0] ss:$8 sps:$4 sm:$0xff]   ;;  %v2072_v23 = vld [vmem:[%s2303_s10 + $0xd4] ss:$8 sps:$4 sm:$0xff]  }
  0x50   : > { %v2092_v18 = vld [vmem:[%s2305_s11 + $0x4] ss:$16 sps:$4 sm:$0xff]   ;;  %v2095_v20 = vld [vmem:[%s2305_s11 + $0xc] ss:$16 sps:$4 sm:$0xff]   ;;  %v2071_v22 = vld [vmem:[%s2303_s10 + $0x1c0] ss:$8 sps:$4 sm:$0xff]  }
  0x51   : > { %944 = vmatpush1.bf16.msra.mxu1 %v2022_v51  ;;  %v2068_v19 = vld [vmem:[%s2303_s10 + $0x1c4] ss:$8 sps:$4 sm:$0xff]   ;;  %967 = vmatprep.mubr.bf16.mxu1 %v2092_v18  ;;  %v2074_v24 = vld [vmem:[%s2303_s10 + $0x1d4] ss:$8 sps:$4 sm:$0xff]   ;;  %v2076_v25 = vld [vmem:[%s2303_s10 + $0xd0] ss:$8 sps:$4 sm:$0xff]  }
  0x52   : > { %1057 = vmatpush1.bf16.msra.mxu0 %v2023_v52  ;;  %945 = vmatprep.subr.bf16.mxu1 %v2024_v53  ;;  %v2077_v26 = vld [vmem:[%s2303_s10 + $0x1d0] ss:$8 sps:$4 sm:$0xff]   ;;  %v2078_v27 = vld [vmem:[%s2303_s10 + $0xe4] ss:$8 sps:$4 sm:$0xff]   ;;  %v2082_v29 = vld [vmem:[%s2303_s10 + $0xe0] ss:$8 sps:$4 sm:$0xff]  }
  0x53   : > { %1058 = vmatprep.subr.bf16.mxu0 %v2026_v54  ;;  %1080 = vmatprep.mubr.bf16.mxu0 %v2095_v20  ;;  %v2080_v28 = vld [vmem:[%s2303_s10 + $0x1e4] ss:$8 sps:$4 sm:$0xff]   ;;  %v2083_v30 = vld [vmem:[%s2303_s10 + $0x1e0] ss:$8 sps:$4 sm:$0xff]   ;;  %v2084_v31 = vld [vmem:[%s2303_s10 + $0xf4] ss:$8 sps:$4 sm:$0xff]  }
  0x54   : > { %v2086_v32 = vld [vmem:[%s2303_s10 + $0x1f4] ss:$8 sps:$4 sm:$0xff]   ;;  %v2088_v33 = vld [vmem:[%s2303_s10 + $0xf0] ss:$8 sps:$4 sm:$0xff]   ;;  %p1900_p10 = scmp.ne.s32.totalorder %s2208_s18, 3 }
  0x55   : > { %946 = vmatpush1.bf16.msra.mxu1 %v2028_v55  ;;  %v2089_v34 = vld [vmem:[%s2303_s10 + $0x1f0] ss:$8 sps:$4 sm:$0xff]   ;;  %v2096_v37 = vld [vmem:[%s2305_s11 + $0x24] ss:$16 sps:$4 sm:$0xff]   ;;  %v2098_v38 = vld [vmem:[%s2305_s11 + $0x2c] ss:$16 sps:$4 sm:$0xff]  }
  0x56   : > { %1059 = vmatpush1.bf16.msra.mxu0 %v2029_v56  ;;  %947 = vmatprep.subr.bf16.mxu1 %v2030_v57  ;;  %v2090_v35 = vld [vmem:[%s2305_s11] ss:$16 sps:$4 sm:$0xff]   ;;  %v2093_v36 = vld [vmem:[%s2305_s11 + $0x8] ss:$16 sps:$4 sm:$0xff]   ;;  %v2102_v41 = vld [vmem:[%s2305_s11 + $0x44] ss:$16 sps:$4 sm:$0xff]  }
  0x57   : > { %1060 = vmatprep.subr.bf16.mxu0 %v2032_v58  ;;  %v2100_v39 = vld [vmem:[%s2305_s11 + $0x20] ss:$16 sps:$4 sm:$0xff]   ;;  %v2101_v40 = vld [vmem:[%s2305_s11 + $0x28] ss:$16 sps:$4 sm:$0xff]   ;;  %v2104_v42 = vld [vmem:[%s2305_s11 + $0x4c] ss:$16 sps:$4 sm:$0xff]  }
  0x58   : > { %v2106_v43 = vld [vmem:[%s2305_s11 + $0x40] ss:$16 sps:$4 sm:$0xff]   ;;  %v2107_v44 = vld [vmem:[%s2305_s11 + $0x48] ss:$16 sps:$4 sm:$0xff]   ;;  %v2108_v45 = vld [vmem:[%s2305_s11 + $0x64] ss:$16 sps:$4 sm:$0xff]  }
  0x59   : > { %948 = vmatpush1.bf16.msra.mxu1 %v2034_v59  ;;  %v2110_v46 = vld [vmem:[%s2305_s11 + $0x6c] ss:$16 sps:$4 sm:$0xff]   ;;  %v2112_v47 = vld [vmem:[%s2305_s11 + $0x60] ss:$16 sps:$4 sm:$0xff]   ;;  %v2113_v48 = vld [vmem:[%s2305_s11 + $0x68] ss:$16 sps:$4 sm:$0xff]  }
  0x5a   : > { %1061 = vmatpush1.bf16.msra.mxu0 %v2035_v60  ;;  %949 = vmatprep.subr.bf16.mxu1 %v2036_v61  ;;  %v2114_v49 = vld [vmem:[%s2305_s11 + $0x84] ss:$16 sps:$4 sm:$0xff]   ;;  %v2116_v50 = vld [vmem:[%s2305_s11 + $0x8c] ss:$16 sps:$4 sm:$0xff]   ;;  %v2118_v51 = vld [vmem:[%s2305_s11 + $0x80] ss:$16 sps:$4 sm:$0xff]  }
  0x5b   : > { %1062 = vmatprep.subr.bf16.mxu0 %v2038_v62  ;;  %v2119_v52 = vld [vmem:[%s2305_s11 + $0x88] ss:$16 sps:$4 sm:$0xff]   ;;  %v2120_v53 = vld [vmem:[%s2305_s11 + $0xa4] ss:$16 sps:$4 sm:$0xff]   ;;  %v2122_v54 = vld [vmem:[%s2305_s11 + $0xac] ss:$16 sps:$4 sm:$0xff]  }
  0x5c   : > { %v2124_v55 = vld [vmem:[%s2305_s11 + $0xa0] ss:$16 sps:$4 sm:$0xff]   ;;  %v2125_v56 = vld [vmem:[%s2305_s11 + $0xa8] ss:$16 sps:$4 sm:$0xff]   ;;  %v2126_v57 = vld [vmem:[%s2305_s11 + $0xc4] ss:$16 sps:$4 sm:$0xff]  }
  0x5d   : > { %950 = vmatpush1.bf16.msra.mxu1 %v2040_v63  ;;  %v2128_v58 = vld [vmem:[%s2305_s11 + $0xcc] ss:$16 sps:$4 sm:$0xff]   ;;  %v2130_v59 = vld [vmem:[%s2305_s11 + $0xc0] ss:$16 sps:$4 sm:$0xff]   ;;  %v2131_v60 = vld [vmem:[%s2305_s11 + $0xc8] ss:$16 sps:$4 sm:$0xff]  }
  0x5e   : > { %1063 = vmatpush1.bf16.msra.mxu0 %v2041_v0  ;;  %951 = vmatprep.subr.bf16.mxu1 %v2042_v1  ;;  %v2132_v61 = vld [vmem:[%s2305_s11 + $0xe4] ss:$16 sps:$4 sm:$0xff]   ;;  %v2134_v62 = vld [vmem:[%s2305_s11 + $0xec] ss:$16 sps:$4 sm:$0xff]   ;;  %v2136_v63 = vld [vmem:[%s2305_s11 + $0xe0] ss:$16 sps:$4 sm:$0xff]  }
  0x5f   : > { %1064 = vmatprep.subr.bf16.mxu0 %v2044_v2  ;;  %v2137_v0 = vld [vmem:[%s2305_s11 + $0xe8] ss:$16 sps:$4 sm:$0xff]   ;;  %v327_v2 = vld [vmem:[#allocation2] sm:$0xff] }
  0x61   : > { %952 = vmatpush1.bf16.msra.mxu1 %v2046_v3 }
  0x62   : > { %1065 = vmatpush1.bf16.msra.mxu0 %v2047_v4  ;;  %953 = vmatprep.subr.bf16.mxu1 %v2048_v5 }
  0x63   : > { %1066 = vmatprep.subr.bf16.mxu0 %v2050_v6  ;;  %v328_v6 = vld [vmem:[#allocation2 + $0x8] sm:$0xff] }
  0x65   : > { %954 = vmatpush1.bf16.msra.mxu1 %v2052_v7 }
  0x66   : > { %1067 = vmatpush1.bf16.msra.mxu0 %v2053_v8  ;;  %955 = vmatprep.subr.bf16.mxu1 %v2054_v9 }
  0x67   : > { %1068 = vmatprep.subr.bf16.mxu0 %v2056_v10  ;;  %v329_v10 = vld [vmem:[#allocation2 + $0x10] sm:$0xff] }
  0x69   : > { %956 = vmatpush1.bf16.msra.mxu1 %v2058_v11 }
  0x6a   : > { %1069 = vmatpush1.bf16.msra.mxu0 %v2059_v12  ;;  %957 = vmatprep.subr.bf16.mxu1 %v2060_v13 }
  0x6b   : > { %1070 = vmatprep.subr.bf16.mxu0 %v2062_v14 }
  0x6d   : > { %958 = vmatpush1.bf16.msra.mxu1 %v2064_v15  ;;  %v330_v15 = vld [vmem:[#allocation2 + $0x18] sm:$0xff] }
  0x6e   : > { %1071 = vmatpush1.bf16.msra.mxu0 %v2065_v16  ;;  %959 = vmatprep.subr.bf16.mxu1 %v2066_v17 }
  0x6f   : > { %1072 = vmatprep.subr.bf16.mxu0 %v2068_v19 }
  0x71   : > { %960 = vmatpush1.bf16.msra.mxu1 %v2070_v21 }
  0x72   : > { %1073 = vmatpush1.bf16.msra.mxu0 %v2071_v22  ;;  %961 = vmatprep.subr.bf16.mxu1 %v2072_v23  ;;  %v331_v22 = vld [vmem:[#allocation2 + $0x20] sm:$0xff] }
  0x73   : > { %1074 = vmatprep.subr.bf16.mxu0 %v2074_v24 }
  0x75   : > { %962 = vmatpush1.bf16.msra.mxu1 %v2076_v25 }
  0x76   : > { %1075 = vmatpush1.bf16.msra.mxu0 %v2077_v26  ;;  %963 = vmatprep.subr.bf16.mxu1 %v2078_v27  ;;  %v332_v26 = vld [vmem:[#allocation2 + $0x28] sm:$0xff] }
  0x77   : > { %1076 = vmatprep.subr.bf16.mxu0 %v2080_v28 }
  0x79   : > { %964 = vmatpush1.bf16.msra.mxu1 %v2082_v29 }
  0x7a   : > { %1077 = vmatpush1.bf16.msra.mxu0 %v2083_v30  ;;  %965 = vmatprep.subr.bf16.mxu1 %v2084_v31  ;;  %v333_v30 = vld [vmem:[#allocation2 + $0x30] sm:$0xff] }
  0x7b   : > { %1078 = vmatprep.subr.bf16.mxu0 %v2086_v32 }
  0x7d   : > { %966 = vmatpush1.bf16.msra.mxu1 %v2088_v33 }
  0x7e   : > { %1079 = vmatpush1.bf16.msra.mxu0 %v2089_v34 }
  0x80   : > { %968 = vmatmul.mubr.bf16.vlgmr.msra.gmra.mrb[0].mxu1 %v2090_v35  ;;  %v334_v35 = vld [vmem:[#allocation2 + $0x38] sm:$0xff] }
  0x81   : > { %1081 = vmatmul.mubr.bf16.vlgmr.msra.gmra.mrb[0].mxu0 %v2093_v36  ;;  %977 = vmatprep.mubr.bf16.mxu1 %v2096_v37 }
  0x82   : > { %1090 = vmatprep.mubr.bf16.mxu0 %v2098_v38 }
  0x88   : > { %978 = vmatmul.mubr.bf16.gmra.mrb[4].mxu1 %v2100_v39 }
  0x89   : > { %1091 = vmatmul.mubr.bf16.gmra.mrb[4].mxu0 %v2101_v40  ;;  %987 = vmatprep.mubr.bf16.mxu1 %v2102_v41 }
  0x8a   : > { %1100 = vmatprep.mubr.bf16.mxu0 %v2104_v42  ;;  %v335_v42 = vld [vmem:[#allocation2 + $0x40] sm:$0xff] }
  0x90   : > { %988 = vmatmul.mubr.bf16.gmra.mrb[8].mxu1 %v2106_v43 }
  0x91   : > { %1101 = vmatmul.mubr.bf16.gmra.mrb[8].mxu0 %v2107_v44  ;;  %997 = vmatprep.mubr.bf16.mxu1 %v2108_v45 }
  0x92   : > { %1110 = vmatprep.mubr.bf16.mxu0 %v2110_v46  ;;  %v336_v46 = vld [vmem:[#allocation2 + $0x48] sm:$0xff] }
  0x98   : > { %998 = vmatmul.mubr.bf16.gmra.mrb[12].mxu1 %v2112_v47 }
  0x99   : > { %1111 = vmatmul.mubr.bf16.gmra.mrb[12].mxu0 %v2113_v48  ;;  %1007 = vmatprep.mubr.bf16.mxu1 %v2114_v49 }
  0x9a   : > { %1120 = vmatprep.mubr.bf16.mxu0 %v2116_v50  ;;  %v337_v50 = vld [vmem:[#allocation2 + $0x50] sm:$0xff] }
  0xa0   : > { %1008 = vmatmul.mubr.bf16.gmra.mrb[16].mxu1 %v2118_v51 }
  0xa1   : > { %1121 = vmatmul.mubr.bf16.gmra.mrb[16].mxu0 %v2119_v52  ;;  %1017 = vmatprep.mubr.bf16.mxu1 %v2120_v53 }
  0xa2   : > { %1130 = vmatprep.mubr.bf16.mxu0 %v2122_v54 }
  0xa8   : > { %1018 = vmatmul.mubr.bf16.gmra.mrb[20].mxu1 %v2124_v55  ;;  %v338_v55 = vld [vmem:[#allocation2 + $0x58] sm:$0xff] }
  0xa9   : > { %1131 = vmatmul.mubr.bf16.gmra.mrb[20].mxu0 %v2125_v56  ;;  %1027 = vmatprep.mubr.bf16.mxu1 %v2126_v57 }
  0xaa   : > { %1140 = vmatprep.mubr.bf16.mxu0 %v2128_v58 }
  0xb0   : > { %1028 = vmatmul.mubr.bf16.gmra.mrb[24].mxu1 %v2130_v59 }
  0xb1   : > { %1141 = vmatmul.mubr.bf16.gmra.mrb[24].mxu0 %v2131_v60  ;;  %1037 = vmatprep.mubr.bf16.mxu1 %v2132_v61 }
  0xb2   : > { %1150 = vmatprep.mubr.bf16.mxu0 %v2134_v62  ;;  %v339_v62 = vld [vmem:[#allocation2 + $0x60] sm:$0xff] }
  0xb8   : > { %1038 = vmatmul.mubr.bf16.gmra.mrb[28].mxu1 %v2136_v63 }
  0xb9   : > { %1151 = vmatmul.mubr.bf16.gmra.mrb[28].mxu0 %v2137_v0 }
 0x153   : > { %v969_v1 = vpop.f32.mrb[0].mxu1 }
 0x154   : > { %v1082_v3 = vpop.f32.mrb[0].mxu0  ;;  %v971_v5 = vpop.f32.mrb[1].mxu1 }
 0x155   : > { %v1083_v4 = vadd.f32 %v1082_v3, %v969_v1  ;;  %v1084_v7 = vpop.f32.mrb[1].mxu0  ;;  %v973_v9 = vpop.f32.mrb[2].mxu1 }
 0x156   : > { %v1085_v8 = vadd.f32 %v1084_v7, %v971_v5  ;;  %v1086_v11 = vpop.f32.mrb[2].mxu0  ;;  %v975_v14 = vpop.f32.mrb[3].mxu1 }
 0x157   : > { %v1161_v12 = vadd.f32 %v1083_v4, %v327_v2  ;;  %v1087_v13 = vadd.f32 %v1086_v11, %v973_v9  ;;  %v1088_v16 = vpop.f32.mrb[3].mxu0  ;;  %v340_v2 = vld [vmem:[#allocation2 + $0x68] sm:$0xff]  ;;  %v342_v11 = vld [vmem:[#allocation2 + $0x78] sm:$0xff] }
 0x158   : > { %v1162_v17 = vadd.f32 %v1085_v8, %v328_v6  ;;  %v1089_v18 = vadd.f32 %v1088_v16, %v975_v14  ;;  %v341_v6 = vld [vmem:[#allocation2 + $0x70] sm:$0xff] }
 0x159   : > { %1193 = vst [vmem:[#allocation2] sm:$0xff] %v1161_v12  ;;  %v1163_v19 = vadd.f32 %v1087_v13, %v329_v10 }
 0x15a   : > { %1194 = vst [vmem:[#allocation2 + $0x8] sm:$0xff] %v1162_v17  ;;  %v1164_v20 = vadd.f32 %v1089_v18, %v330_v15  ;;  %v343_v18 = vld [vmem:[#allocation2 + $0x80] sm:$0xff] }
 0x15b   : > { %1195 = vst [vmem:[#allocation2 + $0x10] sm:$0xff] %v1163_v19  ;;  %v979_v21 = vpop.f32.mrb[4].mxu1 }
 0x15c   : > { %1196 = vst [vmem:[#allocation2 + $0x18] sm:$0xff] %v1164_v20  ;;  %v1092_v23 = vpop.f32.mrb[4].mxu0  ;;  %v981_v25 = vpop.f32.mrb[5].mxu1 }
 0x15d   : > { %v1093_v24 = vadd.f32 %v1092_v23, %v979_v21  ;;  %v1094_v27 = vpop.f32.mrb[5].mxu0  ;;  %v983_v29 = vpop.f32.mrb[6].mxu1 }
 0x15e   : > { %v1095_v28 = vadd.f32 %v1094_v27, %v981_v25  ;;  %v1096_v31 = vpop.f32.mrb[6].mxu0  ;;  %v985_v34 = vpop.f32.mrb[7].mxu1 }
 0x15f   : > { %v1165_v32 = vadd.f32 %v1093_v24, %v331_v22  ;;  %v1097_v33 = vadd.f32 %v1096_v31, %v983_v29  ;;  %v1098_v36 = vpop.f32.mrb[7].mxu0  ;;  %v344_v22 = vld [vmem:[#allocation2 + $0x88] sm:$0xff]  ;;  %v346_v31 = vld [vmem:[#allocation2 + $0x98] sm:$0xff] }
 0x160   : > { %v1166_v37 = vadd.f32 %v1095_v28, %v332_v26  ;;  %v1099_v38 = vadd.f32 %v1098_v36, %v985_v34  ;;  %v345_v26 = vld [vmem:[#allocation2 + $0x90] sm:$0xff] }
 0x161   : > { %1197 = vst [vmem:[#allocation2 + $0x20] sm:$0xff] %v1165_v32  ;;  %v1167_v39 = vadd.f32 %v1097_v33, %v333_v30 }
 0x162   : > { %1198 = vst [vmem:[#allocation2 + $0x28] sm:$0xff] %v1166_v37  ;;  %v1168_v40 = vadd.f32 %v1099_v38, %v334_v35  ;;  %v347_v38 = vld [vmem:[#allocation2 + $0xa0] sm:$0xff] }
 0x163   : > { %1199 = vst [vmem:[#allocation2 + $0x30] sm:$0xff] %v1167_v39  ;;  %v989_v41 = vpop.f32.mrb[8].mxu1 }
 0x164   : > { %1200 = vst [vmem:[#allocation2 + $0x38] sm:$0xff] %v1168_v40  ;;  %v1102_v43 = vpop.f32.mrb[8].mxu0  ;;  %v991_v45 = vpop.f32.mrb[9].mxu1 }
 0x165   : > { %v1103_v44 = vadd.f32 %v1102_v43, %v989_v41  ;;  %v1104_v47 = vpop.f32.mrb[9].mxu0  ;;  %v993_v49 = vpop.f32.mrb[10].mxu1 }
 0x166   : > { %v1105_v48 = vadd.f32 %v1104_v47, %v991_v45  ;;  %v1106_v51 = vpop.f32.mrb[10].mxu0  ;;  %v995_v54 = vpop.f32.mrb[11].mxu1 }
 0x167   : > { %v1169_v52 = vadd.f32 %v1103_v44, %v335_v42  ;;  %v1107_v53 = vadd.f32 %v1106_v51, %v993_v49  ;;  %v1108_v56 = vpop.f32.mrb[11].mxu0  ;;  %v348_v42 = vld [vmem:[#allocation2 + $0xa8] sm:$0xff]  ;;  %v350_v51 = vld [vmem:[#allocation2 + $0xb8] sm:$0xff] }
 0x168   : > { %v1170_v57 = vadd.f32 %v1105_v48, %v336_v46  ;;  %v1109_v58 = vadd.f32 %v1108_v56, %v995_v54  ;;  %v349_v46 = vld [vmem:[#allocation2 + $0xb0] sm:$0xff] }
 0x169   : > { %1201 = vst [vmem:[#allocation2 + $0x40] sm:$0xff] %v1169_v52  ;;  %v1171_v59 = vadd.f32 %v1107_v53, %v337_v50 }
 0x16a   : > { %1202 = vst [vmem:[#allocation2 + $0x48] sm:$0xff] %v1170_v57  ;;  %v1172_v60 = vadd.f32 %v1109_v58, %v338_v55  ;;  %v351_v58 = vld [vmem:[#allocation2 + $0xc0] sm:$0xff] }
 0x16b   : > { %1203 = vst [vmem:[#allocation2 + $0x50] sm:$0xff] %v1171_v59  ;;  %v999_v61 = vpop.f32.mrb[12].mxu1 }
 0x16c   : > { %1204 = vst [vmem:[#allocation2 + $0x58] sm:$0xff] %v1172_v60  ;;  %v1112_v63 = vpop.f32.mrb[12].mxu0  ;;  %v1001_v1 = vpop.f32.mrb[13].mxu1 }
 0x16d   : > { %v1113_v0 = vadd.f32 %v1112_v63, %v999_v61  ;;  %v1114_v3 = vpop.f32.mrb[13].mxu0  ;;  %v1003_v5 = vpop.f32.mrb[14].mxu1 }
 0x16e   : > { %v1115_v4 = vadd.f32 %v1114_v3, %v1001_v1  ;;  %v1116_v7 = vpop.f32.mrb[14].mxu0  ;;  %v1005_v10 = vpop.f32.mrb[15].mxu1 }
 0x16f   : > { %v1173_v8 = vadd.f32 %v1113_v0, %v339_v62  ;;  %v1117_v9 = vadd.f32 %v1116_v7, %v1003_v5  ;;  %v1118_v12 = vpop.f32.mrb[15].mxu0  ;;  %v352_v62 = vld [vmem:[#allocation2 + $0xc8] sm:$0xff]  ;;  %v354_v7 = vld [vmem:[#allocation2 + $0xd8] sm:$0xff] }
 0x170   : > { %v1174_v13 = vadd.f32 %v1115_v4, %v340_v2  ;;  %v1119_v14 = vadd.f32 %v1118_v12, %v1005_v10  ;;  %v353_v2 = vld [vmem:[#allocation2 + $0xd0] sm:$0xff] }
 0x171   : > { %1205 = vst [vmem:[#allocation2 + $0x60] sm:$0xff] %v1173_v8  ;;  %v1175_v15 = vadd.f32 %v1117_v9, %v341_v6 }
 0x172   : > { %1206 = vst [vmem:[#allocation2 + $0x68] sm:$0xff] %v1174_v13  ;;  %v1176_v16 = vadd.f32 %v1119_v14, %v342_v11  ;;  %v355_v14 = vld [vmem:[#allocation2 + $0xe0] sm:$0xff] }
 0x173   : > { %1207 = vst [vmem:[#allocation2 + $0x70] sm:$0xff] %v1175_v15  ;;  %v1009_v17 = vpop.f32.mrb[16].mxu1 }
 0x174   : > { %1208 = vst [vmem:[#allocation2 + $0x78] sm:$0xff] %v1176_v16  ;;  %v1122_v19 = vpop.f32.mrb[16].mxu0  ;;  %v1011_v21 = vpop.f32.mrb[17].mxu1 }
 0x175   : > { %v1123_v20 = vadd.f32 %v1122_v19, %v1009_v17  ;;  %v1124_v23 = vpop.f32.mrb[17].mxu0  ;;  %v1013_v25 = vpop.f32.mrb[18].mxu1 }
 0x176   : > { %v1125_v24 = vadd.f32 %v1124_v23, %v1011_v21  ;;  %v1126_v27 = vpop.f32.mrb[18].mxu0  ;;  %v1015_v30 = vpop.f32.mrb[19].mxu1 }
 0x177   : > { %v1177_v28 = vadd.f32 %v1123_v20, %v343_v18  ;;  %v1127_v29 = vadd.f32 %v1126_v27, %v1013_v25  ;;  %v1128_v32 = vpop.f32.mrb[19].mxu0  ;;  %v356_v18 = vld [vmem:[#allocation2 + $0xe8] sm:$0xff]  ;;  %v358_v27 = vld [vmem:[#allocation2 + $0xf8] sm:$0xff] }
 0x178   : > { %v1178_v33 = vadd.f32 %v1125_v24, %v344_v22  ;;  %v1129_v34 = vadd.f32 %v1128_v32, %v1015_v30  ;;  %v357_v22 = vld [vmem:[#allocation2 + $0xf0] sm:$0xff] }
 0x179   : > { %1209 = vst [vmem:[#allocation2 + $0x80] sm:$0xff] %v1177_v28  ;;  %v1179_v35 = vadd.f32 %v1127_v29, %v345_v26 }
 0x17a   : > { %1210 = vst [vmem:[#allocation2 + $0x88] sm:$0xff] %v1178_v33  ;;  %v1180_v36 = vadd.f32 %v1129_v34, %v346_v31  ;;  %v2405_v33 = vld [vmem:[#allocation2] sm:$0xff] (!%p1900_p10)  ;;  %v2407_v34 = vld [vmem:[#allocation2 + $0x8] sm:$0xff] (!%p1900_p10) }
 0x17b   : > { %1211 = vst [vmem:[#allocation2 + $0x90] sm:$0xff] %v1179_v35  ;;  %v1019_v37 = vpop.f32.mrb[20].mxu1  ;;  %v2409_v35 = vld [vmem:[#allocation2 + $0x10] sm:$0xff] (!%p1900_p10) }
 0x17c   : > { %1212 = vst [vmem:[#allocation2 + $0x98] sm:$0xff] %v1180_v36  ;;  %v1132_v39 = vpop.f32.mrb[20].mxu0  ;;  %v1021_v41 = vpop.f32.mrb[21].mxu1  ;;  %v2411_v36 = vld [vmem:[#allocation2 + $0x18] sm:$0xff] (!%p1900_p10) }
 0x17d   : > { %v1133_v40 = vadd.f32 %v1132_v39, %v1019_v37  ;;  %v1134_v43 = vpop.f32.mrb[21].mxu0  ;;  %v1023_v45 = vpop.f32.mrb[22].mxu1  ;;  %v2413_v37 = vld [vmem:[#allocation2 + $0x20] sm:$0xff] (!%p1900_p10)  ;;  %v1261_v39 = vadd.f32 (!%p1900_p10), %v2409_v35, %v2405_v33 }
 0x17e   : > { %v1135_v44 = vadd.f32 %v1134_v43, %v1021_v41  ;;  %v1136_v47 = vpop.f32.mrb[22].mxu0  ;;  %v1025_v50 = vpop.f32.mrb[23].mxu1  ;;  %v1282_v41 = vadd.f32 (!%p1900_p10), %v2411_v36, %v2407_v34 }
 0x17f   : > { %v1181_v48 = vadd.f32 %v1133_v40, %v347_v38  ;;  %v1137_v49 = vadd.f32 %v1136_v47, %v1023_v45  ;;  %v1138_v52 = vpop.f32.mrb[23].mxu0  ;;  %v2415_v38 = vld [vmem:[#allocation2 + $0x28] sm:$0xff] (!%p1900_p10)  ;;  %v2419_v40 = vld [vmem:[#allocation2 + $0x30] sm:$0xff] (!%p1900_p10)  ;;  %v1262_v43 = vadd.f32 (!%p1900_p10), %v1261_v39, %v2413_v37 }
 0x180   : > { %v1182_v53 = vadd.f32 %v1135_v44, %v348_v42  ;;  %v1139_v54 = vadd.f32 %v1138_v52, %v1025_v50  ;;  %v2423_v42 = vld [vmem:[#allocation2 + $0x38] sm:$0xff] (!%p1900_p10)  ;;  %v2426_v44 = vld [vmem:[#allocation2 + $0x40] sm:$0xff] (!%p1900_p10)  ;;  %v1283_v45 = vadd.f32 (!%p1900_p10), %v1282_v41, %v2415_v38 }
 0x181   : > { %1213 = vst [vmem:[#allocation2 + $0xa0] sm:$0xff] %v1181_v48  ;;  %v1183_v55 = vadd.f32 %v1137_v49, %v349_v46  ;;  %v2429_v46 = vld [vmem:[#allocation2 + $0x48] sm:$0xff] (!%p1900_p10)  ;;  %v1263_v47 = vadd.f32 (!%p1900_p10), %v1262_v43, %v2419_v40  ;;  %v2432_v48 = vld [vmem:[#allocation2 + $0x50] sm:$0xff] (!%p1900_p10)  ;;  %v2435_v50 = vld [vmem:[#allocation2 + $0x58] sm:$0xff] (!%p1900_p10) }
 0x182   : > { %1214 = vst [vmem:[#allocation2 + $0xa8] sm:$0xff] %v1182_v53  ;;  %v1184_v56 = vadd.f32 %v1139_v54, %v350_v51  ;;  %v1284_v49 = vadd.f32 (!%p1900_p10), %v1283_v45, %v2423_v42  ;;  %v2438_v52 = vld [vmem:[#allocation2 + $0x60] sm:$0xff] (!%p1900_p10)  ;;  %v2441_v54 = vld [vmem:[#allocation2 + $0x68] sm:$0xff] (!%p1900_p10) }
 0x183   : > { %1215 = vst [vmem:[#allocation2 + $0xb0] sm:$0xff] %v1183_v55  ;;  %v1029_v57 = vpop.f32.mrb[24].mxu1  ;;  %v1264_v51 = vadd.f32 (!%p1900_p10), %v1263_v47, %v2426_v44 }
 0x184   : > { %1216 = vst [vmem:[#allocation2 + $0xb8] sm:$0xff] %v1184_v56  ;;  %v1142_v59 = vpop.f32.mrb[24].mxu0  ;;  %v1031_v61 = vpop.f32.mrb[25].mxu1  ;;  %v1285_v53 = vadd.f32 (!%p1900_p10), %v1284_v49, %v2429_v46  ;;  %v2444_v56 = vld [vmem:[#allocation2 + $0x70] sm:$0xff] (!%p1900_p10) }
 0x185   : > { %v1143_v60 = vadd.f32 %v1142_v59, %v1029_v57  ;;  %v1144_v63 = vpop.f32.mrb[25].mxu0  ;;  %v1033_v1 = vpop.f32.mrb[26].mxu1  ;;  %v1265_v55 = vadd.f32 (!%p1900_p10), %v1264_v51, %v2432_v48 }
 0x186   : > { %v1145_v0 = vadd.f32 %v1144_v63, %v1031_v61  ;;  %v1146_v3 = vpop.f32.mrb[26].mxu0  ;;  %v1035_v6 = vpop.f32.mrb[27].mxu1  ;;  %v1286_v57 = vadd.f32 (!%p1900_p10), %v1285_v53, %v2435_v50 }
 0x187   : > { %v1185_v4 = vadd.f32 %v1143_v60, %v351_v58  ;;  %v1147_v5 = vadd.f32 %v1146_v3, %v1033_v1  ;;  %v1148_v8 = vpop.f32.mrb[27].mxu0  ;;  %v2447_v58 = vld [vmem:[#allocation2 + $0x78] sm:$0xff] (!%p1900_p10)  ;;  %v1266_v59 = vadd.f32 (!%p1900_p10), %v1265_v55, %v2438_v52  ;;  %v2450_v60 = vld [vmem:[#allocation2 + $0x80] sm:$0xff] (!%p1900_p10) }
 0x188   : > { %v1186_v9 = vadd.f32 %v1145_v0, %v352_v62  ;;  %v1149_v10 = vadd.f32 %v1148_v8, %v1035_v6  ;;  %v1287_v61 = vadd.f32 (!%p1900_p10), %v1286_v57, %v2441_v54  ;;  %v2453_v62 = vld [vmem:[#allocation2 + $0x88] sm:$0xff] (!%p1900_p10)  ;;  %v2456_v0 = vld [vmem:[#allocation2 + $0x90] sm:$0xff] (!%p1900_p10) }
 0x189   : > { %1217 = vst [vmem:[#allocation2 + $0xc0] sm:$0xff] %v1185_v4  ;;  %v1187_v11 = vadd.f32 %v1147_v5, %v353_v2  ;;  %v1267_v63 = vadd.f32 (!%p1900_p10), %v1266_v59, %v2444_v56  ;;  %v2459_v2 = vld [vmem:[#allocation2 + $0x98] sm:$0xff] (!%p1900_p10)  ;;  %v2462_v4 = vld [vmem:[#allocation2 + $0xa0] sm:$0xff] (!%p1900_p10)  ;;  %v2465_v6 = vld [vmem:[#allocation2 + $0xa8] sm:$0xff] (!%p1900_p10) }
 0x18a   : > { %1218 = vst [vmem:[#allocation2 + $0xc8] sm:$0xff] %v1186_v9  ;;  %v1188_v12 = vadd.f32 %v1149_v10, %v354_v7  ;;  %v1288_v1 = vadd.f32 (!%p1900_p10), %v1287_v61, %v2447_v58  ;;  %v2468_v8 = vld [vmem:[#allocation2 + $0xb0] sm:$0xff] (!%p1900_p10) }
 0x18b   : > { %1219 = vst [vmem:[#allocation2 + $0xd0] sm:$0xff] %v1187_v11  ;;  %v1039_v13 = vpop.f32.mrb[28].mxu1  ;;  %v1268_v3 = vadd.f32 (!%p1900_p10), %v1267_v63, %v2450_v60  ;;  %v2471_v10 = vld [vmem:[#allocation2 + $0xb8] sm:$0xff] (!%p1900_p10) }
 0x18c   : > { %1220 = vst [vmem:[#allocation2 + $0xd8] sm:$0xff] %v1188_v12  ;;  %v1152_v15 = vpop.f32.mrb[28].mxu0  ;;  %v1041_v17 = vpop.f32.mrb[29].mxu1  ;;  %v1289_v5 = vadd.f32 (!%p1900_p10), %v1288_v1, %v2453_v62 }
 0x18d   : > { %v1153_v16 = vadd.f32 %v1152_v15, %v1039_v13  ;;  %v1154_v19 = vpop.f32.mrb[29].mxu0  ;;  %v1043_v21 = vpop.f32.mrb[30].mxu1  ;;  %v1269_v7 = vadd.f32 (!%p1900_p10), %v1268_v3, %v2456_v0 }
 0x18e   : > { %v1155_v20 = vadd.f32 %v1154_v19, %v1041_v17  ;;  %v1156_v23 = vpop.f32.mrb[30].mxu0  ;;  %v1045_v26 = vpop.f32.mrb[31].mxu1  ;;  %1228 = sbr.rel (%p1900_p10) target bundleno = 546 (0x222), region = 67  ;;  %v1290_v9 = vadd.f32 (!%p1900_p10), %v1289_v5, %v2459_v2 }
 0x18f   : > { %v1189_v24 = vadd.f32 %v1153_v16, %v355_v14  ;;  %v1157_v25 = vadd.f32 %v1156_v23, %v1043_v21  ;;  %v1158_v28 = vpop.f32.mrb[31].mxu0  ;;  %v1270_v11 = vadd.f32 (!%p1900_p10), %v1269_v7, %v2462_v4 }
 0x190   : > { %v1190_v29 = vadd.f32 %v1155_v20, %v356_v18  ;;  %v1159_v30 = vadd.f32 %v1158_v28, %v1045_v26  ;;  %v2474_v12 = vld [vmem:[#allocation2 + $0xc0] sm:$0xff] (!%p1900_p10)  ;;  %v1291_v13 = vadd.f32 (!%p1900_p10), %v1290_v9, %v2465_v6 }
 0x191   : > { %1221 = vst [vmem:[#allocation2 + $0xe0] sm:$0xff] %v1189_v24  ;;  %v1191_v31 = vadd.f32 %v1157_v25, %v357_v22  ;;  %v2477_v14 = vld [vmem:[#allocation2 + $0xc8] sm:$0xff] (!%p1900_p10)  ;;  %v1271_v15 = vadd.f32 (!%p1900_p10), %v1270_v11, %v2468_v8 }
 0x192   : > { %1222 = vst [vmem:[#allocation2 + $0xe8] sm:$0xff] %v1190_v29  ;;  %v1192_v32 = vadd.f32 %v1159_v30, %v358_v27  ;;  %v2480_v16 = vld [vmem:[#allocation2 + $0xd0] sm:$0xff] (!%p1900_p10)  ;;  %v1292_v17 = vadd.f32 (!%p1900_p10), %v1291_v13, %v2471_v10 }
 0x193   : > { %1223 = vst [vmem:[#allocation2 + $0xf0] sm:$0xff] %v1191_v31  ;;  %v2483_v18 = vld [vmem:[#allocation2 + $0xd8] sm:$0xff] (!%p1900_p10)  ;;  %v1272_v19 = vadd.f32 (!%p1900_p10), %v1271_v15, %v2474_v12 }
 0x194   : > { %1224 = vst [vmem:[#allocation2 + $0xf8] sm:$0xff] %v1192_v32  ;;  %v1293_v21 = vadd.f32 (!%p1900_p10), %v1292_v17, %v2477_v14 }
 0x195   : > { %v1273_v23 = vadd.f32 %v1272_v19, %v2480_v16 }
 0x196   : > { %v1294_v25 = vadd.f32 %v1293_v21, %v2483_v18 }
 0x198   : > { %v2486_v20 = vld [vmem:[#allocation2 + $0xe0] sm:$0xff] }
 0x199   : > { %v2489_v22 = vld [vmem:[#allocation2 + $0xe8] sm:$0xff]  ;;  %v1274_v27 = vadd.f32 %v1273_v23, %v2486_v20 }
 0x19a   : > { %v2492_v24 = vld [vmem:[#allocation2 + $0xf0] sm:$0xff]  ;;  %v1295_v28 = vadd.f32 %v1294_v25, %v2489_v22 }
 0x19b   : > { %v2495_v26 = vld [vmem:[#allocation2 + $0xf8] sm:$0xff]  ;;  %v1275_v29 = vadd.f32 %v1274_v27, %v2492_v24 }
 0x19c   : > { %v1296_v30 = vadd.f32 %v1295_v28, %v2495_v26 }
 0x19d   : > { %v1276_v31 = vrot.slane %v1275_v29, 4 }
 0x19e   : > { %v1297_v32 = vrot.slane %v1296_v30, 4 }
 0x19f   : > { %v1277_v39 = vadd.f32 %v1276_v31, %v1275_v29 }
 0x1a0   : > { %v1298_v41 = vadd.f32 %v1297_v32, %v1296_v30 }
 0x1a1   : > { %v1278_v43 = vrot.slane %v1277_v39, 2 }
 0x1a2   : > { %v1299_v45 = vrot.slane %v1298_v41, 2 }
 0x1a3   : > { %v1279_v47 = vadd.f32 %v1278_v43, %v1277_v39 }
 0x1a4   : > { %v1300_v49 = vadd.f32 %v1299_v45, %v1298_v41 }
 0x1a5   : > { %v1280_v51 = vrot.slane %v1279_v47, 1 }
 0x1a6   : > { %v1301_v53 = vrot.slane %v1300_v49, 1 }
 0x1a7   : > { %v1281_v55 = vadd.f32 %v1280_v51, %v1279_v47 }
 0x1a8   : > { %v1302_v57 = vadd.f32 %v1301_v53, %v1300_v49 }
 0x1a9   : > { %v2501_v59 = vmul.f32 0.0078125, %v1281_v55 }
 0x1aa   : > { %v2503_v61 = vmul.f32 0.0078125, %v1302_v57 }
 0x1ab   : > { %v2507_v63 = vsub.f32 %v2405_v33, %v2501_v59  ;;  %v2515_v3 = vsub.f32 %v2409_v35, %v2501_v59  ;;  %v2523_v7 = vsub.f32 %v2413_v37, %v2501_v59  ;;  %v2559_v15 = vsub.f32 %v2432_v48, %v2501_v59 }
 0x1ac   : > { %v2511_v1 = vsub.f32 %v2407_v34, %v2503_v61  ;;  %v2519_v5 = vsub.f32 %v2411_v36, %v2503_v61  ;;  %v2527_v33 = vsub.f32 %v2415_v38, %v2503_v61  ;;  %v2531_v34 = vsub.f32 %v2419_v40, %v2501_v59 }
 0x1ad   : > { %v2535_v35 = vsub.f32 %v2423_v42, %v2503_v61  ;;  %v1338_v36 = vmul.f32 %v2507_v63, %v2507_v63  ;;  %v1340_v37 = vmul.f32 %v2515_v3, %v2515_v3  ;;  %v2547_v40 = vsub.f32 %v2426_v44, %v2501_v59 }
 0x1ae   : > { %v1339_v9 = vmul.f32 %v2511_v1, %v2511_v1  ;;  %v1341_v38 = vmul.f32 %v2519_v5, %v2519_v5  ;;  %v2551_v42 = vsub.f32 %v2429_v46, %v2503_v61  ;;  %v1342_v11 = vmul.f32 %v2523_v7, %v2523_v7 }
 0x1af   : > { %v1343_v13 = vmul.f32 %v2527_v33, %v2527_v33  ;;  %v2563_v17 = vsub.f32 %v2435_v50, %v2503_v61  ;;  %v1344_v44 = vmul.f32 %v2531_v34, %v2531_v34  ;;  %v1345_v46 = vmul.f32 %v2535_v35, %v2535_v35 }
 0x1b0   : > { %v1370_v19 = vadd.f32 %v1340_v37, %v1338_v36  ;;  %v1391_v21 = vadd.f32 %v1341_v38, %v1339_v9  ;;  %v2571_v23 = vsub.f32 %v2438_v52, %v2501_v59  ;;  %v2575_v48 = vsub.f32 %v2441_v54, %v2503_v61 }
 0x1b1   : > { %v1346_v50 = vmul.f32 %v2547_v40, %v2547_v40  ;;  %v1347_v25 = vmul.f32 %v2551_v42, %v2551_v42  ;;  %v2583_v29 = vsub.f32 %v2444_v56, %v2501_v59  ;;  %v2587_v52 = vsub.f32 %v2447_v58, %v2503_v61 }
 0x1b2   : > { %v1371_v27 = vadd.f32 %v1370_v19, %v1342_v11  ;;  %v1392_v28 = vadd.f32 %v1391_v21, %v1343_v13  ;;  %v1348_v54 = vmul.f32 %v2559_v15, %v2559_v15  ;;  %v1349_v30 = vmul.f32 %v2563_v17, %v2563_v17 }
 0x1b3   : > { %v2595_v39 = vsub.f32 %v2450_v60, %v2501_v59  ;;  %v2599_v56 = vsub.f32 %v2453_v62, %v2503_v61  ;;  %v1350_v58 = vmul.f32 %v2571_v23, %v2571_v23  ;;  %v1351_v41 = vmul.f32 %v2575_v48, %v2575_v48 }
 0x1b4   : > { %v1372_v31 = vadd.f32 %v1371_v27, %v1344_v44  ;;  %v1393_v32 = vadd.f32 %v1392_v28, %v1345_v46  ;;  %v2607_v47 = vsub.f32 %v2456_v0, %v2501_v59  ;;  %v2611_v60 = vsub.f32 %v2459_v2, %v2503_v61 }
 0x1b5   : > { %v1352_v62 = vmul.f32 %v2583_v29, %v2583_v29  ;;  %v1353_v49 = vmul.f32 %v2587_v52, %v2587_v52  ;;  %v2619_v55 = vsub.f32 %v2462_v4, %v2501_v59  ;;  %v2623_v0 = vsub.f32 %v2465_v6, %v2503_v61 }
 0x1b6   : > { %v1373_v43 = vadd.f32 %v1372_v31, %v1346_v50  ;;  %v1394_v45 = vadd.f32 %v1393_v32, %v1347_v25  ;;  %v1354_v2 = vmul.f32 %v2595_v39, %v2595_v39  ;;  %v1355_v57 = vmul.f32 %v2599_v56, %v2599_v56 }
 0x1b7   : > { %v2631_v37 = vsub.f32 %v2468_v8, %v2501_v59  ;;  %v2635_v4 = vsub.f32 %v2471_v10, %v2503_v61  ;;  %v1356_v6 = vmul.f32 %v2607_v47, %v2607_v47  ;;  %v1357_v38 = vmul.f32 %v2611_v60, %v2611_v60 }
 0x1b8   : > { %v1374_v51 = vadd.f32 %v1373_v43, %v1348_v54  ;;  %v1395_v53 = vadd.f32 %v1394_v45, %v1349_v30  ;;  %v2643_v44 = vsub.f32 %v2474_v12, %v2501_v59  ;;  %v2647_v8 = vsub.f32 %v2477_v14, %v2503_v61 }
 0x1b9   : > { %v1358_v10 = vmul.f32 %v2619_v55, %v2619_v55  ;;  %v1359_v46 = vmul.f32 %v2623_v0, %v2623_v0  ;;  %v2655_v50 = vsub.f32 %v2480_v16, %v2501_v59  ;;  %v2659_v12 = vsub.f32 %v2483_v18, %v2503_v61 }
 0x1ba   : > { %v1375_v36 = vadd.f32 %v1374_v51, %v1350_v58  ;;  %v1396_v9 = vadd.f32 %v1395_v53, %v1351_v41  ;;  %v1360_v14 = vmul.f32 %v2631_v37, %v2631_v37  ;;  %v1361_v25 = vmul.f32 %v2635_v4, %v2635_v4 }
 0x1bb   : > { %v2667_v54 = vsub.f32 %v2486_v20, %v2501_v59  ;;  %v2671_v16 = vsub.f32 %v2489_v22, %v2503_v61  ;;  %v1362_v18 = vmul.f32 %v2643_v44, %v2643_v44  ;;  %v1363_v30 = vmul.f32 %v2647_v8, %v2647_v8 }
 0x1bc   : > { %v1376_v11 = vadd.f32 %v1375_v36, %v1352_v62  ;;  %v1397_v13 = vadd.f32 %v1396_v9, %v1353_v49  ;;  %v2679_v58 = vsub.f32 %v2492_v24, %v2501_v59  ;;  %v2683_v20 = vsub.f32 %v2495_v26, %v2503_v61 }
 0x1bd   : > { %v1364_v22 = vmul.f32 %v2655_v50, %v2655_v50  ;;  %v1365_v41 = vmul.f32 %v2659_v12, %v2659_v12  ;;  %v1366_v62 = vmul.f32 %v2667_v54, %v2667_v54  ;;  %v1367_v49 = vmul.f32 %v2671_v16, %v2671_v16 }
 0x1be   : > { %v1377_v19 = vadd.f32 %v1376_v11, %v1354_v2  ;;  %v1398_v21 = vadd.f32 %v1397_v13, %v1355_v57  ;;  %v1368_v26 = vmul.f32 %v2679_v58, %v2679_v58  ;;  %v1369_v61 = vmul.f32 %v2683_v20, %v2683_v20 }
 0x1c0   : > { %v1378_v27 = vadd.f32 %v1377_v19, %v1356_v6  ;;  %v1399_v28 = vadd.f32 %v1398_v21, %v1357_v38 }
 0x1c2   : > { %v1379_v31 = vadd.f32 %v1378_v27, %v1358_v10  ;;  %v1400_v32 = vadd.f32 %v1399_v28, %v1359_v46 }
 0x1c4   : > { %v1380_v43 = vadd.f32 %v1379_v31, %v1360_v14  ;;  %v1401_v45 = vadd.f32 %v1400_v32, %v1361_v25  ;;  %v1452_v31 = vlaneseq }
 0x1c6   : > { %v1381_v24 = vadd.f32 %v1380_v43, %v1362_v18  ;;  %v1402_v59 = vadd.f32 %v1401_v45, %v1363_v30  ;;  %v1450_v45 = vld [vmem:[%s2903_s2] sm:$0x3] }
 0x1c8   : > { %v1382_v51 = vadd.f32 %v1381_v24, %v1364_v22  ;;  %v1403_v53 = vadd.f32 %v1402_v59, %v1365_v41  ;;  %v1453_v41 = vshrl.u32 %v1452_v31, 7 }
 0x1ca   : > { %v1383_v2 = vadd.f32 %v1382_v51, %v1366_v62  ;;  %v1404_v57 = vadd.f32 %v1403_v53, %v1367_v49  ;;  %v1454_v43 = vsub.s32 0, %v1453_v41  ;;  %v1458_v62 = vsub.s32 1, %v1453_v41  ;;  %v1494_v49 = vld [vmem:[%s2904_s3] sm:$0x3] }
 0x1cc   : > { %v1384_v36 = vadd.f32 %v1383_v2, %v1368_v26  ;;  %v1405_v9 = vadd.f32 %v1404_v57, %v1369_v61  ;;  %v2703_v24 = vrot.slane %v1450_v45, %v1454_v43  ;;  %v2707_v26 = vrot.slane %v1450_v45, %v1458_v62 }
 0x1cd   : > { %v2709_v61 = vrot.slane %v1494_v49, %v1454_v43  ;;  %v2711_v51 = vrot.slane %v1494_v49, %v1458_v62 }
 0x1ce   : > { %v1385_v6 = vrot.slane %v1384_v36, 4  ;;  %v1406_v38 = vrot.slane %v1405_v9, 4 }
 0x1d0   : > { %v1386_v11 = vadd.f32 %v1385_v6, %v1384_v36  ;;  %v1407_v13 = vadd.f32 %v1406_v38, %v1405_v9 }
 0x1d2   : > { %v1387_v10 = vrot.slane %v1386_v11, 2  ;;  %v1408_v46 = vrot.slane %v1407_v13, 2 }
 0x1d4   : > { %v1388_v19 = vadd.f32 %v1387_v10, %v1386_v11  ;;  %v1409_v21 = vadd.f32 %v1408_v46, %v1407_v13 }
 0x1d6   : > { %v1389_v14 = vrot.slane %v1388_v19, 1  ;;  %v1410_v25 = vrot.slane %v1409_v21, 1 }
 0x1d8   : > { %v1390_v27 = vadd.f32 %v1389_v14, %v1388_v19  ;;  %v1411_v28 = vadd.f32 %v1410_v25, %v1409_v21 }
 0x1da   : > { %v1412_v18 = vmul.f32 0.0078125, %v1390_v27  ;;  %v1413_v30 = vmul.f32 0.0078125, %v1411_v28 }
 0x1dc   : > { %v1414_v32 = vadd.f32 1e-05, %v1412_v18  ;;  %v1415_v22 = vadd.f32 1e-05, %v1413_v30 }
 0x1de   : > { %2138 = vrsqrt.f32 %v1414_v32 }
 0x1df   : > { %2140 = vrsqrt.f32 %v1415_v22 }
 0x1e8   : > { %v2705_v59 = vpop.eup %2138 }
 0x1e9   : > { %v2713_v53 = vpop.eup %2140  ;;  %v1418_v2 = vmul.f32 %v2705_v59, %v2507_v63  ;;  %v1420_v57 = vmul.f32 %v2705_v59, %v2515_v3  ;;  %v1422_v36 = vmul.f32 %v2705_v59, %v2523_v7  ;;  %v1424_v9 = vmul.f32 %v2705_v59, %v2531_v34 }
 0x1ea   : > { %v1419_v6 = vmul.f32 %v2713_v53, %v2511_v1  ;;  %v1421_v38 = vmul.f32 %v2713_v53, %v2519_v5  ;;  %v1423_v11 = vmul.f32 %v2713_v53, %v2527_v33  ;;  %v1425_v63 = vmul.f32 %v2713_v53, %v2535_v35 }
 0x1eb   : > { %v1462_v3 = vmul.f32 %v2703_v24, %v1418_v2  ;;  %v1464_v13 = vmul.f32 %v2703_v24, %v1420_v57  ;;  %v1466_v7 = vmul.f32 %v2703_v24, %v1422_v36  ;;  %v1468_v34 = vmul.f32 %v2703_v24, %v1424_v9 }
 0x1ec   : > { %v1463_v10 = vmul.f32 %v2707_v26, %v1419_v6  ;;  %v1465_v1 = vmul.f32 %v2707_v26, %v1421_v38  ;;  %v1467_v5 = vmul.f32 %v2707_v26, %v1423_v11  ;;  %v1469_v46 = vmul.f32 %v2707_v26, %v1425_v63 }
 0x1ed   : > { %v1506_v33 = vadd.f32 %v2709_v61, %v1462_v3  ;;  %v1508_v35 = vadd.f32 %v2709_v61, %v1464_v13  ;;  %v1510_v19 = vadd.f32 %v2709_v61, %v1466_v7  ;;  %v1512_v21 = vadd.f32 %v2709_v61, %v1468_v34 }
 0x1ee   : > { %v1507_v14 = vadd.f32 %v2711_v51, %v1463_v10  ;;  %v1509_v25 = vadd.f32 %v2711_v51, %v1465_v1  ;;  %v1511_v27 = vadd.f32 %v2711_v51, %v1467_v5  ;;  %v1513_v28 = vadd.f32 %v2711_v51, %v1469_v46 }
 0x1ef   : > { %vm1538_vm0 = vcmp.gt.f32.partialorder %v1506_v33, 0.0  ;;  %v1570_v18 = vmul.f32 0.2, %v1506_v33  ;;  %vm1540_vm1 = vcmp.gt.f32.partialorder %v1508_v35, 0.0  ;;  %v1572_v30 = vmul.f32 0.2, %v1508_v35 }
 0x1f0   : > { %vm1539_vm2 = vcmp.gt.f32.partialorder %v1507_v14, 0.0  ;;  %v1571_v31 = vmul.f32 0.2, %v1507_v14  ;;  %vm1541_vm3 = vcmp.gt.f32.partialorder %v1509_v25, 0.0  ;;  %v1573_v32 = vmul.f32 0.2, %v1509_v25 }
 0x1f1   : > { %v1602_v22 = vsel %vm1538_vm0, %v1506_v33, %v1570_v18  ;;  %v1604_v41 = vsel %vm1540_vm1, %v1508_v35, %v1572_v30  ;;  %vm1542_vm4 = vcmp.gt.f32.partialorder %v1510_v19, 0.0  ;;  %vm1543_vm5 = vcmp.gt.f32.partialorder %v1511_v27, 0.0 }
 0x1f2   : > { %v1603_v43 = vsel %vm1539_vm2, %v1507_v14, %v1571_v31  ;;  %v1605_v45 = vsel %vm1541_vm3, %v1509_v25, %v1573_v32  ;;  %v1574_v62 = vmul.f32 0.2, %v1510_v19  ;;  %v1575_v49 = vmul.f32 0.2, %v1511_v27 }
 0x1f3   : > { %v1921_v2 = vpack.c.bf16 %v1603_v43, %v1602_v22  ;;  %v1922_v57 = vpack.c.bf16 %v1605_v45, %v1604_v41  ;;  %vm1544_vm6 = vcmp.gt.f32.partialorder %v1512_v21, 0.0  ;;  %vm1545_vm7 = vcmp.gt.f32.partialorder %v1513_v28, 0.0 }
 0x1f4   : > { %v1606_v36 = vsel %vm1542_vm4, %v1510_v19, %v1574_v62  ;;  %v1607_v9 = vsel %vm1543_vm5, %v1511_v27, %v1575_v49  ;;  %v1576_v6 = vmul.f32 0.2, %v1512_v21  ;;  %v1577_v38 = vmul.f32 0.2, %v1513_v28 }
 0x1f5   : > { %1730 = vst [vmem:[%s2905_s4] sm:$0xff] %v1921_v2  ;;  %1731 = vst [vmem:[%s2905_s4 + $0x8] sm:$0xff] %v1922_v57  ;;  %v1923_v11 = vpack.c.bf16 %v1607_v9, %v1606_v36  ;;  %v1426_v63 = vmul.f32 %v2705_v59, %v2547_v40  ;;  %v1427_v3 = vmul.f32 %v2713_v53, %v2551_v42 }
 0x1f6   : > { %v1428_v13 = vmul.f32 %v2705_v59, %v2559_v15  ;;  %v1608_v7 = vsel %vm1544_vm6, %v1512_v21, %v1576_v6  ;;  %v1609_v34 = vsel %vm1545_vm7, %v1513_v28, %v1577_v38  ;;  %v1429_v10 = vmul.f32 %v2713_v53, %v2563_v17 }
 0x1f7   : > { %v1430_v1 = vmul.f32 %v2705_v59, %v2571_v23  ;;  %1732 = vst [vmem:[%s2905_s4 + $0x10] sm:$0xff] %v1923_v11  ;;  %v1924_v5 = vpack.c.bf16 %v1609_v34, %v1608_v7  ;;  %v1470_v40 = vmul.f32 %v2703_v24, %v1426_v63  ;;  %v1471_v42 = vmul.f32 %v2707_v26, %v1427_v3 }
 0x1f8   : > { %v1472_v46 = vmul.f32 %v2703_v24, %v1428_v13  ;;  %v1473_v15 = vmul.f32 %v2707_v26, %v1429_v10  ;;  %v1431_v33 = vmul.f32 %v2713_v53, %v2575_v48  ;;  %v1432_v23 = vmul.f32 %v2705_v59, %v2583_v29 }
 0x1f9   : > { %v1474_v17 = vmul.f32 %v2703_v24, %v1430_v1  ;;  %1733 = vst [vmem:[%s2905_s4 + $0x18] sm:$0xff] %v1924_v5  ;;  %v1514_v35 = vadd.f32 %v2709_v61, %v1470_v40  ;;  %v1515_v19 = vadd.f32 %v2711_v51, %v1471_v42  ;;  %v1433_v14 = vmul.f32 %v2713_v53, %v2587_v52 }
 0x1fa   : > { %v1516_v21 = vadd.f32 %v2709_v61, %v1472_v46  ;;  %v1517_v48 = vadd.f32 %v2711_v51, %v1473_v15  ;;  %v1475_v25 = vmul.f32 %v2707_v26, %v1431_v33  ;;  %v1476_v29 = vmul.f32 %v2703_v24, %v1432_v23 }
 0x1fb   : > { %v1518_v27 = vadd.f32 %v2709_v61, %v1474_v17  ;;  %vm1546_vm8 = vcmp.gt.f32.partialorder %v1514_v35, 0.0  ;;  %vm1547_vm9 = vcmp.gt.f32.partialorder %v1515_v19, 0.0  ;;  %v1578_v28 = vmul.f32 0.2, %v1514_v35 }
 0x1fc   : > { %v1579_v18 = vmul.f32 0.2, %v1515_v19  ;;  %vm1548_vm10 = vcmp.gt.f32.partialorder %v1516_v21, 0.0  ;;  %vm1549_vm11 = vcmp.gt.f32.partialorder %v1517_v48, 0.0  ;;  %v1580_v30 = vmul.f32 0.2, %v1516_v21 }
 0x1fd   : > { %v1581_v31 = vmul.f32 0.2, %v1517_v48  ;;  %v1610_v32 = vsel %vm1546_vm8, %v1514_v35, %v1578_v28  ;;  %v1519_v52 = vadd.f32 %v2711_v51, %v1475_v25  ;;  %vm1550_vm12 = vcmp.gt.f32.partialorder %v1518_v27, 0.0 }
 0x1fe   : > { %v1611_v22 = vsel %vm1547_vm9, %v1515_v19, %v1579_v18  ;;  %v1612_v43 = vsel %vm1548_vm10, %v1516_v21, %v1580_v30  ;;  %v1582_v62 = vmul.f32 0.2, %v1518_v27  ;;  %v1477_v57 = vmul.f32 %v2707_v26, %v1433_v14 }
 0x1ff   : > { %v1925_v41 = vpack.c.bf16 %v1611_v22, %v1610_v32  ;;  %v1613_v45 = vsel %vm1549_vm11, %v1517_v48, %v1581_v31  ;;  %vm1551_vm13 = vcmp.gt.f32.partialorder %v1519_v52, 0.0  ;;  %v1583_v2 = vmul.f32 0.2, %v1519_v52 }
 0x200   : > { %v1926_v49 = vpack.c.bf16 %v1613_v45, %v1612_v43  ;;  %v1614_v36 = vsel %vm1550_vm12, %v1518_v27, %v1582_v62  ;;  %v1520_v9 = vadd.f32 %v2709_v61, %v1476_v29  ;;  %v1434_v6 = vmul.f32 %v2705_v59, %v2595_v39 }
 0x201   : > { %1734 = vst [vmem:[%s2905_s4 + $0x20] sm:$0xff] %v1925_v41  ;;  %v1435_v38 = vmul.f32 %v2713_v53, %v2599_v56  ;;  %v1615_v11 = vsel %vm1551_vm13, %v1519_v52, %v1583_v2  ;;  %v1521_v63 = vadd.f32 %v2711_v51, %v1477_v57  ;;  %v1436_v3 = vmul.f32 %v2705_v59, %v2607_v47 }
 0x202   : > { %1735 = vst [vmem:[%s2905_s4 + $0x28] sm:$0xff] %v1926_v49  ;;  %v1437_v13 = vmul.f32 %v2713_v53, %v2611_v60  ;;  %v1927_v7 = vpack.c.bf16 %v1615_v11, %v1614_v36  ;;  %vm1552_vm14 = vcmp.gt.f32.partialorder %v1520_v9, 0.0  ;;  %v1584_v34 = vmul.f32 0.2, %v1520_v9 }
 0x203   : > { %v1478_v39 = vmul.f32 %v2703_v24, %v1434_v6  ;;  %vm1553_vm15 = vcmp.gt.f32.partialorder %v1521_v63, 0.0  ;;  %v1585_v56 = vmul.f32 0.2, %v1521_v63  ;;  %v1479_v10 = vmul.f32 %v2707_v26, %v1435_v38 }
 0x204   : > { %v1480_v1 = vmul.f32 %v2703_v24, %v1436_v3  ;;  %1736 = vst [vmem:[%s2905_s4 + $0x30] sm:$0xff] %v1927_v7  ;;  %v1616_v5 = vsel %vm1552_vm14, %v1520_v9, %v1584_v34  ;;  %v1481_v60 = vmul.f32 %v2707_v26, %v1437_v13  ;;  %v1438_v40 = vmul.f32 %v2705_v59, %v2619_v55 }
 0x205   : > { %v1522_v47 = vadd.f32 %v2709_v61, %v1478_v39  ;;  %v1617_v42 = vsel %vm1553_vm15, %v1521_v63, %v1585_v56  ;;  %v1523_v46 = vadd.f32 %v2711_v51, %v1479_v10  ;;  %v1439_v33 = vmul.f32 %v2713_v53, %v2623_v0 }
 0x206   : > { %v1524_v15 = vadd.f32 %v2709_v61, %v1480_v1  ;;  %v1928_v17 = vpack.c.bf16 %v1617_v42, %v1616_v5  ;;  %v1525_v35 = vadd.f32 %v2711_v51, %v1481_v60  ;;  %v1482_v48 = vmul.f32 %v2703_v24, %v1438_v40 }
 0x207   : > { %vm1554_vm0 = vcmp.gt.f32.partialorder %v1522_v47, 0.0  ;;  %v1586_v23 = vmul.f32 0.2, %v1522_v47  ;;  %vm1555_vm1 = vcmp.gt.f32.partialorder %v1523_v46, 0.0  ;;  %v1587_v19 = vmul.f32 0.2, %v1523_v46 }
 0x208   : > { %vm1556_vm2 = vcmp.gt.f32.partialorder %v1524_v15, 0.0  ;;  %v1588_v21 = vmul.f32 0.2, %v1524_v15  ;;  %1737 = vst [vmem:[%s2905_s4 + $0x38] sm:$0xff] %v1928_v17  ;;  %vm1557_vm3 = vcmp.gt.f32.partialorder %v1525_v35, 0.0  ;;  %v1483_v27 = vmul.f32 %v2707_v26, %v1439_v33 }
 0x209   : > { %v1618_v55 = vsel %vm1554_vm0, %v1522_v47, %v1586_v23  ;;  %v1589_v14 = vmul.f32 0.2, %v1525_v35  ;;  %v1619_v25 = vsel %vm1555_vm1, %v1523_v46, %v1587_v19  ;;  %v1440_v29 = vmul.f32 %v2705_v59, %v2631_v37 }
 0x20a   : > { %v1620_v0 = vsel %vm1556_vm2, %v1524_v15, %v1588_v21  ;;  %v1929_v28 = vpack.c.bf16 %v1619_v25, %v1618_v55  ;;  %v1526_v30 = vadd.f32 %v2709_v61, %v1482_v48  ;;  %v1441_v31 = vmul.f32 %v2713_v53, %v2635_v4 }
 0x20b   : > { %v1621_v18 = vsel %vm1557_vm3, %v1525_v35, %v1589_v14  ;;  %v1527_v22 = vadd.f32 %v2711_v51, %v1483_v27  ;;  %v1484_v52 = vmul.f32 %v2703_v24, %v1440_v29  ;;  %v1442_v41 = vmul.f32 %v2705_v59, %v2643_v44 }
 0x20c   : > { %v1930_v32 = vpack.c.bf16 %v1621_v18, %v1620_v0  ;;  %1738 = vst [vmem:[%s2905_s4 + $0x40] sm:$0xff] %v1929_v28  ;;  %vm1558_vm4 = vcmp.gt.f32.partialorder %v1526_v30, 0.0  ;;  %v1590_v37 = vmul.f32 0.2, %v1526_v30  ;;  %v1485_v43 = vmul.f32 %v2707_v26, %v1441_v31 }
 0x20d   : > { %v1443_v45 = vmul.f32 %v2713_v53, %v2647_v8  ;;  %vm1559_vm5 = vcmp.gt.f32.partialorder %v1527_v22, 0.0  ;;  %v1591_v4 = vmul.f32 0.2, %v1527_v22  ;;  %v1528_v62 = vadd.f32 %v2709_v61, %v1484_v52 }
 0x20e   : > { %1739 = vst [vmem:[%s2905_s4 + $0x48] sm:$0xff] %v1930_v32  ;;  %v1486_v44 = vmul.f32 %v2703_v24, %v1442_v41  ;;  %v1622_v49 = vsel %vm1558_vm4, %v1526_v30, %v1590_v37  ;;  %v1529_v2 = vadd.f32 %v2711_v51, %v1485_v43  ;;  %v1444_v36 = vmul.f32 %v2705_v59, %v2655_v50 }
 0x20f   : > { %v1487_v57 = vmul.f32 %v2707_v26, %v1443_v45  ;;  %v1623_v9 = vsel %vm1559_vm5, %v1527_v22, %v1591_v4  ;;  %vm1560_vm6 = vcmp.gt.f32.partialorder %v1528_v62, 0.0  ;;  %v1592_v8 = vmul.f32 0.2, %v1528_v62 }
 0x210   : > { %v1530_v6 = vadd.f32 %v2709_v61, %v1486_v44  ;;  %v1931_v38 = vpack.c.bf16 %v1623_v9, %v1622_v49  ;;  %vm1561_vm7 = vcmp.gt.f32.partialorder %v1529_v2, 0.0  ;;  %v1593_v11 = vmul.f32 0.2, %v1529_v2 }
 0x211   : > { %v1531_v63 = vadd.f32 %v2711_v51, %v1487_v57  ;;  %v1624_v3 = vsel %vm1560_vm6, %v1528_v62, %v1592_v8  ;;  %v1445_v7 = vmul.f32 %v2713_v53, %v2659_v12  ;;  %v1488_v39 = vmul.f32 %v2703_v24, %v1444_v36 }
 0x212   : > { %vm1562_vm8 = vcmp.gt.f32.partialorder %v1530_v6, 0.0  ;;  %v1594_v13 = vmul.f32 0.2, %v1530_v6  ;;  %1740 = vst [vmem:[%s2905_s4 + $0x50] sm:$0xff] %v1931_v38  ;;  %v1625_v50 = vsel %vm1561_vm7, %v1529_v2, %v1593_v11  ;;  %v1446_v5 = vmul.f32 %v2705_v59, %v2667_v54 }
 0x213   : > { %vm1563_vm9 = vcmp.gt.f32.partialorder %v1531_v63, 0.0  ;;  %v1595_v34 = vmul.f32 0.2, %v1531_v63  ;;  %v1932_v56 = vpack.c.bf16 %v1625_v50, %v1624_v3  ;;  %v1489_v1 = vmul.f32 %v2707_v26, %v1445_v7 }
 0x214   : > { %v1626_v10 = vsel %vm1562_vm8, %v1530_v6, %v1594_v13  ;;  %v1532_v60 = vadd.f32 %v2709_v61, %v1488_v39  ;;  %v1447_v12 = vmul.f32 %v2713_v53, %v2671_v16  ;;  %v1448_v40 = vmul.f32 %v2705_v59, %v2679_v58 }
 0x215   : > { %v1627_v47 = vsel %vm1563_vm9, %v1531_v63, %v1595_v34  ;;  %1741 = vst [vmem:[%s2905_s4 + $0x58] sm:$0xff] %v1932_v56  ;;  %v1533_v46 = vadd.f32 %v2711_v51, %v1489_v1  ;;  %v1490_v15 = vmul.f32 %v2703_v24, %v1446_v5  ;;  %v1449_v54 = vmul.f32 %v2713_v53, %v2683_v20 }
 0x216   : > { %v1933_v42 = vpack.c.bf16 %v1627_v47, %v1626_v10  ;;  %vm1564_vm10 = vcmp.gt.f32.partialorder %v1532_v60, 0.0  ;;  %v1596_v33 = vmul.f32 0.2, %v1532_v60  ;;  %v1491_v17 = vmul.f32 %v2707_v26, %v1447_v12 }
 0x217   : > { %v1492_v16 = vmul.f32 %v2703_v24, %v1448_v40  ;;  %vm1565_vm11 = vcmp.gt.f32.partialorder %v1533_v46, 0.0  ;;  %v1597_v58 = vmul.f32 0.2, %v1533_v46  ;;  %v1534_v59 = vadd.f32 %v2709_v61, %v1490_v15 }
 0x218   : > { %1742 = vst [vmem:[%s2905_s4 + $0x60] sm:$0xff] %v1933_v42  ;;  %v1493_v23 = vmul.f32 %v2707_v26, %v1449_v54  ;;  %v1628_v35 = vsel %vm1564_vm10, %v1532_v60, %v1596_v33  ;;  %v1535_v19 = vadd.f32 %v2711_v51, %v1491_v17 }
 0x219   : > { %v1536_v20 = vadd.f32 %v2709_v61, %v1492_v16  ;;  %v1629_v53 = vsel %vm1565_vm11, %v1533_v46, %v1597_v58  ;;  %vm1566_vm12 = vcmp.gt.f32.partialorder %v1534_v59, 0.0  ;;  %v1598_v21 = vmul.f32 0.2, %v1534_v59 }
 0x21a   : > { %v1537_v24 = vadd.f32 %v2711_v51, %v1493_v23  ;;  %v1934_v55 = vpack.c.bf16 %v1629_v53, %v1628_v35  ;;  %vm1567_vm13 = vcmp.gt.f32.partialorder %v1535_v19, 0.0  ;;  %v1599_v14 = vmul.f32 0.2, %v1535_v19 }
 0x21b   : > { %vm1568_vm14 = vcmp.gt.f32.partialorder %v1536_v20, 0.0  ;;  %v1630_v48 = vsel %vm1566_vm12, %v1534_v59, %v1598_v21  ;;  %v1600_v25 = vmul.f32 0.2, %v1536_v20 }
 0x21c   : > { %vm1569_vm15 = vcmp.gt.f32.partialorder %v1537_v24, 0.0  ;;  %v1601_v0 = vmul.f32 0.2, %v1537_v24  ;;  %1743 = vst [vmem:[%s2905_s4 + $0x68] sm:$0xff] %v1934_v55  ;;  %v1631_v26 = vsel %vm1567_vm13, %v1535_v19, %v1599_v14 }
 0x21d   : > { %v1935_v27 = vpack.c.bf16 %v1631_v26, %v1630_v48  ;;  %v1632_v61 = vsel %vm1568_vm14, %v1536_v20, %v1600_v25 }
 0x21e   : > { %v1633_v29 = vsel %vm1569_vm15, %v1537_v24, %v1601_v0 }
 0x21f   : > { %v1936_v28 = vpack.c.bf16 %v1633_v29, %v1632_v61  ;;  %1744 = vst [vmem:[%s2905_s4 + $0x70] sm:$0xff] %v1935_v27 }
 0x221   : > { %1745 = vst [vmem:[%s2905_s4 + $0x78] sm:$0xff] %v1936_v28 }
 0x222 PF: > { %p11_p11 = scmp.ge.s32.totalorder %s2211_s19, 6   ;;  %s2906_s15 = smov %s2160_s16 }
 0x223   : > { %s2907_s16 = smov %s2220_s22  ;;  %s2908_s17 = smov %s2211_s19 }
 0x224   :  { %13 = sbr.rel (!%p11_p11) target bundleno = 2 (0x2), region = 101 }

// kernel: d_forward.8
= control target key start
LH: loop header
LB: loop body
LE: loop exit
PB: predicated region body
PF: predicated region fallthrough
CT: control target
= control target key end

     0   :  { %s2194_s15 = smov 0   ;;  %s2196_s16 = smov 0   ;;  %s2571_s0 = inlined_call_operand.vmem [shape: bf16[32,4096], index: 0, kind: input, shape index: {}]   ;;  %s2572_s1 = inlined_call_operand.vmem [shape: bf16[4096,512], index: 1, kind: input, shape index: {}]   ;;  %s2573_s2 = inlined_call_operand.vmem [shape: f32[1,512], index: 2, kind: input, shape index: {}]   ;;  %s2574_s3 = inlined_call_operand.vmem [shape: f32[1,512], index: 3, kind: input, shape index: {}]   ;;  %s2575_s4 = inlined_call_operand.vmem [shape: bf16[32,512], index: 4, kind: output, shape index: {}]  }
   0x1   :  { %s2198_s17 = smov 0  }
   0x2 LB: > { %s2210_s18 = sadd.s32 4294967295, %s2166_s17   ;;  %s2213_s19 = sadd.s32 1, %s2166_s17   ;;  %s2166_s17 = sphi %s2198_s17, %s2578_s17   ;;  %s2162_s16 = sphi %s2196_s16, %s2577_s16   ;;  %s2158_s15 = sphi %s2194_s15, %s2576_s15  }
   0x3   : > { %s18_s20 = ssub.s32 %s2166_s17, %s2213_s19  ;;  %s21_s21 = sadd.s32 1, %s2162_s16 }
   0x4   : > { %p19_p0 = scmp.eq.s32.totalorder %s18_s20, 0  ;;  %p28_p1 = scmp.ne.s32.totalorder %s2162_s16, %s2158_s15 }
   0x5   : > { %p29_p2 = scmp.eq.s32.totalorder %s2166_s17, 0  ;;  %p1724_p4 = scmp.ge.s32.totalorder %s2166_s17, 8 }
   0x6   : > { %s2222_s22 = scalar_select %p19_p0, %s2162_s16, %s21_s21  }
   0x7   : > { %p30_p3 = por %p29_p2, %p28_p1  ;;  %149 = sbr.rel (%p1724_p4) target bundleno = 22 (0x16), region = 24 }
   0xe   : > { %152 = sbr.rel (!%p30_p3) target bundleno = 22 (0x16), region = 28  ;;  %s154_s23 = sand.u32 (%p30_p3), 1, %s2162_s16  }
   0xf   : > { %s1881_s24 = sshll.u32 (%p30_p3), %s2166_s17, 4  ;;  %s1725_s25 = sshll.u32 (%p30_p3), %s154_s23, 6 }
  0x10   : > { %s159_s28 = scalar_lea.vmem (%p30_p3), %s2571_s0, %s1881_s24  ;;  %s156_s29 = scalar_lea.vmem (%p30_p3), [#allocation3], %s1725_s25 }
  0x11   : > { %v172_v0 = vld [vmem:[%s159_s28] sm:$0xff] (%p30_p3)  ;;  %v174_v1 = vld [vmem:[%s159_s28 + $0x8] sm:$0xff] (%p30_p3) }
  0x12   : > { %v176_v2 = vld [vmem:[%s159_s28 + $0x80] sm:$0xff] (%p30_p3)  ;;  %173 = vst [vmem:[%s156_s29] sm:$0xff] (%p30_p3), %v172_v0  ;;  %175 = vst [vmem:[%s156_s29 + $0x8] sm:$0xff] (%p30_p3), %v174_v1  ;;  %v178_v3 = vld [vmem:[%s159_s28 + $0x88] sm:$0xff] (%p30_p3) }
  0x13   : > { %177 = vst [vmem:[%s156_s29 + $0x10] sm:$0xff] (%p30_p3), %v176_v2  ;;  %v180_v4 = vld [vmem:[%s159_s28 + $0x100] sm:$0xff] (%p30_p3)  ;;  %v182_v5 = vld [vmem:[%s159_s28 + $0x108] sm:$0xff] (%p30_p3)  ;;  %179 = vst [vmem:[%s156_s29 + $0x18] sm:$0xff] (%p30_p3), %v178_v3 }
  0x14   : > { %181 = vst [vmem:[%s156_s29 + $0x20] sm:$0xff] (%p30_p3), %v180_v4  ;;  %183 = vst [vmem:[%s156_s29 + $0x28] sm:$0xff] (%p30_p3), %v182_v5  ;;  %v184_v6 = vld [vmem:[%s159_s28 + $0x180] sm:$0xff] (%p30_p3)  ;;  %v186_v7 = vld [vmem:[%s159_s28 + $0x188] sm:$0xff] (%p30_p3) }
  0x15   : > { %185 = vst [vmem:[%s156_s29 + $0x30] sm:$0xff] %v184_v6  ;;  %187 = vst [vmem:[%s156_s29 + $0x38] sm:$0xff] %v186_v7 }
  0x16 PF: > { %p1728_p5 = scmp.ge.s32.totalorder %s2166_s17, 1  ;;  %p202_p6 = scmp.lt.s32.totalorder %s2166_s17, 9 }
  0x18   : > { %p203_p7 = pnand %p1728_p5, %p202_p6 }
  0x19   : > { %s209_s30 = sand.u32 (!%p203_p7), 1, %s2158_s15   ;;  %s1730_s5 = sshll.u32 (!%p203_p7), %s2210_s18, 6 }
  0x1a   : > { %206 = sbr.rel (%p203_p7) target bundleno = 490 (0x1ea), region = 55  ;;  %s1729_s6 = sshll.u32 (!%p203_p7), %s209_s30, 6 }
  0x1b   : > { %p237_p8 = scmp.lt.s32.totalorder (!%p203_p7), %s1730_s5, 511  ;;  %s2239_s11 = scalar_lea.vmem (!%p203_p7), [#allocation3], %s1729_s6 }
  0x1c   : > { %p1733_p9 = scmp.ne.s32.totalorder (!%p203_p7), %s2210_s18, 0 }
  0x21   : > { %s2580_s5 = smov (!%p237_p8, %s1730_s5), 511  ;;  %246 = sbr.rel (%p1733_p9) target bundleno = 43 (0x2b), region = 63 }
  0x22   : > { %s1882_s7 = sshll.u32 %s2580_s5, 4  ;;  %v2168_v8 = vmov (!%p1733_p9), 0.0  }
  0x23   : > { %s2237_s10 = scalar_lea.vmem %s2572_s1, %s1882_s7  ;;  %247 = vst [vmem:[#allocation2] sm:$0xff] (!%p1733_p9), %v2168_v8  ;;  %248 = vst [vmem:[#allocation2 + $0x8] sm:$0xff] (!%p1733_p9), %v2168_v8 }
  0x24   : > { %249 = vst [vmem:[#allocation2 + $0x10] sm:$0xff] (!%p1733_p9), %v2168_v8  ;;  %250 = vst [vmem:[#allocation2 + $0x18] sm:$0xff] (!%p1733_p9), %v2168_v8 }
  0x25   : > { %251 = vst [vmem:[#allocation2 + $0x20] sm:$0xff] (!%p1733_p9), %v2168_v8  ;;  %252 = vst [vmem:[#allocation2 + $0x28] sm:$0xff] (!%p1733_p9), %v2168_v8 }
  0x26   : > { %253 = vst [vmem:[#allocation2 + $0x30] sm:$0xff] (!%p1733_p9), %v2168_v8  ;;  %254 = vst [vmem:[#allocation2 + $0x38] sm:$0xff] (!%p1733_p9), %v2168_v8 }
  0x27   : > { %255 = vst [vmem:[#allocation2 + $0x40] sm:$0xff] (!%p1733_p9), %v2168_v8  ;;  %256 = vst [vmem:[#allocation2 + $0x48] sm:$0xff] (!%p1733_p9), %v2168_v8 }
  0x28   : > { %257 = vst [vmem:[#allocation2 + $0x50] sm:$0xff] %v2168_v8  ;;  %258 = vst [vmem:[#allocation2 + $0x58] sm:$0xff] %v2168_v8 }
  0x29   : > { %259 = vst [vmem:[#allocation2 + $0x60] sm:$0xff] %v2168_v8  ;;  %260 = vst [vmem:[#allocation2 + $0x68] sm:$0xff] %v2168_v8 }
  0x2a   : > { %261 = vst [vmem:[#allocation2 + $0x70] sm:$0xff] %v2168_v8  ;;  %262 = vst [vmem:[#allocation2 + $0x78] sm:$0xff] %v2168_v8 }
  0x2b PF: > { %v1932_v9 = vld [vmem:[%s2237_s10 + $0x4] ss:$16 sps:$4 sm:$0xff]   ;;  %v1934_v10 = vld [vmem:[%s2237_s10 + $0xc] ss:$16 sps:$4 sm:$0xff]   ;;  %v1936_v11 = vld [vmem:[%s2237_s10] ss:$16 sps:$4 sm:$0xff]  }
  0x2c   : > { %1095 = vmatprep.subr.bf16.mxu0 %v1932_v9  ;;  %v1937_v12 = vld [vmem:[%s2237_s10 + $0x8] ss:$16 sps:$4 sm:$0xff]   ;;  %1201 = vmatprep.subr.bf16.mxu1 %v1934_v10  ;;  %v1938_v13 = vld [vmem:[%s2237_s10 + $0x24] ss:$16 sps:$4 sm:$0xff]   ;;  %v1940_v14 = vld [vmem:[%s2237_s10 + $0x2c] ss:$16 sps:$4 sm:$0xff]  }
  0x2d   : > { %1096 = vmatpush1.bf16.msra.mxu0 %v1936_v11  ;;  %1202 = vmatpush1.bf16.msra.mxu1 %v1937_v12  ;;  %v1942_v15 = vld [vmem:[%s2237_s10 + $0x20] ss:$16 sps:$4 sm:$0xff]   ;;  %v1943_v16 = vld [vmem:[%s2237_s10 + $0x28] ss:$16 sps:$4 sm:$0xff]   ;;  %v1944_v17 = vld [vmem:[%s2237_s10 + $0x44] ss:$16 sps:$4 sm:$0xff]  }
  0x2e   : > { %1097 = vmatprep.subr.bf16.mxu0 %v1938_v13  ;;  %1203 = vmatprep.subr.bf16.mxu1 %v1940_v14  ;;  %v1946_v18 = vld [vmem:[%s2237_s10 + $0x4c] ss:$16 sps:$4 sm:$0xff]   ;;  %v1948_v19 = vld [vmem:[%s2237_s10 + $0x40] ss:$16 sps:$4 sm:$0xff]   ;;  %v1949_v20 = vld [vmem:[%s2237_s10 + $0x48] ss:$16 sps:$4 sm:$0xff]  }
  0x2f   : > { %v1950_v21 = vld [vmem:[%s2237_s10 + $0x64] ss:$16 sps:$4 sm:$0xff]   ;;  %v1952_v22 = vld [vmem:[%s2237_s10 + $0x6c] ss:$16 sps:$4 sm:$0xff]   ;;  %v1954_v23 = vld [vmem:[%s2237_s10 + $0x60] ss:$16 sps:$4 sm:$0xff]  }
  0x30   : > { %v1955_v24 = vld [vmem:[%s2237_s10 + $0x68] ss:$16 sps:$4 sm:$0xff]   ;;  %v1956_v25 = vld [vmem:[%s2237_s10 + $0x84] ss:$16 sps:$4 sm:$0xff]   ;;  %v1958_v26 = vld [vmem:[%s2237_s10 + $0x8c] ss:$16 sps:$4 sm:$0xff]  }
  0x31   : > { %1098 = vmatpush1.bf16.msra.mxu0 %v1942_v15  ;;  %1204 = vmatpush1.bf16.msra.mxu1 %v1943_v16  ;;  %v1960_v27 = vld [vmem:[%s2237_s10 + $0x80] ss:$16 sps:$4 sm:$0xff]   ;;  %v1961_v28 = vld [vmem:[%s2237_s10 + $0x88] ss:$16 sps:$4 sm:$0xff]   ;;  %v1962_v29 = vld [vmem:[%s2237_s10 + $0xa4] ss:$16 sps:$4 sm:$0xff]  }
  0x32   : > { %1099 = vmatprep.subr.bf16.mxu0 %v1944_v17  ;;  %1205 = vmatprep.subr.bf16.mxu1 %v1946_v18  ;;  %v1964_v30 = vld [vmem:[%s2237_s10 + $0xac] ss:$16 sps:$4 sm:$0xff]   ;;  %v1966_v31 = vld [vmem:[%s2237_s10 + $0xa0] ss:$16 sps:$4 sm:$0xff]   ;;  %v1967_v32 = vld [vmem:[%s2237_s10 + $0xa8] ss:$16 sps:$4 sm:$0xff]  }
  0x33   : > { %v1968_v33 = vld [vmem:[%s2237_s10 + $0xc4] ss:$16 sps:$4 sm:$0xff]   ;;  %v1970_v34 = vld [vmem:[%s2237_s10 + $0xcc] ss:$16 sps:$4 sm:$0xff]   ;;  %v1972_v35 = vld [vmem:[%s2237_s10 + $0xc0] ss:$16 sps:$4 sm:$0xff]  }
  0x34   : > { %v1973_v36 = vld [vmem:[%s2237_s10 + $0xc8] ss:$16 sps:$4 sm:$0xff]   ;;  %v1974_v37 = vld [vmem:[%s2237_s10 + $0xe4] ss:$16 sps:$4 sm:$0xff]   ;;  %v1976_v38 = vld [vmem:[%s2237_s10 + $0xec] ss:$16 sps:$4 sm:$0xff]  }
  0x35   : > { %1100 = vmatpush1.bf16.msra.mxu0 %v1948_v19  ;;  %1206 = vmatpush1.bf16.msra.mxu1 %v1949_v20  ;;  %v1978_v39 = vld [vmem:[%s2237_s10 + $0xe0] ss:$16 sps:$4 sm:$0xff]   ;;  %v1979_v40 = vld [vmem:[%s2237_s10 + $0xe8] ss:$16 sps:$4 sm:$0xff]   ;;  %v1980_v41 = vld [vmem:[%s2237_s10 + $0x104] ss:$16 sps:$4 sm:$0xff]  }
  0x36   : > { %1101 = vmatprep.subr.bf16.mxu0 %v1950_v21  ;;  %1207 = vmatprep.subr.bf16.mxu1 %v1952_v22  ;;  %v1982_v42 = vld [vmem:[%s2237_s10 + $0x10c] ss:$16 sps:$4 sm:$0xff]   ;;  %v1984_v43 = vld [vmem:[%s2237_s10 + $0x100] ss:$16 sps:$4 sm:$0xff]   ;;  %v1985_v44 = vld [vmem:[%s2237_s10 + $0x108] ss:$16 sps:$4 sm:$0xff]  }
  0x37   : > { %v1986_v45 = vld [vmem:[%s2237_s10 + $0x124] ss:$16 sps:$4 sm:$0xff]   ;;  %v1988_v46 = vld [vmem:[%s2237_s10 + $0x12c] ss:$16 sps:$4 sm:$0xff]   ;;  %v1990_v47 = vld [vmem:[%s2237_s10 + $0x120] ss:$16 sps:$4 sm:$0xff]  }
  0x38   : > { %v1991_v48 = vld [vmem:[%s2237_s10 + $0x128] ss:$16 sps:$4 sm:$0xff]   ;;  %v1992_v49 = vld [vmem:[%s2237_s10 + $0x144] ss:$16 sps:$4 sm:$0xff]   ;;  %v1994_v50 = vld [vmem:[%s2237_s10 + $0x14c] ss:$16 sps:$4 sm:$0xff]  }
  0x39   : > { %1102 = vmatpush1.bf16.msra.mxu0 %v1954_v23  ;;  %1208 = vmatpush1.bf16.msra.mxu1 %v1955_v24  ;;  %v1996_v51 = vld [vmem:[%s2237_s10 + $0x140] ss:$16 sps:$4 sm:$0xff]   ;;  %v1997_v52 = vld [vmem:[%s2237_s10 + $0x148] ss:$16 sps:$4 sm:$0xff]   ;;  %v1998_v53 = vld [vmem:[%s2237_s10 + $0x164] ss:$16 sps:$4 sm:$0xff]  }
  0x3a   : > { %1103 = vmatprep.subr.bf16.mxu0 %v1956_v25  ;;  %1209 = vmatprep.subr.bf16.mxu1 %v1958_v26  ;;  %v2000_v54 = vld [vmem:[%s2237_s10 + $0x16c] ss:$16 sps:$4 sm:$0xff]   ;;  %v2002_v55 = vld [vmem:[%s2237_s10 + $0x160] ss:$16 sps:$4 sm:$0xff]   ;;  %v2003_v56 = vld [vmem:[%s2237_s10 + $0x168] ss:$16 sps:$4 sm:$0xff]  }
  0x3b   : > { %v2030_v57 = vld [vmem:[%s2239_s11 + $0x4] ss:$16 sps:$4 sm:$0xff]   ;;  %v2006_v59 = vld [vmem:[%s2237_s10 + $0x18c] ss:$16 sps:$4 sm:$0xff]   ;;  %v2008_v60 = vld [vmem:[%s2237_s10 + $0x180] ss:$16 sps:$4 sm:$0xff]  }
  0x3c   : > { %v2004_v58 = vld [vmem:[%s2237_s10 + $0x184] ss:$16 sps:$4 sm:$0xff]   ;;  %1127 = vmatprep.mubr.bf16.mxu0 %v2030_v57  ;;  %1233 = vmatprep.mubr.bf16.mxu1 %v2030_v57  ;;  %v2009_v61 = vld [vmem:[%s2237_s10 + $0x188] ss:$16 sps:$4 sm:$0xff]   ;;  %v2012_v63 = vld [vmem:[%s2237_s10 + $0x1ac] ss:$16 sps:$4 sm:$0xff]  }
  0x3d   : > { %1104 = vmatpush1.bf16.msra.mxu0 %v1960_v27  ;;  %1210 = vmatpush1.bf16.msra.mxu1 %v1961_v28  ;;  %v2010_v62 = vld [vmem:[%s2237_s10 + $0x1a4] ss:$16 sps:$4 sm:$0xff]   ;;  %v2014_v0 = vld [vmem:[%s2237_s10 + $0x1a0] ss:$16 sps:$4 sm:$0xff]   ;;  %v2015_v1 = vld [vmem:[%s2237_s10 + $0x1a8] ss:$16 sps:$4 sm:$0xff]  }
  0x3e   : > { %1105 = vmatprep.subr.bf16.mxu0 %v1962_v29  ;;  %1211 = vmatprep.subr.bf16.mxu1 %v1964_v30  ;;  %v2016_v2 = vld [vmem:[%s2237_s10 + $0x1c4] ss:$16 sps:$4 sm:$0xff]   ;;  %v2018_v3 = vld [vmem:[%s2237_s10 + $0x1cc] ss:$16 sps:$4 sm:$0xff]   ;;  %v2020_v4 = vld [vmem:[%s2237_s10 + $0x1c0] ss:$16 sps:$4 sm:$0xff]  }
  0x3f   : > { %v2021_v5 = vld [vmem:[%s2237_s10 + $0x1c8] ss:$16 sps:$4 sm:$0xff]   ;;  %v2022_v6 = vld [vmem:[%s2237_s10 + $0x1e4] ss:$16 sps:$4 sm:$0xff]   ;;  %v2024_v7 = vld [vmem:[%s2237_s10 + $0x1ec] ss:$16 sps:$4 sm:$0xff]  }
  0x40   : > { %v2026_v8 = vld [vmem:[%s2237_s10 + $0x1e0] ss:$16 sps:$4 sm:$0xff]   ;;  %v2027_v9 = vld [vmem:[%s2237_s10 + $0x1e8] ss:$16 sps:$4 sm:$0xff]   ;;  %v2033_v10 = vld [vmem:[%s2237_s10 + $0x204] ss:$16 sps:$4 sm:$0xff]  }
  0x41   : > { %1106 = vmatpush1.bf16.msra.mxu0 %v1966_v31  ;;  %1212 = vmatpush1.bf16.msra.mxu1 %v1967_v32  ;;  %v2036_v11 = vld [vmem:[%s2237_s10 + $0x20c] ss:$16 sps:$4 sm:$0xff]   ;;  %v2028_v12 = vld [vmem:[%s2239_s11] ss:$16 sps:$4 sm:$0xff]   ;;  %v2034_v14 = vld [vmem:[%s2237_s10 + $0x208] ss:$16 sps:$4 sm:$0xff]  }
  0x42   : > { %1107 = vmatprep.subr.bf16.mxu0 %v1968_v33  ;;  %1213 = vmatprep.subr.bf16.mxu1 %v1970_v34  ;;  %v2031_v13 = vld [vmem:[%s2237_s10 + $0x200] ss:$16 sps:$4 sm:$0xff]   ;;  %v2039_v15 = vld [vmem:[%s2237_s10 + $0x224] ss:$16 sps:$4 sm:$0xff]   ;;  %v2042_v16 = vld [vmem:[%s2237_s10 + $0x22c] ss:$16 sps:$4 sm:$0xff]  }
  0x43   : > { %v2037_v17 = vld [vmem:[%s2237_s10 + $0x220] ss:$16 sps:$4 sm:$0xff]   ;;  %v2040_v18 = vld [vmem:[%s2237_s10 + $0x228] ss:$16 sps:$4 sm:$0xff]   ;;  %v2045_v19 = vld [vmem:[%s2237_s10 + $0x244] ss:$16 sps:$4 sm:$0xff]  }
  0x44   : > { %v2048_v20 = vld [vmem:[%s2237_s10 + $0x24c] ss:$16 sps:$4 sm:$0xff]   ;;  %v2043_v21 = vld [vmem:[%s2237_s10 + $0x240] ss:$16 sps:$4 sm:$0xff]   ;;  %v2046_v22 = vld [vmem:[%s2237_s10 + $0x248] ss:$16 sps:$4 sm:$0xff]  }
  0x45   : > { %1108 = vmatpush1.bf16.msra.mxu0 %v1972_v35  ;;  %1214 = vmatpush1.bf16.msra.mxu1 %v1973_v36  ;;  %v2051_v23 = vld [vmem:[%s2237_s10 + $0x264] ss:$16 sps:$4 sm:$0xff]   ;;  %v2054_v24 = vld [vmem:[%s2237_s10 + $0x26c] ss:$16 sps:$4 sm:$0xff]   ;;  %v2049_v25 = vld [vmem:[%s2237_s10 + $0x260] ss:$16 sps:$4 sm:$0xff]  }
  0x46   : > { %1109 = vmatprep.subr.bf16.mxu0 %v1974_v37  ;;  %1215 = vmatprep.subr.bf16.mxu1 %v1976_v38  ;;  %v2052_v26 = vld [vmem:[%s2237_s10 + $0x268] ss:$16 sps:$4 sm:$0xff]   ;;  %v2057_v27 = vld [vmem:[%s2237_s10 + $0x284] ss:$16 sps:$4 sm:$0xff]   ;;  %v2060_v28 = vld [vmem:[%s2237_s10 + $0x28c] ss:$16 sps:$4 sm:$0xff]  }
  0x47   : > { %v2055_v29 = vld [vmem:[%s2237_s10 + $0x280] ss:$16 sps:$4 sm:$0xff]   ;;  %v2058_v30 = vld [vmem:[%s2237_s10 + $0x288] ss:$16 sps:$4 sm:$0xff]   ;;  %v2063_v31 = vld [vmem:[%s2237_s10 + $0x2a4] ss:$16 sps:$4 sm:$0xff]  }
  0x48   : > { %v2066_v32 = vld [vmem:[%s2237_s10 + $0x2ac] ss:$16 sps:$4 sm:$0xff]   ;;  %v2061_v33 = vld [vmem:[%s2237_s10 + $0x2a0] ss:$16 sps:$4 sm:$0xff]   ;;  %v2115_v34 = vld [vmem:[%s2239_s11 + $0x24] ss:$16 sps:$4 sm:$0xff]  }
  0x49   : > { %1110 = vmatpush1.bf16.msra.mxu0 %v1978_v39  ;;  %1216 = vmatpush1.bf16.msra.mxu1 %v1979_v40  ;;  %v2064_v35 = vld [vmem:[%s2237_s10 + $0x2a8] ss:$16 sps:$4 sm:$0xff]   ;;  %v2117_v36 = vld [vmem:[%s2239_s11 + $0x20] ss:$16 sps:$4 sm:$0xff]   ;;  %v2069_v37 = vld [vmem:[%s2237_s10 + $0x2c4] ss:$16 sps:$4 sm:$0xff]  }
  0x4a   : > { %1111 = vmatprep.subr.bf16.mxu0 %v1980_v41  ;;  %1217 = vmatprep.subr.bf16.mxu1 %v1982_v42  ;;  %v2072_v38 = vld [vmem:[%s2237_s10 + $0x2cc] ss:$16 sps:$4 sm:$0xff]   ;;  %v2067_v39 = vld [vmem:[%s2237_s10 + $0x2c0] ss:$16 sps:$4 sm:$0xff]   ;;  %v2070_v40 = vld [vmem:[%s2237_s10 + $0x2c8] ss:$16 sps:$4 sm:$0xff]  }
  0x4b   : > { %v2075_v41 = vld [vmem:[%s2237_s10 + $0x2e4] ss:$16 sps:$4 sm:$0xff]   ;;  %v2078_v42 = vld [vmem:[%s2237_s10 + $0x2ec] ss:$16 sps:$4 sm:$0xff]   ;;  %v2094_v57 = vld [vmem:[%s2237_s10 + $0x348] ss:$16 sps:$4 sm:$0xff]  }
  0x4c   : > { %p1870_p10 = scmp.ne.s32.totalorder %s2210_s18, 7 }
  0x4d   : > { %1112 = vmatpush1.bf16.msra.mxu0 %v1984_v43  ;;  %1218 = vmatpush1.bf16.msra.mxu1 %v1985_v44  ;;  %v2132_v43 = vld [vmem:[%s2239_s11 + $0xc] ss:$16 sps:$4 sm:$0xff]   ;;  %v2073_v44 = vld [vmem:[%s2237_s10 + $0x2e0] ss:$16 sps:$4 sm:$0xff]  }
  0x4e   : > { %1113 = vmatprep.subr.bf16.mxu0 %v1986_v45  ;;  %1219 = vmatprep.subr.bf16.mxu1 %v1988_v46  ;;  %v2076_v45 = vld [vmem:[%s2237_s10 + $0x2e8] ss:$16 sps:$4 sm:$0xff]   ;;  %v2081_v46 = vld [vmem:[%s2237_s10 + $0x304] ss:$16 sps:$4 sm:$0xff]  }
  0x51   : > { %1114 = vmatpush1.bf16.msra.mxu0 %v1990_v47  ;;  %1220 = vmatpush1.bf16.msra.mxu1 %v1991_v48  ;;  %v2084_v47 = vld [vmem:[%s2237_s10 + $0x30c] ss:$16 sps:$4 sm:$0xff]   ;;  %v2079_v48 = vld [vmem:[%s2237_s10 + $0x300] ss:$16 sps:$4 sm:$0xff]  }
  0x52   : > { %1115 = vmatprep.subr.bf16.mxu0 %v1992_v49  ;;  %1221 = vmatprep.subr.bf16.mxu1 %v1994_v50  ;;  %v2082_v49 = vld [vmem:[%s2237_s10 + $0x308] ss:$16 sps:$4 sm:$0xff]   ;;  %v2087_v50 = vld [vmem:[%s2237_s10 + $0x324] ss:$16 sps:$4 sm:$0xff]  }
  0x55   : > { %1116 = vmatpush1.bf16.msra.mxu0 %v1996_v51  ;;  %1222 = vmatpush1.bf16.msra.mxu1 %v1997_v52  ;;  %v2090_v51 = vld [vmem:[%s2237_s10 + $0x32c] ss:$16 sps:$4 sm:$0xff]   ;;  %v2085_v52 = vld [vmem:[%s2237_s10 + $0x320] ss:$16 sps:$4 sm:$0xff]  }
  0x56   : > { %1117 = vmatprep.subr.bf16.mxu0 %v1998_v53  ;;  %1223 = vmatprep.subr.bf16.mxu1 %v2000_v54  ;;  %v2088_v53 = vld [vmem:[%s2237_s10 + $0x328] ss:$16 sps:$4 sm:$0xff]   ;;  %v2093_v54 = vld [vmem:[%s2237_s10 + $0x344] ss:$16 sps:$4 sm:$0xff]  }
  0x59   : > { %1118 = vmatpush1.bf16.msra.mxu0 %v2002_v55  ;;  %1224 = vmatpush1.bf16.msra.mxu1 %v2003_v56  ;;  %v2096_v55 = vld [vmem:[%s2237_s10 + $0x34c] ss:$16 sps:$4 sm:$0xff]   ;;  %v2091_v56 = vld [vmem:[%s2237_s10 + $0x340] ss:$16 sps:$4 sm:$0xff]  }
  0x5a   : > { %1119 = vmatprep.subr.bf16.mxu0 %v2004_v58  ;;  %1225 = vmatprep.subr.bf16.mxu1 %v2006_v59  ;;  %v2099_v58 = vld [vmem:[%s2237_s10 + $0x364] ss:$16 sps:$4 sm:$0xff]   ;;  %v2102_v59 = vld [vmem:[%s2237_s10 + $0x36c] ss:$16 sps:$4 sm:$0xff]  }
  0x5d   : > { %1120 = vmatpush1.bf16.msra.mxu0 %v2008_v60  ;;  %1226 = vmatpush1.bf16.msra.mxu1 %v2009_v61  ;;  %v2097_v60 = vld [vmem:[%s2237_s10 + $0x360] ss:$16 sps:$4 sm:$0xff]   ;;  %v2100_v61 = vld [vmem:[%s2237_s10 + $0x368] ss:$16 sps:$4 sm:$0xff]  }
  0x5e   : > { %1121 = vmatprep.subr.bf16.mxu0 %v2010_v62  ;;  %1227 = vmatprep.subr.bf16.mxu1 %v2012_v63  ;;  %v2105_v62 = vld [vmem:[%s2237_s10 + $0x384] ss:$16 sps:$4 sm:$0xff]   ;;  %v2108_v63 = vld [vmem:[%s2237_s10 + $0x38c] ss:$16 sps:$4 sm:$0xff]  }
  0x61   : > { %1122 = vmatpush1.bf16.msra.mxu0 %v2014_v0  ;;  %1228 = vmatpush1.bf16.msra.mxu1 %v2015_v1  ;;  %v2103_v0 = vld [vmem:[%s2237_s10 + $0x380] ss:$16 sps:$4 sm:$0xff]   ;;  %v2106_v1 = vld [vmem:[%s2237_s10 + $0x388] ss:$16 sps:$4 sm:$0xff]  }
  0x62   : > { %1123 = vmatprep.subr.bf16.mxu0 %v2016_v2  ;;  %1229 = vmatprep.subr.bf16.mxu1 %v2018_v3  ;;  %v2111_v2 = vld [vmem:[%s2237_s10 + $0x3a4] ss:$16 sps:$4 sm:$0xff]   ;;  %v2114_v3 = vld [vmem:[%s2237_s10 + $0x3ac] ss:$16 sps:$4 sm:$0xff]  }
  0x65   : > { %1124 = vmatpush1.bf16.msra.mxu0 %v2020_v4  ;;  %1230 = vmatpush1.bf16.msra.mxu1 %v2021_v5  ;;  %v2109_v4 = vld [vmem:[%s2237_s10 + $0x3a0] ss:$16 sps:$4 sm:$0xff]   ;;  %v2112_v5 = vld [vmem:[%s2237_s10 + $0x3a8] ss:$16 sps:$4 sm:$0xff]  }
  0x66   : > { %1125 = vmatprep.subr.bf16.mxu0 %v2022_v6  ;;  %1231 = vmatprep.subr.bf16.mxu1 %v2024_v7  ;;  %v2120_v6 = vld [vmem:[%s2237_s10 + $0x3c4] ss:$16 sps:$4 sm:$0xff]   ;;  %v2123_v7 = vld [vmem:[%s2237_s10 + $0x3cc] ss:$16 sps:$4 sm:$0xff]  }
  0x69   : > { %1126 = vmatpush1.bf16.msra.mxu0 %v2026_v8  ;;  %1232 = vmatpush1.bf16.msra.mxu1 %v2027_v9  ;;  %v2118_v8 = vld [vmem:[%s2237_s10 + $0x3c0] ss:$16 sps:$4 sm:$0xff]   ;;  %v2121_v9 = vld [vmem:[%s2237_s10 + $0x3c8] ss:$16 sps:$4 sm:$0xff]  }
  0x6a   : > { %1148 = vmatprep.subr.bf16.mxu0 %v2033_v10  ;;  %1254 = vmatprep.subr.bf16.mxu1 %v2036_v11  ;;  %v2126_v10 = vld [vmem:[%s2237_s10 + $0x3e4] ss:$16 sps:$4 sm:$0xff]   ;;  %v2129_v11 = vld [vmem:[%s2237_s10 + $0x3ec] ss:$16 sps:$4 sm:$0xff]  }
  0x6c   : > { %1128 = vmatmul.mubr.bf16.vlgmr.msra.gmra.mrb[0].mxu0 %v2028_v12  ;;  %1234 = vmatmul.mubr.bf16.vlgmr.msra.gmra.mrb[0].mxu1 %v2028_v12  ;;  %v2124_v12 = vld [vmem:[%s2237_s10 + $0x3e0] ss:$16 sps:$4 sm:$0xff]  }
  0x6d   : > { %1149 = vmatpush1.bf16.msra.mxu0 %v2031_v13  ;;  %1255 = vmatpush1.bf16.msra.mxu1 %v2034_v14  ;;  %v2127_v13 = vld [vmem:[%s2237_s10 + $0x3e8] ss:$16 sps:$4 sm:$0xff]  }
  0x6e   : > { %1150 = vmatprep.subr.bf16.mxu0 %v2039_v15  ;;  %1256 = vmatprep.subr.bf16.mxu1 %v2042_v16  ;;  %v2130_v14 = vld [vmem:[%s2239_s11 + $0x8] ss:$16 sps:$4 sm:$0xff]   ;;  %v2133_v15 = vld [vmem:[%s2239_s11 + $0x2c] ss:$16 sps:$4 sm:$0xff]  }
  0x6f   : > { %1137 = vmatprep.mubr.bf16.mxu0 %v2115_v34  ;;  %1243 = vmatprep.mubr.bf16.mxu1 %v2115_v34  ;;  %v2135_v16 = vld [vmem:[%s2239_s11 + $0x28] ss:$16 sps:$4 sm:$0xff]  }
  0x71   : > { %1151 = vmatpush1.bf16.msra.mxu0 %v2037_v17  ;;  %1257 = vmatpush1.bf16.msra.mxu1 %v2040_v18  ;;  %v263_v17 = vld [vmem:[#allocation2] sm:$0xff]  ;;  %v265_v18 = vld [vmem:[#allocation2 + $0x10] sm:$0xff] }
  0x72   : > { %1152 = vmatprep.subr.bf16.mxu0 %v2045_v19  ;;  %1258 = vmatprep.subr.bf16.mxu1 %v2048_v20  ;;  %v264_v19 = vld [vmem:[#allocation2 + $0x8] sm:$0xff]  ;;  %v266_v20 = vld [vmem:[#allocation2 + $0x18] sm:$0xff] }
  0x74   : > { %1138 = vmatmul.mubr.bf16.gmra.mrb[4].mxu0 %v2117_v36  ;;  %1244 = vmatmul.mubr.bf16.gmra.mrb[4].mxu1 %v2117_v36 }
  0x75   : > { %1153 = vmatpush1.bf16.msra.mxu0 %v2043_v21  ;;  %1259 = vmatpush1.bf16.msra.mxu1 %v2046_v22 }
  0x76   : > { %1154 = vmatprep.subr.bf16.mxu0 %v2051_v23  ;;  %1260 = vmatprep.subr.bf16.mxu1 %v2054_v24  ;;  %v267_v23 = vld [vmem:[#allocation2 + $0x20] sm:$0xff]  ;;  %v269_v24 = vld [vmem:[#allocation2 + $0x30] sm:$0xff] }
  0x77   : > { %1180 = vmatprep.mubr.bf16.mxu0 %v2132_v43  ;;  %1286 = vmatprep.mubr.bf16.mxu1 %v2132_v43  ;;  %v272_v43 = vld [vmem:[#allocation2 + $0x48] sm:$0xff] }
  0x79   : > { %1155 = vmatpush1.bf16.msra.mxu0 %v2049_v25  ;;  %1261 = vmatpush1.bf16.msra.mxu1 %v2052_v26 }
  0x7a   : > { %1156 = vmatprep.subr.bf16.mxu0 %v2057_v27  ;;  %1262 = vmatprep.subr.bf16.mxu1 %v2060_v28 }
  0x7d   : > { %1157 = vmatpush1.bf16.msra.mxu0 %v2055_v29  ;;  %1263 = vmatpush1.bf16.msra.mxu1 %v2058_v30  ;;  %v268_v29 = vld [vmem:[#allocation2 + $0x28] sm:$0xff]  ;;  %v270_v30 = vld [vmem:[#allocation2 + $0x38] sm:$0xff] }
  0x7e   : > { %1158 = vmatprep.subr.bf16.mxu0 %v2063_v31  ;;  %1264 = vmatprep.subr.bf16.mxu1 %v2066_v32 }
  0x81   : > { %1159 = vmatpush1.bf16.msra.mxu0 %v2061_v33  ;;  %1265 = vmatpush1.bf16.msra.mxu1 %v2064_v35 }
  0x82   : > { %1160 = vmatprep.subr.bf16.mxu0 %v2069_v37  ;;  %1266 = vmatprep.subr.bf16.mxu1 %v2072_v38 }
  0x85   : > { %1161 = vmatpush1.bf16.msra.mxu0 %v2067_v39  ;;  %1267 = vmatpush1.bf16.msra.mxu1 %v2070_v40 }
  0x86   : > { %1162 = vmatprep.subr.bf16.mxu0 %v2075_v41  ;;  %1268 = vmatprep.subr.bf16.mxu1 %v2078_v42  ;;  %v271_v41 = vld [vmem:[#allocation2 + $0x40] sm:$0xff]  ;;  %v273_v42 = vld [vmem:[#allocation2 + $0x50] sm:$0xff] }
  0x89   : > { %1163 = vmatpush1.bf16.msra.mxu0 %v2073_v44  ;;  %1269 = vmatpush1.bf16.msra.mxu1 %v2076_v45  ;;  %v274_v44 = vld [vmem:[#allocation2 + $0x58] sm:$0xff] }
  0x8a   : > { %1164 = vmatprep.subr.bf16.mxu0 %v2081_v46  ;;  %1270 = vmatprep.subr.bf16.mxu1 %v2084_v47  ;;  %v275_v47 = vld [vmem:[#allocation2 + $0x60] sm:$0xff] }
  0x8d   : > { %1165 = vmatpush1.bf16.msra.mxu0 %v2079_v48  ;;  %1271 = vmatpush1.bf16.msra.mxu1 %v2082_v49  ;;  %v277_v48 = vld [vmem:[#allocation2 + $0x70] sm:$0xff] }
  0x8e   : > { %1166 = vmatprep.subr.bf16.mxu0 %v2087_v50  ;;  %1272 = vmatprep.subr.bf16.mxu1 %v2090_v51 }
  0x91   : > { %1167 = vmatpush1.bf16.msra.mxu0 %v2085_v52  ;;  %1273 = vmatpush1.bf16.msra.mxu1 %v2088_v53  ;;  %v276_v53 = vld [vmem:[#allocation2 + $0x68] sm:$0xff] }
  0x92   : > { %1168 = vmatprep.subr.bf16.mxu0 %v2093_v54  ;;  %1274 = vmatprep.subr.bf16.mxu1 %v2096_v55  ;;  %v278_v54 = vld [vmem:[#allocation2 + $0x78] sm:$0xff] }
  0x95   : > { %1169 = vmatpush1.bf16.msra.mxu0 %v2091_v56  ;;  %1275 = vmatpush1.bf16.msra.mxu1 %v2094_v57 }
  0x96   : > { %1170 = vmatprep.subr.bf16.mxu0 %v2099_v58  ;;  %1276 = vmatprep.subr.bf16.mxu1 %v2102_v59 }
  0x99   : > { %1171 = vmatpush1.bf16.msra.mxu0 %v2097_v60  ;;  %1277 = vmatpush1.bf16.msra.mxu1 %v2100_v61 }
  0x9a   : > { %1172 = vmatprep.subr.bf16.mxu0 %v2105_v62  ;;  %1278 = vmatprep.subr.bf16.mxu1 %v2108_v63 }
  0x9d   : > { %1173 = vmatpush1.bf16.msra.mxu0 %v2103_v0  ;;  %1279 = vmatpush1.bf16.msra.mxu1 %v2106_v1 }
  0x9e   : > { %1174 = vmatprep.subr.bf16.mxu0 %v2111_v2  ;;  %1280 = vmatprep.subr.bf16.mxu1 %v2114_v3 }
  0xa1   : > { %1175 = vmatpush1.bf16.msra.mxu0 %v2109_v4  ;;  %1281 = vmatpush1.bf16.msra.mxu1 %v2112_v5 }
  0xa2   : > { %1176 = vmatprep.subr.bf16.mxu0 %v2120_v6  ;;  %1282 = vmatprep.subr.bf16.mxu1 %v2123_v7 }
  0xa5   : > { %1177 = vmatpush1.bf16.msra.mxu0 %v2118_v8  ;;  %1283 = vmatpush1.bf16.msra.mxu1 %v2121_v9 }
  0xa6   : > { %1178 = vmatprep.subr.bf16.mxu0 %v2126_v10  ;;  %1284 = vmatprep.subr.bf16.mxu1 %v2129_v11 }
  0xa9   : > { %1179 = vmatpush1.bf16.msra.mxu0 %v2124_v12  ;;  %1285 = vmatpush1.bf16.msra.mxu1 %v2127_v13 }
  0xac   : > { %1181 = vmatmul.mubr.bf16.vlgmr.msra.gmra.mrb[0].mxu0 %v2130_v14  ;;  %1287 = vmatmul.mubr.bf16.vlgmr.msra.gmra.mrb[0].mxu1 %v2130_v14 }
  0xad   : > { %1190 = vmatprep.mubr.bf16.mxu0 %v2133_v15  ;;  %1296 = vmatprep.mubr.bf16.mxu1 %v2133_v15 }
  0xb4   : > { %1191 = vmatmul.mubr.bf16.gmra.mrb[4].mxu0 %v2135_v16  ;;  %1297 = vmatmul.mubr.bf16.gmra.mrb[4].mxu1 %v2135_v16 }
 0x17f   : > { %v1182_v21 = vpop.f32.mrb[0].mxu0  ;;  %v1288_v22 = vpop.f32.mrb[0].mxu1 }
 0x180   : > { %v1307_v25 = vadd.f32 %v1182_v21, %v263_v17  ;;  %v1309_v26 = vadd.f32 %v1288_v22, %v265_v18  ;;  %v1184_v27 = vpop.f32.mrb[1].mxu0  ;;  %v1290_v28 = vpop.f32.mrb[1].mxu1 }
 0x181   : > { %v1308_v31 = vadd.f32 %v1184_v27, %v264_v19  ;;  %v1310_v32 = vadd.f32 %v1290_v28, %v266_v20  ;;  %v1186_v33 = vpop.f32.mrb[2].mxu0  ;;  %v1292_v34 = vpop.f32.mrb[2].mxu1 }
 0x182   : > { %1323 = vst [vmem:[#allocation2] sm:$0xff] %v1307_v25  ;;  %1325 = vst [vmem:[#allocation2 + $0x10] sm:$0xff] %v1309_v26  ;;  %v1311_v35 = vadd.f32 %v1186_v33, %v267_v23  ;;  %v1313_v36 = vadd.f32 %v1292_v34, %v269_v24  ;;  %v1188_v37 = vpop.f32.mrb[3].mxu0  ;;  %v1294_v38 = vpop.f32.mrb[3].mxu1 }
 0x183   : > { %1324 = vst [vmem:[#allocation2 + $0x8] sm:$0xff] %v1308_v31  ;;  %1326 = vst [vmem:[#allocation2 + $0x18] sm:$0xff] %v1310_v32  ;;  %v1312_v39 = vadd.f32 %v1188_v37, %v268_v29  ;;  %v1314_v40 = vadd.f32 %v1294_v38, %v270_v30 }
 0x184   : > { %1327 = vst [vmem:[#allocation2 + $0x20] sm:$0xff] %v1311_v35  ;;  %1329 = vst [vmem:[#allocation2 + $0x30] sm:$0xff] %v1313_v36 }
 0x185   : > { %1328 = vst [vmem:[#allocation2 + $0x28] sm:$0xff] %v1312_v39  ;;  %1330 = vst [vmem:[#allocation2 + $0x38] sm:$0xff] %v1314_v40 }
 0x187   : > { %v1192_v45 = vpop.f32.mrb[4].mxu0  ;;  %v1298_v46 = vpop.f32.mrb[4].mxu1  ;;  %1342 = sbr.rel (%p1870_p10) target bundleno = 490 (0x1ea), region = 67 }
 0x188   : > { %v1315_v49 = vadd.f32 %v1192_v45, %v271_v41  ;;  %v1317_v50 = vadd.f32 %v1298_v46, %v273_v42  ;;  %v1194_v51 = vpop.f32.mrb[5].mxu0  ;;  %v1300_v52 = vpop.f32.mrb[5].mxu1 }
 0x189   : > { %v1316_v55 = vadd.f32 %v1194_v51, %v272_v43  ;;  %v1318_v56 = vadd.f32 %v1300_v52, %v274_v44  ;;  %v1196_v57 = vpop.f32.mrb[6].mxu0  ;;  %v1302_v58 = vpop.f32.mrb[6].mxu1  ;;  %v1343_v1 = vld [vmem:[#allocation2] sm:$0xff] (!%p1870_p10)  ;;  %v2379_v12 = vld [vmem:[#allocation2 + $0x10] sm:$0xff] (!%p1870_p10) }
 0x18a   : > { %1331 = vst [vmem:[#allocation2 + $0x40] sm:$0xff] %v1315_v49  ;;  %1333 = vst [vmem:[#allocation2 + $0x50] sm:$0xff] %v1317_v50  ;;  %v1319_v59 = vadd.f32 %v1196_v57, %v275_v47  ;;  %v1321_v60 = vadd.f32 %v1302_v58, %v277_v48  ;;  %v1198_v61 = vpop.f32.mrb[7].mxu0  ;;  %v1304_v62 = vpop.f32.mrb[7].mxu1  ;;  %v1344_v2 = vld [vmem:[#allocation2 + $0x8] sm:$0xff] (!%p1870_p10)  ;;  %v2381_v13 = vld [vmem:[#allocation2 + $0x18] sm:$0xff] (!%p1870_p10) }
 0x18b   : > { %1332 = vst [vmem:[#allocation2 + $0x48] sm:$0xff] %v1316_v55  ;;  %1334 = vst [vmem:[#allocation2 + $0x58] sm:$0xff] %v1318_v56  ;;  %v1320_v63 = vadd.f32 %v1198_v61, %v276_v53  ;;  %v1322_v0 = vadd.f32 %v1304_v62, %v278_v54  ;;  %v1347_v3 = vld [vmem:[#allocation2 + $0x20] sm:$0xff] (!%p1870_p10)  ;;  %v2383_v15 = vld [vmem:[#allocation2 + $0x30] sm:$0xff] (!%p1870_p10) }
 0x18c   : > { %1335 = vst [vmem:[#allocation2 + $0x60] sm:$0xff] %v1319_v59  ;;  %1337 = vst [vmem:[#allocation2 + $0x70] sm:$0xff] %v1321_v60  ;;  %v1348_v4 = vld [vmem:[#allocation2 + $0x28] sm:$0xff] (!%p1870_p10)  ;;  %v1359_v7 = vadd.f32 (!%p1870_p10), %v1347_v3, %v1343_v1  ;;  %v2385_v16 = vld [vmem:[#allocation2 + $0x38] sm:$0xff] (!%p1870_p10)  ;;  %v1377_v20 = vadd.f32 (!%p1870_p10), %v2383_v15, %v2379_v12 }
 0x18d   : > { %1336 = vst [vmem:[#allocation2 + $0x68] sm:$0xff] %v1320_v63  ;;  %1338 = vst [vmem:[#allocation2 + $0x78] sm:$0xff] %v1322_v0  ;;  %v1368_v9 = vadd.f32 (!%p1870_p10), %v1348_v4, %v1344_v2  ;;  %v1386_v21 = vadd.f32 (!%p1870_p10), %v2385_v16, %v2381_v13 }
 0x191   : > { %v1351_v5 = vld [vmem:[#allocation2 + $0x40] sm:$0xff]  ;;  %v2387_v17 = vld [vmem:[#allocation2 + $0x50] sm:$0xff] }
 0x192   : > { %v1352_v6 = vld [vmem:[#allocation2 + $0x48] sm:$0xff]  ;;  %v1360_v11 = vadd.f32 %v1359_v7, %v1351_v5  ;;  %v2389_v19 = vld [vmem:[#allocation2 + $0x58] sm:$0xff]  ;;  %v1378_v26 = vadd.f32 %v1377_v20, %v2387_v17 }
 0x193   : > { %v1355_v8 = vld [vmem:[#allocation2 + $0x60] sm:$0xff]  ;;  %v1369_v14 = vadd.f32 %v1368_v9, %v1352_v6  ;;  %v2395_v23 = vld [vmem:[#allocation2 + $0x70] sm:$0xff]  ;;  %v1387_v27 = vadd.f32 %v1386_v21, %v2389_v19 }
 0x194   : > { %v1356_v10 = vld [vmem:[#allocation2 + $0x68] sm:$0xff]  ;;  %v1361_v18 = vadd.f32 %v1360_v11, %v1355_v8  ;;  %v2397_v24 = vld [vmem:[#allocation2 + $0x78] sm:$0xff]  ;;  %v1379_v30 = vadd.f32 %v1378_v26, %v2395_v23 }
 0x195   : > { %v1370_v22 = vadd.f32 %v1369_v14, %v1356_v10  ;;  %v1388_v31 = vadd.f32 %v1387_v27, %v2397_v24 }
 0x196   : > { %v1362_v25 = vrot.slane %v1361_v18, 4  ;;  %v1380_v34 = vrot.slane %v1379_v30, 4 }
 0x197   : > { %v1371_v28 = vrot.slane %v1370_v22, 4  ;;  %v1389_v35 = vrot.slane %v1388_v31, 4 }
 0x198   : > { %v1363_v29 = vadd.f32 %v1362_v25, %v1361_v18  ;;  %v1381_v38 = vadd.f32 %v1380_v34, %v1379_v30 }
 0x199   : > { %v1372_v32 = vadd.f32 %v1371_v28, %v1370_v22  ;;  %v1390_v39 = vadd.f32 %v1389_v35, %v1388_v31 }
 0x19a   : > { %v1364_v33 = vrot.slane %v1363_v29, 2  ;;  %v1382_v42 = vrot.slane %v1381_v38, 2 }
 0x19b   : > { %v1373_v36 = vrot.slane %v1372_v32, 2  ;;  %v1391_v43 = vrot.slane %v1390_v39, 2 }
 0x19c   : > { %v1365_v37 = vadd.f32 %v1364_v33, %v1363_v29  ;;  %v1383_v46 = vadd.f32 %v1382_v42, %v1381_v38 }
 0x19d   : > { %v1374_v40 = vadd.f32 %v1373_v36, %v1372_v32  ;;  %v1392_v47 = vadd.f32 %v1391_v43, %v1390_v39 }
 0x19e   : > { %v1366_v41 = vrot.slane %v1365_v37, 1  ;;  %v1384_v51 = vrot.slane %v1383_v46, 1 }
 0x19f   : > { %v1375_v44 = vrot.slane %v1374_v40, 1  ;;  %v1393_v52 = vrot.slane %v1392_v47, 1 }
 0x1a0   : > { %v1367_v45 = vadd.f32 %v1366_v41, %v1365_v37 }
 0x1a1   : > { %v1376_v48 = vadd.f32 %v1375_v44, %v1374_v40 }
 0x1a2   : > { %v1396_v49 = vmul.f32 0.03125, %v1367_v45 }
 0x1a3   : > { %v1397_v50 = vmul.f32 0.03125, %v1376_v48 }
 0x1a4   : > { %v2403_v53 = vsub.f32 %v1343_v1, %v1396_v49  ;;  %v2405_v54 = vsub.f32 %v1347_v3, %v1396_v49  ;;  %v2407_v55 = vsub.f32 %v1351_v5, %v1396_v49  ;;  %v2409_v56 = vsub.f32 %v1355_v8, %v1396_v49 }
 0x1a5   : > { %v2411_v57 = vsub.f32 %v1344_v2, %v1397_v50  ;;  %v2413_v58 = vsub.f32 %v1348_v4, %v1397_v50  ;;  %v2415_v59 = vsub.f32 %v1352_v6, %v1397_v50  ;;  %v2417_v60 = vsub.f32 %v1356_v10, %v1397_v50 }
 0x1a6   : > { %v1416_v61 = vmul.f32 %v2403_v53, %v2403_v53  ;;  %v1420_v62 = vmul.f32 %v2405_v54, %v2405_v54  ;;  %v1424_v63 = vmul.f32 %v2407_v55, %v2407_v55  ;;  %v1428_v3 = vmul.f32 %v2409_v56, %v2409_v56 }
 0x1a7   : > { %v1417_v0 = vmul.f32 %v2411_v57, %v2411_v57  ;;  %v1421_v1 = vmul.f32 %v2413_v58, %v2413_v58  ;;  %v1425_v2 = vmul.f32 %v2415_v59, %v2415_v59  ;;  %v1385_v5 = vadd.f32 %v1384_v51, %v1383_v46 }
 0x1a8   : > { %v1432_v4 = vadd.f32 %v1420_v62, %v1416_v61  ;;  %v1394_v6 = vadd.f32 %v1393_v52, %v1392_v47  ;;  %v1429_v7 = vmul.f32 %v2417_v60, %v2417_v60  ;;  %v1498_v62 = vlaneseq }
 0x1a9   : > { %v1441_v8 = vadd.f32 %v1421_v1, %v1417_v0  ;;  %v1398_v10 = vmul.f32 0.03125, %v1385_v5 }
 0x1aa   : > { %v1433_v9 = vadd.f32 %v1432_v4, %v1424_v63  ;;  %v1399_v11 = vmul.f32 0.03125, %v1394_v6  ;;  %v1499_v6 = vshrl.u32 %v1498_v62, 7 }
 0x1ab   : > { %v1442_v14 = vadd.f32 %v1441_v8, %v1425_v2  ;;  %v2436_v20 = vsub.f32 %v2379_v12, %v1398_v10  ;;  %v2442_v22 = vsub.f32 %v2383_v15, %v1398_v10  ;;  %v2448_v27 = vsub.f32 %v2387_v17, %v1398_v10 }
 0x1ac   : > { %v1434_v18 = vadd.f32 %v1433_v9, %v1428_v3  ;;  %v2439_v21 = vsub.f32 %v2381_v13, %v1399_v11  ;;  %v2445_v26 = vsub.f32 %v2385_v16, %v1399_v11  ;;  %v2451_v28 = vsub.f32 %v2389_v19, %v1399_v11 }
 0x1ad   : > { %v1443_v25 = vadd.f32 %v1442_v14, %v1429_v7  ;;  %v2454_v12 = vsub.f32 %v2395_v23, %v1398_v10  ;;  %v2457_v13 = vsub.f32 %v2397_v24, %v1399_v11  ;;  %v1418_v15 = vmul.f32 %v2436_v20, %v2436_v20 }
 0x1ae   : > { %v1435_v29 = vrot.slane %v1434_v18, 4  ;;  %v1419_v16 = vmul.f32 %v2439_v21, %v2439_v21  ;;  %v1422_v17 = vmul.f32 %v2442_v22, %v2442_v22  ;;  %v1423_v19 = vmul.f32 %v2445_v26, %v2445_v26 }
 0x1af   : > { %v1444_v30 = vrot.slane %v1443_v25, 4  ;;  %v1426_v23 = vmul.f32 %v2448_v27, %v2448_v27  ;;  %v1427_v24 = vmul.f32 %v2451_v28, %v2451_v28  ;;  %v1430_v32 = vmul.f32 %v2454_v12, %v2454_v12 }
 0x1b0   : > { %v1436_v31 = vadd.f32 %v1435_v29, %v1434_v18  ;;  %v1431_v34 = vmul.f32 %v2457_v13, %v2457_v13  ;;  %v1450_v35 = vadd.f32 %v1422_v17, %v1418_v15  ;;  %v1459_v36 = vadd.f32 %v1423_v19, %v1419_v16  ;;  %v1496_v18 = vld [vmem:[%s2573_s2] sm:$0xf] }
 0x1b1   : > { %v1445_v33 = vadd.f32 %v1444_v30, %v1443_v25  ;;  %v1500_v11 = vsub.s32 0, %v1499_v6  ;;  %v1504_v14 = vsub.s32 1, %v1499_v6  ;;  %v1508_v15 = vsub.s32 2, %v1499_v6  ;;  %v1534_v30 = vld [vmem:[%s2574_s3] sm:$0xf] }
 0x1b2   : > { %v1437_v37 = vrot.slane %v1436_v31, 2  ;;  %v1451_v39 = vadd.f32 %v1450_v35, %v1426_v23  ;;  %v1460_v40 = vadd.f32 %v1459_v36, %v1427_v24  ;;  %v1512_v16 = vsub.s32 3, %v1499_v6 }
 0x1b3   : > { %v1446_v38 = vrot.slane %v1445_v33, 2  ;;  %v1505_v23 = vrot.slane %v1496_v18, %v1504_v14  ;;  %v1539_v24 = vrot.slane %v1534_v30, %v1500_v11  ;;  %v2485_v36 = vrot.slane %v1534_v30, %v1508_v15 }
 0x1b4   : > { %v1438_v41 = vadd.f32 %v1437_v37, %v1436_v31  ;;  %v1452_v43 = vadd.f32 %v1451_v39, %v1430_v32  ;;  %v1461_v44 = vadd.f32 %v1460_v40, %v1431_v34  ;;  %v1501_v31 = vrot.slane %v1496_v18, %v1500_v11 }
 0x1b5   : > { %v1447_v42 = vadd.f32 %v1446_v38, %v1445_v33  ;;  %v1543_v32 = vrot.slane %v1534_v30, %v1504_v14  ;;  %v2481_v33 = vrot.slane %v1496_v18, %v1508_v15  ;;  %v2483_v35 = vrot.slane %v1496_v18, %v1512_v16 }
 0x1b6   : > { %v1439_v45 = vrot.slane %v1438_v41, 1  ;;  %v1453_v47 = vrot.slane %v1452_v43, 4  ;;  %v1462_v48 = vrot.slane %v1461_v44, 4  ;;  %v2487_v37 = vrot.slane %v1534_v30, %v1512_v16 }
 0x1b7   : > { %v1448_v46 = vrot.slane %v1447_v42, 1 }
 0x1b8   : > { %v1440_v49 = vadd.f32 %v1439_v45, %v1438_v41  ;;  %v1454_v51 = vadd.f32 %v1453_v47, %v1452_v43  ;;  %v1463_v52 = vadd.f32 %v1462_v48, %v1461_v44 }
 0x1b9   : > { %v1449_v50 = vadd.f32 %v1448_v46, %v1447_v42 }
 0x1ba   : > { %v1468_v61 = vmul.f32 0.03125, %v1440_v49  ;;  %v1455_v0 = vrot.slane %v1454_v51, 2  ;;  %v1464_v1 = vrot.slane %v1463_v52, 2 }
 0x1bb   : > { %v1469_v63 = vmul.f32 0.03125, %v1449_v50 }
 0x1bc   : > { %v1472_v2 = vadd.f32 1e-05, %v1468_v61  ;;  %v1456_v4 = vadd.f32 %v1455_v0, %v1454_v51  ;;  %v1465_v5 = vadd.f32 %v1464_v1, %v1463_v52 }
 0x1bd   : > { %v1473_v3 = vadd.f32 1e-05, %v1469_v63 }
 0x1be   : > { %2136 = vrsqrt.f32 %v1472_v2  ;;  %v1457_v7 = vrot.slane %v1456_v4, 1  ;;  %v1466_v8 = vrot.slane %v1465_v5, 1 }
 0x1bf   : > { %2138 = vrsqrt.f32 %v1473_v3 }
 0x1c0   : > { %v1458_v9 = vadd.f32 %v1457_v7, %v1456_v4  ;;  %v1467_v10 = vadd.f32 %v1466_v8, %v1465_v5 }
 0x1c2   : > { %v1470_v25 = vmul.f32 0.03125, %v1458_v9  ;;  %v1471_v29 = vmul.f32 0.03125, %v1467_v10 }
 0x1c4   : > { %v1474_v17 = vadd.f32 1e-05, %v1470_v25  ;;  %v1475_v19 = vadd.f32 1e-05, %v1471_v29 }
 0x1c6   : > { %2140 = vrsqrt.f32 %v1474_v17 }
 0x1c7   : > { %2142 = vrsqrt.f32 %v1475_v19 }
 0x1c8   : > { %v2137_v34 = vpop.eup %2136 }
 0x1c9   : > { %v2139_v38 = vpop.eup %2138  ;;  %v1480_v39 = vmul.f32 %v2137_v34, %v2403_v53  ;;  %v1484_v40 = vmul.f32 %v2137_v34, %v2405_v54  ;;  %v1488_v41 = vmul.f32 %v2137_v34, %v2407_v55  ;;  %v1492_v42 = vmul.f32 %v2137_v34, %v2409_v56 }
 0x1ca   : > { %v1481_v43 = vmul.f32 %v2139_v38, %v2411_v57  ;;  %v1485_v44 = vmul.f32 %v2139_v38, %v2413_v58  ;;  %v1489_v45 = vmul.f32 %v2139_v38, %v2415_v59  ;;  %v1493_v46 = vmul.f32 %v2139_v38, %v2417_v60 }
 0x1cb   : > { %v1518_v47 = vmul.f32 %v1501_v31, %v1480_v39  ;;  %v1522_v48 = vmul.f32 %v1501_v31, %v1484_v40  ;;  %v1526_v49 = vmul.f32 %v1501_v31, %v1488_v41  ;;  %v1530_v50 = vmul.f32 %v1501_v31, %v1492_v42 }
 0x1cc   : > { %v1519_v51 = vmul.f32 %v1505_v23, %v1481_v43  ;;  %v1523_v53 = vmul.f32 %v1505_v23, %v1485_v44  ;;  %v1527_v52 = vmul.f32 %v1505_v23, %v1489_v45  ;;  %v1531_v54 = vmul.f32 %v1505_v23, %v1493_v46 }
 0x1cd   : > { %v1556_v61 = vadd.f32 %v1539_v24, %v1518_v47  ;;  %v1560_v55 = vadd.f32 %v1539_v24, %v1522_v48  ;;  %v1564_v62 = vadd.f32 %v1539_v24, %v1526_v49  ;;  %v2497_v56 = vadd.f32 %v1539_v24, %v1530_v50 }
 0x1ce   : > { %v1557_v57 = vadd.f32 %v1543_v32, %v1519_v51  ;;  %v1561_v63 = vadd.f32 %v1543_v32, %v1523_v53  ;;  %v1565_v58 = vadd.f32 %v1543_v32, %v1527_v52  ;;  %v2499_v0 = vadd.f32 %v1543_v32, %v1531_v54 }
 0x1cf   : > { %vm1572_vm0 = vcmp.gt.f32.partialorder %v1556_v61, 0.0  ;;  %v1588_v59 = vmul.f32 0.2, %v1556_v61  ;;  %vm1576_vm1 = vcmp.gt.f32.partialorder %v1560_v55, 0.0  ;;  %v1592_v60 = vmul.f32 0.2, %v1560_v55 }
 0x1d0   : > { %vm1573_vm2 = vcmp.gt.f32.partialorder %v1557_v57, 0.0  ;;  %v1589_v1 = vmul.f32 0.2, %v1557_v57  ;;  %vm1577_vm3 = vcmp.gt.f32.partialorder %v1561_v63, 0.0  ;;  %v1593_v2 = vmul.f32 0.2, %v1561_v63  ;;  %v2141_v3 = vpop.eup %2140 }
 0x1d1   : > { %v1604_v4 = vsel %vm1572_vm0, %v1556_v61, %v1588_v59  ;;  %v1608_v5 = vsel %vm1576_vm1, %v1560_v55, %v1592_v60  ;;  %vm1580_vm4 = vcmp.gt.f32.partialorder %v1564_v62, 0.0  ;;  %vm1581_vm5 = vcmp.gt.f32.partialorder %v1565_v58, 0.0  ;;  %v2143_v6 = vpop.eup %2142 }
 0x1d2   : > { %v1605_v7 = vsel %vm1573_vm2, %v1557_v57, %v1589_v1  ;;  %v1482_v8 = vmul.f32 %v2141_v3, %v2436_v20  ;;  %v1609_v9 = vsel %vm1577_vm3, %v1561_v63, %v1593_v2  ;;  %v1486_v10 = vmul.f32 %v2141_v3, %v2442_v22 }
 0x1d3   : > { %v1883_v11 = vpack.c.bf16 %v1605_v7, %v1604_v4  ;;  %v1483_v14 = vmul.f32 %v2143_v6, %v2439_v21  ;;  %v1885_v18 = vpack.c.bf16 %v1609_v9, %v1608_v5  ;;  %v1487_v25 = vmul.f32 %v2143_v6, %v2445_v26 }
 0x1d4   : > { %v1520_v29 = vmul.f32 %v2481_v33, %v1482_v8  ;;  %v1524_v15 = vmul.f32 %v2481_v33, %v1486_v10  ;;  %v1596_v30 = vmul.f32 0.2, %v1564_v62  ;;  %v1597_v16 = vmul.f32 0.2, %v1565_v58 }
 0x1d5   : > { %1668 = vst [vmem:[%s2575_s4] sm:$0xff] %v1883_v11  ;;  %v1521_v20 = vmul.f32 %v2483_v35, %v1483_v14  ;;  %1670 = vst [vmem:[%s2575_s4 + $0x10] sm:$0xff] %v1885_v18  ;;  %v1525_v21 = vmul.f32 %v2483_v35, %v1487_v25  ;;  %v1490_v22 = vmul.f32 %v2141_v3, %v2448_v27  ;;  %vm1584_vm10 = vcmp.gt.f32.partialorder %v2497_v56, 0.0 }
 0x1d6   : > { %v1491_v26 = vmul.f32 %v2143_v6, %v2451_v28  ;;  %v1558_v17 = vadd.f32 %v2485_v36, %v1520_v29  ;;  %v1562_v19 = vadd.f32 %v2485_v36, %v1524_v15  ;;  %v1612_v31 = vsel %vm1580_vm4, %v1564_v62, %v1596_v30 }
 0x1d7   : > { %v1613_v23 = vsel %vm1581_vm5, %v1565_v58, %v1597_v16  ;;  %v1559_v24 = vadd.f32 %v2487_v37, %v1521_v20  ;;  %v1563_v32 = vadd.f32 %v2487_v37, %v1525_v21  ;;  %v1528_v38 = vmul.f32 %v2481_v33, %v1490_v22 }
 0x1d8   : > { %v1887_v34 = vpack.c.bf16 %v1613_v23, %v1612_v31  ;;  %vm1574_vm6 = vcmp.gt.f32.partialorder %v1558_v17, 0.0  ;;  %v1590_v39 = vmul.f32 0.2, %v1558_v17  ;;  %vm1578_vm7 = vcmp.gt.f32.partialorder %v1562_v19, 0.0 }
 0x1d9   : > { %v1594_v27 = vmul.f32 0.2, %v1562_v19  ;;  %vm1575_vm8 = vcmp.gt.f32.partialorder %v1559_v24, 0.0  ;;  %v1591_v28 = vmul.f32 0.2, %v1559_v24  ;;  %vm1579_vm9 = vcmp.gt.f32.partialorder %v1563_v32, 0.0 }
 0x1da   : > { %v1595_v40 = vmul.f32 0.2, %v1563_v32  ;;  %1672 = vst [vmem:[%s2575_s4 + $0x20] sm:$0xff] %v1887_v34  ;;  %v1606_v41 = vsel %vm1574_vm6, %v1558_v17, %v1590_v39  ;;  %v1529_v43 = vmul.f32 %v2483_v35, %v1491_v26  ;;  %v1566_v44 = vadd.f32 %v2485_v36, %v1528_v38 }
 0x1db   : > { %v1610_v42 = vsel %vm1578_vm7, %v1562_v19, %v1594_v27  ;;  %v1607_v45 = vsel %vm1575_vm8, %v1559_v24, %v1591_v28  ;;  %vm1585_vm11 = vcmp.gt.f32.partialorder %v2499_v0, 0.0  ;;  %v1600_v51 = vmul.f32 0.2, %v2497_v56 }
 0x1dc   : > { %v1611_v46 = vsel %vm1579_vm9, %v1563_v32, %v1595_v40  ;;  %v1884_v47 = vpack.c.bf16 %v1607_v45, %v1606_v41  ;;  %v1567_v49 = vadd.f32 %v2487_v37, %v1529_v43  ;;  %vm1582_vm12 = vcmp.gt.f32.partialorder %v1566_v44, 0.0 }
 0x1dd   : > { %v1886_v48 = vpack.c.bf16 %v1611_v46, %v1610_v42  ;;  %v1598_v50 = vmul.f32 0.2, %v1566_v44  ;;  %v1601_v53 = vmul.f32 0.2, %v2499_v0  ;;  %v1494_v52 = vmul.f32 %v2141_v3, %v2454_v12 }
 0x1de   : > { %1669 = vst [vmem:[%s2575_s4 + $0x8] sm:$0xff] %v1884_v47  ;;  %vm1583_vm13 = vcmp.gt.f32.partialorder %v1567_v49, 0.0  ;;  %v1599_v54 = vmul.f32 0.2, %v1567_v49  ;;  %v1495_v61 = vmul.f32 %v2143_v6, %v2457_v13  ;;  %v1616_v62 = vsel %vm1584_vm10, %v2497_v56, %v1600_v51 }
 0x1df   : > { %1671 = vst [vmem:[%s2575_s4 + $0x18] sm:$0xff] %v1886_v48  ;;  %v1614_v55 = vsel %vm1582_vm12, %v1566_v44, %v1598_v50  ;;  %v1617_v12 = vsel %vm1585_vm11, %v2499_v0, %v1601_v53  ;;  %v1532_v57 = vmul.f32 %v2481_v33, %v1494_v52 }
 0x1e0   : > { %v1615_v63 = vsel %vm1583_vm13, %v1567_v49, %v1599_v54  ;;  %v1889_v58 = vpack.c.bf16 %v1617_v12, %v1616_v62  ;;  %v1533_v59 = vmul.f32 %v2483_v35, %v1495_v61 }
 0x1e1   : > { %v1888_v60 = vpack.c.bf16 %v1615_v63, %v1614_v55  ;;  %v1570_v1 = vadd.f32 %v2485_v36, %v1532_v57 }
 0x1e2   : > { %1674 = vst [vmem:[%s2575_s4 + $0x30] sm:$0xff] %v1889_v58  ;;  %v1571_v13 = vadd.f32 %v2487_v37, %v1533_v59 }
 0x1e3   : > { %1673 = vst [vmem:[%s2575_s4 + $0x28] sm:$0xff] %v1888_v60  ;;  %vm1586_vm14 = vcmp.gt.f32.partialorder %v1570_v1, 0.0  ;;  %v1602_v56 = vmul.f32 0.2, %v1570_v1 }
 0x1e4   : > { %vm1587_vm15 = vcmp.gt.f32.partialorder %v1571_v13, 0.0  ;;  %v1603_v33 = vmul.f32 0.2, %v1571_v13 }
 0x1e5   : > { %v1618_v0 = vsel %vm1586_vm14, %v1570_v1, %v1602_v56 }
 0x1e6   : > { %v1619_v2 = vsel %vm1587_vm15, %v1571_v13, %v1603_v33 }
 0x1e7   : > { %v1890_v35 = vpack.c.bf16 %v1619_v2, %v1618_v0 }
 0x1e9   : > { %1675 = vst [vmem:[%s2575_s4 + $0x38] sm:$0xff] %v1890_v35 }
 0x1ea PF: > { %p11_p11 = scmp.ge.s32.totalorder %s2213_s19, 10   ;;  %s2576_s15 = smov %s2162_s16 }
 0x1eb   : > { %s2577_s16 = smov %s2222_s22  ;;  %s2578_s17 = smov %s2213_s19 }
 0x1ec   :  { %13 = sbr.rel (!%p11_p11) target bundleno = 2 (0x2), region = 101 }

// kernel: d_forward.9
= control target key start
LH: loop header
LB: loop body
LE: loop exit
PB: predicated region body
PF: predicated region fallthrough
CT: control target
= control target key end

     0   :  { %v56_v1 = vlaneseq  ;;  %v1124_v51 = vmov 1983009808   ;;  %vm968_vm0 = vcmask 1041408   ;;  %vm1112_vm1 = vcmask 1024   ;;  %s1885_s2 = inlined_call_operand.<no memory space> [shape: f32[1,1], index: 2, kind: input, shape index: {}]   ;;  %s1886_s1 = inlined_call_operand.vmem [shape: f32[1,8192], index: 1, kind: input, shape index: {}]   ;;  %s1887_s0 = inlined_call_operand.vmem [shape: bf16[2,8192], index: 0, kind: input, shape index: {}]   ;;  %s1888_s3 = inlined_call_operand.vmem [shape: f32[2,1], index: 3, kind: output, shape index: {}]  }
   0x1   :  { %v8_v0 = vstv %s1885_s2  ;;  %v1153_v3 = vld [vmem:[%s1886_s1 + $0x20] sm:$0xff]  ;;  %v1170_v8 = vld [vmem:[%s1886_s1 + $0x28] sm:$0xff]  ;;  %v1195_v17 = vld [vmem:[%s1886_s1 + $0x30] sm:$0xff]  ;;  %v315_v52 = vunpack.c.l.s4 %v1124_v51 }
   0x2   :  { %9 = vst [vmem:[#allocation2] sm:$0x1] %v8_v0  ;;  %v1148_v2 = vshrl.u32 %v56_v1, 7  ;;  %v1216_v26 = vld [vmem:[%s1886_s1 + $0x38] sm:$0xff]  ;;  %v1253_v43 = vld [vmem:[%s1887_s0 + $0x20] sm:$0xff]  ;;  %v1258_v44 = vld [vmem:[%s1887_s0 + $0x28] sm:$0xff] }
   0x3   :  { %v1271_v49 = vld [vmem:[%s1887_s0 + $0x30] sm:$0xff]  ;;  %v1276_v50 = vld [vmem:[%s1887_s0 + $0x38] sm:$0xff]  ;;  %v1281_v53 = vld [vmem:[%s1886_s1] sm:$0xff]  ;;  %v316_v1 = vunpack.c.0.s8 %v315_v52 }
   0x4   :  { %v1156_v4 = vsub.s32 0, %v1148_v2  ;;  %v1159_v5 = vsub.s32 1, %v1148_v2  ;;  %v1162_v6 = vsub.s32 2, %v1148_v2  ;;  %v1165_v7 = vsub.s32 3, %v1148_v2  ;;  %v1293_v61 = vld [vmem:[%s1886_s1 + $0x8] sm:$0xff]  ;;  %v1311_v62 = vld [vmem:[%s1886_s1 + $0x10] sm:$0xff] }
   0x5   :  { %v1173_v9 = vsub.s32 4, %v1148_v2  ;;  %v1176_v10 = vsub.s32 5, %v1148_v2  ;;  %v1179_v11 = vsub.s32 6, %v1148_v2  ;;  %v1182_v12 = vsub.s32 7, %v1148_v2 }
   0x6   :  { %v187_v13 = vrot.slane %v1153_v3, %v1156_v4  ;;  %v191_v14 = vrot.slane %v1153_v3, %v1159_v5  ;;  %v195_v15 = vrot.slane %v1153_v3, %v1162_v6  ;;  %v199_v16 = vrot.slane %v1153_v3, %v1165_v7 }
   0x7   :  { %v203_v18 = vrot.slane %v1153_v3, %v1173_v9  ;;  %v207_v19 = vrot.slane %v1153_v3, %v1176_v10  ;;  %v211_v20 = vrot.slane %v1153_v3, %v1179_v11  ;;  %v215_v21 = vrot.slane %v1153_v3, %v1182_v12 }
   0x8   :  { %v219_v22 = vrot.slane %v1170_v8, %v1156_v4  ;;  %v223_v23 = vrot.slane %v1170_v8, %v1159_v5  ;;  %v227_v24 = vrot.slane %v1170_v8, %v1162_v6  ;;  %v231_v25 = vrot.slane %v1170_v8, %v1165_v7 }
   0x9   :  { %v235_v27 = vrot.slane %v1170_v8, %v1173_v9  ;;  %v239_v28 = vrot.slane %v1170_v8, %v1176_v10  ;;  %v243_v29 = vrot.slane %v1170_v8, %v1179_v11  ;;  %v247_v30 = vrot.slane %v1170_v8, %v1182_v12 }
   0xa   :  { %v251_v31 = vrot.slane %v1195_v17, %v1156_v4  ;;  %v255_v32 = vrot.slane %v1195_v17, %v1159_v5  ;;  %v259_v33 = vrot.slane %v1195_v17, %v1162_v6  ;;  %v263_v34 = vrot.slane %v1195_v17, %v1165_v7 }
   0xb   :  { %v267_v35 = vrot.slane %v1195_v17, %v1173_v9  ;;  %v271_v36 = vrot.slane %v1195_v17, %v1176_v10  ;;  %v279_v38 = vrot.slane %v1195_v17, %v1182_v12  ;;  %v59_v63 = vrot.slane %v1281_v53, %v1156_v4 }
   0xc   :  { %v63_v0 = vrot.slane %v1281_v53, %v1159_v5  ;;  %v67_v51 = vrot.slane %v1281_v53, %v1162_v6  ;;  %v71_v60 = vrot.slane %v1281_v53, %v1165_v7  ;;  %v75_v59 = vrot.slane %v1281_v53, %v1173_v9 }
   0xd   :  { %v79_v58 = vrot.slane %v1281_v53, %v1176_v10  ;;  %v83_v52 = vrot.slane %v1281_v53, %v1179_v11  ;;  %v87_v57 = vrot.slane %v1281_v53, %v1182_v12  ;;  %v91_v56 = vrot.slane %v1293_v61, %v1156_v4 }
   0xe   :  { %v95_v55 = vrot.slane %v1293_v61, %v1159_v5  ;;  %v99_v54 = vrot.slane %v1293_v61, %v1162_v6  ;;  %v103_v47 = vrot.slane %v1293_v61, %v1165_v7  ;;  %v107_v48 = vrot.slane %v1293_v61, %v1173_v9 }
   0xf   :  { %v111_v45 = vrot.slane %v1293_v61, %v1176_v10  ;;  %v115_v53 = vrot.slane %v1293_v61, %v1179_v11  ;;  %v119_v46 = vrot.slane %v1293_v61, %v1182_v12  ;;  %v1334_v41 = vsub.s32 %v316_v1, %v1148_v2 }
  0x10   :  { %v448_v42 = vcombine.low %v187_v13, %v191_v14  ;;  %v123_v39 = vrot.slane %v1311_v62, %v1156_v4  ;;  %v127_v40 = vrot.slane %v1311_v62, %v1159_v5  ;;  %v131_v37 = vrot.slane %v1311_v62, %v1162_v6 }
  0x11   :  { %v449_v2 = vcombine.low %v195_v15, %v199_v16  ;;  %v135_v61 = vrot.slane %v1311_v62, %v1165_v7  ;;  %v465_v14 = vcombine.low %v203_v18, %v207_v19  ;;  %v466_v1 = vcombine.low %v211_v20, %v215_v21 }
  0x12   :  { %v456_v13 = vrot.slane %v448_v42, %v1334_v41  ;;  %v1369_v15 = vcombine.low %v59_v63, %v63_v0  ;;  %v482_v42 = vcombine.low %v219_v22, %v223_v23  ;;  %v483_v18 = vcombine.low %v227_v24, %v231_v25 }
  0x13   :  { %v463_v16 = vrot.slane %v449_v2, %v1334_v41  ;;  %v1384_v3 = vcombine.low %v67_v51, %v71_v60  ;;  %v473_v19 = vrot.slane %v465_v14, %v1334_v41  ;;  %v480_v20 = vrot.slane %v466_v1, %v1334_v41 }
  0x14   :  { %v499_v21 = vcombine.low %v235_v27, %v239_v28  ;;  %v490_v23 = vrot.slane %v482_v42, %v1334_v41  ;;  %v497_v63 = vrot.slane %v483_v18, %v1334_v41  ;;  %v500_v24 = vcombine.low %v243_v29, %v247_v30 }
  0x15   :  { %v464_v22 = vcombine.low %v456_v13, %v463_v16  ;;  %v481_v25 = vcombine.low %v473_v19, %v480_v20  ;;  %v516_v27 = vcombine.low %v251_v31, %v255_v32  ;;  %v517_v28 = vcombine.low %v259_v33, %v263_v34 }
  0x16   :  { %v507_v60 = vrot.slane %v499_v21, %v1334_v41  ;;  %v498_v0 = vcombine.low %v490_v23, %v497_v63  ;;  %v514_v8 = vrot.slane %v500_v24, %v1334_v41  ;;  %v533_v29 = vcombine.low %v267_v35, %v271_v36 }
  0x17   :  { %v1890_v30 = vrot.slane %v1195_v17, %v1179_v11  ;;  %v524_v32 = vrot.slane %v516_v27, %v1334_v41  ;;  %v531_v33 = vrot.slane %v517_v28, %v1334_v41  ;;  %v1891_v34 = vrot.slane %v1216_v26, %v1159_v5 }
  0x18   :  { %v1892_v51 = vrot.slane %v1216_v26, %v1156_v4  ;;  %v1893_v35 = vrot.slane %v1216_v26, %v1165_v7  ;;  %v1894_v36 = vrot.slane %v1216_v26, %v1162_v6  ;;  %v515_v17 = vcombine.low %v507_v60, %v514_v8 }
  0x19   :  { %v534_v31 = vcombine.low %v1890_v30, %v279_v38  ;;  %v541_v38 = vrot.slane %v533_v29, %v1334_v41  ;;  %v1895_v1 = vrot.slane %v1216_v26, %v1176_v10  ;;  %v1896_v16 = vrot.slane %v1216_v26, %v1173_v9 }
  0x1a   :  { %v550_v2 = vcombine.low %v1892_v51, %v1891_v34  ;;  %v551_v13 = vcombine.low %v1894_v36, %v1893_v35  ;;  %v532_v18 = vcombine.low %v524_v32, %v531_v33  ;;  %v1897_v21 = vrot.slane %v1216_v26, %v1182_v12  ;;  %v17_v36 = vld [vmem:[%s1887_s0 + $0x8] sm:$0xff] }
  0x1b   :  { %v548_v14 = vrot.slane %v534_v31, %v1334_v41  ;;  %v567_v42 = vcombine.low %v1896_v16, %v1895_v1  ;;  %v1898_v23 = vrot.slane %v1216_v26, %v1179_v11  ;;  %v329_v24 = vcombine.low %v75_v59, %v79_v58  ;;  %v1517_v1 = vld [vmem:[%s1887_s0 + $0x10] sm:$0xff] }
  0x1c   :  { %v558_v19 = vrot.slane %v550_v2, %v1334_v41  ;;  %v565_v20 = vrot.slane %v551_v13, %v1334_v41  ;;  %v330_v60 = vcombine.low %v83_v52, %v87_v57  ;;  %v346_v8 = vcombine.low %v91_v56, %v95_v55 }
  0x1d   :  { %v568_v63 = vcombine.low %v1898_v23, %v1897_v21  ;;  %v549_v27 = vcombine.low %v541_v38, %v548_v14  ;;  %v575_v28 = vrot.slane %v567_v42, %v1334_v41  ;;  %v347_v29 = vcombine.low %v99_v54, %v103_v47 }
  0x1e   :  { %v566_v30 = vcombine.low %v558_v19, %v565_v20  ;;  %v320_v32 = vrot.slane %v1369_v15, %v1334_v41  ;;  %v327_v33 = vrot.slane %v1384_v3, %v1334_v41  ;;  %v363_v34 = vcombine.low %v107_v48, %v111_v45 }
  0x1f   :  { %v582_v31 = vrot.slane %v568_v63, %v1334_v41  ;;  %v364_v51 = vcombine.low %v115_v53, %v119_v46  ;;  %v1899_v58 = vunpack.c.l.bf16 %v1253_v43  ;;  %v1900_v59 = vunpack.c.h.bf16 %v1253_v43  ;;  %v16_v43 = vld [vmem:[%s1887_s0] sm:$0xff] }
  0x20   :  { %v1901_v47 = vunpack.c.l.bf16 %v1258_v44  ;;  %v1902_v55 = vunpack.c.h.bf16 %v1258_v44  ;;  %v1903_v15 = vunpack.c.l.bf16 %v1271_v49  ;;  %v1904_v45 = vunpack.c.h.bf16 %v1271_v49 }
  0x21   :  { %v583_v26 = vcombine.low %v575_v28, %v582_v31  ;;  %v608_v57 = vmul.f32 %v464_v22, %v1899_v58  ;;  %v609_v52 = vmul.f32 %v481_v25, %v1900_v59  ;;  %v1905_v48 = vunpack.c.l.bf16 %v1276_v50 }
  0x22   :  { %v610_v54 = vmul.f32 %v498_v0, %v1901_v47  ;;  %v611_v56 = vmul.f32 %v515_v17, %v1902_v55  ;;  %v1474_v2 = vmul.f32 %v532_v18, %v1903_v15  ;;  %v1478_v46 = vmul.f32 %v549_v27, %v1904_v45 }
  0x23   :  { %v1482_v53 = vmul.f32 %v566_v30, %v1905_v48  ;;  %v337_v3 = vrot.slane %v329_v24, %v1334_v41  ;;  %v344_v44 = vrot.slane %v330_v60, %v1334_v41  ;;  %v1906_v22 = vunpack.c.h.bf16 %v1276_v50 }
  0x24   :  { %v354_v49 = vrot.slane %v346_v8, %v1334_v41  ;;  %v361_v0 = vrot.slane %v347_v29, %v1334_v41  ;;  %v380_v35 = vcombine.low %v123_v39, %v127_v40  ;;  %v381_v50 = vcombine.low %v131_v37, %v135_v61  ;;  %v1522_v37 = vld [vmem:[%s1886_s1 + $0x18] sm:$0xff] }
  0x25   :  { %v1491_v25 = vmul.f32 %v583_v26, %v1906_v22  ;;  %v371_v13 = vrot.slane %v363_v34, %v1334_v41  ;;  %v378_v17 = vrot.slane %v364_v51, %v1334_v41  ;;  %v24_v38 = vunpack.c.l.bf16 %v16_v43 }
  0x26   :  { %v25_v14 = vunpack.c.h.bf16 %v16_v43  ;;  %v139_v39 = vrot.slane %v1311_v62, %v1173_v9  ;;  %v328_v40 = vcombine.low %v320_v32, %v327_v33  ;;  %v143_v61 = vrot.slane %v1311_v62, %v1176_v10 }
  0x27   :  { %v147_v16 = vrot.slane %v1311_v62, %v1179_v11  ;;  %v151_v42 = vrot.slane %v1311_v62, %v1182_v12  ;;  %v345_v18 = vcombine.low %v337_v3, %v344_v44  ;;  %v26_v19 = vunpack.c.l.bf16 %v17_v36 }
  0x28   :  { %v362_v20 = vcombine.low %v354_v49, %v361_v0  ;;  %v388_v21 = vrot.slane %v380_v35, %v1334_v41  ;;  %v395_v23 = vrot.slane %v381_v50, %v1334_v41  ;;  %v27_v63 = vunpack.c.h.bf16 %v17_v36 }
  0x29   :  { %v379_v24 = vcombine.low %v371_v13, %v378_v17  ;;  %v28_v60 = vunpack.c.l.bf16 %v1517_v1  ;;  %v600_v8 = vmul.f32 %v328_v40, %v24_v38  ;;  %v1539_v29 = vcombine.low %v139_v39, %v143_v61 }
  0x2a   :  { %v1541_v30 = vcombine.low %v147_v16, %v151_v42  ;;  %v601_v31 = vmul.f32 %v345_v18, %v25_v14  ;;  %v396_v32 = vcombine.low %v388_v21, %v395_v23  ;;  %v602_v33 = vmul.f32 %v362_v20, %v26_v19 }
  0x2b   :  { %v632_v34 = vcombine.high %v600_v8, %v600_v8  ;;  %v768_v51 = vcombine.high %v608_v57, %v608_v57  ;;  %v603_v26 = vmul.f32 %v379_v24, %v27_v63  ;;  %v1544_v58 = vrot.slane %v608_v57, %v1334_v41 }
  0x2c   :  { %v785_v59 = vcombine.high %v609_v52, %v609_v52  ;;  %v1547_v47 = vrot.slane %v609_v52, %v1334_v41  ;;  %v639_v55 = vrot.slane %v600_v8, %v1334_v41  ;;  %v802_v45 = vcombine.high %v610_v54, %v610_v54 }
  0x2d   :  { %1907 = vst [vmem:[#allocation3_spill] sm:$0xff] %v1544_v58  ;;  %v1551_v15 = vrot.slane %v768_v51, %v1334_v41  ;;  %v1554_v48 = vrot.slane %v610_v54, %v1334_v41  ;;  %v649_v43 = vcombine.high %v601_v31, %v601_v31  ;;  %v656_v3 = vrot.slane %v601_v31, %v1334_v41 }
  0x2e   :  { %v1558_v44 = vrot.slane %v785_v59, %v1334_v41  ;;  %v819_v57 = vcombine.high %v611_v56, %v611_v56  ;;  %v646_v22 = vrot.slane %v632_v34, %v1334_v41  ;;  %v666_v52 = vcombine.high %v602_v33, %v602_v33 }
  0x2f   :  { %v1562_v49 = vrot.slane %v802_v45, %v1334_v41  ;;  %v1565_v0 = vrot.slane %v611_v56, %v1334_v41  ;;  %v673_v35 = vrot.slane %v602_v33, %v1334_v41  ;;  %v836_v50 = vcombine.high %v1474_v2, %v1474_v2 }
  0x30   :  { %v1569_v54 = vrot.slane %v819_v57, %v1334_v41  ;;  %v1575_v36 = vrot.slane %v1474_v2, %v1334_v41  ;;  %v647_v13 = vcombine.high %v639_v55, %v639_v55  ;;  %v683_v17 = vcombine.high %v603_v26, %v603_v26 }
  0x31   :  { %v853_v38 = vcombine.high %v1478_v46, %v1478_v46  ;;  %v1581_v56 = vrot.slane %v1478_v46, %v1334_v41  ;;  %v663_v14 = vrot.slane %v649_v43, %v1334_v41  ;;  %v1585_v39 = vrot.slane %v603_v26, %v1334_v41 }
  0x32   :  { %v1588_v40 = vrot.slane %v836_v50, %v1334_v41  ;;  %v870_v2 = vcombine.high %v1482_v53, %v1482_v53  ;;  %v648_v61 = vcombine.high %v646_v22, %v646_v22  ;;  %v1597_v42 = vrot.slane %v1482_v53, %v1334_v41 }
  0x33   :  { %v1593_v16 = vrot.slane %v853_v38, %v1334_v41  ;;  %v887_v46 = vcombine.high %v1491_v25, %v1491_v25  ;;  %v680_v18 = vrot.slane %v666_v52, %v1334_v41  ;;  %v1607_v20 = vrot.slane %v1491_v25, %v1334_v41 }
  0x34   :  { %v1603_v19 = vrot.slane %v870_v2, %v1334_v41  ;;  %v969_v21 = vsel %vm968_vm0, %v639_v55, 0.0  ;;  %v970_v24 = vsel %vm968_vm0, %v647_v13, 0.0  ;;  %v1620_v31 = vmul.f32 %v396_v32, %v28_v60 }
  0x35   :  { %v1615_v63 = vrot.slane %v887_v46, %v1334_v41  ;;  %v971_v25 = vadd.f32 %v970_v24, %v969_v21  ;;  %v972_v33 = vsel %vm968_vm0, %v646_v22, 0.0  ;;  %v664_v34 = vcombine.high %v656_v3, %v656_v3 }
  0x36   :  { %v681_v51 = vcombine.high %v673_v35, %v673_v35  ;;  %v1624_v26 = vrot.slane %v683_v17, %v1334_v41  ;;  %v974_v59 = vsel %vm968_vm0, %v648_v61, 0.0  ;;  %v665_v55 = vcombine.high %v663_v14, %v663_v14 }
  0x37   :  { %v682_v45 = vcombine.high %v680_v18, %v680_v18  ;;  %v973_v57 = vadd.f32 %v972_v33, %v971_v25  ;;  %v783_v60 = vcombine.high %v1544_v58, %v1544_v58  ;;  %v784_v32 = vcombine.high %v1551_v15, %v1551_v15 }
  0x38   :  { %v800_v22 = vcombine.high %v1547_v47, %v1547_v47  ;;  %v976_v52 = vsel %vm968_vm0, %v656_v3, 0.0  ;;  %v801_v50 = vcombine.high %v1558_v44, %v1558_v44  ;;  %v817_v13 = vcombine.high %v1554_v48, %v1554_v48 }
  0x39   :  { %v818_v17 = vcombine.high %v1562_v49, %v1562_v49  ;;  %v975_v38 = vadd.f32 %v974_v59, %v973_v57  ;;  %v834_v2 = vcombine.high %v1565_v0, %v1565_v0  ;;  %v835_v61 = vcombine.high %v1569_v54, %v1569_v54 }
  0x3a   :  { %v851_v46 = vcombine.high %v1575_v36, %v1575_v36  ;;  %v978_v3 = vsel %vm968_vm0, %v664_v34, 0.0  ;;  %v852_v21 = vcombine.high %v1588_v40, %v1588_v40  ;;  %v868_v24 = vcombine.high %v1581_v56, %v1581_v56 }
  0x3b   :  { %v869_v25 = vcombine.high %v1593_v16, %v1593_v16  ;;  %v977_v33 = vadd.f32 %v976_v52, %v975_v38  ;;  %v885_v59 = vcombine.high %v1597_v42, %v1597_v42  ;;  %v886_v57 = vcombine.high %v1603_v19, %v1603_v19 }
  0x3c   :  { %v902_v43 = vcombine.high %v1607_v20, %v1607_v20  ;;  %v980_v34 = vsel %vm968_vm0, %v663_v14, 0.0  ;;  %v903_v62 = vcombine.high %v1615_v63, %v1615_v63  ;;  %v982_v27 = vsel %vm968_vm0, %v665_v55, 0.0 }
  0x3d   :  { %v979_v23 = vadd.f32 %v978_v3, %v977_v33  ;;  %v984_v28 = vsel %vm968_vm0, %v673_v35, 0.0  ;;  %v986_v52 = vsel %vm968_vm0, %v681_v51, 0.0  ;;  %v988_v38 = vsel %vm968_vm0, %v680_v18, 0.0 }
  0x3e   :  { %v990_v53 = vsel %vm968_vm0, %v682_v45, 0.0  ;;  %v1670_v8 = vsel %vm968_vm0, %v783_v60, 0.0  ;;  %v1674_v14 = vsel %vm968_vm0, %v1551_v15, 0.0  ;;  %v1677_v3 = vsel %vm968_vm0, %v784_v32, 0.0 }
  0x3f   :  { %v981_v58 = vadd.f32 %v980_v34, %v979_v23  ;;  %v1681_v35 = vsel %vm968_vm0, %v1547_v47, 0.0  ;;  %v1684_v51 = vsel %vm968_vm0, %v800_v22, 0.0  ;;  %v1688_v18 = vsel %vm968_vm0, %v1558_v44, 0.0 }
  0x40   :  { %v1691_v23 = vsel %vm968_vm0, %v801_v50, 0.0  ;;  %v1695_v15 = vsel %vm968_vm0, %v1554_v48, 0.0  ;;  %v1698_v45 = vsel %vm968_vm0, %v817_v13, 0.0  ;;  %v1702_v47 = vsel %vm968_vm0, %v1562_v49, 0.0 }
  0x41   :  { %v983_v55 = vadd.f32 %v982_v27, %v981_v58  ;;  %v1705_v60 = vsel %vm968_vm0, %v818_v17, 0.0  ;;  %v1709_v44 = vsel %vm968_vm0, %v1565_v0, 0.0  ;;  %v1712_v32 = vsel %vm968_vm0, %v834_v2, 0.0 }
  0x42   :  { %v1716_v27 = vsel %vm968_vm0, %v1569_v54, 0.0  ;;  %v1719_v58 = vsel %vm968_vm0, %v835_v61, 0.0  ;;  %v1723_v49 = vsel %vm968_vm0, %v1575_v36, 0.0  ;;  %v1726_v22 = vsel %vm968_vm0, %v851_v46, 0.0 }
  0x43   :  { %v985_v48 = vadd.f32 %v984_v28, %v983_v55  ;;  %v1730_v0 = vsel %vm968_vm0, %v1588_v40, 0.0  ;;  %v1733_v50 = vsel %vm968_vm0, %v852_v21, 0.0  ;;  %v1737_v54 = vsel %vm968_vm0, %v1581_v56, 0.0 }
  0x44   :  { %v1740_v28 = vsel %vm968_vm0, %v868_v24, 0.0  ;;  %v1744_v36 = vsel %vm968_vm0, %v1593_v16, 0.0  ;;  %v1747_v17 = vsel %vm968_vm0, %v869_v25, 0.0  ;;  %v1751_v40 = vsel %vm968_vm0, %v1597_v42, 0.0 }
  0x45   :  { %v987_v13 = vadd.f32 %v986_v52, %v985_v48  ;;  %v1754_v2 = vsel %vm968_vm0, %v885_v59, 0.0  ;;  %v1758_v56 = vsel %vm968_vm0, %v1603_v19, 0.0  ;;  %v1761_v61 = vsel %vm968_vm0, %v886_v57, 0.0 }
  0x46   :  { %v1765_v16 = vsel %vm968_vm0, %v1607_v20, 0.0  ;;  %v1768_v46 = vsel %vm968_vm0, %v902_v43, 0.0  ;;  %v1772_v42 = vsel %vm968_vm0, %v1615_v63, 0.0  ;;  %v1775_v24 = vsel %vm968_vm0, %v903_v62, 0.0 }
  0x47   :  { %v989_v21 = vadd.f32 %v988_v38, %v987_v13  ;;  %v29_v19 = vunpack.c.h.bf16 %v1517_v1  ;;  %v992_v25 = vsel %vm968_vm0, %v1585_v39, 0.0  ;;  %v1908_v20 = vrot.slane %v1541_v30, %v1334_v41 }
  0x48   :  { %v1909_v43 = vrot.slane %v1539_v29, %v1334_v41  ;;  %v1910_v59 = vrot.slane %v1522_v37, %v1159_v5  ;;  %v1911_v63 = vrot.slane %v1522_v37, %v1156_v4  ;;  %v1912_v1 = vrot.slane %v1522_v37, %v1165_v7 }
  0x49   :  { %v1913_v57 = vrot.slane %v1522_v37, %v1162_v6  ;;  %v991_v52 = vadd.f32 %v990_v53, %v989_v21  ;;  %v699_v30 = vcombine.high %v1624_v26, %v1624_v26  ;;  %v700_v29 = vcombine.high %v1620_v31, %v1620_v31 }
  0x4a   :  { %v413_v33 = vcombine.low %v1909_v43, %v1908_v20  ;;  %v414_v62 = vcombine.low %v1911_v63, %v1910_v59  ;;  %v707_v5 = vrot.slane %v1620_v31, %v1334_v41  ;;  %v1914_v4 = vcombine.high %v1585_v39, %v1585_v39  ;;  %v19_v31 = vld [vmem:[%s1887_s0 + $0x18] sm:$0xff] }
  0x4b   :  { %v415_v34 = vcombine.low %v1913_v57, %v1912_v1  ;;  %v993_v7 = vadd.f32 %v992_v25, %v991_v52  ;;  %v171_v6 = vrot.slane %v1522_v37, %v1173_v9  ;;  %v175_v53 = vrot.slane %v1522_v37, %v1176_v10 }
  0x4c   :  { %v994_v38 = vsel %vm968_vm0, %v1914_v4, 0.0  ;;  %v179_v55 = vrot.slane %v1522_v37, %v1179_v11  ;;  %v996_v48 = vsel %vm968_vm0, %v1624_v26, 0.0  ;;  %v183_v39 = vrot.slane %v1522_v37, %v1182_v12 }
  0x4d   :  { %v422_v13 = vrot.slane %v414_v62, %v1334_v41  ;;  %v429_v9 = vrot.slane %v415_v34, %v1334_v41  ;;  %v995_v21 = vadd.f32 %v994_v38, %v993_v7  ;;  %v605_v25 = vmul.f32 %v413_v33, %v29_v19 }
  0x4e   :  { %v714_v10 = vrot.slane %v700_v29, %v1334_v41  ;;  %v715_v20 = vcombine.high %v707_v5, %v707_v5  ;;  %v998_v11 = vsel %vm968_vm0, %v699_v30, 0.0  ;;  %v30_v26 = vunpack.c.l.bf16 %v19_v31 }
  0x4f   :  { %v997_v43 = vadd.f32 %v996_v48, %v995_v21  ;;  %v1000_v59 = vsel %vm968_vm0, %v707_v5, 0.0  ;;  %v430_v63 = vcombine.low %v422_v13, %v429_v9  ;;  %v431_v1 = vcombine.low %v171_v6, %v175_v53 }
  0x50   :  { %v432_v57 = vcombine.low %v179_v55, %v183_v39  ;;  %v716_v12 = vcombine.high %v714_v10, %v714_v10  ;;  %v717_v37 = vcombine.high %v605_v25, %v605_v25  ;;  %v724_v62 = vrot.slane %v605_v25, %v1334_v41 }
  0x51   :  { %v999_v52 = vadd.f32 %v998_v11, %v997_v43  ;;  %v1002_v34 = vsel %vm968_vm0, %v715_v20, 0.0  ;;  %v1004_v33 = vsel %vm968_vm0, %v714_v10, 0.0  ;;  %v439_v29 = vrot.slane %v431_v1, %v1334_v41 }
  0x52   :  { %v446_v30 = vrot.slane %v432_v57, %v1334_v41  ;;  %v606_v38 = vmul.f32 %v430_v63, %v30_v26  ;;  %v731_v5 = vrot.slane %v717_v37, %v1334_v41  ;;  %v732_v7 = vcombine.high %v724_v62, %v724_v62 }
  0x53   :  { %v1001_v19 = vadd.f32 %v1000_v59, %v999_v52  ;;  %v1006_v6 = vsel %vm968_vm0, %v716_v12, 0.0  ;;  %v1008_v55 = vsel %vm968_vm0, %v724_v62, 0.0  ;;  %v31_v48 = vunpack.c.h.bf16 %v19_v31 }
  0x54   :  { %v447_v39 = vcombine.low %v439_v29, %v446_v30  ;;  %v733_v9 = vcombine.high %v731_v5, %v731_v5  ;;  %v734_v21 = vcombine.high %v606_v38, %v606_v38  ;;  %v741_v25 = vrot.slane %v606_v38, %v1334_v41 }
  0x55   :  { %v1003_v4 = vadd.f32 %v1002_v34, %v1001_v19  ;;  %v1010_v10 = vsel %vm968_vm0, %v732_v7, 0.0  ;;  %v1012_v11 = vsel %vm968_vm0, %v731_v5, 0.0 }
  0x56   :  { %v607_v26 = vmul.f32 %v447_v39, %v31_v48  ;;  %v748_v59 = vrot.slane %v734_v21, %v1334_v41  ;;  %v749_v63 = vcombine.high %v741_v25, %v741_v25  ;;  %v1014_v1 = vsel %vm968_vm0, %v733_v9, 0.0 }
  0x57   :  { %v1005_v53 = vadd.f32 %v1004_v33, %v1003_v4  ;;  %v1016_v31 = vsel %vm968_vm0, %v741_v25, 0.0  ;;  %v1915_v25 = vld [vmem:[#allocation3_spill] sm:$0xff] }
  0x58   :  { %v750_v12 = vcombine.high %v748_v59, %v748_v59  ;;  %v751_v37 = vcombine.high %v607_v26, %v607_v26  ;;  %v758_v62 = vrot.slane %v607_v26, %v1334_v41  ;;  %v1018_v34 = vsel %vm968_vm0, %v749_v63, 0.0 }
  0x59   :  { %v1007_v13 = vadd.f32 %v1006_v6, %v1005_v53  ;;  %v1020_v33 = vsel %vm968_vm0, %v748_v59, 0.0 }
  0x5a   :  { %v765_v30 = vrot.slane %v751_v37, %v1334_v41  ;;  %v766_v4 = vcombine.high %v758_v62, %v758_v62  ;;  %v1022_v38 = vsel %vm968_vm0, %v750_v12, 0.0  ;;  %v1024_v7 = vsel %vm968_vm0, %v758_v62, 0.0 }
  0x5b   :  { %v1009_v20 = vadd.f32 %v1008_v55, %v1007_v13  ;;  %v1032_v41 = vsel %vm968_vm0, %v1915_v25, 0.0 }
  0x5c   :  { %v767_v53 = vcombine.high %v765_v30, %v765_v30  ;;  %v1026_v55 = vsel %vm968_vm0, %v766_v4, 0.0  ;;  %v1028_v39 = vsel %vm968_vm0, %v765_v30, 0.0 }
  0x5d   :  { %v1011_v43 = vadd.f32 %v1010_v10, %v1009_v20 }
  0x5e   :  { %v1030_v9 = vsel %vm968_vm0, %v767_v53, 0.0 }
  0x5f   :  { %v1013_v57 = vadd.f32 %v1012_v11, %v1011_v43 }
  0x61   :  { %v1015_v52 = vadd.f32 %v1014_v1, %v1013_v57 }
  0x63   :  { %v1017_v19 = vadd.f32 %v1016_v31, %v1015_v52 }
  0x65   :  { %v1019_v29 = vadd.f32 %v1018_v34, %v1017_v19 }
  0x67   :  { %v1021_v5 = vadd.f32 %v1020_v33, %v1019_v29 }
  0x69   :  { %v1023_v6 = vadd.f32 %v1022_v38, %v1021_v5 }
  0x6b   :  { %v1025_v48 = vadd.f32 %v1024_v7, %v1023_v6 }
  0x6d   :  { %v1027_v13 = vadd.f32 %v1026_v55, %v1025_v48 }
  0x6f   :  { %v1029_v21 = vadd.f32 %v1028_v39, %v1027_v13 }
  0x71   :  { %v1031_v10 = vadd.f32 %v1030_v9, %v1029_v21 }
  0x73   :  { %v1033_v20 = vadd.f32 %v1032_v41, %v1031_v10 }
  0x75   :  { %v1035_v11 = vadd.f32 %v1670_v8, %v1033_v20 }
  0x77   :  { %v1037_v43 = vadd.f32 %v1674_v14, %v1035_v11 }
  0x79   :  { %v1039_v26 = vadd.f32 %v1677_v3, %v1037_v43 }
  0x7b   :  { %v1041_v59 = vadd.f32 %v1681_v35, %v1039_v26 }
  0x7d   :  { %v1043_v63 = vadd.f32 %v1684_v51, %v1041_v59 }
  0x7f   :  { %v1045_v1 = vadd.f32 %v1688_v18, %v1043_v63 }
  0x81   :  { %v1047_v57 = vadd.f32 %v1691_v23, %v1045_v1 }
  0x83   :  { %v1049_v31 = vadd.f32 %v1695_v15, %v1047_v57 }
  0x85   :  { %v1051_v52 = vadd.f32 %v1698_v45, %v1049_v31 }
  0x87   :  { %v1053_v12 = vadd.f32 %v1702_v47, %v1051_v52 }
  0x89   :  { %v1055_v8 = vadd.f32 %v1705_v60, %v1053_v12 }
  0x8b   :  { %v1057_v14 = vadd.f32 %v1709_v44, %v1055_v8 }
  0x8d   :  { %v1059_v3 = vadd.f32 %v1712_v32, %v1057_v14 }
  0x8f   :  { %v1061_v35 = vadd.f32 %v1716_v27, %v1059_v3 }
  0x91   :  { %v1063_v51 = vadd.f32 %v1719_v58, %v1061_v35 }
  0x93   :  { %v1065_v18 = vadd.f32 %v1723_v49, %v1063_v51 }
  0x95   :  { %v1067_v23 = vadd.f32 %v1726_v22, %v1065_v18 }
  0x97   :  { %v1069_v15 = vadd.f32 %v1730_v0, %v1067_v23 }
  0x99   :  { %v1071_v45 = vadd.f32 %v1733_v50, %v1069_v15 }
  0x9b   :  { %v1073_v47 = vadd.f32 %v1737_v54, %v1071_v45 }
  0x9d   :  { %v1075_v60 = vadd.f32 %v1740_v28, %v1073_v47 }
  0x9f   :  { %v1077_v44 = vadd.f32 %v1744_v36, %v1075_v60  ;;  %v1118_v36 = vld [vmem:[#allocation2] ss:$0 sm:$0xff] }
  0xa1   :  { %v1079_v32 = vadd.f32 %v1747_v17, %v1077_v44 }
  0xa3   :  { %v1081_v27 = vadd.f32 %v1751_v40, %v1079_v32 }
  0xa5   :  { %v1083_v58 = vadd.f32 %v1754_v2, %v1081_v27 }
  0xa7   :  { %v1085_v49 = vadd.f32 %v1758_v56, %v1083_v58 }
  0xa9   :  { %v1087_v22 = vadd.f32 %v1761_v61, %v1085_v49 }
  0xab   :  { %v1089_v0 = vadd.f32 %v1765_v16, %v1087_v22 }
  0xad   :  { %v1091_v50 = vadd.f32 %v1768_v46, %v1089_v0 }
  0xaf   :  { %v1093_v54 = vadd.f32 %v1772_v42, %v1091_v50 }
  0xb1   :  { %v1095_v28 = vadd.f32 %v1775_v24, %v1093_v54 }
  0xb3   :  { %1096 = vadd.xlane.f32.xlu0 %v1095_v28 }
 0x140   :  { %v1097_v37 = vpop.xlane.xlu0 %1096 }
 0x141   :  { %v1105_v17 = vadd.f32 %v1118_v36, %v1097_v37 }
 0x143   :  { %v1106_v62 = vsub.f32 0.0, %v1105_v17 }
 0x145   :  { %v1107_v40 = vmul.f32 1.442695, %v1106_v62 }
 0x147   :  { %1120 = vpow2.f32 %v1107_v40 }
 0x151   :  { %v1121_v2 = vpop.eup %1120 }
 0x152   :  { %v1109_v34 = vadd.f32 1.0, %v1121_v2 }
 0x154   :  { %1122 = vrcp.f32 %v1109_v34 }
 0x15e   :  { %v1123_v56 = vpop.eup %1122 }
 0x15f   :  { %1113 = vst.msk [vmem:[%s1888_s3] sm:$0x3] %vm1112_vm1, %v1123_v56 }

</bundles_post_ra>
